<compile_context>
chip_gen: v6e
topology: v6e:2x2x1
jax: 0.10.0
libtpu: 0.0.40
codegen_flags: <defaults>
</compile_context>

<pallas_src>
import jax
import jax.numpy as jnp
from jax.experimental import pallas as pl
from jax.experimental.pallas import tpu as pltpu

# ----------------------------------------------------------------------------
# Geometry (fixed by the module: 3x32x32 input, 16*5*5 = 400 flatten).
# ----------------------------------------------------------------------------
H0 = W0 = 32
K = 5                            # conv kernel size
OH1, OW1 = 28, 28                # conv1 output
PH1, PW1 = 14, 14                # pool1 output
OH2, OW2 = 10, 10                # conv2 output
PH2, PW2 = 5, 5                  # pool2 output
LANES = 128                      # lane-dense padding
CIN2_PAD = 8                     # 6 real conv2 input channels, zero-padded to 8
C2OUT = 16                       # conv2 real output channels
COL1 = 3 * K * K                 # 75 real im2col taps for conv1
COL1_ONE = COL1                  # extra constant-1 lane carrying the conv1 bias
N_OUT2 = (OH2 - 1) * PW1 + OW2   # 136 "full-width" conv2 rows materialized
CHUNK1 = 112                     # 784 = 7 * 112 conv1 row chunks (acc stays in vregs)


# ----------------------------------------------------------------------------
# Fused Pallas kernel (one image per grid step)
# ----------------------------------------------------------------------------
def _cnn_kernel(xc_ref, w1_ref, w2_ref, w3_ref, w4_ref, w5_ref, b_ref, o_ref,
                c1_sc, p1_sc, c2_sc, p2_sc):
    f32 = jnp.float32

    def pool2x2_relu(src, dst, width, out_h, out_w):
        # relu(maxpool 2x2 / stride 2) from flat (i*width + j) layout into a
        # compact flat (ip*out_w + jp) layout, via strided VMEM reads.
        # (relu is monotone, so relu-after-pool == pool-after-relu.)
        for ip in range(out_h):
            r0 = 2 * ip * width
            a = src[pl.ds(r0, out_w, stride=2), :]
            b = src[pl.ds(r0 + 1, out_w, stride=2), :]
            c = src[pl.ds(r0 + width, out_w, stride=2), :]
            d = src[pl.ds(r0 + width + 1, out_w, stride=2), :]
            m = jnp.maximum(jnp.maximum(a, b), jnp.maximum(c, d))
            dst[pl.ds(ip * out_w, out_w), :] = jnp.maximum(m, 0.0)

    # --- conv1 (+bias via the constant-1 lane) ------------------------------
    # One lane-dense K=128 MXU dot per 112-row chunk: 7 dots total per image.
    # Output lanes >= 6 are exactly zero (weight columns are zero-padded).
    for m0 in range(0, OH1 * OW1, CHUNK1):
        c1_sc[pl.ds(m0, CHUNK1), :] = jnp.dot(
            xc_ref[pl.ds(m0, CHUNK1), :], w1_ref[...], preferred_element_type=f32)
    pool2x2_relu(c1_sc, p1_sc, OW1, PH1, PW1)

    # --- conv2 (+bias) -> relu + pool ---------------------------------------
    # Shift-accumulate over the 5x5 taps on the flat (i*14 + j, channel) view.
    # Rows with j >= 10 hold garbage and are never read by pool2.
    acc = None
    for di in range(K):
        for dj in range(K):
            lhs = p1_sc[pl.ds(di * PW1 + dj, N_OUT2), :][:, :CIN2_PAD]
            prod = jnp.dot(lhs, w2_ref[di * K + dj], preferred_element_type=f32)
            acc = prod if acc is None else acc + prod
    c2_sc[...] = acc + b_ref[pl.ds(0, 1), :]
    pool2x2_relu(c2_sc, p2_sc, PW1, PH2, PW2)

    # --- fc1: contract the (25 spatial, 16 channel) pooled activation -------
    # w3_ref[p] already carries torch's NCHW flatten order (reordered on host),
    # so this is exactly x.view(-1, 400) @ W3.T.
    a2 = p2_sc[...]                                    # (25, 128)
    h = b_ref[pl.ds(1, 1), :]                          # (1, 128) bias init
    for p in range(PH2 * PW2):
        h = h + jnp.dot(a2[p:p + 1, :C2OUT], w3_ref[p],
                        preferred_element_type=f32)
    h = jnp.maximum(h, 0.0)

    # --- fc2 + relu ----------------------------------------------------------
    h = jnp.maximum(
        jnp.dot(h, w4_ref[...], preferred_element_type=f32)
        + b_ref[pl.ds(2, 1), :], 0.0)

    # --- fc3 (logits; lanes >= 10 stay exactly zero) --------------------------
    o_ref[...] = (jnp.dot(h, w5_ref[...], preferred_element_type=f32)
                  + b_ref[pl.ds(3, 1), :]).astype(o_ref.dtype)


# ----------------------------------------------------------------------------
# Host-side weight / input re-layout (tiny, under jit) + the pallas_call wrapper
# ----------------------------------------------------------------------------
def _prep_conv_w(w_oihw, cin_pad):
    # (O, I, KH, KW) -> (KH*KW, I_pad, 128): w[di*K+dj, c, o] = w_oihw[o, c, di, dj]
    O, I, KH, KW = w_oihw.shape
    w = jnp.transpose(w_oihw, (2, 3, 1, 0)).reshape(KH * KW, I, O)
    return jnp.pad(w, ((0, 0), (0, cin_pad - I), (0, LANES - O)))


@jax.jit
def cnn_forward(x_nchw, params):
    B = x_nchw.shape[0]
    x = x_nchw.astype(jnp.float32)

    # im2col for conv1 (layout plumbing): xc[b, oh*28+ow, c*25 + di*5 + dj]
    # = x[b, c, oh+di, ow+dj]; lane 75 is a constant 1 that carries the bias.
    slabs = [x[:, :, di:di + OH1, dj:dj + OW1] for di in range(K) for dj in range(K)]
    xc = jnp.stack(slabs, axis=2).reshape(B, COL1, OH1 * OW1)      # (B, 75, 784)
    xc = jnp.transpose(xc, (0, 2, 1))                              # (B, 784, 75)
    xc = jnp.pad(xc, ((0, 0), (0, 0), (0, LANES - COL1)))          # (B, 784, 128)
    xc = xc.at[:, :, COL1_ONE].set(1.0)

    # conv1 weight as one (128, 128) matrix, bias folded into row COL1_ONE.
    w1 = jnp.zeros((LANES, LANES), jnp.float32)
    w1 = w1.at[:COL1, :6].set(params["w1"].reshape(6, COL1).T)
    w1 = w1.at[COL1_ONE, :6].set(params["b1"])

    w2 = _prep_conv_w(params["w2"], CIN2_PAD)                      # (25, 8, 128)
    # fc1 weight rows are in torch NCHW-flatten order (c*25 + p); regroup to
    # [spatial p, channel c, out] so the kernel can consume the NHWC pooled act.
    w3 = params["w3"].reshape(C2OUT, PH2 * PW2, 120).transpose(1, 0, 2)
    w3 = jnp.pad(w3, ((0, 0), (0, 0), (0, LANES - 120)))           # (25, 16, 128)
    w4 = jnp.pad(params["w4"], ((0, LANES - 120), (0, LANES - 84)))  # (128, 128)
    w5 = jnp.pad(params["w5"], ((0, LANES - 84), (0, LANES - 10)))   # (128, 128)

    b = jnp.zeros((4, LANES), jnp.float32)
    b = b.at[0, :16].set(params["b2"])
    b = b.at[1, :120].set(params["b3"])
    b = b.at[2, :84].set(params["b4"])
    b = b.at[3, :10].set(params["b5"])

    out = pl.pallas_call(
        _cnn_kernel,
        out_shape=jax.ShapeDtypeStruct((B, 1, LANES), jnp.float32),
        grid=(B,),
        in_specs=[
            pl.BlockSpec((None, OH1 * OW1, LANES), lambda i: (i, 0, 0)),   # xc
            pl.BlockSpec((LANES, LANES), lambda i: (0, 0)),                # w1
            pl.BlockSpec((K * K, CIN2_PAD, LANES), lambda i: (0, 0, 0)),   # w2
            pl.BlockSpec((PH2 * PW2, C2OUT, LANES), lambda i: (0, 0, 0)),  # w3
            pl.BlockSpec((LANES, LANES), lambda i: (0, 0)),                # w4
            pl.BlockSpec((LANES, LANES), lambda i: (0, 0)),                # w5
            pl.BlockSpec((4, LANES), lambda i: (0, 0)),                    # biases
        ],
        out_specs=pl.BlockSpec((None, 1, LANES), lambda i: (i, 0, 0)),
        scratch_shapes=[
            pltpu.VMEM((OH1 * OW1, LANES), jnp.float32),   # conv1 pre-pool
            pltpu.VMEM((PH1 * PW1, LANES), jnp.float32),   # pool1 output
            pltpu.VMEM((N_OUT2, LANES), jnp.float32),      # conv2 pre-pool
            pltpu.VMEM((PH2 * PW2, LANES), jnp.float32),   # pool2 output
        ],
        compiler_params=pltpu.CompilerParams(
            dimension_semantics=("parallel",),
            vmem_limit_bytes=16 * 1024 * 1024,
        ),
    )(xc, w1, w2, w3, w4, w5, b)
    return out[:, 0, :10]


# ----------------------------------------------------------------------------
# Pure-JAX reference (mirrors the PyTorch module exactly) for self-checking
# ----------------------------------------------------------------------------
def cnn_reference(x_nchw, params):
    hi = jax.lax.Precision.HIGHEST

    def conv(x, w, bias):
        y = jax.lax.conv_general_dilated(
            x, w, window_strides=(1, 1), padding="VALID",
            dimension_numbers=("NCHW", "OIHW", "NCHW"), precision=hi)
        return jax.nn.relu(y + bias[None, :, None, None])

    def pool(x):
        return jax.lax.reduce_window(x, -jnp.inf, jax.lax.max,
                                     (1, 1, 2, 2), (1, 1, 2, 2), "VALID")

    x = x_nchw.astype(jnp.float32)
    x = pool(conv(x, params["w1"], params["b1"]))
    x = pool(conv(x, params["w2"], params["b2"]))
    x = x.reshape(x.shape[0], -1)                       # NCHW flatten -> 400
    x = jax.nn.relu(jnp.dot(x, params["w3"], precision=hi) + params["b3"])
    x = jax.nn.relu(jnp.dot(x, params["w4"], precision=hi) + params["b4"])
    return jnp.dot(x, params["w5"], precision=hi) + params["b5"]


# ----------------------------------------------------------------------------
# Deterministic PyTorch-default-style init (uniform +-1/sqrt(fan_in))
# ----------------------------------------------------------------------------
def _uniform(key, shape, bound):
    return jax.random.uniform(key, shape, jnp.float32, -bound, bound)


def init_params(key):
    ks = jax.random.split(key, 10)
    p = {}
    fan = 3 * 5 * 5
    p["w1"] = _uniform(ks[0], (6, 3, 5, 5), 1.0 / jnp.sqrt(fan))
    p["b1"] = _uniform(ks[1], (6,), 1.0 / jnp.sqrt(fan))
    fan = 6 * 5 * 5
    p["w2"] = _uniform(ks[2], (16, 6, 5, 5), 1.0 / jnp.sqrt(fan))
    p["b2"] = _uniform(ks[3], (16,), 1.0 / jnp.sqrt(fan))
    fan = 400
    p["w3"] = _uniform(ks[4], (400, 120), 1.0 / jnp.sqrt(fan))   # = fc1.weight.T
    p["b3"] = _uniform(ks[5], (120,), 1.0 / jnp.sqrt(fan))
    fan = 120
    p["w4"] = _uniform(ks[6], (120, 84), 1.0 / jnp.sqrt(fan))    # = fc2.weight.T
    p["b4"] = _uniform(ks[7], (84,), 1.0 / jnp.sqrt(fan))
    fan = 84
    p["w5"] = _uniform(ks[8], (84, 10), 1.0 / jnp.sqrt(fan))     # = fc3.weight.T
    p["b5"] = _uniform(ks[9], (10,), 1.0 / jnp.sqrt(fan))
    return p


if __name__ == "__main__":
    key = jax.random.PRNGKey(0)
    pkey, xkey = jax.random.split(key)
    params = init_params(pkey)

    # CIFAR-10 geometry is required by the fc1 shape (16*5*5): 3x32x32 input.
    x = jax.random.normal(xkey, (2, 3, 32, 32), jnp.float32)     # NCHW, batch=2

    out = jax.block_until_ready(cnn_forward(x, params))
    assert out.shape == (2, 10) and out.dtype == jnp.float32

    ref = jax.block_until_ready(cnn_reference(x, params))
    err = float(jnp.max(jnp.abs(out - ref)))
    assert err < 2e-2, f"mismatch vs reference: max abs err = {err}"

    print("KERNEL_OK")
</pallas_src>

<mosaic_0001>
module attributes {stable_mosaic.version = 11 : i64} {
  func.func @_cnn_kernel(%arg0: i32, %arg1: memref<1x784x128xf32, #tpu.memory_space<vmem>>, %arg2: memref<128x128xf32, #tpu.memory_space<vmem>>, %arg3: memref<25x8x128xf32, #tpu.memory_space<vmem>>, %arg4: memref<25x16x128xf32, #tpu.memory_space<vmem>>, %arg5: memref<128x128xf32, #tpu.memory_space<vmem>>, %arg6: memref<128x128xf32, #tpu.memory_space<vmem>>, %arg7: memref<4x128xf32, #tpu.memory_space<vmem>>, %arg8: memref<1x1x128xf32, #tpu.memory_space<vmem>>, %arg9: memref<784x128xf32, #tpu.memory_space<vmem>>, %arg10: memref<196x128xf32, #tpu.memory_space<vmem>>, %arg11: memref<136x128xf32, #tpu.memory_space<vmem>>, %arg12: memref<25x128xf32, #tpu.memory_space<vmem>>) attributes {dimension_semantics = [#tpu.dimension_semantics<parallel>], iteration_bounds = array<i64: 2>, scalar_prefetch = 0 : i64, scratch_operands = 4 : i64, tpu.core_type = #tpu.core_type<tc>, window_params = [{transform_indices = @transform_0, window_bounds = array<i64: 1, 784, 128>}, {pipeline_mode = #tpu.pipeline_mode<synchronous>, transform_indices = @transform_1, window_bounds = array<i64: 128, 128>}, {pipeline_mode = #tpu.pipeline_mode<synchronous>, transform_indices = @transform_2, window_bounds = array<i64: 25, 8, 128>}, {pipeline_mode = #tpu.pipeline_mode<synchronous>, transform_indices = @transform_3, window_bounds = array<i64: 25, 16, 128>}, {pipeline_mode = #tpu.pipeline_mode<synchronous>, transform_indices = @transform_4, window_bounds = array<i64: 128, 128>}, {pipeline_mode = #tpu.pipeline_mode<synchronous>, transform_indices = @transform_5, window_bounds = array<i64: 128, 128>}, {pipeline_mode = #tpu.pipeline_mode<synchronous>, transform_indices = @transform_6, window_bounds = array<i64: 4, 128>}, {transform_indices = @transform_7, window_bounds = array<i64: 1, 1, 128>}]} {
    %c0 = arith.constant 0 : index
    %c0_0 = arith.constant 0 : index
    %c0_1 = arith.constant 0 : index
    %0 = vector.load %arg1[%c0, %c0_0, %c0_1] : memref<1x784x128xf32, #tpu.memory_space<vmem>>, vector<1x112x128xf32>
    %1 = vector.shape_cast %0 : vector<1x112x128xf32> to vector<112x128xf32>
    %c0_2 = arith.constant 0 : index
    %c0_3 = arith.constant 0 : index
    %2 = vector.load %arg2[%c0_2, %c0_3] : memref<128x128xf32, #tpu.memory_space<vmem>>, vector<128x128xf32>
    %cst = arith.constant dense<0.000000e+00> : vector<112x128xf32>
    %3 = tpu.matmul %1, %2, %cst {dimension_numbers = #tpu.dot_dimension_numbers<[1], [0], [0], [1], [0, 0, 1, 1], [], []>} : vector<112x128xf32>, vector<128x128xf32>, vector<112x128xf32> -> vector<112x128xf32>
    %c0_4 = arith.constant 0 : index
    %c0_5 = arith.constant 0 : index
    %4 = vector.load %arg9[%c0_4, %c0_5] : memref<784x128xf32, #tpu.memory_space<vmem>>, vector<112x128xf32>
    tpu.vector_store %arg9[%c0_4, %c0_5], %3 {strides = array<i32>} : memref<784x128xf32, #tpu.memory_space<vmem>>, vector<112x128xf32>,
    %c0_6 = arith.constant 0 : index
    %c112 = arith.constant 112 : index
    %c0_7 = arith.constant 0 : index
    %5 = vector.load %arg1[%c0_6, %c112, %c0_7] : memref<1x784x128xf32, #tpu.memory_space<vmem>>, vector<1x112x128xf32>
    %6 = vector.shape_cast %5 : vector<1x112x128xf32> to vector<112x128xf32>
    %c0_8 = arith.constant 0 : index
    %c0_9 = arith.constant 0 : index
    %7 = vector.load %arg2[%c0_8, %c0_9] : memref<128x128xf32, #tpu.memory_space<vmem>>, vector<128x128xf32>
    %cst_10 = arith.constant dense<0.000000e+00> : vector<112x128xf32>
    %8 = tpu.matmul %6, %7, %cst_10 {dimension_numbers = #tpu.dot_dimension_numbers<[1], [0], [0], [1], [0, 0, 1, 1], [], []>} : vector<112x128xf32>, vector<128x128xf32>, vector<112x128xf32> -> vector<112x128xf32>
    %c112_11 = arith.constant 112 : index
    %c0_12 = arith.constant 0 : index
    %9 = vector.load %arg9[%c112_11, %c0_12] : memref<784x128xf32, #tpu.memory_space<vmem>>, vector<112x128xf32>
    tpu.vector_store %arg9[%c112_11, %c0_12], %8 {strides = array<i32>} : memref<784x128xf32, #tpu.memory_space<vmem>>, vector<112x128xf32>,
    %c0_13 = arith.constant 0 : index
    %c224 = arith.constant 224 : index
    %c0_14 = arith.constant 0 : index
    %10 = vector.load %arg1[%c0_13, %c224, %c0_14] : memref<1x784x128xf32, #tpu.memory_space<vmem>>, vector<1x112x128xf32>
    %11 = vector.shape_cast %10 : vector<1x112x128xf32> to vector<112x128xf32>
    %c0_15 = arith.constant 0 : index
    %c0_16 = arith.constant 0 : index
    %12 = vector.load %arg2[%c0_15, %c0_16] : memref<128x128xf32, #tpu.memory_space<vmem>>, vector<128x128xf32>
    %cst_17 = arith.constant dense<0.000000e+00> : vector<112x128xf32>
    %13 = tpu.matmul %11, %12, %cst_17 {dimension_numbers = #tpu.dot_dimension_numbers<[1], [0], [0], [1], [0, 0, 1, 1], [], []>} : vector<112x128xf32>, vector<128x128xf32>, vector<112x128xf32> -> vector<112x128xf32>
    %c224_18 = arith.constant 224 : index
    %c0_19 = arith.constant 0 : index
    %14 = vector.load %arg9[%c224_18, %c0_19] : memref<784x128xf32, #tpu.memory_space<vmem>>, vector<112x128xf32>
    tpu.vector_store %arg9[%c224_18, %c0_19], %13 {strides = array<i32>} : memref<784x128xf32, #tpu.memory_space<vmem>>, vector<112x128xf32>,
    %c0_20 = arith.constant 0 : index
    %c336 = arith.constant 336 : index
    %c0_21 = arith.constant 0 : index
    %15 = vector.load %arg1[%c0_20, %c336, %c0_21] : memref<1x784x128xf32, #tpu.memory_space<vmem>>, vector<1x112x128xf32>
    %16 = vector.shape_cast %15 : vector<1x112x128xf32> to vector<112x128xf32>
    %c0_22 = arith.constant 0 : index
    %c0_23 = arith.constant 0 : index
    %17 = vector.load %arg2[%c0_22, %c0_23] : memref<128x128xf32, #tpu.memory_space<vmem>>, vector<128x128xf32>
    %cst_24 = arith.constant dense<0.000000e+00> : vector<112x128xf32>
    %18 = tpu.matmul %16, %17, %cst_24 {dimension_numbers = #tpu.dot_dimension_numbers<[1], [0], [0], [1], [0, 0, 1, 1], [], []>} : vector<112x128xf32>, vector<128x128xf32>, vector<112x128xf32> -> vector<112x128xf32>
    %c336_25 = arith.constant 336 : index
    %c0_26 = arith.constant 0 : index
    %19 = vector.load %arg9[%c336_25, %c0_26] : memref<784x128xf32, #tpu.memory_space<vmem>>, vector<112x128xf32>
    tpu.vector_store %arg9[%c336_25, %c0_26], %18 {strides = array<i32>} : memref<784x128xf32, #tpu.memory_space<vmem>>, vector<112x128xf32>,
    %c0_27 = arith.constant 0 : index
    %c448 = arith.constant 448 : index
    %c0_28 = arith.constant 0 : index
    %20 = vector.load %arg1[%c0_27, %c448, %c0_28] : memref<1x784x128xf32, #tpu.memory_space<vmem>>, vector<1x112x128xf32>
    %21 = vector.shape_cast %20 : vector<1x112x128xf32> to vector<112x128xf32>
    %c0_29 = arith.constant 0 : index
    %c0_30 = arith.constant 0 : index
    %22 = vector.load %arg2[%c0_29, %c0_30] : memref<128x128xf32, #tpu.memory_space<vmem>>, vector<128x128xf32>
    %cst_31 = arith.constant dense<0.000000e+00> : vector<112x128xf32>
    %23 = tpu.matmul %21, %22, %cst_31 {dimension_numbers = #tpu.dot_dimension_numbers<[1], [0], [0], [1], [0, 0, 1, 1], [], []>} : vector<112x128xf32>, vector<128x128xf32>, vector<112x128xf32> -> vector<112x128xf32>
    %c448_32 = arith.constant 448 : index
    %c0_33 = arith.constant 0 : index
    %24 = vector.load %arg9[%c448_32, %c0_33] : memref<784x128xf32, #tpu.memory_space<vmem>>, vector<112x128xf32>
    tpu.vector_store %arg9[%c448_32, %c0_33], %23 {strides = array<i32>} : memref<784x128xf32, #tpu.memory_space<vmem>>, vector<112x128xf32>,
    %c0_34 = arith.constant 0 : index
    %c560 = arith.constant 560 : index
    %c0_35 = arith.constant 0 : index
    %25 = vector.load %arg1[%c0_34, %c560, %c0_35] : memref<1x784x128xf32, #tpu.memory_space<vmem>>, vector<1x112x128xf32>
    %26 = vector.shape_cast %25 : vector<1x112x128xf32> to vector<112x128xf32>
    %c0_36 = arith.constant 0 : index
    %c0_37 = arith.constant 0 : index
    %27 = vector.load %arg2[%c0_36, %c0_37] : memref<128x128xf32, #tpu.memory_space<vmem>>, vector<128x128xf32>
    %cst_38 = arith.constant dense<0.000000e+00> : vector<112x128xf32>
    %28 = tpu.matmul %26, %27, %cst_38 {dimension_numbers = #tpu.dot_dimension_numbers<[1], [0], [0], [1], [0, 0, 1, 1], [], []>} : vector<112x128xf32>, vector<128x128xf32>, vector<112x128xf32> -> vector<112x128xf32>
    %c560_39 = arith.constant 560 : index
    %c0_40 = arith.constant 0 : index
    %29 = vector.load %arg9[%c560_39, %c0_40] : memref<784x128xf32, #tpu.memory_space<vmem>>, vector<112x128xf32>
    tpu.vector_store %arg9[%c560_39, %c0_40], %28 {strides = array<i32>} : memref<784x128xf32, #tpu.memory_space<vmem>>, vector<112x128xf32>,
    %c0_41 = arith.constant 0 : index
    %c672 = arith.constant 672 : index
    %c0_42 = arith.constant 0 : index
    %30 = vector.load %arg1[%c0_41, %c672, %c0_42] : memref<1x784x128xf32, #tpu.memory_space<vmem>>, vector<1x112x128xf32>
    %31 = vector.shape_cast %30 : vector<1x112x128xf32> to vector<112x128xf32>
    %c0_43 = arith.constant 0 : index
    %c0_44 = arith.constant 0 : index
    %32 = vector.load %arg2[%c0_43, %c0_44] : memref<128x128xf32, #tpu.memory_space<vmem>>, vector<128x128xf32>
    %cst_45 = arith.constant dense<0.000000e+00> : vector<112x128xf32>
    %33 = tpu.matmul %31, %32, %cst_45 {dimension_numbers = #tpu.dot_dimension_numbers<[1], [0], [0], [1], [0, 0, 1, 1], [], []>} : vector<112x128xf32>, vector<128x128xf32>, vector<112x128xf32> -> vector<112x128xf32>
    %c672_46 = arith.constant 672 : index
    %c0_47 = arith.constant 0 : index
    %34 = vector.load %arg9[%c672_46, %c0_47] : memref<784x128xf32, #tpu.memory_space<vmem>>, vector<112x128xf32>
    tpu.vector_store %arg9[%c672_46, %c0_47], %33 {strides = array<i32>} : memref<784x128xf32, #tpu.memory_space<vmem>>, vector<112x128xf32>,
    %c0_48 = arith.constant 0 : index
    %c0_49 = arith.constant 0 : index
    %35 = tpu.strided_load %arg9[%c0_48, %c0_49] {strides = array<i32: 2, 1>} : memref<784x128xf32, #tpu.memory_space<vmem>>, vector<14x128xf32>
    %c1 = arith.constant 1 : index
    %c0_50 = arith.constant 0 : index
    %36 = tpu.strided_load %arg9[%c1, %c0_50] {strides = array<i32: 2, 1>} : memref<784x128xf32, #tpu.memory_space<vmem>>, vector<14x128xf32>
    %c28 = arith.constant 28 : index
    %c0_51 = arith.constant 0 : index
    %37 = tpu.strided_load %arg9[%c28, %c0_51] {strides = array<i32: 2, 1>} : memref<784x128xf32, #tpu.memory_space<vmem>>, vector<14x128xf32>
    %c29 = arith.constant 29 : index
    %c0_52 = arith.constant 0 : index
    %38 = tpu.strided_load %arg9[%c29, %c0_52] {strides = array<i32: 2, 1>} : memref<784x128xf32, #tpu.memory_space<vmem>>, vector<14x128xf32>
    %39 = arith.maximumf %35, %36 : vector<14x128xf32>
    %40 = arith.maximumf %37, %38 : vector<14x128xf32>
    %41 = arith.maximumf %39, %40 : vector<14x128xf32>
    %cst_53 = arith.constant 0.000000e+00 : f32
    %42 = vector.broadcast %cst_53 : f32 to vector<14x128xf32>
    %43 = arith.maximumf %41, %42 : vector<14x128xf32>
    %c0_54 = arith.constant 0 : index
    %c0_55 = arith.constant 0 : index
    %44 = vector.load %arg10[%c0_54, %c0_55] : memref<196x128xf32, #tpu.memory_space<vmem>>, vector<14x128xf32>
    tpu.vector_store %arg10[%c0_54, %c0_55], %43 {strides = array<i32>} : memref<196x128xf32, #tpu.memory_space<vmem>>, vector<14x128xf32>,
    %c56 = arith.constant 56 : index
    %c0_56 = arith.constant 0 : index
    %45 = tpu.strided_load %arg9[%c56, %c0_56] {strides = array<i32: 2, 1>} : memref<784x128xf32, #tpu.memory_space<vmem>>, vector<14x128xf32>
    %c57 = arith.constant 57 : index
    %c0_57 = arith.constant 0 : index
    %46 = tpu.strided_load %arg9[%c57, %c0_57] {strides = array<i32: 2, 1>} : memref<784x128xf32, #tpu.memory_space<vmem>>, vector<14x128xf32>
    %c84 = arith.constant 84 : index
    %c0_58 = arith.constant 0 : index
    %47 = tpu.strided_load %arg9[%c84, %c0_58] {strides = array<i32: 2, 1>} : memref<784x128xf32, #tpu.memory_space<vmem>>, vector<14x128xf32>
    %c85 = arith.constant 85 : index
    %c0_59 = arith.constant 0 : index
    %48 = tpu.strided_load %arg9[%c85, %c0_59] {strides = array<i32: 2, 1>} : memref<784x128xf32, #tpu.memory_space<vmem>>, vector<14x128xf32>
    %49 = arith.maximumf %45, %46 : vector<14x128xf32>
    %50 = arith.maximumf %47, %48 : vector<14x128xf32>
    %51 = arith.maximumf %49, %50 : vector<14x128xf32>
    %cst_60 = arith.constant 0.000000e+00 : f32
    %52 = vector.broadcast %cst_60 : f32 to vector<14x128xf32>
    %53 = arith.maximumf %51, %52 : vector<14x128xf32>
    %c14 = arith.constant 14 : index
    %c0_61 = arith.constant 0 : index
    %54 = vector.load %arg10[%c14, %c0_61] : memref<196x128xf32, #tpu.memory_space<vmem>>, vector<14x128xf32>
    tpu.vector_store %arg10[%c14, %c0_61], %53 {strides = array<i32>} : memref<196x128xf32, #tpu.memory_space<vmem>>, vector<14x128xf32>,
    %c112_62 = arith.constant 112 : index
    %c0_63 = arith.constant 0 : index
    %55 = tpu.strided_load %arg9[%c112_62, %c0_63] {strides = array<i32: 2, 1>} : memref<784x128xf32, #tpu.memory_space<vmem>>, vector<14x128xf32>
    %c113 = arith.constant 113 : index
    %c0_64 = arith.constant 0 : index
    %56 = tpu.strided_load %arg9[%c113, %c0_64] {strides = array<i32: 2, 1>} : memref<784x128xf32, #tpu.memory_space<vmem>>, vector<14x128xf32>
    %c140 = arith.constant 140 : index
    %c0_65 = arith.constant 0 : index
    %57 = tpu.strided_load %arg9[%c140, %c0_65] {strides = array<i32: 2, 1>} : memref<784x128xf32, #tpu.memory_space<vmem>>, vector<14x128xf32>
    %c141 = arith.constant 141 : index
    %c0_66 = arith.constant 0 : index
    %58 = tpu.strided_load %arg9[%c141, %c0_66] {strides = array<i32: 2, 1>} : memref<784x128xf32, #tpu.memory_space<vmem>>, vector<14x128xf32>
    %59 = arith.maximumf %55, %56 : vector<14x128xf32>
    %60 = arith.maximumf %57, %58 : vector<14x128xf32>
    %61 = arith.maximumf %59, %60 : vector<14x128xf32>
    %cst_67 = arith.constant 0.000000e+00 : f32
    %62 = vector.broadcast %cst_67 : f32 to vector<14x128xf32>
    %63 = arith.maximumf %61, %62 : vector<14x128xf32>
    %c28_68 = arith.constant 28 : index
    %c0_69 = arith.constant 0 : index
    %64 = vector.load %arg10[%c28_68, %c0_69] : memref<196x128xf32, #tpu.memory_space<vmem>>, vector<14x128xf32>
    tpu.vector_store %arg10[%c28_68, %c0_69], %63 {strides = array<i32>} : memref<196x128xf32, #tpu.memory_space<vmem>>, vector<14x128xf32>,
    %c168 = arith.constant 168 : index
    %c0_70 = arith.constant 0 : index
    %65 = tpu.strided_load %arg9[%c168, %c0_70] {strides = array<i32: 2, 1>} : memref<784x128xf32, #tpu.memory_space<vmem>>, vector<14x128xf32>
    %c169 = arith.constant 169 : index
    %c0_71 = arith.constant 0 : index
    %66 = tpu.strided_load %arg9[%c169, %c0_71] {strides = array<i32: 2, 1>} : memref<784x128xf32, #tpu.memory_space<vmem>>, vector<14x128xf32>
    %c196 = arith.constant 196 : index
    %c0_72 = arith.constant 0 : index
    %67 = tpu.strided_load %arg9[%c196, %c0_72] {strides = array<i32: 2, 1>} : memref<784x128xf32, #tpu.memory_space<vmem>>, vector<14x128xf32>
    %c197 = arith.constant 197 : index
    %c0_73 = arith.constant 0 : index
    %68 = tpu.strided_load %arg9[%c197, %c0_73] {strides = array<i32: 2, 1>} : memref<784x128xf32, #tpu.memory_space<vmem>>, vector<14x128xf32>
    %69 = arith.maximumf %65, %66 : vector<14x128xf32>
    %70 = arith.maximumf %67, %68 : vector<14x128xf32>
    %71 = arith.maximumf %69, %70 : vector<14x128xf32>
    %cst_74 = arith.constant 0.000000e+00 : f32
    %72 = vector.broadcast %cst_74 : f32 to vector<14x128xf32>
    %73 = arith.maximumf %71, %72 : vector<14x128xf32>
    %c42 = arith.constant 42 : index
    %c0_75 = arith.constant 0 : index
    %74 = vector.load %arg10[%c42, %c0_75] : memref<196x128xf32, #tpu.memory_space<vmem>>, vector<14x128xf32>
    tpu.vector_store %arg10[%c42, %c0_75], %73 {strides = array<i32>} : memref<196x128xf32, #tpu.memory_space<vmem>>, vector<14x128xf32>,
    %c224_76 = arith.constant 224 : index
    %c0_77 = arith.constant 0 : index
    %75 = tpu.strided_load %arg9[%c224_76, %c0_77] {strides = array<i32: 2, 1>} : memref<784x128xf32, #tpu.memory_space<vmem>>, vector<14x128xf32>
    %c225 = arith.constant 225 : index
    %c0_78 = arith.constant 0 : index
    %76 = tpu.strided_load %arg9[%c225, %c0_78] {strides = array<i32: 2, 1>} : memref<784x128xf32, #tpu.memory_space<vmem>>, vector<14x128xf32>
    %c252 = arith.constant 252 : index
    %c0_79 = arith.constant 0 : index
    %77 = tpu.strided_load %arg9[%c252, %c0_79] {strides = array<i32: 2, 1>} : memref<784x128xf32, #tpu.memory_space<vmem>>, vector<14x128xf32>
    %c253 = arith.constant 253 : index
    %c0_80 = arith.constant 0 : index
    %78 = tpu.strided_load %arg9[%c253, %c0_80] {strides = array<i32: 2, 1>} : memref<784x128xf32, #tpu.memory_space<vmem>>, vector<14x128xf32>
    %79 = arith.maximumf %75, %76 : vector<14x128xf32>
    %80 = arith.maximumf %77, %78 : vector<14x128xf32>
    %81 = arith.maximumf %79, %80 : vector<14x128xf32>
    %cst_81 = arith.constant 0.000000e+00 : f32
    %82 = vector.broadcast %cst_81 : f32 to vector<14x128xf32>
    %83 = arith.maximumf %81, %82 : vector<14x128xf32>
    %c56_82 = arith.constant 56 : index
    %c0_83 = arith.constant 0 : index
    %84 = vector.load %arg10[%c56_82, %c0_83] : memref<196x128xf32, #tpu.memory_space<vmem>>, vector<14x128xf32>
    tpu.vector_store %arg10[%c56_82, %c0_83], %83 {strides = array<i32>} : memref<196x128xf32, #tpu.memory_space<vmem>>, vector<14x128xf32>,
    %c280 = arith.constant 280 : index
    %c0_84 = arith.constant 0 : index
    %85 = tpu.strided_load %arg9[%c280, %c0_84] {strides = array<i32: 2, 1>} : memref<784x128xf32, #tpu.memory_space<vmem>>, vector<14x128xf32>
    %c281 = arith.constant 281 : index
    %c0_85 = arith.constant 0 : index
    %86 = tpu.strided_load %arg9[%c281, %c0_85] {strides = array<i32: 2, 1>} : memref<784x128xf32, #tpu.memory_space<vmem>>, vector<14x128xf32>
    %c308 = arith.constant 308 : index
    %c0_86 = arith.constant 0 : index
    %87 = tpu.strided_load %arg9[%c308, %c0_86] {strides = array<i32: 2, 1>} : memref<784x128xf32, #tpu.memory_space<vmem>>, vector<14x128xf32>
    %c309 = arith.constant 309 : index
    %c0_87 = arith.constant 0 : index
    %88 = tpu.strided_load %arg9[%c309, %c0_87] {strides = array<i32: 2, 1>} : memref<784x128xf32, #tpu.memory_space<vmem>>, vector<14x128xf32>
    %89 = arith.maximumf %85, %86 : vector<14x128xf32>
    %90 = arith.maximumf %87, %88 : vector<14x128xf32>
    %91 = arith.maximumf %89, %90 : vector<14x128xf32>
    %cst_88 = arith.constant 0.000000e+00 : f32
    %92 = vector.broadcast %cst_88 : f32 to vector<14x128xf32>
    %93 = arith.maximumf %91, %92 : vector<14x128xf32>
    %c70 = arith.constant 70 : index
    %c0_89 = arith.constant 0 : index
    %94 = vector.load %arg10[%c70, %c0_89] : memref<196x128xf32, #tpu.memory_space<vmem>>, vector<14x128xf32>
    tpu.vector_store %arg10[%c70, %c0_89], %93 {strides = array<i32>} : memref<196x128xf32, #tpu.memory_space<vmem>>, vector<14x128xf32>,
    %c336_90 = arith.constant 336 : index
    %c0_91 = arith.constant 0 : index
    %95 = tpu.strided_load %arg9[%c336_90, %c0_91] {strides = array<i32: 2, 1>} : memref<784x128xf32, #tpu.memory_space<vmem>>, vector<14x128xf32>
    %c337 = arith.constant 337 : index
    %c0_92 = arith.constant 0 : index
    %96 = tpu.strided_load %arg9[%c337, %c0_92] {strides = array<i32: 2, 1>} : memref<784x128xf32, #tpu.memory_space<vmem>>, vector<14x128xf32>
    %c364 = arith.constant 364 : index
    %c0_93 = arith.constant 0 : index
    %97 = tpu.strided_load %arg9[%c364, %c0_93] {strides = array<i32: 2, 1>} : memref<784x128xf32, #tpu.memory_space<vmem>>, vector<14x128xf32>
    %c365 = arith.constant 365 : index
    %c0_94 = arith.constant 0 : index
    %98 = tpu.strided_load %arg9[%c365, %c0_94] {strides = array<i32: 2, 1>} : memref<784x128xf32, #tpu.memory_space<vmem>>, vector<14x128xf32>
    %99 = arith.maximumf %95, %96 : vector<14x128xf32>
    %100 = arith.maximumf %97, %98 : vector<14x128xf32>
    %101 = arith.maximumf %99, %100 : vector<14x128xf32>
    %cst_95 = arith.constant 0.000000e+00 : f32
    %102 = vector.broadcast %cst_95 : f32 to vector<14x128xf32>
    %103 = arith.maximumf %101, %102 : vector<14x128xf32>
    %c84_96 = arith.constant 84 : index
    %c0_97 = arith.constant 0 : index
    %104 = vector.load %arg10[%c84_96, %c0_97] : memref<196x128xf32, #tpu.memory_space<vmem>>, vector<14x128xf32>
    tpu.vector_store %arg10[%c84_96, %c0_97], %103 {strides = array<i32>} : memref<196x128xf32, #tpu.memory_space<vmem>>, vector<14x128xf32>,
    %c392 = arith.constant 392 : index
    %c0_98 = arith.constant 0 : index
    %105 = tpu.strided_load %arg9[%c392, %c0_98] {strides = array<i32: 2, 1>} : memref<784x128xf32, #tpu.memory_space<vmem>>, vector<14x128xf32>
    %c393 = arith.constant 393 : index
    %c0_99 = arith.constant 0 : index
    %106 = tpu.strided_load %arg9[%c393, %c0_99] {strides = array<i32: 2, 1>} : memref<784x128xf32, #tpu.memory_space<vmem>>, vector<14x128xf32>
    %c420 = arith.constant 420 : index
    %c0_100 = arith.constant 0 : index
    %107 = tpu.strided_load %arg9[%c420, %c0_100] {strides = array<i32: 2, 1>} : memref<784x128xf32, #tpu.memory_space<vmem>>, vector<14x128xf32>
    %c421 = arith.constant 421 : index
    %c0_101 = arith.constant 0 : index
    %108 = tpu.strided_load %arg9[%c421, %c0_101] {strides = array<i32: 2, 1>} : memref<784x128xf32, #tpu.memory_space<vmem>>, vector<14x128xf32>
    %109 = arith.maximumf %105, %106 : vector<14x128xf32>
    %110 = arith.maximumf %107, %108 : vector<14x128xf32>
    %111 = arith.maximumf %109, %110 : vector<14x128xf32>
    %cst_102 = arith.constant 0.000000e+00 : f32
    %112 = vector.broadcast %cst_102 : f32 to vector<14x128xf32>
    %113 = arith.maximumf %111, %112 : vector<14x128xf32>
    %c98 = arith.constant 98 : index
    %c0_103 = arith.constant 0 : index
    %114 = vector.load %arg10[%c98, %c0_103] : memref<196x128xf32, #tpu.memory_space<vmem>>, vector<14x128xf32>
    tpu.vector_store %arg10[%c98, %c0_103], %113 {strides = array<i32>} : memref<196x128xf32, #tpu.memory_space<vmem>>, vector<14x128xf32>,
    %c448_104 = arith.constant 448 : index
    %c0_105 = arith.constant 0 : index
    %115 = tpu.strided_load %arg9[%c448_104, %c0_105] {strides = array<i32: 2, 1>} : memref<784x128xf32, #tpu.memory_space<vmem>>, vector<14x128xf32>
    %c449 = arith.constant 449 : index
    %c0_106 = arith.constant 0 : index
    %116 = tpu.strided_load %arg9[%c449, %c0_106] {strides = array<i32: 2, 1>} : memref<784x128xf32, #tpu.memory_space<vmem>>, vector<14x128xf32>
    %c476 = arith.constant 476 : index
    %c0_107 = arith.constant 0 : index
    %117 = tpu.strided_load %arg9[%c476, %c0_107] {strides = array<i32: 2, 1>} : memref<784x128xf32, #tpu.memory_space<vmem>>, vector<14x128xf32>
    %c477 = arith.constant 477 : index
    %c0_108 = arith.constant 0 : index
    %118 = tpu.strided_load %arg9[%c477, %c0_108] {strides = array<i32: 2, 1>} : memref<784x128xf32, #tpu.memory_space<vmem>>, vector<14x128xf32>
    %119 = arith.maximumf %115, %116 : vector<14x128xf32>
    %120 = arith.maximumf %117, %118 : vector<14x128xf32>
    %121 = arith.maximumf %119, %120 : vector<14x128xf32>
    %cst_109 = arith.constant 0.000000e+00 : f32
    %122 = vector.broadcast %cst_109 : f32 to vector<14x128xf32>
    %123 = arith.maximumf %121, %122 : vector<14x128xf32>
    %c112_110 = arith.constant 112 : index
    %c0_111 = arith.constant 0 : index
    %124 = vector.load %arg10[%c112_110, %c0_111] : memref<196x128xf32, #tpu.memory_space<vmem>>, vector<14x128xf32>
    tpu.vector_store %arg10[%c112_110, %c0_111], %123 {strides = array<i32>} : memref<196x128xf32, #tpu.memory_space<vmem>>, vector<14x128xf32>,
    %c504 = arith.constant 504 : index
    %c0_112 = arith.constant 0 : index
    %125 = tpu.strided_load %arg9[%c504, %c0_112] {strides = array<i32: 2, 1>} : memref<784x128xf32, #tpu.memory_space<vmem>>, vector<14x128xf32>
    %c505 = arith.constant 505 : index
    %c0_113 = arith.constant 0 : index
    %126 = tpu.strided_load %arg9[%c505, %c0_113] {strides = array<i32: 2, 1>} : memref<784x128xf32, #tpu.memory_space<vmem>>, vector<14x128xf32>
    %c532 = arith.constant 532 : index
    %c0_114 = arith.constant 0 : index
    %127 = tpu.strided_load %arg9[%c532, %c0_114] {strides = array<i32: 2, 1>} : memref<784x128xf32, #tpu.memory_space<vmem>>, vector<14x128xf32>
    %c533 = arith.constant 533 : index
    %c0_115 = arith.constant 0 : index
    %128 = tpu.strided_load %arg9[%c533, %c0_115] {strides = array<i32: 2, 1>} : memref<784x128xf32, #tpu.memory_space<vmem>>, vector<14x128xf32>
    %129 = arith.maximumf %125, %126 : vector<14x128xf32>
    %130 = arith.maximumf %127, %128 : vector<14x128xf32>
    %131 = arith.maximumf %129, %130 : vector<14x128xf32>
    %cst_116 = arith.constant 0.000000e+00 : f32
    %132 = vector.broadcast %cst_116 : f32 to vector<14x128xf32>
    %133 = arith.maximumf %131, %132 : vector<14x128xf32>
    %c126 = arith.constant 126 : index
    %c0_117 = arith.constant 0 : index
    %134 = vector.load %arg10[%c126, %c0_117] : memref<196x128xf32, #tpu.memory_space<vmem>>, vector<14x128xf32>
    tpu.vector_store %arg10[%c126, %c0_117], %133 {strides = array<i32>} : memref<196x128xf32, #tpu.memory_space<vmem>>, vector<14x128xf32>,
    %c560_118 = arith.constant 560 : index
    %c0_119 = arith.constant 0 : index
    %135 = tpu.strided_load %arg9[%c560_118, %c0_119] {strides = array<i32: 2, 1>} : memref<784x128xf32, #tpu.memory_space<vmem>>, vector<14x128xf32>
    %c561 = arith.constant 561 : index
    %c0_120 = arith.constant 0 : index
    %136 = tpu.strided_load %arg9[%c561, %c0_120] {strides = array<i32: 2, 1>} : memref<784x128xf32, #tpu.memory_space<vmem>>, vector<14x128xf32>
    %c588 = arith.constant 588 : index
    %c0_121 = arith.constant 0 : index
    %137 = tpu.strided_load %arg9[%c588, %c0_121] {strides = array<i32: 2, 1>} : memref<784x128xf32, #tpu.memory_space<vmem>>, vector<14x128xf32>
    %c589 = arith.constant 589 : index
    %c0_122 = arith.constant 0 : index
    %138 = tpu.strided_load %arg9[%c589, %c0_122] {strides = array<i32: 2, 1>} : memref<784x128xf32, #tpu.memory_space<vmem>>, vector<14x128xf32>
    %139 = arith.maximumf %135, %136 : vector<14x128xf32>
    %140 = arith.maximumf %137, %138 : vector<14x128xf32>
    %141 = arith.maximumf %139, %140 : vector<14x128xf32>
    %cst_123 = arith.constant 0.000000e+00 : f32
    %142 = vector.broadcast %cst_123 : f32 to vector<14x128xf32>
    %143 = arith.maximumf %141, %142 : vector<14x128xf32>
    %c140_124 = arith.constant 140 : index
    %c0_125 = arith.constant 0 : index
    %144 = vector.load %arg10[%c140_124, %c0_125] : memref<196x128xf32, #tpu.memory_space<vmem>>, vector<14x128xf32>
    tpu.vector_store %arg10[%c140_124, %c0_125], %143 {strides = array<i32>} : memref<196x128xf32, #tpu.memory_space<vmem>>, vector<14x128xf32>,
    %c616 = arith.constant 616 : index
    %c0_126 = arith.constant 0 : index
    %145 = tpu.strided_load %arg9[%c616, %c0_126] {strides = array<i32: 2, 1>} : memref<784x128xf32, #tpu.memory_space<vmem>>, vector<14x128xf32>
    %c617 = arith.constant 617 : index
    %c0_127 = arith.constant 0 : index
    %146 = tpu.strided_load %arg9[%c617, %c0_127] {strides = array<i32: 2, 1>} : memref<784x128xf32, #tpu.memory_space<vmem>>, vector<14x128xf32>
    %c644 = arith.constant 644 : index
    %c0_128 = arith.constant 0 : index
    %147 = tpu.strided_load %arg9[%c644, %c0_128] {strides = array<i32: 2, 1>} : memref<784x128xf32, #tpu.memory_space<vmem>>, vector<14x128xf32>
    %c645 = arith.constant 645 : index
    %c0_129 = arith.constant 0 : index
    %148 = tpu.strided_load %arg9[%c645, %c0_129] {strides = array<i32: 2, 1>} : memref<784x128xf32, #tpu.memory_space<vmem>>, vector<14x128xf32>
    %149 = arith.maximumf %145, %146 : vector<14x128xf32>
    %150 = arith.maximumf %147, %148 : vector<14x128xf32>
    %151 = arith.maximumf %149, %150 : vector<14x128xf32>
    %cst_130 = arith.constant 0.000000e+00 : f32
    %152 = vector.broadcast %cst_130 : f32 to vector<14x128xf32>
    %153 = arith.maximumf %151, %152 : vector<14x128xf32>
    %c154 = arith.constant 154 : index
    %c0_131 = arith.constant 0 : index
    %154 = vector.load %arg10[%c154, %c0_131] : memref<196x128xf32, #tpu.memory_space<vmem>>, vector<14x128xf32>
    tpu.vector_store %arg10[%c154, %c0_131], %153 {strides = array<i32>} : memref<196x128xf32, #tpu.memory_space<vmem>>, vector<14x128xf32>,
    %c672_132 = arith.constant 672 : index
    %c0_133 = arith.constant 0 : index
    %155 = tpu.strided_load %arg9[%c672_132, %c0_133] {strides = array<i32: 2, 1>} : memref<784x128xf32, #tpu.memory_space<vmem>>, vector<14x128xf32>
    %c673 = arith.constant 673 : index
    %c0_134 = arith.constant 0 : index
    %156 = tpu.strided_load %arg9[%c673, %c0_134] {strides = array<i32: 2, 1>} : memref<784x128xf32, #tpu.memory_space<vmem>>, vector<14x128xf32>
    %c700 = arith.constant 700 : index
    %c0_135 = arith.constant 0 : index
    %157 = tpu.strided_load %arg9[%c700, %c0_135] {strides = array<i32: 2, 1>} : memref<784x128xf32, #tpu.memory_space<vmem>>, vector<14x128xf32>
    %c701 = arith.constant 701 : index
    %c0_136 = arith.constant 0 : index
    %158 = tpu.strided_load %arg9[%c701, %c0_136] {strides = array<i32: 2, 1>} : memref<784x128xf32, #tpu.memory_space<vmem>>, vector<14x128xf32>
    %159 = arith.maximumf %155, %156 : vector<14x128xf32>
    %160 = arith.maximumf %157, %158 : vector<14x128xf32>
    %161 = arith.maximumf %159, %160 : vector<14x128xf32>
    %cst_137 = arith.constant 0.000000e+00 : f32
    %162 = vector.broadcast %cst_137 : f32 to vector<14x128xf32>
    %163 = arith.maximumf %161, %162 : vector<14x128xf32>
    %c168_138 = arith.constant 168 : index
    %c0_139 = arith.constant 0 : index
    %164 = vector.load %arg10[%c168_138, %c0_139] : memref<196x128xf32, #tpu.memory_space<vmem>>, vector<14x128xf32>
    tpu.vector_store %arg10[%c168_138, %c0_139], %163 {strides = array<i32>} : memref<196x128xf32, #tpu.memory_space<vmem>>, vector<14x128xf32>,
    %c728 = arith.constant 728 : index
    %c0_140 = arith.constant 0 : index
    %165 = tpu.strided_load %arg9[%c728, %c0_140] {strides = array<i32: 2, 1>} : memref<784x128xf32, #tpu.memory_space<vmem>>, vector<14x128xf32>
    %c729 = arith.constant 729 : index
    %c0_141 = arith.constant 0 : index
    %166 = tpu.strided_load %arg9[%c729, %c0_141] {strides = array<i32: 2, 1>} : memref<784x128xf32, #tpu.memory_space<vmem>>, vector<14x128xf32>
    %c756 = arith.constant 756 : index
    %c0_142 = arith.constant 0 : index
    %167 = tpu.strided_load %arg9[%c756, %c0_142] {strides = array<i32: 2, 1>} : memref<784x128xf32, #tpu.memory_space<vmem>>, vector<14x128xf32>
    %c757 = arith.constant 757 : index
    %c0_143 = arith.constant 0 : index
    %168 = tpu.strided_load %arg9[%c757, %c0_143] {strides = array<i32: 2, 1>} : memref<784x128xf32, #tpu.memory_space<vmem>>, vector<14x128xf32>
    %169 = arith.maximumf %165, %166 : vector<14x128xf32>
    %170 = arith.maximumf %167, %168 : vector<14x128xf32>
    %171 = arith.maximumf %169, %170 : vector<14x128xf32>
    %cst_144 = arith.constant 0.000000e+00 : f32
    %172 = vector.broadcast %cst_144 : f32 to vector<14x128xf32>
    %173 = arith.maximumf %171, %172 : vector<14x128xf32>
    %c182 = arith.constant 182 : index
    %c0_145 = arith.constant 0 : index
    %174 = vector.load %arg10[%c182, %c0_145] : memref<196x128xf32, #tpu.memory_space<vmem>>, vector<14x128xf32>
    tpu.vector_store %arg10[%c182, %c0_145], %173 {strides = array<i32>} : memref<196x128xf32, #tpu.memory_space<vmem>>, vector<14x128xf32>,
    %c0_146 = arith.constant 0 : index
    %c0_147 = arith.constant 0 : index
    %175 = vector.load %arg10[%c0_146, %c0_147] : memref<196x128xf32, #tpu.memory_space<vmem>>, vector<136x128xf32>
    %176 = vector.extract_strided_slice %175 {offsets = [0, 0], sizes = [136, 8], strides = [1, 1]} : vector<136x128xf32> to vector<136x8xf32>
    %c0_148 = arith.constant 0 : index
    %c0_149 = arith.constant 0 : index
    %c0_150 = arith.constant 0 : index
    %177 = vector.load %arg3[%c0_148, %c0_149, %c0_150] : memref<25x8x128xf32, #tpu.memory_space<vmem>>, vector<1x8x128xf32>
    %178 = vector.shape_cast %177 : vector<1x8x128xf32> to vector<8x128xf32>
    %cst_151 = arith.constant dense<0.000000e+00> : vector<136x128xf32>
    %179 = tpu.matmul %176, %178, %cst_151 {dimension_numbers = #tpu.dot_dimension_numbers<[1], [0], [0], [1], [0, 0, 1, 1], [], []>} : vector<136x8xf32>, vector<8x128xf32>, vector<136x128xf32> -> vector<136x128xf32>
    %c1_152 = arith.constant 1 : index
    %c0_153 = arith.constant 0 : index
    %180 = vector.load %arg10[%c1_152, %c0_153] : memref<196x128xf32, #tpu.memory_space<vmem>>, vector<136x128xf32>
    %181 = vector.extract_strided_slice %180 {offsets = [0, 0], sizes = [136, 8], strides = [1, 1]} : vector<136x128xf32> to vector<136x8xf32>
    %c1_154 = arith.constant 1 : index
    %c0_155 = arith.constant 0 : index
    %c0_156 = arith.constant 0 : index
    %182 = vector.load %arg3[%c1_154, %c0_155, %c0_156] : memref<25x8x128xf32, #tpu.memory_space<vmem>>, vector<1x8x128xf32>
    %183 = vector.shape_cast %182 : vector<1x8x128xf32> to vector<8x128xf32>
    %cst_157 = arith.constant dense<0.000000e+00> : vector<136x128xf32>
    %184 = tpu.matmul %181, %183, %cst_157 {dimension_numbers = #tpu.dot_dimension_numbers<[1], [0], [0], [1], [0, 0, 1, 1], [], []>} : vector<136x8xf32>, vector<8x128xf32>, vector<136x128xf32> -> vector<136x128xf32>
    %185 = arith.addf %179, %184 : vector<136x128xf32>
    %c2 = arith.constant 2 : index
    %c0_158 = arith.constant 0 : index
    %186 = vector.load %arg10[%c2, %c0_158] : memref<196x128xf32, #tpu.memory_space<vmem>>, vector<136x128xf32>
    %187 = vector.extract_strided_slice %186 {offsets = [0, 0], sizes = [136, 8], strides = [1, 1]} : vector<136x128xf32> to vector<136x8xf32>
    %c2_159 = arith.constant 2 : index
    %c0_160 = arith.constant 0 : index
    %c0_161 = arith.constant 0 : index
    %188 = vector.load %arg3[%c2_159, %c0_160, %c0_161] : memref<25x8x128xf32, #tpu.memory_space<vmem>>, vector<1x8x128xf32>
    %189 = vector.shape_cast %188 : vector<1x8x128xf32> to vector<8x128xf32>
    %cst_162 = arith.constant dense<0.000000e+00> : vector<136x128xf32>
    %190 = tpu.matmul %187, %189, %cst_162 {dimension_numbers = #tpu.dot_dimension_numbers<[1], [0], [0], [1], [0, 0, 1, 1], [], []>} : vector<136x8xf32>, vector<8x128xf32>, vector<136x128xf32> -> vector<136x128xf32>
    %191 = arith.addf %185, %190 : vector<136x128xf32>
    %c3 = arith.constant 3 : index
    %c0_163 = arith.constant 0 : index
    %192 = vector.load %arg10[%c3, %c0_163] : memref<196x128xf32, #tpu.memory_space<vmem>>, vector<136x128xf32>
    %193 = vector.extract_strided_slice %192 {offsets = [0, 0], sizes = [136, 8], strides = [1, 1]} : vector<136x128xf32> to vector<136x8xf32>
    %c3_164 = arith.constant 3 : index
    %c0_165 = arith.constant 0 : index
    %c0_166 = arith.constant 0 : index
    %194 = vector.load %arg3[%c3_164, %c0_165, %c0_166] : memref<25x8x128xf32, #tpu.memory_space<vmem>>, vector<1x8x128xf32>
    %195 = vector.shape_cast %194 : vector<1x8x128xf32> to vector<8x128xf32>
    %cst_167 = arith.constant dense<0.000000e+00> : vector<136x128xf32>
    %196 = tpu.matmul %193, %195, %cst_167 {dimension_numbers = #tpu.dot_dimension_numbers<[1], [0], [0], [1], [0, 0, 1, 1], [], []>} : vector<136x8xf32>, vector<8x128xf32>, vector<136x128xf32> -> vector<136x128xf32>
    %197 = arith.addf %191, %196 : vector<136x128xf32>
    %c4 = arith.constant 4 : index
    %c0_168 = arith.constant 0 : index
    %198 = vector.load %arg10[%c4, %c0_168] : memref<196x128xf32, #tpu.memory_space<vmem>>, vector<136x128xf32>
    %199 = vector.extract_strided_slice %198 {offsets = [0, 0], sizes = [136, 8], strides = [1, 1]} : vector<136x128xf32> to vector<136x8xf32>
    %c4_169 = arith.constant 4 : index
    %c0_170 = arith.constant 0 : index
    %c0_171 = arith.constant 0 : index
    %200 = vector.load %arg3[%c4_169, %c0_170, %c0_171] : memref<25x8x128xf32, #tpu.memory_space<vmem>>, vector<1x8x128xf32>
    %201 = vector.shape_cast %200 : vector<1x8x128xf32> to vector<8x128xf32>
    %cst_172 = arith.constant dense<0.000000e+00> : vector<136x128xf32>
    %202 = tpu.matmul %199, %201, %cst_172 {dimension_numbers = #tpu.dot_dimension_numbers<[1], [0], [0], [1], [0, 0, 1, 1], [], []>} : vector<136x8xf32>, vector<8x128xf32>, vector<136x128xf32> -> vector<136x128xf32>
    %203 = arith.addf %197, %202 : vector<136x128xf32>
    %c14_173 = arith.constant 14 : index
    %c0_174 = arith.constant 0 : index
    %204 = vector.load %arg10[%c14_173, %c0_174] : memref<196x128xf32, #tpu.memory_space<vmem>>, vector<136x128xf32>
    %205 = vector.extract_strided_slice %204 {offsets = [0, 0], sizes = [136, 8], strides = [1, 1]} : vector<136x128xf32> to vector<136x8xf32>
    %c5 = arith.constant 5 : index
    %c0_175 = arith.constant 0 : index
    %c0_176 = arith.constant 0 : index
    %206 = vector.load %arg3[%c5, %c0_175, %c0_176] : memref<25x8x128xf32, #tpu.memory_space<vmem>>, vector<1x8x128xf32>
    %207 = vector.shape_cast %206 : vector<1x8x128xf32> to vector<8x128xf32>
    %cst_177 = arith.constant dense<0.000000e+00> : vector<136x128xf32>
    %208 = tpu.matmul %205, %207, %cst_177 {dimension_numbers = #tpu.dot_dimension_numbers<[1], [0], [0], [1], [0, 0, 1, 1], [], []>} : vector<136x8xf32>, vector<8x128xf32>, vector<136x128xf32> -> vector<136x128xf32>
    %209 = arith.addf %203, %208 : vector<136x128xf32>
    %c15 = arith.constant 15 : index
    %c0_178 = arith.constant 0 : index
    %210 = vector.load %arg10[%c15, %c0_178] : memref<196x128xf32, #tpu.memory_space<vmem>>, vector<136x128xf32>
    %211 = vector.extract_strided_slice %210 {offsets = [0, 0], sizes = [136, 8], strides = [1, 1]} : vector<136x128xf32> to vector<136x8xf32>
    %c6 = arith.constant 6 : index
    %c0_179 = arith.constant 0 : index
    %c0_180 = arith.constant 0 : index
    %212 = vector.load %arg3[%c6, %c0_179, %c0_180] : memref<25x8x128xf32, #tpu.memory_space<vmem>>, vector<1x8x128xf32>
    %213 = vector.shape_cast %212 : vector<1x8x128xf32> to vector<8x128xf32>
    %cst_181 = arith.constant dense<0.000000e+00> : vector<136x128xf32>
    %214 = tpu.matmul %211, %213, %cst_181 {dimension_numbers = #tpu.dot_dimension_numbers<[1], [0], [0], [1], [0, 0, 1, 1], [], []>} : vector<136x8xf32>, vector<8x128xf32>, vector<136x128xf32> -> vector<136x128xf32>
    %215 = arith.addf %209, %214 : vector<136x128xf32>
    %c16 = arith.constant 16 : index
    %c0_182 = arith.constant 0 : index
    %216 = vector.load %arg10[%c16, %c0_182] : memref<196x128xf32, #tpu.memory_space<vmem>>, vector<136x128xf32>
    %217 = vector.extract_strided_slice %216 {offsets = [0, 0], sizes = [136, 8], strides = [1, 1]} : vector<136x128xf32> to vector<136x8xf32>
    %c7 = arith.constant 7 : index
    %c0_183 = arith.constant 0 : index
    %c0_184 = arith.constant 0 : index
    %218 = vector.load %arg3[%c7, %c0_183, %c0_184] : memref<25x8x128xf32, #tpu.memory_space<vmem>>, vector<1x8x128xf32>
    %219 = vector.shape_cast %218 : vector<1x8x128xf32> to vector<8x128xf32>
    %cst_185 = arith.constant dense<0.000000e+00> : vector<136x128xf32>
    %220 = tpu.matmul %217, %219, %cst_185 {dimension_numbers = #tpu.dot_dimension_numbers<[1], [0], [0], [1], [0, 0, 1, 1], [], []>} : vector<136x8xf32>, vector<8x128xf32>, vector<136x128xf32> -> vector<136x128xf32>
    %221 = arith.addf %215, %220 : vector<136x128xf32>
    %c17 = arith.constant 17 : index
    %c0_186 = arith.constant 0 : index
    %222 = vector.load %arg10[%c17, %c0_186] : memref<196x128xf32, #tpu.memory_space<vmem>>, vector<136x128xf32>
    %223 = vector.extract_strided_slice %222 {offsets = [0, 0], sizes = [136, 8], strides = [1, 1]} : vector<136x128xf32> to vector<136x8xf32>
    %c8 = arith.constant 8 : index
    %c0_187 = arith.constant 0 : index
    %c0_188 = arith.constant 0 : index
    %224 = vector.load %arg3[%c8, %c0_187, %c0_188] : memref<25x8x128xf32, #tpu.memory_space<vmem>>, vector<1x8x128xf32>
    %225 = vector.shape_cast %224 : vector<1x8x128xf32> to vector<8x128xf32>
    %cst_189 = arith.constant dense<0.000000e+00> : vector<136x128xf32>
    %226 = tpu.matmul %223, %225, %cst_189 {dimension_numbers = #tpu.dot_dimension_numbers<[1], [0], [0], [1], [0, 0, 1, 1], [], []>} : vector<136x8xf32>, vector<8x128xf32>, vector<136x128xf32> -> vector<136x128xf32>
    %227 = arith.addf %221, %226 : vector<136x128xf32>
    %c18 = arith.constant 18 : index
    %c0_190 = arith.constant 0 : index
    %228 = vector.load %arg10[%c18, %c0_190] : memref<196x128xf32, #tpu.memory_space<vmem>>, vector<136x128xf32>
    %229 = vector.extract_strided_slice %228 {offsets = [0, 0], sizes = [136, 8], strides = [1, 1]} : vector<136x128xf32> to vector<136x8xf32>
    %c9 = arith.constant 9 : index
    %c0_191 = arith.constant 0 : index
    %c0_192 = arith.constant 0 : index
    %230 = vector.load %arg3[%c9, %c0_191, %c0_192] : memref<25x8x128xf32, #tpu.memory_space<vmem>>, vector<1x8x128xf32>
    %231 = vector.shape_cast %230 : vector<1x8x128xf32> to vector<8x128xf32>
    %cst_193 = arith.constant dense<0.000000e+00> : vector<136x128xf32>
    %232 = tpu.matmul %229, %231, %cst_193 {dimension_numbers = #tpu.dot_dimension_numbers<[1], [0], [0], [1], [0, 0, 1, 1], [], []>} : vector<136x8xf32>, vector<8x128xf32>, vector<136x128xf32> -> vector<136x128xf32>
    %233 = arith.addf %227, %232 : vector<136x128xf32>
    %c28_194 = arith.constant 28 : index
    %c0_195 = arith.constant 0 : index
    %234 = vector.load %arg10[%c28_194, %c0_195] : memref<196x128xf32, #tpu.memory_space<vmem>>, vector<136x128xf32>
    %235 = vector.extract_strided_slice %234 {offsets = [0, 0], sizes = [136, 8], strides = [1, 1]} : vector<136x128xf32> to vector<136x8xf32>
    %c10 = arith.constant 10 : index
    %c0_196 = arith.constant 0 : index
    %c0_197 = arith.constant 0 : index
    %236 = vector.load %arg3[%c10, %c0_196, %c0_197] : memref<25x8x128xf32, #tpu.memory_space<vmem>>, vector<1x8x128xf32>
    %237 = vector.shape_cast %236 : vector<1x8x128xf32> to vector<8x128xf32>
    %cst_198 = arith.constant dense<0.000000e+00> : vector<136x128xf32>
    %238 = tpu.matmul %235, %237, %cst_198 {dimension_numbers = #tpu.dot_dimension_numbers<[1], [0], [0], [1], [0, 0, 1, 1], [], []>} : vector<136x8xf32>, vector<8x128xf32>, vector<136x128xf32> -> vector<136x128xf32>
    %239 = arith.addf %233, %238 : vector<136x128xf32>
    %c29_199 = arith.constant 29 : index
    %c0_200 = arith.constant 0 : index
    %240 = vector.load %arg10[%c29_199, %c0_200] : memref<196x128xf32, #tpu.memory_space<vmem>>, vector<136x128xf32>
    %241 = vector.extract_strided_slice %240 {offsets = [0, 0], sizes = [136, 8], strides = [1, 1]} : vector<136x128xf32> to vector<136x8xf32>
    %c11 = arith.constant 11 : index
    %c0_201 = arith.constant 0 : index
    %c0_202 = arith.constant 0 : index
    %242 = vector.load %arg3[%c11, %c0_201, %c0_202] : memref<25x8x128xf32, #tpu.memory_space<vmem>>, vector<1x8x128xf32>
    %243 = vector.shape_cast %242 : vector<1x8x128xf32> to vector<8x128xf32>
    %cst_203 = arith.constant dense<0.000000e+00> : vector<136x128xf32>
    %244 = tpu.matmul %241, %243, %cst_203 {dimension_numbers = #tpu.dot_dimension_numbers<[1], [0], [0], [1], [0, 0, 1, 1], [], []>} : vector<136x8xf32>, vector<8x128xf32>, vector<136x128xf32> -> vector<136x128xf32>
    %245 = arith.addf %239, %244 : vector<136x128xf32>
    %c30 = arith.constant 30 : index
    %c0_204 = arith.constant 0 : index
    %246 = vector.load %arg10[%c30, %c0_204] : memref<196x128xf32, #tpu.memory_space<vmem>>, vector<136x128xf32>
    %247 = vector.extract_strided_slice %246 {offsets = [0, 0], sizes = [136, 8], strides = [1, 1]} : vector<136x128xf32> to vector<136x8xf32>
    %c12 = arith.constant 12 : index
    %c0_205 = arith.constant 0 : index
    %c0_206 = arith.constant 0 : index
    %248 = vector.load %arg3[%c12, %c0_205, %c0_206] : memref<25x8x128xf32, #tpu.memory_space<vmem>>, vector<1x8x128xf32>
    %249 = vector.shape_cast %248 : vector<1x8x128xf32> to vector<8x128xf32>
    %cst_207 = arith.constant dense<0.000000e+00> : vector<136x128xf32>
    %250 = tpu.matmul %247, %249, %cst_207 {dimension_numbers = #tpu.dot_dimension_numbers<[1], [0], [0], [1], [0, 0, 1, 1], [], []>} : vector<136x8xf32>, vector<8x128xf32>, vector<136x128xf32> -> vector<136x128xf32>
    %251 = arith.addf %245, %250 : vector<136x128xf32>
    %c31 = arith.constant 31 : index
    %c0_208 = arith.constant 0 : index
    %252 = vector.load %arg10[%c31, %c0_208] : memref<196x128xf32, #tpu.memory_space<vmem>>, vector<136x128xf32>
    %253 = vector.extract_strided_slice %252 {offsets = [0, 0], sizes = [136, 8], strides = [1, 1]} : vector<136x128xf32> to vector<136x8xf32>
    %c13 = arith.constant 13 : index
    %c0_209 = arith.constant 0 : index
    %c0_210 = arith.constant 0 : index
    %254 = vector.load %arg3[%c13, %c0_209, %c0_210] : memref<25x8x128xf32, #tpu.memory_space<vmem>>, vector<1x8x128xf32>
    %255 = vector.shape_cast %254 : vector<1x8x128xf32> to vector<8x128xf32>
    %cst_211 = arith.constant dense<0.000000e+00> : vector<136x128xf32>
    %256 = tpu.matmul %253, %255, %cst_211 {dimension_numbers = #tpu.dot_dimension_numbers<[1], [0], [0], [1], [0, 0, 1, 1], [], []>} : vector<136x8xf32>, vector<8x128xf32>, vector<136x128xf32> -> vector<136x128xf32>
    %257 = arith.addf %251, %256 : vector<136x128xf32>
    %c32 = arith.constant 32 : index
    %c0_212 = arith.constant 0 : index
    %258 = vector.load %arg10[%c32, %c0_212] : memref<196x128xf32, #tpu.memory_space<vmem>>, vector<136x128xf32>
    %259 = vector.extract_strided_slice %258 {offsets = [0, 0], sizes = [136, 8], strides = [1, 1]} : vector<136x128xf32> to vector<136x8xf32>
    %c14_213 = arith.constant 14 : index
    %c0_214 = arith.constant 0 : index
    %c0_215 = arith.constant 0 : index
    %260 = vector.load %arg3[%c14_213, %c0_214, %c0_215] : memref<25x8x128xf32, #tpu.memory_space<vmem>>, vector<1x8x128xf32>
    %261 = vector.shape_cast %260 : vector<1x8x128xf32> to vector<8x128xf32>
    %cst_216 = arith.constant dense<0.000000e+00> : vector<136x128xf32>
    %262 = tpu.matmul %259, %261, %cst_216 {dimension_numbers = #tpu.dot_dimension_numbers<[1], [0], [0], [1], [0, 0, 1, 1], [], []>} : vector<136x8xf32>, vector<8x128xf32>, vector<136x128xf32> -> vector<136x128xf32>
    %263 = arith.addf %257, %262 : vector<136x128xf32>
    %c42_217 = arith.constant 42 : index
    %c0_218 = arith.constant 0 : index
    %264 = vector.load %arg10[%c42_217, %c0_218] : memref<196x128xf32, #tpu.memory_space<vmem>>, vector<136x128xf32>
    %265 = vector.extract_strided_slice %264 {offsets = [0, 0], sizes = [136, 8], strides = [1, 1]} : vector<136x128xf32> to vector<136x8xf32>
    %c15_219 = arith.constant 15 : index
    %c0_220 = arith.constant 0 : index
    %c0_221 = arith.constant 0 : index
    %266 = vector.load %arg3[%c15_219, %c0_220, %c0_221] : memref<25x8x128xf32, #tpu.memory_space<vmem>>, vector<1x8x128xf32>
    %267 = vector.shape_cast %266 : vector<1x8x128xf32> to vector<8x128xf32>
    %cst_222 = arith.constant dense<0.000000e+00> : vector<136x128xf32>
    %268 = tpu.matmul %265, %267, %cst_222 {dimension_numbers = #tpu.dot_dimension_numbers<[1], [0], [0], [1], [0, 0, 1, 1], [], []>} : vector<136x8xf32>, vector<8x128xf32>, vector<136x128xf32> -> vector<136x128xf32>
    %269 = arith.addf %263, %268 : vector<136x128xf32>
    %c43 = arith.constant 43 : index
    %c0_223 = arith.constant 0 : index
    %270 = vector.load %arg10[%c43, %c0_223] : memref<196x128xf32, #tpu.memory_space<vmem>>, vector<136x128xf32>
    %271 = vector.extract_strided_slice %270 {offsets = [0, 0], sizes = [136, 8], strides = [1, 1]} : vector<136x128xf32> to vector<136x8xf32>
    %c16_224 = arith.constant 16 : index
    %c0_225 = arith.constant 0 : index
    %c0_226 = arith.constant 0 : index
    %272 = vector.load %arg3[%c16_224, %c0_225, %c0_226] : memref<25x8x128xf32, #tpu.memory_space<vmem>>, vector<1x8x128xf32>
    %273 = vector.shape_cast %272 : vector<1x8x128xf32> to vector<8x128xf32>
    %cst_227 = arith.constant dense<0.000000e+00> : vector<136x128xf32>
    %274 = tpu.matmul %271, %273, %cst_227 {dimension_numbers = #tpu.dot_dimension_numbers<[1], [0], [0], [1], [0, 0, 1, 1], [], []>} : vector<136x8xf32>, vector<8x128xf32>, vector<136x128xf32> -> vector<136x128xf32>
    %275 = arith.addf %269, %274 : vector<136x128xf32>
    %c44 = arith.constant 44 : index
    %c0_228 = arith.constant 0 : index
    %276 = vector.load %arg10[%c44, %c0_228] : memref<196x128xf32, #tpu.memory_space<vmem>>, vector<136x128xf32>
    %277 = vector.extract_strided_slice %276 {offsets = [0, 0], sizes = [136, 8], strides = [1, 1]} : vector<136x128xf32> to vector<136x8xf32>
    %c17_229 = arith.constant 17 : index
    %c0_230 = arith.constant 0 : index
    %c0_231 = arith.constant 0 : index
    %278 = vector.load %arg3[%c17_229, %c0_230, %c0_231] : memref<25x8x128xf32, #tpu.memory_space<vmem>>, vector<1x8x128xf32>
    %279 = vector.shape_cast %278 : vector<1x8x128xf32> to vector<8x128xf32>
    %cst_232 = arith.constant dense<0.000000e+00> : vector<136x128xf32>
    %280 = tpu.matmul %277, %279, %cst_232 {dimension_numbers = #tpu.dot_dimension_numbers<[1], [0], [0], [1], [0, 0, 1, 1], [], []>} : vector<136x8xf32>, vector<8x128xf32>, vector<136x128xf32> -> vector<136x128xf32>
    %281 = arith.addf %275, %280 : vector<136x128xf32>
    %c45 = arith.constant 45 : index
    %c0_233 = arith.constant 0 : index
    %282 = vector.load %arg10[%c45, %c0_233] : memref<196x128xf32, #tpu.memory_space<vmem>>, vector<136x128xf32>
    %283 = vector.extract_strided_slice %282 {offsets = [0, 0], sizes = [136, 8], strides = [1, 1]} : vector<136x128xf32> to vector<136x8xf32>
    %c18_234 = arith.constant 18 : index
    %c0_235 = arith.constant 0 : index
    %c0_236 = arith.constant 0 : index
    %284 = vector.load %arg3[%c18_234, %c0_235, %c0_236] : memref<25x8x128xf32, #tpu.memory_space<vmem>>, vector<1x8x128xf32>
    %285 = vector.shape_cast %284 : vector<1x8x128xf32> to vector<8x128xf32>
    %cst_237 = arith.constant dense<0.000000e+00> : vector<136x128xf32>
    %286 = tpu.matmul %283, %285, %cst_237 {dimension_numbers = #tpu.dot_dimension_numbers<[1], [0], [0], [1], [0, 0, 1, 1], [], []>} : vector<136x8xf32>, vector<8x128xf32>, vector<136x128xf32> -> vector<136x128xf32>
    %287 = arith.addf %281, %286 : vector<136x128xf32>
    %c46 = arith.constant 46 : index
    %c0_238 = arith.constant 0 : index
    %288 = vector.load %arg10[%c46, %c0_238] : memref<196x128xf32, #tpu.memory_space<vmem>>, vector<136x128xf32>
    %289 = vector.extract_strided_slice %288 {offsets = [0, 0], sizes = [136, 8], strides = [1, 1]} : vector<136x128xf32> to vector<136x8xf32>
    %c19 = arith.constant 19 : index
    %c0_239 = arith.constant 0 : index
    %c0_240 = arith.constant 0 : index
    %290 = vector.load %arg3[%c19, %c0_239, %c0_240] : memref<25x8x128xf32, #tpu.memory_space<vmem>>, vector<1x8x128xf32>
    %291 = vector.shape_cast %290 : vector<1x8x128xf32> to vector<8x128xf32>
    %cst_241 = arith.constant dense<0.000000e+00> : vector<136x128xf32>
    %292 = tpu.matmul %289, %291, %cst_241 {dimension_numbers = #tpu.dot_dimension_numbers<[1], [0], [0], [1], [0, 0, 1, 1], [], []>} : vector<136x8xf32>, vector<8x128xf32>, vector<136x128xf32> -> vector<136x128xf32>
    %293 = arith.addf %287, %292 : vector<136x128xf32>
    %c56_242 = arith.constant 56 : index
    %c0_243 = arith.constant 0 : index
    %294 = vector.load %arg10[%c56_242, %c0_243] : memref<196x128xf32, #tpu.memory_space<vmem>>, vector<136x128xf32>
    %295 = vector.extract_strided_slice %294 {offsets = [0, 0], sizes = [136, 8], strides = [1, 1]} : vector<136x128xf32> to vector<136x8xf32>
    %c20 = arith.constant 20 : index
    %c0_244 = arith.constant 0 : index
    %c0_245 = arith.constant 0 : index
    %296 = vector.load %arg3[%c20, %c0_244, %c0_245] : memref<25x8x128xf32, #tpu.memory_space<vmem>>, vector<1x8x128xf32>
    %297 = vector.shape_cast %296 : vector<1x8x128xf32> to vector<8x128xf32>
    %cst_246 = arith.constant dense<0.000000e+00> : vector<136x128xf32>
    %298 = tpu.matmul %295, %297, %cst_246 {dimension_numbers = #tpu.dot_dimension_numbers<[1], [0], [0], [1], [0, 0, 1, 1], [], []>} : vector<136x8xf32>, vector<8x128xf32>, vector<136x128xf32> -> vector<136x128xf32>
    %299 = arith.addf %293, %298 : vector<136x128xf32>
    %c57_247 = arith.constant 57 : index
    %c0_248 = arith.constant 0 : index
    %300 = vector.load %arg10[%c57_247, %c0_248] : memref<196x128xf32, #tpu.memory_space<vmem>>, vector<136x128xf32>
    %301 = vector.extract_strided_slice %300 {offsets = [0, 0], sizes = [136, 8], strides = [1, 1]} : vector<136x128xf32> to vector<136x8xf32>
    %c21 = arith.constant 21 : index
    %c0_249 = arith.constant 0 : index
    %c0_250 = arith.constant 0 : index
    %302 = vector.load %arg3[%c21, %c0_249, %c0_250] : memref<25x8x128xf32, #tpu.memory_space<vmem>>, vector<1x8x128xf32>
    %303 = vector.shape_cast %302 : vector<1x8x128xf32> to vector<8x128xf32>
    %cst_251 = arith.constant dense<0.000000e+00> : vector<136x128xf32>
    %304 = tpu.matmul %301, %303, %cst_251 {dimension_numbers = #tpu.dot_dimension_numbers<[1], [0], [0], [1], [0, 0, 1, 1], [], []>} : vector<136x8xf32>, vector<8x128xf32>, vector<136x128xf32> -> vector<136x128xf32>
    %305 = arith.addf %299, %304 : vector<136x128xf32>
    %c58 = arith.constant 58 : index
    %c0_252 = arith.constant 0 : index
    %306 = vector.load %arg10[%c58, %c0_252] : memref<196x128xf32, #tpu.memory_space<vmem>>, vector<136x128xf32>
    %307 = vector.extract_strided_slice %306 {offsets = [0, 0], sizes = [136, 8], strides = [1, 1]} : vector<136x128xf32> to vector<136x8xf32>
    %c22 = arith.constant 22 : index
    %c0_253 = arith.constant 0 : index
    %c0_254 = arith.constant 0 : index
    %308 = vector.load %arg3[%c22, %c0_253, %c0_254] : memref<25x8x128xf32, #tpu.memory_space<vmem>>, vector<1x8x128xf32>
    %309 = vector.shape_cast %308 : vector<1x8x128xf32> to vector<8x128xf32>
    %cst_255 = arith.constant dense<0.000000e+00> : vector<136x128xf32>
    %310 = tpu.matmul %307, %309, %cst_255 {dimension_numbers = #tpu.dot_dimension_numbers<[1], [0], [0], [1], [0, 0, 1, 1], [], []>} : vector<136x8xf32>, vector<8x128xf32>, vector<136x128xf32> -> vector<136x128xf32>
    %311 = arith.addf %305, %310 : vector<136x128xf32>
    %c59 = arith.constant 59 : index
    %c0_256 = arith.constant 0 : index
    %312 = vector.load %arg10[%c59, %c0_256] : memref<196x128xf32, #tpu.memory_space<vmem>>, vector<136x128xf32>
    %313 = vector.extract_strided_slice %312 {offsets = [0, 0], sizes = [136, 8], strides = [1, 1]} : vector<136x128xf32> to vector<136x8xf32>
    %c23 = arith.constant 23 : index
    %c0_257 = arith.constant 0 : index
    %c0_258 = arith.constant 0 : index
    %314 = vector.load %arg3[%c23, %c0_257, %c0_258] : memref<25x8x128xf32, #tpu.memory_space<vmem>>, vector<1x8x128xf32>
    %315 = vector.shape_cast %314 : vector<1x8x128xf32> to vector<8x128xf32>
    %cst_259 = arith.constant dense<0.000000e+00> : vector<136x128xf32>
    %316 = tpu.matmul %313, %315, %cst_259 {dimension_numbers = #tpu.dot_dimension_numbers<[1], [0], [0], [1], [0, 0, 1, 1], [], []>} : vector<136x8xf32>, vector<8x128xf32>, vector<136x128xf32> -> vector<136x128xf32>
    %317 = arith.addf %311, %316 : vector<136x128xf32>
    %c60 = arith.constant 60 : index
    %c0_260 = arith.constant 0 : index
    %318 = vector.load %arg10[%c60, %c0_260] : memref<196x128xf32, #tpu.memory_space<vmem>>, vector<136x128xf32>
    %319 = vector.extract_strided_slice %318 {offsets = [0, 0], sizes = [136, 8], strides = [1, 1]} : vector<136x128xf32> to vector<136x8xf32>
    %c24 = arith.constant 24 : index
    %c0_261 = arith.constant 0 : index
    %c0_262 = arith.constant 0 : index
    %320 = vector.load %arg3[%c24, %c0_261, %c0_262] : memref<25x8x128xf32, #tpu.memory_space<vmem>>, vector<1x8x128xf32>
    %321 = vector.shape_cast %320 : vector<1x8x128xf32> to vector<8x128xf32>
    %cst_263 = arith.constant dense<0.000000e+00> : vector<136x128xf32>
    %322 = tpu.matmul %319, %321, %cst_263 {dimension_numbers = #tpu.dot_dimension_numbers<[1], [0], [0], [1], [0, 0, 1, 1], [], []>} : vector<136x8xf32>, vector<8x128xf32>, vector<136x128xf32> -> vector<136x128xf32>
    %323 = arith.addf %317, %322 : vector<136x128xf32>
    %c0_264 = arith.constant 0 : index
    %c0_265 = arith.constant 0 : index
    %324 = vector.load %arg7[%c0_264, %c0_265] : memref<4x128xf32, #tpu.memory_space<vmem>>, vector<1x128xf32>
    %325 = vector.broadcast %324 : vector<1x128xf32> to vector<136x128xf32>
    %326 = arith.addf %323, %325 : vector<136x128xf32>
    %c0_266 = arith.constant 0 : index
    %c0_267 = arith.constant 0 : index
    %327 = vector.load %arg11[%c0_266, %c0_267] : memref<136x128xf32, #tpu.memory_space<vmem>>, vector<136x128xf32>
    tpu.vector_store %arg11[%c0_266, %c0_267], %326 {strides = array<i32>} : memref<136x128xf32, #tpu.memory_space<vmem>>, vector<136x128xf32>,
    %c0_268 = arith.constant 0 : index
    %c0_269 = arith.constant 0 : index
    %328 = tpu.strided_load %arg11[%c0_268, %c0_269] {strides = array<i32: 2, 1>} : memref<136x128xf32, #tpu.memory_space<vmem>>, vector<5x128xf32>
    %c1_270 = arith.constant 1 : index
    %c0_271 = arith.constant 0 : index
    %329 = tpu.strided_load %arg11[%c1_270, %c0_271] {strides = array<i32: 2, 1>} : memref<136x128xf32, #tpu.memory_space<vmem>>, vector<5x128xf32>
    %c14_272 = arith.constant 14 : index
    %c0_273 = arith.constant 0 : index
    %330 = tpu.strided_load %arg11[%c14_272, %c0_273] {strides = array<i32: 2, 1>} : memref<136x128xf32, #tpu.memory_space<vmem>>, vector<5x128xf32>
    %c15_274 = arith.constant 15 : index
    %c0_275 = arith.constant 0 : index
    %331 = tpu.strided_load %arg11[%c15_274, %c0_275] {strides = array<i32: 2, 1>} : memref<136x128xf32, #tpu.memory_space<vmem>>, vector<5x128xf32>
    %332 = arith.maximumf %328, %329 : vector<5x128xf32>
    %333 = arith.maximumf %330, %331 : vector<5x128xf32>
    %334 = arith.maximumf %332, %333 : vector<5x128xf32>
    %cst_276 = arith.constant 0.000000e+00 : f32
    %335 = vector.broadcast %cst_276 : f32 to vector<5x128xf32>
    %336 = arith.maximumf %334, %335 : vector<5x128xf32>
    %c0_277 = arith.constant 0 : index
    %c0_278 = arith.constant 0 : index
    %337 = vector.load %arg12[%c0_277, %c0_278] : memref<25x128xf32, #tpu.memory_space<vmem>>, vector<5x128xf32>
    tpu.vector_store %arg12[%c0_277, %c0_278], %336 {strides = array<i32>} : memref<25x128xf32, #tpu.memory_space<vmem>>, vector<5x128xf32>,
    %c28_279 = arith.constant 28 : index
    %c0_280 = arith.constant 0 : index
    %338 = tpu.strided_load %arg11[%c28_279, %c0_280] {strides = array<i32: 2, 1>} : memref<136x128xf32, #tpu.memory_space<vmem>>, vector<5x128xf32>
    %c29_281 = arith.constant 29 : index
    %c0_282 = arith.constant 0 : index
    %339 = tpu.strided_load %arg11[%c29_281, %c0_282] {strides = array<i32: 2, 1>} : memref<136x128xf32, #tpu.memory_space<vmem>>, vector<5x128xf32>
    %c42_283 = arith.constant 42 : index
    %c0_284 = arith.constant 0 : index
    %340 = tpu.strided_load %arg11[%c42_283, %c0_284] {strides = array<i32: 2, 1>} : memref<136x128xf32, #tpu.memory_space<vmem>>, vector<5x128xf32>
    %c43_285 = arith.constant 43 : index
    %c0_286 = arith.constant 0 : index
    %341 = tpu.strided_load %arg11[%c43_285, %c0_286] {strides = array<i32: 2, 1>} : memref<136x128xf32, #tpu.memory_space<vmem>>, vector<5x128xf32>
    %342 = arith.maximumf %338, %339 : vector<5x128xf32>
    %343 = arith.maximumf %340, %341 : vector<5x128xf32>
    %344 = arith.maximumf %342, %343 : vector<5x128xf32>
    %cst_287 = arith.constant 0.000000e+00 : f32
    %345 = vector.broadcast %cst_287 : f32 to vector<5x128xf32>
    %346 = arith.maximumf %344, %345 : vector<5x128xf32>
    %c5_288 = arith.constant 5 : index
    %c0_289 = arith.constant 0 : index
    %347 = vector.load %arg12[%c5_288, %c0_289] : memref<25x128xf32, #tpu.memory_space<vmem>>, vector<5x128xf32>
    tpu.vector_store %arg12[%c5_288, %c0_289], %346 {strides = array<i32>} : memref<25x128xf32, #tpu.memory_space<vmem>>, vector<5x128xf32>,
    %c56_290 = arith.constant 56 : index
    %c0_291 = arith.constant 0 : index
    %348 = tpu.strided_load %arg11[%c56_290, %c0_291] {strides = array<i32: 2, 1>} : memref<136x128xf32, #tpu.memory_space<vmem>>, vector<5x128xf32>
    %c57_292 = arith.constant 57 : index
    %c0_293 = arith.constant 0 : index
    %349 = tpu.strided_load %arg11[%c57_292, %c0_293] {strides = array<i32: 2, 1>} : memref<136x128xf32, #tpu.memory_space<vmem>>, vector<5x128xf32>
    %c70_294 = arith.constant 70 : index
    %c0_295 = arith.constant 0 : index
    %350 = tpu.strided_load %arg11[%c70_294, %c0_295] {strides = array<i32: 2, 1>} : memref<136x128xf32, #tpu.memory_space<vmem>>, vector<5x128xf32>
    %c71 = arith.constant 71 : index
    %c0_296 = arith.constant 0 : index
    %351 = tpu.strided_load %arg11[%c71, %c0_296] {strides = array<i32: 2, 1>} : memref<136x128xf32, #tpu.memory_space<vmem>>, vector<5x128xf32>
    %352 = arith.maximumf %348, %349 : vector<5x128xf32>
    %353 = arith.maximumf %350, %351 : vector<5x128xf32>
    %354 = arith.maximumf %352, %353 : vector<5x128xf32>
    %cst_297 = arith.constant 0.000000e+00 : f32
    %355 = vector.broadcast %cst_297 : f32 to vector<5x128xf32>
    %356 = arith.maximumf %354, %355 : vector<5x128xf32>
    %c10_298 = arith.constant 10 : index
    %c0_299 = arith.constant 0 : index
    %357 = vector.load %arg12[%c10_298, %c0_299] : memref<25x128xf32, #tpu.memory_space<vmem>>, vector<5x128xf32>
    tpu.vector_store %arg12[%c10_298, %c0_299], %356 {strides = array<i32>} : memref<25x128xf32, #tpu.memory_space<vmem>>, vector<5x128xf32>,
    %c84_300 = arith.constant 84 : index
    %c0_301 = arith.constant 0 : index
    %358 = tpu.strided_load %arg11[%c84_300, %c0_301] {strides = array<i32: 2, 1>} : memref<136x128xf32, #tpu.memory_space<vmem>>, vector<5x128xf32>
    %c85_302 = arith.constant 85 : index
    %c0_303 = arith.constant 0 : index
    %359 = tpu.strided_load %arg11[%c85_302, %c0_303] {strides = array<i32: 2, 1>} : memref<136x128xf32, #tpu.memory_space<vmem>>, vector<5x128xf32>
    %c98_304 = arith.constant 98 : index
    %c0_305 = arith.constant 0 : index
    %360 = tpu.strided_load %arg11[%c98_304, %c0_305] {strides = array<i32: 2, 1>} : memref<136x128xf32, #tpu.memory_space<vmem>>, vector<5x128xf32>
    %c99 = arith.constant 99 : index
    %c0_306 = arith.constant 0 : index
    %361 = tpu.strided_load %arg11[%c99, %c0_306] {strides = array<i32: 2, 1>} : memref<136x128xf32, #tpu.memory_space<vmem>>, vector<5x128xf32>
    %362 = arith.maximumf %358, %359 : vector<5x128xf32>
    %363 = arith.maximumf %360, %361 : vector<5x128xf32>
    %364 = arith.maximumf %362, %363 : vector<5x128xf32>
    %cst_307 = arith.constant 0.000000e+00 : f32
    %365 = vector.broadcast %cst_307 : f32 to vector<5x128xf32>
    %366 = arith.maximumf %364, %365 : vector<5x128xf32>
    %c15_308 = arith.constant 15 : index
    %c0_309 = arith.constant 0 : index
    %367 = vector.load %arg12[%c15_308, %c0_309] : memref<25x128xf32, #tpu.memory_space<vmem>>, vector<5x128xf32>
    tpu.vector_store %arg12[%c15_308, %c0_309], %366 {strides = array<i32>} : memref<25x128xf32, #tpu.memory_space<vmem>>, vector<5x128xf32>,
    %c112_310 = arith.constant 112 : index
    %c0_311 = arith.constant 0 : index
    %368 = tpu.strided_load %arg11[%c112_310, %c0_311] {strides = array<i32: 2, 1>} : memref<136x128xf32, #tpu.memory_space<vmem>>, vector<5x128xf32>
    %c113_312 = arith.constant 113 : index
    %c0_313 = arith.constant 0 : index
    %369 = tpu.strided_load %arg11[%c113_312, %c0_313] {strides = array<i32: 2, 1>} : memref<136x128xf32, #tpu.memory_space<vmem>>, vector<5x128xf32>
    %c126_314 = arith.constant 126 : index
    %c0_315 = arith.constant 0 : index
    %370 = tpu.strided_load %arg11[%c126_314, %c0_315] {strides = array<i32: 2, 1>} : memref<136x128xf32, #tpu.memory_space<vmem>>, vector<5x128xf32>
    %c127 = arith.constant 127 : index
    %c0_316 = arith.constant 0 : index
    %371 = tpu.strided_load %arg11[%c127, %c0_316] {strides = array<i32: 2, 1>} : memref<136x128xf32, #tpu.memory_space<vmem>>, vector<5x128xf32>
    %372 = arith.maximumf %368, %369 : vector<5x128xf32>
    %373 = arith.maximumf %370, %371 : vector<5x128xf32>
    %374 = arith.maximumf %372, %373 : vector<5x128xf32>
    %cst_317 = arith.constant 0.000000e+00 : f32
    %375 = vector.broadcast %cst_317 : f32 to vector<5x128xf32>
    %376 = arith.maximumf %374, %375 : vector<5x128xf32>
    %c20_318 = arith.constant 20 : index
    %c0_319 = arith.constant 0 : index
    %377 = vector.load %arg12[%c20_318, %c0_319] : memref<25x128xf32, #tpu.memory_space<vmem>>, vector<5x128xf32>
    tpu.vector_store %arg12[%c20_318, %c0_319], %376 {strides = array<i32>} : memref<25x128xf32, #tpu.memory_space<vmem>>, vector<5x128xf32>,
    %c0_320 = arith.constant 0 : index
    %c0_321 = arith.constant 0 : index
    %378 = vector.load %arg12[%c0_320, %c0_321] : memref<25x128xf32, #tpu.memory_space<vmem>>, vector<25x128xf32>
    %c1_322 = arith.constant 1 : index
    %c0_323 = arith.constant 0 : index
    %379 = vector.load %arg7[%c1_322, %c0_323] : memref<4x128xf32, #tpu.memory_space<vmem>>, vector<1x128xf32>
    %380 = vector.extract_strided_slice %378 {offsets = [0, 0], sizes = [1, 16], strides = [1, 1]} : vector<25x128xf32> to vector<1x16xf32>
    %c0_324 = arith.constant 0 : index
    %c0_325 = arith.constant 0 : index
    %c0_326 = arith.constant 0 : index
    %381 = vector.load %arg4[%c0_324, %c0_325, %c0_326] : memref<25x16x128xf32, #tpu.memory_space<vmem>>, vector<1x16x128xf32>
    %382 = vector.shape_cast %381 : vector<1x16x128xf32> to vector<16x128xf32>
    %cst_327 = arith.constant dense<0.000000e+00> : vector<1x128xf32>
    %383 = tpu.matmul %380, %382, %cst_327 {dimension_numbers = #tpu.dot_dimension_numbers<[1], [0], [0], [1], [0, 0, 1, 1], [], []>} : vector<1x16xf32>, vector<16x128xf32>, vector<1x128xf32> -> vector<1x128xf32>
    %384 = arith.addf %379, %383 : vector<1x128xf32>
    %385 = vector.extract_strided_slice %378 {offsets = [1, 0], sizes = [1, 16], strides = [1, 1]} : vector<25x128xf32> to vector<1x16xf32>
    %c1_328 = arith.constant 1 : index
    %c0_329 = arith.constant 0 : index
    %c0_330 = arith.constant 0 : index
    %386 = vector.load %arg4[%c1_328, %c0_329, %c0_330] : memref<25x16x128xf32, #tpu.memory_space<vmem>>, vector<1x16x128xf32>
    %387 = vector.shape_cast %386 : vector<1x16x128xf32> to vector<16x128xf32>
    %cst_331 = arith.constant dense<0.000000e+00> : vector<1x128xf32>
    %388 = tpu.matmul %385, %387, %cst_331 {dimension_numbers = #tpu.dot_dimension_numbers<[1], [0], [0], [1], [0, 0, 1, 1], [], []>} : vector<1x16xf32>, vector<16x128xf32>, vector<1x128xf32> -> vector<1x128xf32>
    %389 = arith.addf %384, %388 : vector<1x128xf32>
    %390 = vector.extract_strided_slice %378 {offsets = [2, 0], sizes = [1, 16], strides = [1, 1]} : vector<25x128xf32> to vector<1x16xf32>
    %c2_332 = arith.constant 2 : index
    %c0_333 = arith.constant 0 : index
    %c0_334 = arith.constant 0 : index
    %391 = vector.load %arg4[%c2_332, %c0_333, %c0_334] : memref<25x16x128xf32, #tpu.memory_space<vmem>>, vector<1x16x128xf32>
    %392 = vector.shape_cast %391 : vector<1x16x128xf32> to vector<16x128xf32>
    %cst_335 = arith.constant dense<0.000000e+00> : vector<1x128xf32>
    %393 = tpu.matmul %390, %392, %cst_335 {dimension_numbers = #tpu.dot_dimension_numbers<[1], [0], [0], [1], [0, 0, 1, 1], [], []>} : vector<1x16xf32>, vector<16x128xf32>, vector<1x128xf32> -> vector<1x128xf32>
    %394 = arith.addf %389, %393 : vector<1x128xf32>
    %395 = vector.extract_strided_slice %378 {offsets = [3, 0], sizes = [1, 16], strides = [1, 1]} : vector<25x128xf32> to vector<1x16xf32>
    %c3_336 = arith.constant 3 : index
    %c0_337 = arith.constant 0 : index
    %c0_338 = arith.constant 0 : index
    %396 = vector.load %arg4[%c3_336, %c0_337, %c0_338] : memref<25x16x128xf32, #tpu.memory_space<vmem>>, vector<1x16x128xf32>
    %397 = vector.shape_cast %396 : vector<1x16x128xf32> to vector<16x128xf32>
    %cst_339 = arith.constant dense<0.000000e+00> : vector<1x128xf32>
    %398 = tpu.matmul %395, %397, %cst_339 {dimension_numbers = #tpu.dot_dimension_numbers<[1], [0], [0], [1], [0, 0, 1, 1], [], []>} : vector<1x16xf32>, vector<16x128xf32>, vector<1x128xf32> -> vector<1x128xf32>
    %399 = arith.addf %394, %398 : vector<1x128xf32>
    %400 = vector.extract_strided_slice %378 {offsets = [4, 0], sizes = [1, 16], strides = [1, 1]} : vector<25x128xf32> to vector<1x16xf32>
    %c4_340 = arith.constant 4 : index
    %c0_341 = arith.constant 0 : index
    %c0_342 = arith.constant 0 : index
    %401 = vector.load %arg4[%c4_340, %c0_341, %c0_342] : memref<25x16x128xf32, #tpu.memory_space<vmem>>, vector<1x16x128xf32>
    %402 = vector.shape_cast %401 : vector<1x16x128xf32> to vector<16x128xf32>
    %cst_343 = arith.constant dense<0.000000e+00> : vector<1x128xf32>
    %403 = tpu.matmul %400, %402, %cst_343 {dimension_numbers = #tpu.dot_dimension_numbers<[1], [0], [0], [1], [0, 0, 1, 1], [], []>} : vector<1x16xf32>, vector<16x128xf32>, vector<1x128xf32> -> vector<1x128xf32>
    %404 = arith.addf %399, %403 : vector<1x128xf32>
    %405 = vector.extract_strided_slice %378 {offsets = [5, 0], sizes = [1, 16], strides = [1, 1]} : vector<25x128xf32> to vector<1x16xf32>
    %c5_344 = arith.constant 5 : index
    %c0_345 = arith.constant 0 : index
    %c0_346 = arith.constant 0 : index
    %406 = vector.load %arg4[%c5_344, %c0_345, %c0_346] : memref<25x16x128xf32, #tpu.memory_space<vmem>>, vector<1x16x128xf32>
    %407 = vector.shape_cast %406 : vector<1x16x128xf32> to vector<16x128xf32>
    %cst_347 = arith.constant dense<0.000000e+00> : vector<1x128xf32>
    %408 = tpu.matmul %405, %407, %cst_347 {dimension_numbers = #tpu.dot_dimension_numbers<[1], [0], [0], [1], [0, 0, 1, 1], [], []>} : vector<1x16xf32>, vector<16x128xf32>, vector<1x128xf32> -> vector<1x128xf32>
    %409 = arith.addf %404, %408 : vector<1x128xf32>
    %410 = vector.extract_strided_slice %378 {offsets = [6, 0], sizes = [1, 16], strides = [1, 1]} : vector<25x128xf32> to vector<1x16xf32>
    %c6_348 = arith.constant 6 : index
    %c0_349 = arith.constant 0 : index
    %c0_350 = arith.constant 0 : index
    %411 = vector.load %arg4[%c6_348, %c0_349, %c0_350] : memref<25x16x128xf32, #tpu.memory_space<vmem>>, vector<1x16x128xf32>
    %412 = vector.shape_cast %411 : vector<1x16x128xf32> to vector<16x128xf32>
    %cst_351 = arith.constant dense<0.000000e+00> : vector<1x128xf32>
    %413 = tpu.matmul %410, %412, %cst_351 {dimension_numbers = #tpu.dot_dimension_numbers<[1], [0], [0], [1], [0, 0, 1, 1], [], []>} : vector<1x16xf32>, vector<16x128xf32>, vector<1x128xf32> -> vector<1x128xf32>
    %414 = arith.addf %409, %413 : vector<1x128xf32>
    %415 = vector.extract_strided_slice %378 {offsets = [7, 0], sizes = [1, 16], strides = [1, 1]} : vector<25x128xf32> to vector<1x16xf32>
    %c7_352 = arith.constant 7 : index
    %c0_353 = arith.constant 0 : index
    %c0_354 = arith.constant 0 : index
    %416 = vector.load %arg4[%c7_352, %c0_353, %c0_354] : memref<25x16x128xf32, #tpu.memory_space<vmem>>, vector<1x16x128xf32>
    %417 = vector.shape_cast %416 : vector<1x16x128xf32> to vector<16x128xf32>
    %cst_355 = arith.constant dense<0.000000e+00> : vector<1x128xf32>
    %418 = tpu.matmul %415, %417, %cst_355 {dimension_numbers = #tpu.dot_dimension_numbers<[1], [0], [0], [1], [0, 0, 1, 1], [], []>} : vector<1x16xf32>, vector<16x128xf32>, vector<1x128xf32> -> vector<1x128xf32>
    %419 = arith.addf %414, %418 : vector<1x128xf32>
    %420 = vector.extract_strided_slice %378 {offsets = [8, 0], sizes = [1, 16], strides = [1, 1]} : vector<25x128xf32> to vector<1x16xf32>
    %c8_356 = arith.constant 8 : index
    %c0_357 = arith.constant 0 : index
    %c0_358 = arith.constant 0 : index
    %421 = vector.load %arg4[%c8_356, %c0_357, %c0_358] : memref<25x16x128xf32, #tpu.memory_space<vmem>>, vector<1x16x128xf32>
    %422 = vector.shape_cast %421 : vector<1x16x128xf32> to vector<16x128xf32>
    %cst_359 = arith.constant dense<0.000000e+00> : vector<1x128xf32>
    %423 = tpu.matmul %420, %422, %cst_359 {dimension_numbers = #tpu.dot_dimension_numbers<[1], [0], [0], [1], [0, 0, 1, 1], [], []>} : vector<1x16xf32>, vector<16x128xf32>, vector<1x128xf32> -> vector<1x128xf32>
    %424 = arith.addf %419, %423 : vector<1x128xf32>
    %425 = vector.extract_strided_slice %378 {offsets = [9, 0], sizes = [1, 16], strides = [1, 1]} : vector<25x128xf32> to vector<1x16xf32>
    %c9_360 = arith.constant 9 : index
    %c0_361 = arith.constant 0 : index
    %c0_362 = arith.constant 0 : index
    %426 = vector.load %arg4[%c9_360, %c0_361, %c0_362] : memref<25x16x128xf32, #tpu.memory_space<vmem>>, vector<1x16x128xf32>
    %427 = vector.shape_cast %426 : vector<1x16x128xf32> to vector<16x128xf32>
    %cst_363 = arith.constant dense<0.000000e+00> : vector<1x128xf32>
    %428 = tpu.matmul %425, %427, %cst_363 {dimension_numbers = #tpu.dot_dimension_numbers<[1], [0], [0], [1], [0, 0, 1, 1], [], []>} : vector<1x16xf32>, vector<16x128xf32>, vector<1x128xf32> -> vector<1x128xf32>
    %429 = arith.addf %424, %428 : vector<1x128xf32>
    %430 = vector.extract_strided_slice %378 {offsets = [10, 0], sizes = [1, 16], strides = [1, 1]} : vector<25x128xf32> to vector<1x16xf32>
    %c10_364 = arith.constant 10 : index
    %c0_365 = arith.constant 0 : index
    %c0_366 = arith.constant 0 : index
    %431 = vector.load %arg4[%c10_364, %c0_365, %c0_366] : memref<25x16x128xf32, #tpu.memory_space<vmem>>, vector<1x16x128xf32>
    %432 = vector.shape_cast %431 : vector<1x16x128xf32> to vector<16x128xf32>
    %cst_367 = arith.constant dense<0.000000e+00> : vector<1x128xf32>
    %433 = tpu.matmul %430, %432, %cst_367 {dimension_numbers = #tpu.dot_dimension_numbers<[1], [0], [0], [1], [0, 0, 1, 1], [], []>} : vector<1x16xf32>, vector<16x128xf32>, vector<1x128xf32> -> vector<1x128xf32>
    %434 = arith.addf %429, %433 : vector<1x128xf32>
    %435 = vector.extract_strided_slice %378 {offsets = [11, 0], sizes = [1, 16], strides = [1, 1]} : vector<25x128xf32> to vector<1x16xf32>
    %c11_368 = arith.constant 11 : index
    %c0_369 = arith.constant 0 : index
    %c0_370 = arith.constant 0 : index
    %436 = vector.load %arg4[%c11_368, %c0_369, %c0_370] : memref<25x16x128xf32, #tpu.memory_space<vmem>>, vector<1x16x128xf32>
    %437 = vector.shape_cast %436 : vector<1x16x128xf32> to vector<16x128xf32>
    %cst_371 = arith.constant dense<0.000000e+00> : vector<1x128xf32>
    %438 = tpu.matmul %435, %437, %cst_371 {dimension_numbers = #tpu.dot_dimension_numbers<[1], [0], [0], [1], [0, 0, 1, 1], [], []>} : vector<1x16xf32>, vector<16x128xf32>, vector<1x128xf32> -> vector<1x128xf32>
    %439 = arith.addf %434, %438 : vector<1x128xf32>
    %440 = vector.extract_strided_slice %378 {offsets = [12, 0], sizes = [1, 16], strides = [1, 1]} : vector<25x128xf32> to vector<1x16xf32>
    %c12_372 = arith.constant 12 : index
    %c0_373 = arith.constant 0 : index
    %c0_374 = arith.constant 0 : index
    %441 = vector.load %arg4[%c12_372, %c0_373, %c0_374] : memref<25x16x128xf32, #tpu.memory_space<vmem>>, vector<1x16x128xf32>
    %442 = vector.shape_cast %441 : vector<1x16x128xf32> to vector<16x128xf32>
    %cst_375 = arith.constant dense<0.000000e+00> : vector<1x128xf32>
    %443 = tpu.matmul %440, %442, %cst_375 {dimension_numbers = #tpu.dot_dimension_numbers<[1], [0], [0], [1], [0, 0, 1, 1], [], []>} : vector<1x16xf32>, vector<16x128xf32>, vector<1x128xf32> -> vector<1x128xf32>
    %444 = arith.addf %439, %443 : vector<1x128xf32>
    %445 = vector.extract_strided_slice %378 {offsets = [13, 0], sizes = [1, 16], strides = [1, 1]} : vector<25x128xf32> to vector<1x16xf32>
    %c13_376 = arith.constant 13 : index
    %c0_377 = arith.constant 0 : index
    %c0_378 = arith.constant 0 : index
    %446 = vector.load %arg4[%c13_376, %c0_377, %c0_378] : memref<25x16x128xf32, #tpu.memory_space<vmem>>, vector<1x16x128xf32>
    %447 = vector.shape_cast %446 : vector<1x16x128xf32> to vector<16x128xf32>
    %cst_379 = arith.constant dense<0.000000e+00> : vector<1x128xf32>
    %448 = tpu.matmul %445, %447, %cst_379 {dimension_numbers = #tpu.dot_dimension_numbers<[1], [0], [0], [1], [0, 0, 1, 1], [], []>} : vector<1x16xf32>, vector<16x128xf32>, vector<1x128xf32> -> vector<1x128xf32>
    %449 = arith.addf %444, %448 : vector<1x128xf32>
    %450 = vector.extract_strided_slice %378 {offsets = [14, 0], sizes = [1, 16], strides = [1, 1]} : vector<25x128xf32> to vector<1x16xf32>
    %c14_380 = arith.constant 14 : index
    %c0_381 = arith.constant 0 : index
    %c0_382 = arith.constant 0 : index
    %451 = vector.load %arg4[%c14_380, %c0_381, %c0_382] : memref<25x16x128xf32, #tpu.memory_space<vmem>>, vector<1x16x128xf32>
    %452 = vector.shape_cast %451 : vector<1x16x128xf32> to vector<16x128xf32>
    %cst_383 = arith.constant dense<0.000000e+00> : vector<1x128xf32>
    %453 = tpu.matmul %450, %452, %cst_383 {dimension_numbers = #tpu.dot_dimension_numbers<[1], [0], [0], [1], [0, 0, 1, 1], [], []>} : vector<1x16xf32>, vector<16x128xf32>, vector<1x128xf32> -> vector<1x128xf32>
    %454 = arith.addf %449, %453 : vector<1x128xf32>
    %455 = vector.extract_strided_slice %378 {offsets = [15, 0], sizes = [1, 16], strides = [1, 1]} : vector<25x128xf32> to vector<1x16xf32>
    %c15_384 = arith.constant 15 : index
    %c0_385 = arith.constant 0 : index
    %c0_386 = arith.constant 0 : index
    %456 = vector.load %arg4[%c15_384, %c0_385, %c0_386] : memref<25x16x128xf32, #tpu.memory_space<vmem>>, vector<1x16x128xf32>
    %457 = vector.shape_cast %456 : vector<1x16x128xf32> to vector<16x128xf32>
    %cst_387 = arith.constant dense<0.000000e+00> : vector<1x128xf32>
    %458 = tpu.matmul %455, %457, %cst_387 {dimension_numbers = #tpu.dot_dimension_numbers<[1], [0], [0], [1], [0, 0, 1, 1], [], []>} : vector<1x16xf32>, vector<16x128xf32>, vector<1x128xf32> -> vector<1x128xf32>
    %459 = arith.addf %454, %458 : vector<1x128xf32>
    %460 = vector.extract_strided_slice %378 {offsets = [16, 0], sizes = [1, 16], strides = [1, 1]} : vector<25x128xf32> to vector<1x16xf32>
    %c16_388 = arith.constant 16 : index
    %c0_389 = arith.constant 0 : index
    %c0_390 = arith.constant 0 : index
    %461 = vector.load %arg4[%c16_388, %c0_389, %c0_390] : memref<25x16x128xf32, #tpu.memory_space<vmem>>, vector<1x16x128xf32>
    %462 = vector.shape_cast %461 : vector<1x16x128xf32> to vector<16x128xf32>
    %cst_391 = arith.constant dense<0.000000e+00> : vector<1x128xf32>
    %463 = tpu.matmul %460, %462, %cst_391 {dimension_numbers = #tpu.dot_dimension_numbers<[1], [0], [0], [1], [0, 0, 1, 1], [], []>} : vector<1x16xf32>, vector<16x128xf32>, vector<1x128xf32> -> vector<1x128xf32>
    %464 = arith.addf %459, %463 : vector<1x128xf32>
    %465 = vector.extract_strided_slice %378 {offsets = [17, 0], sizes = [1, 16], strides = [1, 1]} : vector<25x128xf32> to vector<1x16xf32>
    %c17_392 = arith.constant 17 : index
    %c0_393 = arith.constant 0 : index
    %c0_394 = arith.constant 0 : index
    %466 = vector.load %arg4[%c17_392, %c0_393, %c0_394] : memref<25x16x128xf32, #tpu.memory_space<vmem>>, vector<1x16x128xf32>
    %467 = vector.shape_cast %466 : vector<1x16x128xf32> to vector<16x128xf32>
    %cst_395 = arith.constant dense<0.000000e+00> : vector<1x128xf32>
    %468 = tpu.matmul %465, %467, %cst_395 {dimension_numbers = #tpu.dot_dimension_numbers<[1], [0], [0], [1], [0, 0, 1, 1], [], []>} : vector<1x16xf32>, vector<16x128xf32>, vector<1x128xf32> -> vector<1x128xf32>
    %469 = arith.addf %464, %468 : vector<1x128xf32>
    %470 = vector.extract_strided_slice %378 {offsets = [18, 0], sizes = [1, 16], strides = [1, 1]} : vector<25x128xf32> to vector<1x16xf32>
    %c18_396 = arith.constant 18 : index
    %c0_397 = arith.constant 0 : index
    %c0_398 = arith.constant 0 : index
    %471 = vector.load %arg4[%c18_396, %c0_397, %c0_398] : memref<25x16x128xf32, #tpu.memory_space<vmem>>, vector<1x16x128xf32>
    %472 = vector.shape_cast %471 : vector<1x16x128xf32> to vector<16x128xf32>
    %cst_399 = arith.constant dense<0.000000e+00> : vector<1x128xf32>
    %473 = tpu.matmul %470, %472, %cst_399 {dimension_numbers = #tpu.dot_dimension_numbers<[1], [0], [0], [1], [0, 0, 1, 1], [], []>} : vector<1x16xf32>, vector<16x128xf32>, vector<1x128xf32> -> vector<1x128xf32>
    %474 = arith.addf %469, %473 : vector<1x128xf32>
    %475 = vector.extract_strided_slice %378 {offsets = [19, 0], sizes = [1, 16], strides = [1, 1]} : vector<25x128xf32> to vector<1x16xf32>
    %c19_400 = arith.constant 19 : index
    %c0_401 = arith.constant 0 : index
    %c0_402 = arith.constant 0 : index
    %476 = vector.load %arg4[%c19_400, %c0_401, %c0_402] : memref<25x16x128xf32, #tpu.memory_space<vmem>>, vector<1x16x128xf32>
    %477 = vector.shape_cast %476 : vector<1x16x128xf32> to vector<16x128xf32>
    %cst_403 = arith.constant dense<0.000000e+00> : vector<1x128xf32>
    %478 = tpu.matmul %475, %477, %cst_403 {dimension_numbers = #tpu.dot_dimension_numbers<[1], [0], [0], [1], [0, 0, 1, 1], [], []>} : vector<1x16xf32>, vector<16x128xf32>, vector<1x128xf32> -> vector<1x128xf32>
    %479 = arith.addf %474, %478 : vector<1x128xf32>
    %480 = vector.extract_strided_slice %378 {offsets = [20, 0], sizes = [1, 16], strides = [1, 1]} : vector<25x128xf32> to vector<1x16xf32>
    %c20_404 = arith.constant 20 : index
    %c0_405 = arith.constant 0 : index
    %c0_406 = arith.constant 0 : index
    %481 = vector.load %arg4[%c20_404, %c0_405, %c0_406] : memref<25x16x128xf32, #tpu.memory_space<vmem>>, vector<1x16x128xf32>
    %482 = vector.shape_cast %481 : vector<1x16x128xf32> to vector<16x128xf32>
    %cst_407 = arith.constant dense<0.000000e+00> : vector<1x128xf32>
    %483 = tpu.matmul %480, %482, %cst_407 {dimension_numbers = #tpu.dot_dimension_numbers<[1], [0], [0], [1], [0, 0, 1, 1], [], []>} : vector<1x16xf32>, vector<16x128xf32>, vector<1x128xf32> -> vector<1x128xf32>
    %484 = arith.addf %479, %483 : vector<1x128xf32>
    %485 = vector.extract_strided_slice %378 {offsets = [21, 0], sizes = [1, 16], strides = [1, 1]} : vector<25x128xf32> to vector<1x16xf32>
    %c21_408 = arith.constant 21 : index
    %c0_409 = arith.constant 0 : index
    %c0_410 = arith.constant 0 : index
    %486 = vector.load %arg4[%c21_408, %c0_409, %c0_410] : memref<25x16x128xf32, #tpu.memory_space<vmem>>, vector<1x16x128xf32>
    %487 = vector.shape_cast %486 : vector<1x16x128xf32> to vector<16x128xf32>
    %cst_411 = arith.constant dense<0.000000e+00> : vector<1x128xf32>
    %488 = tpu.matmul %485, %487, %cst_411 {dimension_numbers = #tpu.dot_dimension_numbers<[1], [0], [0], [1], [0, 0, 1, 1], [], []>} : vector<1x16xf32>, vector<16x128xf32>, vector<1x128xf32> -> vector<1x128xf32>
    %489 = arith.addf %484, %488 : vector<1x128xf32>
    %490 = vector.extract_strided_slice %378 {offsets = [22, 0], sizes = [1, 16], strides = [1, 1]} : vector<25x128xf32> to vector<1x16xf32>
    %c22_412 = arith.constant 22 : index
    %c0_413 = arith.constant 0 : index
    %c0_414 = arith.constant 0 : index
    %491 = vector.load %arg4[%c22_412, %c0_413, %c0_414] : memref<25x16x128xf32, #tpu.memory_space<vmem>>, vector<1x16x128xf32>
    %492 = vector.shape_cast %491 : vector<1x16x128xf32> to vector<16x128xf32>
    %cst_415 = arith.constant dense<0.000000e+00> : vector<1x128xf32>
    %493 = tpu.matmul %490, %492, %cst_415 {dimension_numbers = #tpu.dot_dimension_numbers<[1], [0], [0], [1], [0, 0, 1, 1], [], []>} : vector<1x16xf32>, vector<16x128xf32>, vector<1x128xf32> -> vector<1x128xf32>
    %494 = arith.addf %489, %493 : vector<1x128xf32>
    %495 = vector.extract_strided_slice %378 {offsets = [23, 0], sizes = [1, 16], strides = [1, 1]} : vector<25x128xf32> to vector<1x16xf32>
    %c23_416 = arith.constant 23 : index
    %c0_417 = arith.constant 0 : index
    %c0_418 = arith.constant 0 : index
    %496 = vector.load %arg4[%c23_416, %c0_417, %c0_418] : memref<25x16x128xf32, #tpu.memory_space<vmem>>, vector<1x16x128xf32>
    %497 = vector.shape_cast %496 : vector<1x16x128xf32> to vector<16x128xf32>
    %cst_419 = arith.constant dense<0.000000e+00> : vector<1x128xf32>
    %498 = tpu.matmul %495, %497, %cst_419 {dimension_numbers = #tpu.dot_dimension_numbers<[1], [0], [0], [1], [0, 0, 1, 1], [], []>} : vector<1x16xf32>, vector<16x128xf32>, vector<1x128xf32> -> vector<1x128xf32>
    %499 = arith.addf %494, %498 : vector<1x128xf32>
    %500 = vector.extract_strided_slice %378 {offsets = [24, 0], sizes = [1, 16], strides = [1, 1]} : vector<25x128xf32> to vector<1x16xf32>
    %c24_420 = arith.constant 24 : index
    %c0_421 = arith.constant 0 : index
    %c0_422 = arith.constant 0 : index
    %501 = vector.load %arg4[%c24_420, %c0_421, %c0_422] : memref<25x16x128xf32, #tpu.memory_space<vmem>>, vector<1x16x128xf32>
    %502 = vector.shape_cast %501 : vector<1x16x128xf32> to vector<16x128xf32>
    %cst_423 = arith.constant dense<0.000000e+00> : vector<1x128xf32>
    %503 = tpu.matmul %500, %502, %cst_423 {dimension_numbers = #tpu.dot_dimension_numbers<[1], [0], [0], [1], [0, 0, 1, 1], [], []>} : vector<1x16xf32>, vector<16x128xf32>, vector<1x128xf32> -> vector<1x128xf32>
    %504 = arith.addf %499, %503 : vector<1x128xf32>
    %cst_424 = arith.constant 0.000000e+00 : f32
    %505 = vector.broadcast %cst_424 : f32 to vector<1x128xf32>
    %506 = arith.maximumf %504, %505 : vector<1x128xf32>
    %c0_425 = arith.constant 0 : index
    %c0_426 = arith.constant 0 : index
    %507 = vector.load %arg5[%c0_425, %c0_426] : memref<128x128xf32, #tpu.memory_space<vmem>>, vector<128x128xf32>
    %cst_427 = arith.constant dense<0.000000e+00> : vector<1x128xf32>
    %508 = tpu.matmul %506, %507, %cst_427 {dimension_numbers = #tpu.dot_dimension_numbers<[1], [0], [0], [1], [0, 0, 1, 1], [], []>} : vector<1x128xf32>, vector<128x128xf32>, vector<1x128xf32> -> vector<1x128xf32>
    %c2_428 = arith.constant 2 : index
    %c0_429 = arith.constant 0 : index
    %509 = vector.load %arg7[%c2_428, %c0_429] : memref<4x128xf32, #tpu.memory_space<vmem>>, vector<1x128xf32>
    %510 = arith.addf %508, %509 : vector<1x128xf32>
    %cst_430 = arith.constant 0.000000e+00 : f32
    %511 = vector.broadcast %cst_430 : f32 to vector<1x128xf32>
    %512 = arith.maximumf %510, %511 : vector<1x128xf32>
    %c0_431 = arith.constant 0 : index
    %c0_432 = arith.constant 0 : index
    %513 = vector.load %arg6[%c0_431, %c0_432] : memref<128x128xf32, #tpu.memory_space<vmem>>, vector<128x128xf32>
    %cst_433 = arith.constant dense<0.000000e+00> : vector<1x128xf32>
    %514 = tpu.matmul %512, %513, %cst_433 {dimension_numbers = #tpu.dot_dimension_numbers<[1], [0], [0], [1], [0, 0, 1, 1], [], []>} : vector<1x128xf32>, vector<128x128xf32>, vector<1x128xf32> -> vector<1x128xf32>
    %c3_434 = arith.constant 3 : index
    %c0_435 = arith.constant 0 : index
    %515 = vector.load %arg7[%c3_434, %c0_435] : memref<4x128xf32, #tpu.memory_space<vmem>>, vector<1x128xf32>
    %516 = arith.addf %514, %515 : vector<1x128xf32>
    %c0_436 = arith.constant 0 : index
    %c0_437 = arith.constant 0 : index
    %c0_438 = arith.constant 0 : index
    %517 = vector.load %arg8[%c0_436, %c0_437, %c0_438] : memref<1x1x128xf32, #tpu.memory_space<vmem>>, vector<1x1x128xf32>
    %518 = vector.shape_cast %517 : vector<1x1x128xf32> to vector<1x128xf32>
    %519 = vector.shape_cast %516 : vector<1x128xf32> to vector<1x1x128xf32>
    tpu.vector_store %arg8[%c0_436, %c0_437, %c0_438], %519 {strides = array<i32>} : memref<1x1x128xf32, #tpu.memory_space<vmem>>, vector<1x1x128xf32>,
    return
  }
  func.func @transform_0(%arg0: i32) -> (i32, i32, i32) {
    %c0_i32 = arith.constant 0 : i32
    %c0_i32_0 = arith.constant 0 : i32
    %c0_i32_1 = arith.constant 0 : i32
    return %arg0, %c0_i32, %c0_i32_0 : i32, i32, i32
  }
  func.func @transform_1(%arg0: i32) -> (i32, i32) {
    %c0_i32 = arith.constant 0 : i32
    %c0_i32_0 = arith.constant 0 : i32
    %c0_i32_1 = arith.constant 0 : i32
    return %c0_i32, %c0_i32_0 : i32, i32
  }
  func.func @transform_2(%arg0: i32) -> (i32, i32, i32) {
    %c0_i32 = arith.constant 0 : i32
    %c0_i32_0 = arith.constant 0 : i32
    %c0_i32_1 = arith.constant 0 : i32
    %c0_i32_2 = arith.constant 0 : i32
    return %c0_i32, %c0_i32_0, %c0_i32_1 : i32, i32, i32
  }
  func.func @transform_3(%arg0: i32) -> (i32, i32, i32) {
    %c0_i32 = arith.constant 0 : i32
    %c0_i32_0 = arith.constant 0 : i32
    %c0_i32_1 = arith.constant 0 : i32
    %c0_i32_2 = arith.constant 0 : i32
    return %c0_i32, %c0_i32_0, %c0_i32_1 : i32, i32, i32
  }
  func.func @transform_4(%arg0: i32) -> (i32, i32) {
    %c0_i32 = arith.constant 0 : i32
    %c0_i32_0 = arith.constant 0 : i32
    %c0_i32_1 = arith.constant 0 : i32
    return %c0_i32, %c0_i32_0 : i32, i32
  }
  func.func @transform_5(%arg0: i32) -> (i32, i32) {
    %c0_i32 = arith.constant 0 : i32
    %c0_i32_0 = arith.constant 0 : i32
    %c0_i32_1 = arith.constant 0 : i32
    return %c0_i32, %c0_i32_0 : i32, i32
  }
  func.func @transform_6(%arg0: i32) -> (i32, i32) {
    %c0_i32 = arith.constant 0 : i32
    %c0_i32_0 = arith.constant 0 : i32
    %c0_i32_1 = arith.constant 0 : i32
    return %c0_i32, %c0_i32_0 : i32, i32
  }
  func.func @transform_7(%arg0: i32) -> (i32, i32, i32) {
    %c0_i32 = arith.constant 0 : i32
    %c0_i32_0 = arith.constant 0 : i32
    %c0_i32_1 = arith.constant 0 : i32
    return %arg0, %c0_i32, %c0_i32_0 : i32, i32, i32
  }
}

</mosaic_0001>

<bundles_post_ra>
// kernel: cnn_forward.1
= control target key start
LH: loop header
LB: loop body
LE: loop exit
PB: predicated region body
PF: predicated region fallthrough
CT: control target
= control target key end

     0   :  { %12 = vsyncpa [#allocation7], 0  ;;  %s16473_s0 = inlined_call_operand.vmem [shape: f32[2,784,128], index: 0, kind: input, shape index: {}]   ;;  %s16474_s1 = inlined_call_operand.vmem [shape: f32[128,128], index: 1, kind: input, shape index: {}]   ;;  %s16475_s2 = inlined_call_operand.vmem [shape: f32[25,8,128], index: 2, kind: input, shape index: {}]   ;;  %s16476_s3 = inlined_call_operand.vmem [shape: f32[25,16,128], index: 3, kind: input, shape index: {}]   ;;  %s16477_s4 = inlined_call_operand.vmem [shape: f32[128,128], index: 4, kind: input, shape index: {}]   ;;  %s16478_s5 = inlined_call_operand.vmem [shape: f32[128,128], index: 5, kind: input, shape index: {}]   ;;  %s16479_s6 = inlined_call_operand.vmem [shape: f32[4,128], index: 6, kind: input, shape index: {}]   ;;  %s16480_s7 = inlined_call_operand.hbm [shape: f32[2,1,128], index: 7, kind: output, shape index: {}]  }
   0x1   :  { %14 = vsyncpa [#allocation7 + $0x1], 0  ;;  %s13452_s24 = smov 0   ;;  %s13454_s25 = smov 0  }
   0x2   :  { %s13456_s26 = smov 0   ;;  %s13458_s27 = smov 0  }
   0x3 LB: > { %s13473_s28 = sadd.s32 4294967295, %s13407_s27   ;;  %s10061_s29 = sadd.s32 4294967294, %s13407_s27   ;;  %s13407_s27 = sphi %s13458_s27, %s16486_s27   ;;  %s13403_s26 = sphi %s13456_s26, %s16485_s26   ;;  %s13399_s25 = sphi %s13454_s25, %s16484_s25   ;;  %s13395_s24 = sphi %s13452_s24, %s16483_s24  }
   0x4   : > { %s13477_s30 = sadd.s32 1, %s13407_s27   ;;  %s179_s8 = sadd.s32 1, %s13403_s26 }
   0x5   : > { %s176_s9 = ssub.s32 %s13407_s27, %s13477_s30  ;;  %p189_p0 = scmp.ne.s32.totalorder %s13403_s26, %s13399_s25 }
   0x6   : > { %p177_p1 = scmp.eq.s32.totalorder %s176_s9, 0  ;;  %p190_p2 = scmp.eq.s32.totalorder %s13473_s28, 1 }
   0x7   : > { %p195_p3 = scmp.ne.s32.totalorder %s13399_s25, %s13395_s24  ;;  %p196_p4 = scmp.eq.s32.totalorder %s10061_s29, 1 }
   0x8   : > { %s13488_s10 = scalar_select %p177_p1, %s13403_s26, %s179_s8  }
   0x9   : > { %p13490_p5 = por %p190_p2, %p189_p0  ;;  %p13494_p6 = por %p196_p4, %p195_p3 }
   0xa   : > { %p10064_p7 = scmp.ge.s32.totalorder %s13407_s27, 1  ;;  %p240_p8 = scmp.lt.s32.totalorder %s13407_s27, 3 }
   0xc   : > { %p241_p9 = pnand %p10064_p7, %p240_p8 }
   0xd   : > { %p271_p10 = scmp.lt.s32.totalorder (!%p241_p9), %s13473_s28, 1  ;;  %s269_s18 = sand.u32 (!%p241_p9), 1, %s13399_s25  }
   0xe   : > { %244 = sbr.rel (%p241_p9) target bundleno = 2058 (0x80a), region = 48  ;;  %s270_s22 = scalar_lea.vmem (!%p241_p9), [#allocation6], %s269_s18 }
   0xf   : > { %s10006_s23 = sshll.u32 (!%p241_p9), %s270_s22, 4  ;;  %s9994_s13 = scalar_lea.sflag (!%p241_p9), [#allocation7], %s269_s18  ;;  %s10007_s23 = int_to_ptr.vmem [resolvable:$true] %s10006_s23 }
  0x10   : > { %s13347_s14 = scalar_lea.vmem (!%p241_p9), %s10007_s23, 16  ;;  %s13411_s15 = smov (!%p241_p9), [#allocation6]  }
  0x11   : > { %p13348_p11 = scmp.ne.s32.totalorder (!%p241_p9), %s10007_s23, %s13347_s14 }
  0x13   : > { %v13503_v0 = vld [vmem:[%s16474_s1 + $0x78] sm:$0xff]  ;;  %v13508_v1 = vld [vmem:[%s16474_s1 + $0x70] sm:$0xff]  ;;  %v13517_v2 = vld [vmem:[%s16474_s1 + $0x68] sm:$0xff]  ;;  %s272_s21 = scalar_select %p271_p10, %s13473_s28, 1  ;;  %vm13410_vm0 = vmmov 0   ;;  %vm1929_vm1 = vcmask 64512  }
  0x14   : > { %11361 = vmatprep.subr.mxu0 %v13503_v0  ;;  %11414 = vmatprep.subr.mxu1 %v13503_v0  ;;  %v13526_v3 = vld [vmem:[%s16474_s1 + $0x60] sm:$0xff]  ;;  %v13535_v4 = vld [vmem:[%s16474_s1 + $0x58] sm:$0xff]  ;;  %v13544_v5 = vld [vmem:[%s16474_s1 + $0x50] sm:$0xff]  ;;  %vm7893_vm2 = vcmask 130048   ;;  %p13349_p12 = pnand %p13348_p11, %p13490_p5 }
  0x15   : > { %11362 = vmatpush3.msra.mxu0 %v13503_v0  ;;  %11415 = vmatpush3.msra.mxu1 %v13503_v0  ;;  %v13553_v6 = vld [vmem:[%s16474_s1 + $0x48] sm:$0xff]  ;;  %v13562_v7 = vld [vmem:[%s16474_s1 + $0x40] sm:$0xff]  ;;  %v13571_v8 = vld [vmem:[%s16474_s1 + $0x38] sm:$0xff]  ;;  %s13302_s9 = smul.u32 784, %s272_s21  ;;  %s10589_s21 = sshll.u32 %s13473_s28, 4 }
  0x16   : > { %11363 = vmatprep.subr.mxu0 %v13508_v1  ;;  %11416 = vmatprep.subr.mxu1 %v13508_v1  ;;  %v13581_v9 = vld [vmem:[%s16474_s1 + $0x30] sm:$0xff]  ;;  %v13590_v10 = vld [vmem:[%s16474_s1 + $0x28] sm:$0xff]  ;;  %v13600_v11 = vld [vmem:[%s16474_s1 + $0x20] sm:$0xff]  ;;  %p13350_p13 = pneg %p13349_p12  ;;  %s13351_s28 = sshll.u32 %s13411_s15, 4  ;;  %s13352_s28 = int_to_ptr.vmem [resolvable:$false] %s13351_s28 }
  0x17   : > { %11364 = vmatpush3.msra.mxu0 %v13508_v1  ;;  %11417 = vmatpush3.msra.mxu1 %v13508_v1  ;;  %v13609_v12 = vld [vmem:[%s16474_s1 + $0x18] sm:$0xff]  ;;  %v13618_v13 = vld [vmem:[%s16474_s1 + $0x10] sm:$0xff]  ;;  %v13627_v14 = vld [vmem:[%s16474_s1 + $0x8] sm:$0xff]  ;;  %s13632_s19 = scalar_lea.vmem %s16473_s0, %s13302_s9  ;;  %s16438_s9 = scalar_lea.hbm %s16480_s7, %s10589_s21 }
  0x18   : > { %11365 = vmatprep.subr.mxu0 %v13517_v2  ;;  %11418 = vmatprep.subr.mxu1 %v13517_v2  ;;  %v13641_v15 = vld [vmem:[%s16474_s1] sm:$0xff]  ;;  %v455_v17 = vld [vmem:[%s13632_s19 + $0x70] sm:$0xff]  ;;  %v277_v18 = vld [vmem:[%s13632_s19 + $0x8] sm:$0xff]  ;;  %s13353_s16 = scalar_lea.vmem %s13352_s28, 32  ;;  %p13354_p0 = scmp.lt.s32.totalorder %s10007_s23, %s13352_s28 }
  0x19   : > { %11366 = vmatpush3.msra.mxu0 %v13517_v2  ;;  %11419 = vmatpush3.msra.mxu1 %v13517_v2  ;;  %v276_v16 = vld [vmem:[%s13632_s19] sm:$0xff]  ;;  %v456_v19 = vld [vmem:[%s13632_s19 + $0x78] sm:$0xff]  ;;  %v278_v20 = vld [vmem:[%s13632_s19 + $0x10] sm:$0xff]  ;;  %p13355_p1 = scmp.lt.s32.totalorder %s13353_s16, %s13347_s14 }
  0x1a   : > { %11367 = vmatprep.subr.mxu0 %v13526_v3  ;;  %11420 = vmatprep.subr.mxu1 %v13526_v3  ;;  %v457_v21 = vld [vmem:[%s13632_s19 + $0x80] sm:$0xff]  ;;  %v279_v22 = vld [vmem:[%s13632_s19 + $0x18] sm:$0xff]  ;;  %v458_v23 = vld [vmem:[%s13632_s19 + $0x88] sm:$0xff] }
  0x1b   : > { %11368 = vmatpush3.msra.mxu0 %v13526_v3  ;;  %11421 = vmatpush3.msra.mxu1 %v13526_v3  ;;  %v280_v24 = vld [vmem:[%s13632_s19 + $0x20] sm:$0xff]  ;;  %v459_v25 = vld [vmem:[%s13632_s19 + $0x90] sm:$0xff]  ;;  %v281_v26 = vld [vmem:[%s13632_s19 + $0x28] sm:$0xff]  ;;  %p13356_p2 = por %p13355_p1, %p13354_p0 }
  0x1c   : > { %11369 = vmatprep.subr.mxu0 %v13535_v4  ;;  %11422 = vmatprep.subr.mxu1 %v13535_v4  ;;  %v460_v27 = vld [vmem:[%s13632_s19 + $0x98] sm:$0xff]  ;;  %v282_v28 = vld [vmem:[%s13632_s19 + $0x30] sm:$0xff]  ;;  %v461_v29 = vld [vmem:[%s13632_s19 + $0xa0] sm:$0xff] }
  0x1d   : > { %11370 = vmatpush3.msra.mxu0 %v13535_v4  ;;  %11423 = vmatpush3.msra.mxu1 %v13535_v4  ;;  %v283_v30 = vld [vmem:[%s13632_s19 + $0x38] sm:$0xff]  ;;  %v462_v31 = vld [vmem:[%s13632_s19 + $0xa8] sm:$0xff]  ;;  %v284_v32 = vld [vmem:[%s13632_s19 + $0x40] sm:$0xff]  ;;  %p13357_p3 = pnand %p13356_p2, %p13350_p13 }
  0x1e   : > { %11371 = vmatprep.subr.mxu0 %v13544_v5  ;;  %11424 = vmatprep.subr.mxu1 %v13544_v5  ;;  %v463_v33 = vld [vmem:[%s13632_s19 + $0xb0] sm:$0xff]  ;;  %v285_v34 = vld [vmem:[%s13632_s19 + $0x48] sm:$0xff]  ;;  %v464_v35 = vld [vmem:[%s13632_s19 + $0xb8] sm:$0xff] }
  0x1f   : > { %11372 = vmatpush3.msra.mxu0 %v13544_v5  ;;  %11425 = vmatpush3.msra.mxu1 %v13544_v5  ;;  %v286_v36 = vld [vmem:[%s13632_s19 + $0x50] sm:$0xff]  ;;  %v465_v37 = vld [vmem:[%s13632_s19 + $0xc0] sm:$0xff]  ;;  %v287_v38 = vld [vmem:[%s13632_s19 + $0x58] sm:$0xff] }
  0x20   : > { %11373 = vmatprep.subr.mxu0 %v13553_v6  ;;  %11426 = vmatprep.subr.mxu1 %v13553_v6  ;;  %v466_v39 = vld [vmem:[%s13632_s19 + $0xc8] sm:$0xff]  ;;  %v288_v40 = vld [vmem:[%s13632_s19 + $0x60] sm:$0xff]  ;;  %v467_v41 = vld [vmem:[%s13632_s19 + $0xd0] sm:$0xff] }
  0x21   : > { %11374 = vmatpush3.msra.mxu0 %v13553_v6  ;;  %11427 = vmatpush3.msra.mxu1 %v13553_v6  ;;  %v289_v42 = vld [vmem:[%s13632_s19 + $0x68] sm:$0xff]  ;;  %v468_v43 = vld [vmem:[%s13632_s19 + $0xd8] sm:$0xff]  ;;  %v634_v44 = vld [vmem:[%s13632_s19 + $0xe0] sm:$0xff] }
  0x22   : > { %11375 = vmatprep.subr.mxu0 %v13562_v7  ;;  %11428 = vmatprep.subr.mxu1 %v13562_v7  ;;  %v813_v45 = vld [vmem:[%s13632_s19 + $0x150] sm:$0xff]  ;;  %v635_v46 = vld [vmem:[%s13632_s19 + $0xe8] sm:$0xff]  ;;  %v814_v47 = vld [vmem:[%s13632_s19 + $0x158] sm:$0xff] }
  0x23   : > { %11376 = vmatpush3.msra.mxu0 %v13562_v7  ;;  %11429 = vmatpush3.msra.mxu1 %v13562_v7  ;;  %v636_v48 = vld [vmem:[%s13632_s19 + $0xf0] sm:$0xff]  ;;  %v815_v49 = vld [vmem:[%s13632_s19 + $0x160] sm:$0xff]  ;;  %v816_v50 = vld [vmem:[%s13632_s19 + $0x168] sm:$0xff] }
  0x24   : > { %11377 = vmatprep.subr.mxu0 %v13571_v8  ;;  %11430 = vmatprep.subr.mxu1 %v13571_v8  ;;  %v637_v51 = vld [vmem:[%s13632_s19 + $0xf8] sm:$0xff]  ;;  %v638_v52 = vld [vmem:[%s13632_s19 + $0x100] sm:$0xff]  ;;  %v817_v53 = vld [vmem:[%s13632_s19 + $0x170] sm:$0xff] }
  0x25   : > { %11378 = vmatpush3.msra.mxu0 %v13571_v8  ;;  %11431 = vmatpush3.msra.mxu1 %v13571_v8  ;;  %v818_v54 = vld [vmem:[%s13632_s19 + $0x178] sm:$0xff]  ;;  %v639_v55 = vld [vmem:[%s13632_s19 + $0x108] sm:$0xff]  ;;  %v640_v56 = vld [vmem:[%s13632_s19 + $0x110] sm:$0xff] }
  0x26   : > { %11379 = vmatprep.subr.mxu0 %v13581_v9  ;;  %11432 = vmatprep.subr.mxu1 %v13581_v9  ;;  %v819_v57 = vld [vmem:[%s13632_s19 + $0x180] sm:$0xff]  ;;  %v820_v58 = vld [vmem:[%s13632_s19 + $0x188] sm:$0xff]  ;;  %v641_v59 = vld [vmem:[%s13632_s19 + $0x118] sm:$0xff] }
  0x27   : > { %11380 = vmatpush3.msra.mxu0 %v13581_v9  ;;  %11433 = vmatpush3.msra.mxu1 %v13581_v9  ;;  %v642_v60 = vld [vmem:[%s13632_s19 + $0x120] sm:$0xff]  ;;  %v821_v61 = vld [vmem:[%s13632_s19 + $0x190] sm:$0xff]  ;;  %v822_v62 = vld [vmem:[%s13632_s19 + $0x198] sm:$0xff] }
  0x28   : > { %11381 = vmatprep.subr.mxu0 %v13590_v10  ;;  %11434 = vmatprep.subr.mxu1 %v13590_v10  ;;  %v643_v63 = vld [vmem:[%s13632_s19 + $0x128] sm:$0xff] }
  0x29   : > { %11382 = vmatpush3.msra.mxu0 %v13590_v10  ;;  %11435 = vmatpush3.msra.mxu1 %v13590_v10 }
  0x2a   : > { %11383 = vmatprep.subr.mxu0 %v13600_v11  ;;  %11436 = vmatprep.subr.mxu1 %v13600_v11 }
  0x2b   : > { %11384 = vmatpush3.msra.mxu0 %v13600_v11  ;;  %11437 = vmatpush3.msra.mxu1 %v13600_v11 }
  0x2c   : > { %11385 = vmatprep.subr.mxu0 %v13609_v12  ;;  %11438 = vmatprep.subr.mxu1 %v13609_v12 }
  0x2d   : > { %11386 = vmatpush3.msra.mxu0 %v13609_v12  ;;  %11439 = vmatpush3.msra.mxu1 %v13609_v12 }
  0x2e   : > { %11387 = vmatprep.subr.mxu0 %v13618_v13  ;;  %11440 = vmatprep.subr.mxu1 %v13618_v13 }
  0x2f   : > { %11388 = vmatpush3.msra.mxu0 %v13618_v13  ;;  %11441 = vmatpush3.msra.mxu1 %v13618_v13 }
  0x30   : > { %11389 = vmatprep.subr.mxu0 %v13627_v14  ;;  %11442 = vmatprep.subr.mxu1 %v13627_v14 }
  0x31   : > { %11390 = vmatpush3.msra.mxu0 %v13627_v14  ;;  %11443 = vmatpush3.msra.mxu1 %v13627_v14 }
  0x32   : > { %11391 = vmatprep.subr.mxu0 %v13641_v15  ;;  %11444 = vmatprep.subr.mxu1 %v13641_v15 }
  0x33   : > { %11392 = vmatpush3.msra.mxu0 %v13641_v15  ;;  %11393 = vmatprep.mubr.f32.mxu0 %v276_v16  ;;  %v644_v16 = vld [vmem:[%s13632_s19 + $0x130] sm:$0xff] }
  0x34   : > { %11445 = vmatpush3.msra.mxu1 %v13641_v15  ;;  %11446 = vmatprep.mubr.f32.mxu1 %v455_v17  ;;  %v823_v17 = vld [vmem:[%s13632_s19 + $0x1a0] sm:$0xff] }
  0x35   : > { %11394 = vmatmul.mubr.f32.vlgmr.msra.gmra.mxu0 %v277_v18  ;;  %11447 = vmatmul.mubr.f32.vlgmr.msra.gmra.mxu1 %v456_v19  ;;  %v645_v18 = vld [vmem:[%s13632_s19 + $0x138] sm:$0xff]  ;;  %v824_v19 = vld [vmem:[%s13632_s19 + $0x1a8] sm:$0xff] }
  0x36   : > { %11467 = vmatprep.subr.mxu0 %v13503_v0  ;;  %11520 = vmatprep.subr.mxu1 %v13503_v0 }
  0x37   : > { %11468 = vmatpush3.msra.mxu0 %v13503_v0  ;;  %11521 = vmatpush3.msra.mxu1 %v13503_v0 }
  0x38   : > { %11469 = vmatprep.subr.mxu0 %v13508_v1  ;;  %11522 = vmatprep.subr.mxu1 %v13508_v1 }
  0x39   : > { %11396 = vmatprep.mubr.f32.mxu0 %v278_v20  ;;  %11449 = vmatprep.mubr.f32.mxu1 %v457_v21  ;;  %v646_v20 = vld [vmem:[%s13632_s19 + $0x140] sm:$0xff]  ;;  %v825_v21 = vld [vmem:[%s13632_s19 + $0x1b0] sm:$0xff] }
  0x3a   : > { %11470 = vmatpush3.msra.mxu0 %v13508_v1  ;;  %11523 = vmatpush3.msra.mxu1 %v13508_v1 }
  0x3b   : > { %11397 = vmatmul.mubr.f32.gmra.mxu0 %v279_v22  ;;  %11450 = vmatmul.mubr.f32.gmra.mxu1 %v458_v23  ;;  %v647_v22 = vld [vmem:[%s13632_s19 + $0x148] sm:$0xff]  ;;  %v826_v23 = vld [vmem:[%s13632_s19 + $0x1b8] sm:$0xff] }
  0x3c   : > { %11471 = vmatprep.subr.mxu0 %v13517_v2  ;;  %11524 = vmatprep.subr.mxu1 %v13517_v2 }
  0x3d   : > { %11472 = vmatpush3.msra.mxu0 %v13517_v2  ;;  %11525 = vmatpush3.msra.mxu1 %v13517_v2 }
  0x3e   : > { %11473 = vmatprep.subr.mxu0 %v13526_v3  ;;  %11526 = vmatprep.subr.mxu1 %v13526_v3 }
  0x3f   : > { %11399 = vmatprep.mubr.f32.mxu0 %v280_v24  ;;  %11452 = vmatprep.mubr.f32.mxu1 %v459_v25  ;;  %v992_v24 = vld [vmem:[%s13632_s19 + $0x1c0] sm:$0xff]  ;;  %v993_v25 = vld [vmem:[%s13632_s19 + $0x1c8] sm:$0xff] }
  0x40   : > { %11474 = vmatpush3.msra.mxu0 %v13526_v3  ;;  %11527 = vmatpush3.msra.mxu1 %v13526_v3 }
  0x41   : > { %11400 = vmatmul.mubr.f32.gmra.mxu0 %v281_v26  ;;  %11453 = vmatmul.mubr.f32.gmra.mxu1 %v460_v27  ;;  %v994_v26 = vld [vmem:[%s13632_s19 + $0x1d0] sm:$0xff] }
  0x42   : > { %11475 = vmatprep.subr.mxu0 %v13535_v4  ;;  %11528 = vmatprep.subr.mxu1 %v13535_v4  ;;  %v1171_v27 = vld [vmem:[%s13632_s19 + $0x230] sm:$0xff] }
  0x43   : > { %11476 = vmatpush3.msra.mxu0 %v13535_v4  ;;  %11529 = vmatpush3.msra.mxu1 %v13535_v4 }
  0x44   : > { %11477 = vmatprep.subr.mxu0 %v13544_v5  ;;  %11530 = vmatprep.subr.mxu1 %v13544_v5 }
  0x45   : > { %11402 = vmatprep.mubr.f32.mxu0 %v282_v28  ;;  %11455 = vmatprep.mubr.f32.mxu1 %v461_v29  ;;  %v995_v28 = vld [vmem:[%s13632_s19 + $0x1d8] sm:$0xff]  ;;  %v996_v29 = vld [vmem:[%s13632_s19 + $0x1e0] sm:$0xff] }
  0x46   : > { %11478 = vmatpush3.msra.mxu0 %v13544_v5  ;;  %11531 = vmatpush3.msra.mxu1 %v13544_v5 }
  0x47   : > { %11403 = vmatmul.mubr.f32.gmra.mxu0 %v283_v30  ;;  %11456 = vmatmul.mubr.f32.gmra.mxu1 %v462_v31  ;;  %v997_v30 = vld [vmem:[%s13632_s19 + $0x1e8] sm:$0xff]  ;;  %v998_v31 = vld [vmem:[%s13632_s19 + $0x1f0] sm:$0xff] }
  0x48   : > { %11479 = vmatprep.subr.mxu0 %v13553_v6  ;;  %11532 = vmatprep.subr.mxu1 %v13553_v6 }
  0x49   : > { %11480 = vmatpush3.msra.mxu0 %v13553_v6  ;;  %11533 = vmatpush3.msra.mxu1 %v13553_v6 }
  0x4a   : > { %11481 = vmatprep.subr.mxu0 %v13562_v7  ;;  %11534 = vmatprep.subr.mxu1 %v13562_v7 }
  0x4b   : > { %11405 = vmatprep.mubr.f32.mxu0 %v284_v32  ;;  %11458 = vmatprep.mubr.f32.mxu1 %v463_v33  ;;  %v999_v32 = vld [vmem:[%s13632_s19 + $0x1f8] sm:$0xff]  ;;  %v1000_v33 = vld [vmem:[%s13632_s19 + $0x200] sm:$0xff] }
  0x4c   : > { %11482 = vmatpush3.msra.mxu0 %v13562_v7  ;;  %11535 = vmatpush3.msra.mxu1 %v13562_v7 }
  0x4d   : > { %11406 = vmatmul.mubr.f32.gmra.mxu0 %v285_v34  ;;  %11459 = vmatmul.mubr.f32.gmra.mxu1 %v464_v35  ;;  %v1172_v34 = vld [vmem:[%s13632_s19 + $0x238] sm:$0xff]  ;;  %v1002_v35 = vld [vmem:[%s13632_s19 + $0x210] sm:$0xff] }
  0x4e   : > { %11483 = vmatprep.subr.mxu0 %v13571_v8  ;;  %11536 = vmatprep.subr.mxu1 %v13571_v8 }
  0x4f   : > { %11484 = vmatpush3.msra.mxu0 %v13571_v8  ;;  %11537 = vmatpush3.msra.mxu1 %v13571_v8 }
  0x50   : > { %11485 = vmatprep.subr.mxu0 %v13581_v9  ;;  %11538 = vmatprep.subr.mxu1 %v13581_v9 }
  0x51   : > { %11408 = vmatprep.mubr.f32.mxu0 %v286_v36  ;;  %11461 = vmatprep.mubr.f32.mxu1 %v465_v37  ;;  %v1003_v36 = vld [vmem:[%s13632_s19 + $0x218] sm:$0xff]  ;;  %v1174_v37 = vld [vmem:[%s13632_s19 + $0x248] sm:$0xff] }
  0x52   : > { %11486 = vmatpush3.msra.mxu0 %v13581_v9  ;;  %11539 = vmatpush3.msra.mxu1 %v13581_v9 }
  0x53   : > { %11409 = vmatmul.mubr.f32.gmra.mxu0 %v287_v38  ;;  %11462 = vmatmul.mubr.f32.gmra.mxu1 %v466_v39  ;;  %v1004_v38 = vld [vmem:[%s13632_s19 + $0x220] sm:$0xff]  ;;  %v1005_v39 = vld [vmem:[%s13632_s19 + $0x228] sm:$0xff] }
  0x54   : > { %11487 = vmatprep.subr.mxu0 %v13590_v10  ;;  %11540 = vmatprep.subr.mxu1 %v13590_v10 }
  0x55   : > { %11488 = vmatpush3.msra.mxu0 %v13590_v10  ;;  %11541 = vmatpush3.msra.mxu1 %v13590_v10 }
  0x56   : > { %11489 = vmatprep.subr.mxu0 %v13600_v11  ;;  %11542 = vmatprep.subr.mxu1 %v13600_v11 }
  0x57   : > { %11411 = vmatprep.mubr.f32.mxu0 %v288_v40  ;;  %11464 = vmatprep.mubr.f32.mxu1 %v467_v41  ;;  %v1176_v40 = vld [vmem:[%s13632_s19 + $0x258] sm:$0xff]  ;;  %v1350_v41 = vld [vmem:[%s13632_s19 + $0x2a0] sm:$0xff] }
  0x58   : > { %11490 = vmatpush3.msra.mxu0 %v13600_v11  ;;  %11543 = vmatpush3.msra.mxu1 %v13600_v11 }
  0x59   : > { %11412 = vmatmul.mubr.f32.gmra.mxu0 %v289_v42  ;;  %11465 = vmatmul.mubr.f32.gmra.mxu1 %v468_v43  ;;  %v1177_v42 = vld [vmem:[%s13632_s19 + $0x260] sm:$0xff]  ;;  %v13409_v43 = vmov 0.0  }
  0x5a   : > { %11491 = vmatprep.subr.mxu0 %v13609_v12  ;;  %11544 = vmatprep.subr.mxu1 %v13609_v12 }
  0x5b   : > { %11492 = vmatpush3.msra.mxu0 %v13609_v12  ;;  %11545 = vmatpush3.msra.mxu1 %v13609_v12 }
  0x5c   : > { %11493 = vmatprep.subr.mxu0 %v13618_v13  ;;  %11546 = vmatprep.subr.mxu1 %v13618_v13 }
  0x5d   : > { %11494 = vmatpush3.msra.mxu0 %v13618_v13  ;;  %11547 = vmatpush3.msra.mxu1 %v13618_v13 }
  0x5e   : > { %11495 = vmatprep.subr.mxu0 %v13627_v14  ;;  %11548 = vmatprep.subr.mxu1 %v13627_v14 }
  0x5f   : > { %11496 = vmatpush3.msra.mxu0 %v13627_v14  ;;  %11549 = vmatpush3.msra.mxu1 %v13627_v14 }
  0x60   : > { %11497 = vmatprep.subr.mxu0 %v13641_v15  ;;  %11550 = vmatprep.subr.mxu1 %v13641_v15 }
  0x61   : > { %11498 = vmatpush3.msra.mxu0 %v13641_v15  ;;  %11499 = vmatprep.mubr.f32.mxu0 %v634_v44  ;;  %v1179_v44 = vld [vmem:[%s13632_s19 + $0x270] sm:$0xff] }
  0x62   : > { %11551 = vmatpush3.msra.mxu1 %v13641_v15  ;;  %11552 = vmatprep.mubr.f32.mxu1 %v813_v45  ;;  %v1181_v45 = vld [vmem:[%s13632_s19 + $0x280] sm:$0xff] }
  0x63   : > { %11500 = vmatmul.mubr.f32.vlgmr.msra.gmra.mxu0 %v635_v46  ;;  %11553 = vmatmul.mubr.f32.vlgmr.msra.gmra.mxu1 %v814_v47  ;;  %v1356_v46 = vld [vmem:[%s13632_s19 + $0x2d0] sm:$0xff]  ;;  %v1358_v47 = vld [vmem:[%s13632_s19 + $0x2e0] sm:$0xff] }
  0x64   : > { %11573 = vmatprep.subr.mxu0 %v13503_v0  ;;  %11502 = vmatprep.mubr.f32.mxu0 %v636_v48  ;;  %v1359_v48 = vld [vmem:[%s13632_s19 + $0x2e8] sm:$0xff] }
  0x65   : > { %11574 = vmatpush3.msra.mxu0 %v13503_v0  ;;  %11555 = vmatprep.mubr.f32.mxu1 %v815_v49  ;;  %v1360_v49 = vld [vmem:[%s13632_s19 + $0x2f0] sm:$0xff] }
  0x66   : > { %11575 = vmatprep.subr.mxu0 %v13508_v1  ;;  %11626 = vmatprep.subr.mxu1 %v13503_v0 }
  0x67   : > { %11576 = vmatpush3.msra.mxu0 %v13508_v1  ;;  %11556 = vmatmul.mubr.f32.gmra.mxu1 %v816_v50  ;;  %v1361_v50 = vld [vmem:[%s13632_s19 + $0x2f8] sm:$0xff] }
  0x68   : > { %11503 = vmatmul.mubr.f32.gmra.mxu0 %v637_v51  ;;  %11577 = vmatprep.subr.mxu0 %v13517_v2  ;;  %v1362_v51 = vld [vmem:[%s13632_s19 + $0x300] sm:$0xff] }
  0x69   : > { %11578 = vmatpush3.msra.mxu0 %v13517_v2  ;;  %11505 = vmatprep.mubr.f32.mxu0 %v638_v52  ;;  %v1363_v52 = vld [vmem:[%s13632_s19 + $0x308] sm:$0xff] }
  0x6a   : > { %11579 = vmatprep.subr.mxu0 %v13526_v3  ;;  %11558 = vmatprep.mubr.f32.mxu1 %v817_v53 }
  0x6b   : > { %11580 = vmatpush3.msra.mxu0 %v13526_v3  ;;  %11559 = vmatmul.mubr.f32.gmra.mxu1 %v818_v54 }
  0x6c   : > { %11506 = vmatmul.mubr.f32.gmra.mxu0 %v639_v55  ;;  %11581 = vmatprep.subr.mxu0 %v13535_v4 }
  0x6d   : > { %11582 = vmatpush3.msra.mxu0 %v13535_v4  ;;  %11508 = vmatprep.mubr.f32.mxu0 %v640_v56 }
  0x6e   : > { %11583 = vmatprep.subr.mxu0 %v13544_v5  ;;  %11561 = vmatprep.mubr.f32.mxu1 %v819_v57 }
  0x6f   : > { %11584 = vmatpush3.msra.mxu0 %v13544_v5  ;;  %11562 = vmatmul.mubr.f32.gmra.mxu1 %v820_v58 }
  0x70   : > { %11509 = vmatmul.mubr.f32.gmra.mxu0 %v641_v59  ;;  %11585 = vmatprep.subr.mxu0 %v13553_v6 }
  0x71   : > { %11586 = vmatpush3.msra.mxu0 %v13553_v6  ;;  %11511 = vmatprep.mubr.f32.mxu0 %v642_v60 }
  0x72   : > { %11587 = vmatprep.subr.mxu0 %v13562_v7  ;;  %11564 = vmatprep.mubr.f32.mxu1 %v821_v61 }
  0x73   : > { %11588 = vmatpush3.msra.mxu0 %v13562_v7  ;;  %11565 = vmatmul.mubr.f32.gmra.mxu1 %v822_v62 }
  0x74   : > { %11512 = vmatmul.mubr.f32.gmra.mxu0 %v643_v63  ;;  %11589 = vmatprep.subr.mxu0 %v13571_v8 }
  0x75   : > { %11590 = vmatpush3.msra.mxu0 %v13571_v8  ;;  %11627 = vmatpush3.msra.mxu1 %v13503_v0 }
  0x76   : > { %11591 = vmatprep.subr.mxu0 %v13581_v9  ;;  %11628 = vmatprep.subr.mxu1 %v13508_v1 }
  0x77   : > { %11514 = vmatprep.mubr.f32.mxu0 %v644_v16  ;;  %11567 = vmatprep.mubr.f32.mxu1 %v823_v17 }
  0x78   : > { %11592 = vmatpush3.msra.mxu0 %v13581_v9  ;;  %11629 = vmatpush3.msra.mxu1 %v13508_v1 }
  0x79   : > { %11515 = vmatmul.mubr.f32.gmra.mxu0 %v645_v18  ;;  %11568 = vmatmul.mubr.f32.gmra.mxu1 %v824_v19 }
  0x7a   : > { %11593 = vmatprep.subr.mxu0 %v13590_v10  ;;  %11630 = vmatprep.subr.mxu1 %v13517_v2 }
  0x7b   : > { %11594 = vmatpush3.msra.mxu0 %v13590_v10  ;;  %11631 = vmatpush3.msra.mxu1 %v13517_v2 }
  0x7c   : > { %11595 = vmatprep.subr.mxu0 %v13600_v11  ;;  %11632 = vmatprep.subr.mxu1 %v13526_v3 }
  0x7d   : > { %11517 = vmatprep.mubr.f32.mxu0 %v646_v20  ;;  %11570 = vmatprep.mubr.f32.mxu1 %v825_v21 }
  0x7e   : > { %11596 = vmatpush3.msra.mxu0 %v13600_v11  ;;  %11633 = vmatpush3.msra.mxu1 %v13526_v3 }
  0x7f   : > { %11518 = vmatmul.mubr.f32.gmra.mxu0 %v647_v22  ;;  %11571 = vmatmul.mubr.f32.gmra.mxu1 %v826_v23 }
  0x80   : > { %11597 = vmatprep.subr.mxu0 %v13609_v12  ;;  %11634 = vmatprep.subr.mxu1 %v13535_v4 }
  0x81   : > { %11598 = vmatpush3.msra.mxu0 %v13609_v12  ;;  %11635 = vmatpush3.msra.mxu1 %v13535_v4 }
  0x82   : > { %11599 = vmatprep.subr.mxu0 %v13618_v13  ;;  %11636 = vmatprep.subr.mxu1 %v13544_v5 }
  0x83   : > { %11600 = vmatpush3.msra.mxu0 %v13618_v13  ;;  %11637 = vmatpush3.msra.mxu1 %v13544_v5 }
  0x84   : > { %11601 = vmatprep.subr.mxu0 %v13627_v14  ;;  %11638 = vmatprep.subr.mxu1 %v13553_v6 }
  0x85   : > { %11602 = vmatpush3.msra.mxu0 %v13627_v14  ;;  %11639 = vmatpush3.msra.mxu1 %v13553_v6 }
  0x86   : > { %11603 = vmatprep.subr.mxu0 %v13641_v15  ;;  %11640 = vmatprep.subr.mxu1 %v13562_v7 }
  0x87   : > { %11604 = vmatpush3.msra.mxu0 %v13641_v15  ;;  %11605 = vmatprep.mubr.f32.mxu0 %v992_v24 }
  0x88   : > { %11641 = vmatpush3.msra.mxu1 %v13562_v7  ;;  %11606 = vmatmul.mubr.f32.vlgmr.msra.gmra.mxu0 %v993_v25 }
  0x89   : > { %11642 = vmatprep.subr.mxu1 %v13571_v8  ;;  %11608 = vmatprep.mubr.f32.mxu0 %v994_v26 }
  0x8a   : > { %11643 = vmatpush3.msra.mxu1 %v13571_v8  ;;  %11658 = vmatprep.mubr.f32.mxu1 %v1171_v27 }
  0x8b   : > { %11644 = vmatprep.subr.mxu1 %v13581_v9  ;;  %11679 = vmatprep.subr.mxu0 %v13503_v0 }
  0x8c   : > { %11645 = vmatpush3.msra.mxu1 %v13581_v9  ;;  %11609 = vmatmul.mubr.f32.gmra.mxu0 %v995_v28 }
  0x8d   : > { %11646 = vmatprep.subr.mxu1 %v13590_v10  ;;  %11611 = vmatprep.mubr.f32.mxu0 %v996_v29 }
  0x8e   : > { %11647 = vmatpush3.msra.mxu1 %v13590_v10  ;;  %11680 = vmatpush3.msra.mxu0 %v13503_v0  ;;  %v1001_v0 = vld [vmem:[%s13632_s19 + $0x208] sm:$0xff] }
  0x8f   : > { %11648 = vmatprep.subr.mxu1 %v13600_v11  ;;  %11681 = vmatprep.subr.mxu0 %v13508_v1 }
  0x90   : > { %11649 = vmatpush3.msra.mxu1 %v13600_v11  ;;  %11612 = vmatmul.mubr.f32.gmra.mxu0 %v997_v30 }
  0x91   : > { %11650 = vmatprep.subr.mxu1 %v13609_v12  ;;  %11614 = vmatprep.mubr.f32.mxu0 %v998_v31 }
  0x92   : > { %11651 = vmatpush3.msra.mxu1 %v13609_v12  ;;  %11682 = vmatpush3.msra.mxu0 %v13508_v1  ;;  %v1173_v1 = vld [vmem:[%s13632_s19 + $0x240] sm:$0xff] }
  0x93   : > { %11652 = vmatprep.subr.mxu1 %v13618_v13  ;;  %11683 = vmatprep.subr.mxu0 %v13517_v2 }
  0x94   : > { %11653 = vmatpush3.msra.mxu1 %v13618_v13  ;;  %11615 = vmatmul.mubr.f32.gmra.mxu0 %v999_v32 }
  0x95   : > { %11654 = vmatprep.subr.mxu1 %v13627_v14  ;;  %11617 = vmatprep.mubr.f32.mxu0 %v1000_v33 }
  0x96   : > { %11655 = vmatpush3.msra.mxu1 %v13627_v14  ;;  %11684 = vmatpush3.msra.mxu0 %v13517_v2  ;;  %v1175_v2 = vld [vmem:[%s13632_s19 + $0x250] sm:$0xff] }
  0x97   : > { %11656 = vmatprep.subr.mxu1 %v13641_v15  ;;  %11685 = vmatprep.subr.mxu0 %v13526_v3 }
  0x98   : > { %11657 = vmatpush3.msra.mxu1 %v13641_v15  ;;  %11618 = vmatmul.mubr.f32.gmra.mxu0 %v1001_v0 }
  0x99   : > { %11659 = vmatmul.mubr.f32.vlgmr.msra.gmra.mxu1 %v1172_v34  ;;  %11620 = vmatprep.mubr.f32.mxu0 %v1002_v35 }
  0x9a   : > { %11661 = vmatprep.mubr.f32.mxu1 %v1173_v1  ;;  %11686 = vmatpush3.msra.mxu0 %v13526_v3  ;;  %v10066_v3 = vld [vmem:[%s16475_s2 + $0x8] sm:$0xff] }
  0x9b   : > { %11687 = vmatprep.subr.mxu0 %v13535_v4  ;;  %11732 = vmatprep.subr.mxu1 %v13409_v43 }
  0x9c   : > { %11621 = vmatmul.mubr.f32.gmra.mxu0 %v1003_v36  ;;  %11733 = vmatpush3.msra.mxu1 %v10066_v3 }
  0x9d   : > { %11662 = vmatmul.mubr.f32.gmra.mxu1 %v1174_v37  ;;  %11623 = vmatprep.mubr.f32.mxu0 %v1004_v38 }
  0x9e   : > { %11664 = vmatprep.mubr.f32.mxu1 %v1175_v2  ;;  %11688 = vmatpush3.msra.mxu0 %v13535_v4  ;;  %v1178_v4 = vld [vmem:[%s13632_s19 + $0x268] sm:$0xff] }
  0x9f   : > { %11689 = vmatprep.subr.mxu0 %v13544_v5  ;;  %11838 = vmatprep.subr.mxu1 %v13409_v43 }
  0xa0   : > { %11624 = vmatmul.mubr.f32.gmra.mxu0 %v1005_v39 }
  0xa1   : > { %11665 = vmatmul.mubr.f32.gmra.mxu1 %v1176_v40  ;;  %11690 = vmatpush3.msra.mxu0 %v13544_v5  ;;  %v1180_v5 = vld [vmem:[%s13632_s19 + $0x278] sm:$0xff] }
  0xa2   : > { %11691 = vmatprep.subr.mxu0 %v13553_v6  ;;  %11711 = vmatprep.mubr.f32.mxu0 %v1350_v41  ;;  %v10119_v41 = vld [vmem:[%s16475_s2 + $0x18] sm:$0xff] }
  0xa3   : > { %11692 = vmatpush3.msra.mxu0 %v13553_v6  ;;  %11667 = vmatprep.mubr.f32.mxu1 %v1177_v42  ;;  %v1182_v6 = vld [vmem:[%s13632_s19 + $0x288] sm:$0xff] }
  0xa4   : > { %11693 = vmatprep.subr.mxu0 %v13562_v7 }
  0xa5   : > { %11694 = vmatpush3.msra.mxu0 %v13562_v7  ;;  %11668 = vmatmul.mubr.f32.gmra.mxu1 %v1178_v4  ;;  %v1183_v7 = vld [vmem:[%s13632_s19 + $0x290] sm:$0xff] }
  0xa6   : > { %11695 = vmatprep.subr.mxu0 %v13571_v8  ;;  %11670 = vmatprep.mubr.f32.mxu1 %v1179_v44 }
  0xa7   : > { %11696 = vmatpush3.msra.mxu0 %v13571_v8  ;;  %v1184_v8 = vld [vmem:[%s13632_s19 + $0x298] sm:$0xff] }
  0xa8   : > { %11697 = vmatprep.subr.mxu0 %v13581_v9 }
  0xa9   : > { %11698 = vmatpush3.msra.mxu0 %v13581_v9  ;;  %11671 = vmatmul.mubr.f32.gmra.mxu1 %v1180_v5  ;;  %v1351_v9 = vld [vmem:[%s13632_s19 + $0x2a8] sm:$0xff] }
  0xaa   : > { %11699 = vmatprep.subr.mxu0 %v13590_v10  ;;  %11673 = vmatprep.mubr.f32.mxu1 %v1181_v45 }
  0xab   : > { %11700 = vmatpush3.msra.mxu0 %v13590_v10  ;;  %v1352_v10 = vld [vmem:[%s13632_s19 + $0x2b0] sm:$0xff] }
  0xac   : > { %11701 = vmatprep.subr.mxu0 %v13600_v11 }
  0xad   : > { %11702 = vmatpush3.msra.mxu0 %v13600_v11  ;;  %11674 = vmatmul.mubr.f32.gmra.mxu1 %v1182_v6  ;;  %v1909_v11 = vld [vmem:[%s16475_s2] sm:$0xff] }
  0xae   : > { %11703 = vmatprep.subr.mxu0 %v13609_v12  ;;  %11676 = vmatprep.mubr.f32.mxu1 %v1183_v7 }
  0xaf   : > { %11704 = vmatpush3.msra.mxu0 %v13609_v12  ;;  %v1353_v12 = vld [vmem:[%s13632_s19 + $0x2b8] sm:$0xff] }
  0xb0   : > { %11705 = vmatprep.subr.mxu0 %v13618_v13 }
  0xb1   : > { %11706 = vmatpush3.msra.mxu0 %v13618_v13  ;;  %11677 = vmatmul.mubr.f32.gmra.mxu1 %v1184_v8  ;;  %v1354_v13 = vld [vmem:[%s13632_s19 + $0x2c0] sm:$0xff] }
  0xb2   : > { %11707 = vmatprep.subr.mxu0 %v13627_v14  ;;  %11734 = vmatprep.mubr.msk.f32.mxu1 %vm13410_vm0, %v13409_v43 }
  0xb3   : > { %11708 = vmatpush3.msra.mxu0 %v13627_v14  ;;  %v1355_v14 = vld [vmem:[%s13632_s19 + $0x2c8] sm:$0xff] }
  0xb4   : > { %11709 = vmatprep.subr.mxu0 %v13641_v15 }
  0xb5   : > { %11710 = vmatpush3.msra.mxu0 %v13641_v15  ;;  %v1357_v15 = vld [vmem:[%s13632_s19 + $0x2d8] sm:$0xff] }
  0xb6   : > { %11712 = vmatmul.mubr.f32.vlgmr.msra.gmra.mxu0 %v1351_v9  ;;  %11785 = vmatprep.subr.mxu0 %v13409_v43 }
  0xb7   : > { %11714 = vmatprep.mubr.f32.mxu0 %v1352_v10  ;;  %11786 = vmatpush3.msra.mxu0 %v1909_v11 }
  0xb8   : > { %11891 = vmatprep.subr.mxu0 %v13409_v43 }
  0xba   : > { %11715 = vmatmul.mubr.f32.gmra.mxu0 %v1353_v12 }
  0xbb   : > { %11717 = vmatprep.mubr.f32.mxu0 %v1354_v13 }
  0xbe   : > { %11718 = vmatmul.mubr.f32.gmra.mxu0 %v1355_v14 }
  0xbf   : > { %11720 = vmatprep.mubr.f32.mxu0 %v1356_v46 }
  0xc2   : > { %11721 = vmatmul.mubr.f32.gmra.mxu0 %v1357_v15 }
  0xc3   : > { %11723 = vmatprep.mubr.f32.mxu0 %v1358_v47 }
  0xc6   : > { %11724 = vmatmul.mubr.f32.gmra.mxu0 %v1359_v48 }
  0xc7   : > { %11726 = vmatprep.mubr.f32.mxu0 %v1360_v49 }
  0xca   : > { %11727 = vmatmul.mubr.f32.gmra.mxu0 %v1361_v50 }
  0xcb   : > { %11729 = vmatprep.mubr.f32.mxu0 %v1362_v51  ;;  %v10101_v51 = vld [vmem:[%s16475_s2 + $0x10] sm:$0xff] }
  0xce   : > { %11730 = vmatmul.mubr.f32.gmra.mxu0 %v1363_v52 }
  0xcf   : > { %11787 = vmatprep.mubr.msk.f32.mxu0 %vm13410_vm0, %v13409_v43 }
  0xf5   : > { %v11395_v53 = vpop.f32.mrf.mxu0  ;;  %v11448_v54 = vpop.f32.mrf.mxu1 }
  0xf6   : > { %442 = vst [vmem:[#allocation2 + $0x8] sm:$0xff] %v11395_v53  ;;  %621 = vst [vmem:[#allocation2 + $0x78] sm:$0xff] %v11448_v54 }
  0xf7   : > { %v372_v55 = vpop.f32.mrf.mxu0  ;;  %v551_v56 = vpop.f32.mrf.mxu1 }
  0xf8   : > { %441 = vst [vmem:[#allocation2] sm:$0xff] %v372_v55  ;;  %620 = vst [vmem:[#allocation2 + $0x70] sm:$0xff] %v551_v56 }
  0xfb   : > { %v11398_v57 = vpop.f32.mrf.mxu0  ;;  %v11451_v58 = vpop.f32.mrf.mxu1 }
  0xfc   : > { %444 = vst [vmem:[#allocation2 + $0x18] sm:$0xff] %v11398_v57  ;;  %623 = vst [vmem:[#allocation2 + $0x88] sm:$0xff] %v11451_v58 }
  0xfd   : > { %v382_v59 = vpop.f32.mrf.mxu0  ;;  %v561_v60 = vpop.f32.mrf.mxu1 }
  0xfe   : > { %443 = vst [vmem:[#allocation2 + $0x10] sm:$0xff] %v382_v59  ;;  %622 = vst [vmem:[#allocation2 + $0x80] sm:$0xff] %v561_v60 }
  0xff   : > { %v1581_v19 = vld [vmem:[#allocation2 + $0x70] ss:$2 sm:$0xff]  ;;  %v1585_v20 = vld [vmem:[#allocation2 + $0x71] ss:$2 sm:$0xff]  ;;  %v1529_v21 = vld [vmem:[#allocation2] ss:$2 sm:$0xff] }
 0x100   : > { %v1533_v22 = vld [vmem:[#allocation2 + $0x1] ss:$2 sm:$0xff]  ;;  %v1596_v25 = vmax.f32 %v1581_v19, %v1585_v20 }
 0x101   : > { %v11401_v61 = vpop.f32.mrf.mxu0  ;;  %v11454_v62 = vpop.f32.mrf.mxu1  ;;  %v1544_v29 = vmax.f32 %v1529_v21, %v1533_v22 }
 0x102   : > { %446 = vst [vmem:[#allocation2 + $0x28] sm:$0xff] %v11401_v61  ;;  %625 = vst [vmem:[#allocation2 + $0x98] sm:$0xff] %v11454_v62 }
 0x103   : > { %v392_v63 = vpop.f32.mrf.mxu0  ;;  %v571_v16 = vpop.f32.mrf.mxu1 }
 0x104   : > { %445 = vst [vmem:[#allocation2 + $0x20] sm:$0xff] %v392_v63  ;;  %624 = vst [vmem:[#allocation2 + $0x90] sm:$0xff] %v571_v16 }
 0x105   : > { %v1583_v34 = vld [vmem:[#allocation2 + $0x80] ss:$2 sm:$0x3f]  ;;  %v1587_v35 = vld [vmem:[#allocation2 + $0x81] ss:$2 sm:$0x3f] }
 0x106   : > { %v1531_v36 = vld [vmem:[#allocation2 + $0x10] ss:$2 sm:$0x3f]  ;;  %v1535_v37 = vld [vmem:[#allocation2 + $0x11] ss:$2 sm:$0x3f]  ;;  %v1597_v42 = vmax.f32 %v1583_v34, %v1587_v35 }
 0x107   : > { %v11404_v17 = vpop.f32.mrf.mxu0  ;;  %v11457_v18 = vpop.f32.mrf.mxu1  ;;  %v1545_v44 = vmax.f32 %v1531_v36, %v1535_v37 }
 0x108   : > { %448 = vst [vmem:[#allocation2 + $0x38] sm:$0xff] %v11404_v17  ;;  %627 = vst [vmem:[#allocation2 + $0xa8] sm:$0xff] %v11457_v18 }
 0x109   : > { %v402_v23 = vpop.f32.mrf.mxu0  ;;  %v581_v24 = vpop.f32.mrf.mxu1 }
 0x10a   : > { %447 = vst [vmem:[#allocation2 + $0x30] sm:$0xff] %v402_v23  ;;  %626 = vst [vmem:[#allocation2 + $0xa0] sm:$0xff] %v581_v24 }
 0x10b   : > { %v1537_v26 = vld [vmem:[#allocation2 + $0x1c] ss:$2 sm:$0xff]  ;;  %v1541_v27 = vld [vmem:[#allocation2 + $0x1d] ss:$2 sm:$0xff]  ;;  %v1589_v28 = vld [vmem:[#allocation2 + $0x8c] ss:$2 sm:$0xff] }
 0x10c   : > { %v1546_v30 = vmax.f32 %v1537_v26, %v1541_v27  ;;  %v1593_v31 = vld [vmem:[#allocation2 + $0x8d] ss:$2 sm:$0xff] }
 0x10d   : > { %v1598_v32 = vmax.f32 %v1589_v28, %v1593_v31  ;;  %v11407_v33 = vpop.f32.mrf.mxu0  ;;  %v11460_v0 = vpop.f32.mrf.mxu1 }
 0x10e   : > { %v1548_v1 = vmax.f32 %v1544_v29, %v1546_v30  ;;  %450 = vst [vmem:[#allocation2 + $0x48] sm:$0xff] %v11407_v33  ;;  %629 = vst [vmem:[#allocation2 + $0xb8] sm:$0xff] %v11460_v0 }
 0x10f   : > { %v412_v38 = vpop.f32.mrf.mxu0  ;;  %v591_v2 = vpop.f32.mrf.mxu1  ;;  %v1600_v39 = vmax.f32 %v1596_v25, %v1598_v32 }
 0x110   : > { %v1550_v40 = vmax.f32 %v1548_v1, 0.0  ;;  %449 = vst [vmem:[#allocation2 + $0x40] sm:$0xff] %v412_v38  ;;  %628 = vst [vmem:[#allocation2 + $0xb0] sm:$0xff] %v591_v2 }
 0x111   : > { %v1539_v3 = vld [vmem:[#allocation2 + $0x2c] ss:$2 sm:$0x3f]  ;;  %v1543_v4 = vld [vmem:[#allocation2 + $0x2d] ss:$2 sm:$0x3f] }
 0x112   : > { %1552 = vst [vmem:[#allocation3] sm:$0xff] %v1550_v40  ;;  %v1547_v5 = vmax.f32 %v1539_v3, %v1543_v4  ;;  %v1591_v45 = vld [vmem:[#allocation2 + $0x9c] ss:$2 sm:$0x3f]  ;;  %11788 = vmatmul.mubr.msk.f32.vlgmr.msra.gmra.mxu0 %vm1929_vm1, %v1550_v40  ;;  %v1602_v10 = vmax.f32 %v1600_v39, 0.0 }
 0x113   : > { %v1595_v6 = vld [vmem:[#allocation2 + $0x9d] ss:$2 sm:$0x3f]  ;;  %v11410_v8 = vpop.f32.mrf.mxu0  ;;  %v11463_v9 = vpop.f32.mrf.mxu1  ;;  %11790 = vmatprep.mubr.msk.f32.mxu0 %vm13410_vm0, %v13409_v43  ;;  %11892 = vmatpush3.msra.mxu0 %v10119_v41 }
 0x114   : > { %v1599_v7 = vmax.f32 %v1591_v45, %v1595_v6  ;;  %v1549_v11 = vmax.f32 %v1545_v44, %v1547_v5  ;;  %452 = vst [vmem:[#allocation2 + $0x58] sm:$0xff] %v11410_v8  ;;  %631 = vst [vmem:[#allocation2 + $0xc8] sm:$0xff] %v11463_v9  ;;  %11997 = vmatprep.subr.mxu0 %v13409_v43 }
 0x115   : > { %v422_v12 = vpop.f32.mrf.mxu0  ;;  %v601_v13 = vpop.f32.mrf.mxu1  ;;  %1604 = vst [vmem:[#allocation3 + $0x1c] sm:$0xff] %v1602_v10 }
 0x116   : > { %v1601_v14 = vmax.f32 %v1597_v42, %v1599_v7  ;;  %v1551_v46 = vmax.f32 %v1549_v11, 0.0  ;;  %451 = vst [vmem:[#allocation2 + $0x50] sm:$0xff] %v422_v12  ;;  %630 = vst [vmem:[#allocation2 + $0xc0] sm:$0xff] %v601_v13 }
 0x117   : > { %v1555_v52 = vld [vmem:[#allocation2 + $0x38] ss:$2 sm:$0xff]  ;;  %v1559_v54 = vld [vmem:[#allocation2 + $0x39] ss:$2 sm:$0xff]  ;;  %v1607_v55 = vld [vmem:[#allocation2 + $0xa8] ss:$2 sm:$0xff] }
 0x118   : > { %1553 = vst [vmem:[#allocation3 + $0x8] sm:$0x3f] %v1551_v46  ;;  %v1603_v15 = vmax.f32 %v1601_v14, 0.0  ;;  %v1611_v56 = vld [vmem:[#allocation2 + $0xa9] ss:$2 sm:$0xff]  ;;  %v1570_v17 = vmax.f32 %v1555_v52, %v1559_v54 }
 0x119   : > { %v11413_v47 = vpop.f32.mrf.mxu0  ;;  %v11466_v48 = vpop.f32.mrf.mxu1  ;;  %v1622_v18 = vmax.f32 %v1607_v55, %v1611_v56 }
 0x11a   : > { %454 = vst [vmem:[#allocation2 + $0x68] sm:$0xff] %v11413_v47  ;;  %633 = vst [vmem:[#allocation2 + $0xd8] sm:$0xff] %v11466_v48 }
 0x11b   : > { %1605 = vst [vmem:[#allocation3 + $0x24] sm:$0x3f] %v1603_v15  ;;  %v432_v49 = vpop.f32.mrf.mxu0  ;;  %v611_v50 = vpop.f32.mrf.mxu1 }
 0x11c   : > { %453 = vst [vmem:[#allocation2 + $0x60] sm:$0xff] %v432_v49  ;;  %632 = vst [vmem:[#allocation2 + $0xd0] sm:$0xff] %v611_v50 }
 0x11d   : > { %v1557_v57 = vld [vmem:[#allocation2 + $0x48] ss:$2 sm:$0x3f]  ;;  %v1561_v58 = vld [vmem:[#allocation2 + $0x49] ss:$2 sm:$0x3f] }
 0x11e   : > { %v1609_v59 = vld [vmem:[#allocation2 + $0xb8] ss:$2 sm:$0x3f]  ;;  %v1613_v60 = vld [vmem:[#allocation2 + $0xb9] ss:$2 sm:$0x3f]  ;;  %v1571_v21 = vmax.f32 %v1557_v57, %v1561_v58 }
 0x11f   : > { %v1910_v53 = vld [vmem:[#allocation3 + $0x1] sm:$0xff]  ;;  %v1623_v22 = vmax.f32 %v1609_v59, %v1613_v60 }
 0x120   : > { %11735 = vmatmul.mubr.msk.f32.vlgmr.msra.gmra.mxu1 %vm1929_vm1, %v1910_v53 }
 0x121   : > { %11737 = vmatprep.mubr.msk.f32.mxu1 %vm13410_vm0, %v13409_v43  ;;  %11839 = vmatpush3.msra.mxu1 %v10101_v51 }
 0x122   : > { %11944 = vmatprep.subr.mxu1 %v13409_v43 }
 0x123   : > { %v1563_v61 = vld [vmem:[#allocation2 + $0x54] ss:$2 sm:$0xff]  ;;  %v1565_v62 = vld [vmem:[#allocation2 + $0x64] ss:$2 sm:$0x3f]  ;;  %v11501_v63 = vpop.f32.mrf.mxu0  ;;  %v11554_v16 = vpop.f32.mrf.mxu1 }
 0x124   : > { %v1567_v19 = vld [vmem:[#allocation2 + $0x55] ss:$2 sm:$0xff]  ;;  %v1569_v20 = vld [vmem:[#allocation2 + $0x65] ss:$2 sm:$0x3f]  ;;  %800 = vst [vmem:[#allocation2 + $0xe8] sm:$0xff] %v11501_v63 }
 0x125   : > { %979 = vst [vmem:[#allocation2 + $0x158] sm:$0xff] %v11554_v16  ;;  %v1572_v23 = vmax.f32 %v1563_v61, %v1567_v19  ;;  %v1573_v24 = vmax.f32 %v1565_v62, %v1569_v20  ;;  %v1615_v25 = vld [vmem:[#allocation2 + $0xc4] ss:$2 sm:$0xff]  ;;  %v1617_v26 = vld [vmem:[#allocation2 + $0xd4] ss:$2 sm:$0x3f]  ;;  %v730_v27 = vpop.f32.mrf.mxu0  ;;  %v909_v28 = vpop.f32.mrf.mxu1 }
 0x126   : > { %v1619_v29 = vld [vmem:[#allocation2 + $0xc5] ss:$2 sm:$0xff]  ;;  %v1621_v30 = vld [vmem:[#allocation2 + $0xd5] ss:$2 sm:$0x3f]  ;;  %799 = vst [vmem:[#allocation2 + $0xe0] sm:$0xff] %v730_v27 }
 0x127   : > { %978 = vst [vmem:[#allocation2 + $0x150] sm:$0xff] %v909_v28  ;;  %v1624_v31 = vmax.f32 %v1615_v25, %v1619_v29  ;;  %v1625_v32 = vmax.f32 %v1617_v26, %v1621_v30  ;;  %v11557_v33 = vpop.f32.mrf.mxu1  ;;  %v1574_v0 = vmax.f32 %v1570_v17, %v1572_v23  ;;  %v1575_v34 = vmax.f32 %v1571_v21, %v1573_v24 }
 0x128   : > { %v11504_v35 = vpop.f32.mrf.mxu0  ;;  %981 = vst [vmem:[#allocation2 + $0x168] sm:$0xff] %v11557_v33 }
 0x129   : > { %802 = vst [vmem:[#allocation2 + $0xf8] sm:$0xff] %v11504_v35  ;;  %v919_v1 = vpop.f32.mrf.mxu1  ;;  %v1576_v36 = vmax.f32 %v1574_v0, 0.0  ;;  %v1577_v37 = vmax.f32 %v1575_v34, 0.0  ;;  %v13937_v38 = vmax.f32 %v1622_v18, %v1624_v31  ;;  %v1627_v2 = vmax.f32 %v1623_v22, %v1625_v32 }
 0x12a   : > { %v740_v39 = vpop.f32.mrf.mxu0  ;;  %980 = vst [vmem:[#allocation2 + $0x160] sm:$0xff] %v919_v1  ;;  %v1914_v1 = vld [vmem:[#allocation3 + $0x21] sm:$0xff] }
 0x12b   : > { %801 = vst [vmem:[#allocation2 + $0xf0] sm:$0xff] %v740_v39  ;;  %v11560_v40 = vpop.f32.mrf.mxu1  ;;  %1578 = vst [vmem:[#allocation3 + $0xe] sm:$0xff] %v1576_v36  ;;  %v1628_v41 = vmax.f32 %v13937_v38, 0.0  ;;  %v1629_v42 = vmax.f32 %v1627_v2, 0.0  ;;  %v1896_v36 = vld [vmem:[#allocation3 + $0x20] sm:$0xff] }
 0x12c   : > { %1579 = vst [vmem:[#allocation3 + $0x16] sm:$0x3f] %v1577_v37  ;;  %v11507_v3 = vpop.f32.mrf.mxu0  ;;  %983 = vst [vmem:[#allocation2 + $0x178] sm:$0xff] %v11560_v40 }
 0x12d   : > { %804 = vst [vmem:[#allocation2 + $0x108] sm:$0xff] %v11507_v3  ;;  %v929_v4 = vpop.f32.mrf.mxu1  ;;  %1630 = vst [vmem:[#allocation3 + $0x2a] sm:$0xff] %v1628_v41  ;;  %v1633_v9 = vld [vmem:[#allocation2 + $0xe0] ss:$2 sm:$0xff]  ;;  %v1637_v11 = vld [vmem:[#allocation2 + $0xe1] ss:$2 sm:$0xff] }
 0x12e   : > { %1631 = vst [vmem:[#allocation3 + $0x32] sm:$0x3f] %v1629_v42  ;;  %v750_v44 = vpop.f32.mrf.mxu0  ;;  %982 = vst [vmem:[#allocation2 + $0x170] sm:$0xff] %v929_v4  ;;  %v1685_v6 = vld [vmem:[#allocation2 + $0x150] ss:$2 sm:$0xff]  ;;  %v1648_v56 = vmax.f32 %v1633_v9, %v1637_v11 }
 0x12f   : > { %803 = vst [vmem:[#allocation2 + $0x100] sm:$0xff] %v750_v44  ;;  %v11563_v5 = vpop.f32.mrf.mxu1  ;;  %v1689_v7 = vld [vmem:[#allocation2 + $0x151] ss:$2 sm:$0xff] }
 0x130   : > { %v11510_v45 = vpop.f32.mrf.mxu0  ;;  %985 = vst [vmem:[#allocation2 + $0x188] sm:$0xff] %v11563_v5  ;;  %v1700_v46 = vmax.f32 %v1685_v6, %v1689_v7 }
 0x131   : > { %806 = vst [vmem:[#allocation2 + $0x118] sm:$0xff] %v11510_v45  ;;  %v939_v8 = vpop.f32.mrf.mxu1  ;;  %v1687_v15 = vld [vmem:[#allocation2 + $0x160] ss:$2 sm:$0x3f] }
 0x132   : > { %v760_v10 = vpop.f32.mrf.mxu0  ;;  %984 = vst [vmem:[#allocation2 + $0x180] sm:$0xff] %v939_v8  ;;  %v1911_v13 = vld [vmem:[#allocation3 + $0x9] sm:$0xff]  ;;  %v1691_v47 = vld [vmem:[#allocation2 + $0x161] ss:$2 sm:$0x3f] }
 0x133   : > { %805 = vst [vmem:[#allocation2 + $0x110] sm:$0xff] %v760_v10  ;;  %v11566_v12 = vpop.f32.mrf.mxu1  ;;  %v1893_v14 = vld [vmem:[#allocation3 + $0x8] sm:$0xff]  ;;  %11738 = vmatmul.mubr.msk.f32.gmra.mxu1 %vm1929_vm1, %v1911_v13  ;;  %v1912_v58 = vld [vmem:[#allocation3 + $0x11] sm:$0xff]  ;;  %v1701_v62 = vmax.f32 %v1687_v15, %v1691_v47  ;;  %v1913_v28 = vld [vmem:[#allocation3 + $0x19] sm:$0xff] }
 0x134   : > { %v11513_v48 = vpop.f32.mrf.mxu0  ;;  %987 = vst [vmem:[#allocation2 + $0x198] sm:$0xff] %v11566_v12  ;;  %11791 = vmatmul.mubr.msk.f32.gmra.mxu0 %vm1929_vm1, %v1893_v14  ;;  %11740 = vmatprep.mubr.msk.f32.mxu1 %vm13410_vm0, %v13409_v43  ;;  %v1894_v59 = vld [vmem:[#allocation3 + $0x10] sm:$0xff]  ;;  %v1635_v60 = vld [vmem:[#allocation2 + $0xf0] ss:$2 sm:$0x3f]  ;;  %v1895_v29 = vld [vmem:[#allocation3 + $0x18] sm:$0xff] }
 0x135   : > { %v1693_v49 = vld [vmem:[#allocation2 + $0x16c] ss:$2 sm:$0xff]  ;;  %v1697_v50 = vld [vmem:[#allocation2 + $0x16d] ss:$2 sm:$0xff]  ;;  %808 = vst [vmem:[#allocation2 + $0x128] sm:$0xff] %v11513_v48  ;;  %v949_v51 = vpop.f32.mrf.mxu1  ;;  %11793 = vmatprep.mubr.msk.f32.mxu0 %vm13410_vm0, %v13409_v43  ;;  %v1898_v3 = vld [vmem:[#allocation3 + $0x30] sm:$0xff] }
 0x136   : > { %v1641_v52 = vld [vmem:[#allocation2 + $0xfc] ss:$2 sm:$0xff]  ;;  %v1645_v53 = vld [vmem:[#allocation2 + $0xfd] ss:$2 sm:$0xff]  ;;  %v1702_v54 = vmax.f32 %v1693_v49, %v1697_v50  ;;  %v770_v55 = vpop.f32.mrf.mxu0  ;;  %986 = vst [vmem:[#allocation2 + $0x190] sm:$0xff] %v949_v51 }
 0x137   : > { %v1650_v57 = vmax.f32 %v1641_v52, %v1645_v53  ;;  %807 = vst [vmem:[#allocation2 + $0x120] sm:$0xff] %v770_v55  ;;  %v1639_v61 = vld [vmem:[#allocation2 + $0xf1] ss:$2 sm:$0x3f]  ;;  %11741 = vmatmul.mubr.msk.f32.gmra.mxu1 %vm1929_vm1, %v1912_v58 }
 0x138   : > { %11794 = vmatmul.mubr.msk.f32.gmra.mxu0 %vm1929_vm1, %v1894_v59  ;;  %v13950_v63 = vmax.f32 %v1700_v46, %v1702_v54  ;;  %11743 = vmatprep.mubr.msk.f32.mxu1 %vm13410_vm0, %v13409_v43  ;;  %v1649_v24 = vmax.f32 %v1635_v60, %v1639_v61  ;;  %v1915_v40 = vld [vmem:[#allocation3 + $0x29] sm:$0xff] }
 0x139   : > { %v1695_v16 = vld [vmem:[#allocation2 + $0x17c] ss:$2 sm:$0x3f]  ;;  %v1699_v17 = vld [vmem:[#allocation2 + $0x17d] ss:$2 sm:$0x3f]  ;;  %v11516_v18 = vpop.f32.mrf.mxu0  ;;  %v11569_v19 = vpop.f32.mrf.mxu1  ;;  %11796 = vmatprep.mubr.msk.f32.mxu0 %vm13410_vm0, %v13409_v43  ;;  %v13956_v20 = vmax.f32 %v1648_v56, %v1650_v57 }
 0x13a   : > { %v1643_v21 = vld [vmem:[#allocation2 + $0x10c] ss:$2 sm:$0x3f]  ;;  %v1647_v22 = vld [vmem:[#allocation2 + $0x10d] ss:$2 sm:$0x3f]  ;;  %v1703_v23 = vmax.f32 %v1695_v16, %v1699_v17 }
 0x13b   : > { %810 = vst [vmem:[#allocation2 + $0x138] sm:$0xff] %v11516_v18  ;;  %989 = vst [vmem:[#allocation2 + $0x1a8] sm:$0xff] %v11569_v19  ;;  %v1651_v25 = vmax.f32 %v1643_v21, %v1647_v22  ;;  %v780_v26 = vpop.f32.mrf.mxu0  ;;  %v959_v27 = vpop.f32.mrf.mxu1  ;;  %v1654_v30 = vmax.f32 %v13956_v20, 0.0  ;;  %v1706_v31 = vmax.f32 %v13950_v63, 0.0  ;;  %11744 = vmatmul.mubr.msk.f32.gmra.mxu1 %vm1929_vm1, %v1913_v28  ;;  %v1897_v42 = vld [vmem:[#allocation3 + $0x28] sm:$0xff] }
 0x13c   : > { %809 = vst [vmem:[#allocation2 + $0x130] sm:$0xff] %v780_v26  ;;  %988 = vst [vmem:[#allocation2 + $0x1a0] sm:$0xff] %v959_v27  ;;  %11797 = vmatmul.mubr.msk.f32.gmra.mxu0 %vm1929_vm1, %v1895_v29  ;;  %v1705_v32 = vmax.f32 %v1701_v62, %v1703_v23  ;;  %11746 = vmatprep.mubr.msk.f32.mxu1 %vm13410_vm0, %v13409_v43 }
 0x13d   : > { %11799 = vmatprep.mubr.msk.f32.mxu0 %vm13410_vm0, %v13409_v43  ;;  %1656 = vst [vmem:[#allocation3 + $0x38] sm:$0xff] %v1654_v30  ;;  %v1653_v33 = vmax.f32 %v1649_v24, %v1651_v25  ;;  %1708 = vst [vmem:[#allocation3 + $0x54] sm:$0xff] %v1706_v31  ;;  %v1711_v44 = vld [vmem:[#allocation2 + $0x188] ss:$2 sm:$0xff]  ;;  %v1715_v5 = vld [vmem:[#allocation2 + $0x189] ss:$2 sm:$0xff] }
 0x13e   : > { %v1707_v0 = vmax.f32 %v1705_v32, 0.0  ;;  %v1659_v4 = vld [vmem:[#allocation2 + $0x118] ss:$2 sm:$0xff]  ;;  %v1663_v45 = vld [vmem:[#allocation2 + $0x119] ss:$2 sm:$0xff]  ;;  %v1726_v14 = vmax.f32 %v1711_v44, %v1715_v5 }
 0x13f   : > { %v11519_v34 = vpop.f32.mrf.mxu0  ;;  %v11572_v35 = vpop.f32.mrf.mxu1  ;;  %v1655_v37 = vmax.f32 %v1653_v33, 0.0  ;;  %11747 = vmatmul.mubr.msk.f32.gmra.mxu1 %vm1929_vm1, %v1914_v1  ;;  %v1674_v48 = vmax.f32 %v1659_v4, %v1663_v45 }
 0x140   : > { %812 = vst [vmem:[#allocation2 + $0x148] sm:$0xff] %v11519_v34  ;;  %991 = vst [vmem:[#allocation2 + $0x1b8] sm:$0xff] %v11572_v35  ;;  %11800 = vmatmul.mubr.msk.f32.gmra.mxu0 %vm1929_vm1, %v1896_v36  ;;  %11749 = vmatprep.mubr.msk.f32.mxu1 %vm13410_vm0, %v13409_v43 }
 0x141   : > { %1709 = vst [vmem:[#allocation3 + $0x5c] sm:$0x3f] %v1707_v0  ;;  %v790_v2 = vpop.f32.mrf.mxu0  ;;  %v969_v39 = vpop.f32.mrf.mxu1  ;;  %11802 = vmatprep.mubr.msk.f32.mxu0 %vm13410_vm0, %v13409_v43  ;;  %1657 = vst [vmem:[#allocation3 + $0x40] sm:$0x3f] %v1655_v37 }
 0x142   : > { %811 = vst [vmem:[#allocation2 + $0x140] sm:$0xff] %v790_v2  ;;  %990 = vst [vmem:[#allocation2 + $0x1b0] sm:$0xff] %v969_v39 }
 0x143   : > { %11750 = vmatmul.mubr.msk.f32.gmra.mxu1 %vm1929_vm1, %v1915_v40  ;;  %v1661_v6 = vld [vmem:[#allocation2 + $0x128] ss:$2 sm:$0x3f]  ;;  %v1665_v7 = vld [vmem:[#allocation2 + $0x129] ss:$2 sm:$0x3f] }
 0x144   : > { %11803 = vmatmul.mubr.msk.f32.gmra.mxu0 %vm1929_vm1, %v1897_v42  ;;  %11752 = vmatprep.mubr.msk.f32.mxu1 %vm13410_vm0, %v13409_v43  ;;  %v1916_v8 = vld [vmem:[#allocation3 + $0x31] sm:$0xff]  ;;  %v1675_v55 = vmax.f32 %v1661_v6, %v1665_v7 }
 0x145   : > { %11805 = vmatprep.mubr.msk.f32.mxu0 %vm13410_vm0, %v13409_v43  ;;  %v1713_v9 = vld [vmem:[#allocation2 + $0x198] ss:$2 sm:$0x3f]  ;;  %v1717_v10 = vld [vmem:[#allocation2 + $0x199] ss:$2 sm:$0x3f] }
 0x146   : > { %v1727_v49 = vmax.f32 %v1713_v9, %v1717_v10 }
 0x147   : > { %11753 = vmatmul.mubr.msk.f32.gmra.mxu1 %vm1929_vm1, %v1916_v8 }
 0x148   : > { %v11607_v11 = vpop.f32.mrf.mxu0  ;;  %11806 = vmatmul.mubr.msk.f32.gmra.mxu0 %vm1929_vm1, %v1898_v3  ;;  %11755 = vmatprep.mubr.msk.f32.mxu1 %vm13410_vm0, %v13409_v43  ;;  %v1917_v54 = vld [vmem:[#allocation3 + $0x39] sm:$0xff] }
 0x149   : > { %v1667_v12 = vld [vmem:[#allocation2 + $0x134] ss:$2 sm:$0xff]  ;;  %v1669_v13 = vld [vmem:[#allocation2 + $0x144] ss:$2 sm:$0x3f]  ;;  %1158 = vst [vmem:[#allocation2 + $0x1c8] sm:$0xff] %v11607_v11  ;;  %11808 = vmatprep.mubr.msk.f32.mxu0 %vm13410_vm0, %v13409_v43 }
 0x14a   : > { %v1671_v46 = vld [vmem:[#allocation2 + $0x135] ss:$2 sm:$0xff]  ;;  %v1673_v15 = vld [vmem:[#allocation2 + $0x145] ss:$2 sm:$0x3f]  ;;  %v1088_v47 = vpop.f32.mrf.mxu0 }
 0x14b   : > { %v1676_v50 = vmax.f32 %v1667_v12, %v1671_v46  ;;  %v1677_v51 = vmax.f32 %v1669_v13, %v1673_v15  ;;  %v1719_v52 = vld [vmem:[#allocation2 + $0x1a4] ss:$2 sm:$0xff]  ;;  %v1721_v53 = vld [vmem:[#allocation2 + $0x1b4] ss:$2 sm:$0x3f]  ;;  %1157 = vst [vmem:[#allocation2 + $0x1c0] sm:$0xff] %v1088_v47  ;;  %11756 = vmatmul.mubr.msk.f32.gmra.mxu1 %vm1929_vm1, %v1917_v54 }
 0x14c   : > { %v1723_v56 = vld [vmem:[#allocation2 + $0x1a5] ss:$2 sm:$0xff]  ;;  %v1725_v57 = vld [vmem:[#allocation2 + $0x1b5] ss:$2 sm:$0x3f]  ;;  %v11610_v58 = vpop.f32.mrf.mxu0  ;;  %11809 = vmatmul.mubr.msk.f32.gmra.mxu0 %vm1929_vm1, %v1654_v30  ;;  %11758 = vmatprep.mubr.msk.f32.mxu1 %vm13410_vm0, %v13409_v43 }
 0x14d   : > { %v1728_v59 = vmax.f32 %v1719_v52, %v1723_v56  ;;  %v1729_v60 = vmax.f32 %v1721_v53, %v1725_v57  ;;  %1160 = vst [vmem:[#allocation2 + $0x1d8] sm:$0xff] %v11610_v58  ;;  %11811 = vmatprep.mubr.msk.f32.mxu0 %vm13410_vm0, %v13409_v43  ;;  %v13996_v61 = vmax.f32 %v1674_v48, %v1676_v50  ;;  %v14029_v50 = vld [vmem:[#allocation3 + $0x58] sm:$0xff] }
 0x14e   : > { %v1098_v62 = vpop.f32.mrf.mxu0  ;;  %v1679_v16 = vmax.f32 %v1675_v55, %v1677_v51 }
 0x14f   : > { %1159 = vst [vmem:[#allocation2 + $0x1d0] sm:$0xff] %v1098_v62  ;;  %v1680_v17 = vmax.f32 %v13996_v61, 0.0  ;;  %v13999_v18 = vmax.f32 %v1726_v14, %v1728_v59  ;;  %v1731_v19 = vmax.f32 %v1727_v49, %v1729_v60  ;;  %v1921_v49 = vld [vmem:[#allocation3 + $0x59] sm:$0xff] }
 0x150   : > { %v11613_v20 = vpop.f32.mrf.mxu0  ;;  %v1681_v21 = vmax.f32 %v1679_v16, 0.0 }
 0x151   : > { %1162 = vst [vmem:[#allocation2 + $0x1e8] sm:$0xff] %v11613_v20  ;;  %1682 = vst [vmem:[#allocation3 + $0x46] sm:$0xff] %v1680_v17  ;;  %v1732_v22 = vmax.f32 %v13999_v18, 0.0  ;;  %v1733_v23 = vmax.f32 %v1731_v19, 0.0 }
 0x152   : > { %v1108_v24 = vpop.f32.mrf.mxu0  ;;  %1683 = vst [vmem:[#allocation3 + $0x4e] sm:$0x3f] %v1681_v21  ;;  %v1737_v27 = vld [vmem:[#allocation2 + $0x1c0] ss:$2 sm:$0xff]  ;;  %v1741_v28 = vld [vmem:[#allocation2 + $0x1c1] ss:$2 sm:$0xff] }
 0x153   : > { %1161 = vst [vmem:[#allocation2 + $0x1e0] sm:$0xff] %v1108_v24  ;;  %1734 = vst [vmem:[#allocation3 + $0x62] sm:$0xff] %v1732_v22  ;;  %v1752_v1 = vmax.f32 %v1737_v27, %v1741_v28 }
 0x154   : > { %1735 = vst [vmem:[#allocation3 + $0x6a] sm:$0x3f] %v1733_v23  ;;  %v11616_v25 = vpop.f32.mrf.mxu0 }
 0x155   : > { %1164 = vst [vmem:[#allocation2 + $0x1f8] sm:$0xff] %v11616_v25 }
 0x156   : > { %v1118_v26 = vpop.f32.mrf.mxu0  ;;  %v1739_v36 = vld [vmem:[#allocation2 + $0x1d0] ss:$2 sm:$0x3f]  ;;  %v1743_v39 = vld [vmem:[#allocation2 + $0x1d1] ss:$2 sm:$0x3f] }
 0x157   : > { %1163 = vst [vmem:[#allocation2 + $0x1f0] sm:$0xff] %v1118_v26  ;;  %v1753_v7 = vmax.f32 %v1739_v36, %v1743_v39 }
 0x158   : > { %v11619_v29 = vpop.f32.mrf.mxu0  ;;  %v1918_v30 = vld [vmem:[#allocation3 + $0x41] sm:$0xff] }
 0x159   : > { %v1900_v32 = vld [vmem:[#allocation3 + $0x40] sm:$0xff]  ;;  %1166 = vst [vmem:[#allocation2 + $0x208] sm:$0xff] %v11619_v29  ;;  %v11660_v33 = vpop.f32.mrf.mxu1  ;;  %11759 = vmatmul.mubr.msk.f32.gmra.mxu1 %vm1929_vm1, %v1918_v30  ;;  %v1919_v42 = vld [vmem:[#allocation3 + $0x49] sm:$0xff]  ;;  %v1920_v12 = vld [vmem:[#allocation3 + $0x51] sm:$0xff] }
 0x15a   : > { %11812 = vmatmul.mubr.msk.f32.gmra.mxu0 %vm1929_vm1, %v1900_v32  ;;  %v1745_v0 = vld [vmem:[#allocation2 + $0x1dc] ss:$2 sm:$0xff]  ;;  %v1749_v34 = vld [vmem:[#allocation2 + $0x1dd] ss:$2 sm:$0xff]  ;;  %1337 = vst [vmem:[#allocation2 + $0x238] sm:$0xff] %v11660_v33  ;;  %v1128_v35 = vpop.f32.mrf.mxu0  ;;  %11761 = vmatprep.mubr.msk.f32.mxu1 %vm13410_vm0, %v13409_v43  ;;  %v1922_v52 = vld [vmem:[#allocation3 + $0x61] sm:$0xff] }
 0x15b   : > { %11814 = vmatprep.mubr.msk.f32.mxu0 %vm13410_vm0, %v13409_v43  ;;  %v1754_v37 = vmax.f32 %v1745_v0, %v1749_v34  ;;  %1165 = vst [vmem:[#allocation2 + $0x200] sm:$0xff] %v1128_v35  ;;  %v1267_v2 = vpop.f32.mrf.mxu1  ;;  %v1901_v3 = vld [vmem:[#allocation3 + $0x48] sm:$0xff]  ;;  %v1902_v13 = vld [vmem:[#allocation3 + $0x50] sm:$0xff]  ;;  %v14038_v53 = vld [vmem:[#allocation3 + $0x60] sm:$0xff] }
 0x15c   : > { %1336 = vst [vmem:[#allocation2 + $0x230] sm:$0xff] %v1267_v2  ;;  %v11622_v40 = vpop.f32.mrf.mxu0  ;;  %v14047_v26 = vld [vmem:[#allocation3 + $0x68] sm:$0xff] }
 0x15d   : > { %1168 = vst [vmem:[#allocation2 + $0x218] sm:$0xff] %v11622_v40  ;;  %v11663_v4 = vpop.f32.mrf.mxu1  ;;  %11762 = vmatmul.mubr.msk.f32.gmra.mxu1 %vm1929_vm1, %v1919_v42  ;;  %v14014_v44 = vmax.f32 %v1752_v1, %v1754_v37  ;;  %v2815_v61 = vld [vmem:[#allocation3 + $0x4c] sm:$0xff] }
 0x15e   : > { %11815 = vmatmul.mubr.msk.f32.gmra.mxu0 %vm1929_vm1, %v1901_v3  ;;  %v1747_v5 = vld [vmem:[#allocation2 + $0x1ec] ss:$2 sm:$0x3f]  ;;  %v1751_v45 = vld [vmem:[#allocation2 + $0x1ed] ss:$2 sm:$0x3f]  ;;  %v1138_v6 = vpop.f32.mrf.mxu0  ;;  %11764 = vmatprep.mubr.msk.f32.mxu1 %vm13410_vm0, %v13409_v43 }
 0x15f   : > { %1339 = vst [vmem:[#allocation2 + $0x248] sm:$0xff] %v11663_v4  ;;  %11817 = vmatprep.mubr.msk.f32.mxu0 %vm13410_vm0, %v13409_v43  ;;  %v1755_v8 = vmax.f32 %v1747_v5, %v1751_v45  ;;  %1167 = vst [vmem:[#allocation2 + $0x210] sm:$0xff] %v1138_v6  ;;  %v1277_v9 = vpop.f32.mrf.mxu1  ;;  %v1758_v10 = vmax.f32 %v14014_v44, 0.0 }
 0x160   : > { %1338 = vst [vmem:[#allocation2 + $0x240] sm:$0xff] %v1277_v9  ;;  %v11625_v11 = vpop.f32.mrf.mxu0 }
 0x161   : > { %1170 = vst [vmem:[#allocation2 + $0x228] sm:$0xff] %v11625_v11  ;;  %v11666_v14 = vpop.f32.mrf.mxu1  ;;  %11765 = vmatmul.mubr.msk.f32.gmra.mxu1 %vm1929_vm1, %v1920_v12  ;;  %1760 = vst [vmem:[#allocation3 + $0x70] sm:$0xff] %v1758_v10  ;;  %v1757_v46 = vmax.f32 %v1753_v7, %v1755_v8 }
 0x162   : > { %11818 = vmatmul.mubr.msk.f32.gmra.mxu0 %vm1929_vm1, %v1902_v13  ;;  %1341 = vst [vmem:[#allocation2 + $0x258] sm:$0xff] %v11666_v14  ;;  %v1148_v15 = vpop.f32.mrf.mxu0  ;;  %11767 = vmatprep.mubr.msk.f32.mxu1 %vm13410_vm0, %v13409_v43  ;;  %v1763_v54 = vld [vmem:[#allocation2 + $0x1f8] ss:$2 sm:$0xff]  ;;  %v1767_v55 = vld [vmem:[#allocation2 + $0x1f9] ss:$2 sm:$0xff] }
 0x163   : > { %11820 = vmatprep.mubr.msk.f32.mxu0 %vm13410_vm0, %v13409_v43  ;;  %1169 = vst [vmem:[#allocation2 + $0x220] sm:$0xff] %v1148_v15  ;;  %v1287_v47 = vpop.f32.mrf.mxu1  ;;  %v1759_v48 = vmax.f32 %v1757_v46, 0.0  ;;  %v1789_v56 = vld [vmem:[#allocation2 + $0x230] ss:$2 sm:$0xff]  ;;  %v1793_v57 = vld [vmem:[#allocation2 + $0x231] ss:$2 sm:$0xff]  ;;  %v1778_v28 = vmax.f32 %v1763_v54, %v1767_v55 }
 0x164   : > { %1340 = vst [vmem:[#allocation2 + $0x250] sm:$0xff] %v1287_v47  ;;  %v1804_v23 = vmax.f32 %v1789_v56, %v1793_v57 }
 0x165   : > { %11768 = vmatmul.mubr.msk.f32.gmra.mxu1 %vm1929_vm1, %v1921_v49  ;;  %1761 = vst [vmem:[#allocation3 + $0x78] sm:$0x3f] %v1759_v48  ;;  %v11669_v51 = vpop.f32.mrf.mxu1 }
 0x166   : > { %11821 = vmatmul.mubr.msk.f32.gmra.mxu0 %vm1929_vm1, %v14029_v50  ;;  %11770 = vmatprep.mubr.msk.f32.mxu1 %vm13410_vm0, %v13409_v43  ;;  %1343 = vst [vmem:[#allocation2 + $0x268] sm:$0xff] %v11669_v51  ;;  %v1765_v59 = vld [vmem:[#allocation2 + $0x208] ss:$2 sm:$0x3f] }
 0x167   : > { %11823 = vmatprep.mubr.msk.f32.mxu0 %vm13410_vm0, %v13409_v43  ;;  %v1297_v58 = vpop.f32.mrf.mxu1  ;;  %v1769_v60 = vld [vmem:[#allocation2 + $0x209] ss:$2 sm:$0x3f]  ;;  %v1791_v62 = vld [vmem:[#allocation2 + $0x240] ss:$2 sm:$0x3f] }
 0x168   : > { %1342 = vst [vmem:[#allocation2 + $0x260] sm:$0xff] %v1297_v58  ;;  %v1795_v16 = vld [vmem:[#allocation2 + $0x241] ss:$2 sm:$0x3f]  ;;  %v1779_v29 = vmax.f32 %v1765_v59, %v1769_v60  ;;  %v1923_v34 = vld [vmem:[#allocation3 + $0x69] sm:$0xff] }
 0x169   : > { %11771 = vmatmul.mubr.msk.f32.gmra.mxu1 %vm1929_vm1, %v1922_v52  ;;  %v11672_v19 = vpop.f32.mrf.mxu1  ;;  %v1805_v36 = vmax.f32 %v1791_v62, %v1795_v16 }
 0x16a   : > { %11824 = vmatmul.mubr.msk.f32.gmra.mxu0 %vm1929_vm1, %v14038_v53  ;;  %v1771_v20 = vld [vmem:[#allocation2 + $0x214] ss:$2 sm:$0xff]  ;;  %v1773_v21 = vld [vmem:[#allocation2 + $0x224] ss:$2 sm:$0x3f]  ;;  %11773 = vmatprep.mubr.msk.f32.mxu1 %vm13410_vm0, %v13409_v43  ;;  %1345 = vst [vmem:[#allocation2 + $0x278] sm:$0xff] %v11672_v19 }
 0x16b   : > { %11826 = vmatprep.mubr.msk.f32.mxu0 %vm13410_vm0, %v13409_v43  ;;  %v1775_v24 = vld [vmem:[#allocation2 + $0x215] ss:$2 sm:$0xff]  ;;  %v1777_v25 = vld [vmem:[#allocation2 + $0x225] ss:$2 sm:$0x3f]  ;;  %v1307_v27 = vpop.f32.mrf.mxu1 }
 0x16c   : > { %v1780_v30 = vmax.f32 %v1771_v20, %v1775_v24  ;;  %v1781_v32 = vmax.f32 %v1773_v21, %v1777_v25  ;;  %v1797_v33 = vld [vmem:[#allocation2 + $0x24c] ss:$2 sm:$0xff]  ;;  %v1801_v0 = vld [vmem:[#allocation2 + $0x24d] ss:$2 sm:$0xff]  ;;  %1344 = vst [vmem:[#allocation2 + $0x270] sm:$0xff] %v1307_v27  ;;  %v1924_v4 = vld [vmem:[#allocation3 + $0x71] sm:$0xff] }
 0x16d   : > { %v1806_v35 = vmax.f32 %v1797_v33, %v1801_v0  ;;  %11774 = vmatmul.mubr.msk.f32.gmra.mxu1 %vm1929_vm1, %v1923_v34  ;;  %v11675_v1 = vpop.f32.mrf.mxu1  ;;  %v10137_v21 = vld [vmem:[%s16475_s2 + $0x20] sm:$0xff]  ;;  %v2332_v25 = vld [vmem:[#allocation3 + $0x2] sm:$0xff] }
 0x16e   : > { %11827 = vmatmul.mubr.msk.f32.gmra.mxu0 %vm1929_vm1, %v14047_v26  ;;  %11776 = vmatprep.mubr.msk.f32.mxu1 %vm13410_vm0, %v13409_v43  ;;  %v14056_v37 = vmax.f32 %v1778_v28, %v1780_v30  ;;  %v1783_v2 = vmax.f32 %v1779_v29, %v1781_v32  ;;  %1347 = vst [vmem:[#allocation2 + $0x288] sm:$0xff] %v11675_v1  ;;  %v2569_v27 = vld [vmem:[#allocation3 + $0x3] sm:$0xff]  ;;  %v10155_v28 = vld [vmem:[%s16475_s2 + $0x28] sm:$0xff]  ;;  %v2570_v1 = vld [vmem:[#allocation3 + $0xb] sm:$0xff] }
 0x16f   : > { %11829 = vmatprep.mubr.msk.f32.mxu0 %vm13410_vm0, %v13409_v43  ;;  %v1808_v39 = vmax.f32 %v1804_v23, %v1806_v35  ;;  %v1799_v40 = vld [vmem:[#allocation2 + $0x25c] ss:$2 sm:$0x3f]  ;;  %v1803_v42 = vld [vmem:[#allocation2 + $0x25d] ss:$2 sm:$0x3f]  ;;  %v1317_v3 = vpop.f32.mrf.mxu1 }
 0x170   : > { %v1784_v5 = vmax.f32 %v14056_v37, 0.0  ;;  %v1785_v45 = vmax.f32 %v1783_v2, 0.0  ;;  %v1807_v6 = vmax.f32 %v1799_v40, %v1803_v42  ;;  %1346 = vst [vmem:[#allocation2 + $0x280] sm:$0xff] %v1317_v3  ;;  %v2333_v35 = vld [vmem:[#allocation3 + $0xa] sm:$0xff]  ;;  %v2346_v18 = vld [vmem:[#allocation3 + $0x72] sm:$0xff] }
 0x171   : > { %v1810_v7 = vmax.f32 %v1808_v39, 0.0  ;;  %11777 = vmatmul.mubr.msk.f32.gmra.mxu1 %vm1929_vm1, %v1924_v4  ;;  %v11678_v8 = vpop.f32.mrf.mxu1 }
 0x172   : > { %11830 = vmatmul.mubr.msk.f32.gmra.mxu0 %vm1929_vm1, %v1758_v10  ;;  %11779 = vmatprep.mubr.msk.f32.mxu1 %vm13410_vm0, %v13409_v43  ;;  %1786 = vst [vmem:[#allocation3 + $0x7e] sm:$0xff] %v1784_v5  ;;  %1787 = vst [vmem:[#allocation3 + $0x86] sm:$0x3f] %v1785_v45  ;;  %v1809_v9 = vmax.f32 %v1805_v36, %v1807_v6  ;;  %v2334_v45 = vld [vmem:[#allocation3 + $0x12] sm:$0xff] }
 0x173   : > { %11832 = vmatprep.mubr.msk.f32.mxu0 %vm13410_vm0, %v13409_v43  ;;  %1349 = vst [vmem:[#allocation2 + $0x298] sm:$0xff] %v11678_v8  ;;  %1812 = vst [vmem:[#allocation3 + $0x8c] sm:$0xff] %v1810_v7  ;;  %v1327_v11 = vpop.f32.mrf.mxu1  ;;  %v1815_v10 = vld [vmem:[#allocation2 + $0x268] ss:$2 sm:$0xff]  ;;  %v1819_v14 = vld [vmem:[#allocation2 + $0x269] ss:$2 sm:$0xff] }
 0x174   : > { %v1811_v12 = vmax.f32 %v1809_v9, 0.0  ;;  %1348 = vst [vmem:[#allocation2 + $0x290] sm:$0xff] %v1327_v11  ;;  %v1830_v51 = vmax.f32 %v1815_v10, %v1819_v14  ;;  %v2571_v6 = vld [vmem:[#allocation3 + $0x13] sm:$0xff]  ;;  %v2572_v14 = vld [vmem:[#allocation3 + $0x1b] sm:$0xff] }
 0x176   : > { %v11713_v44 = vpop.f32.mrf.mxu0  ;;  %1813 = vst [vmem:[#allocation3 + $0x94] sm:$0x3f] %v1811_v12 }
 0x177   : > { %1516 = vst [vmem:[#allocation2 + $0x2a8] sm:$0xff] %v11713_v44  ;;  %v1817_v46 = vld [vmem:[#allocation2 + $0x278] ss:$2 sm:$0x3f] }
 0x178   : > { %v1446_v13 = vpop.f32.mrf.mxu0  ;;  %v1821_v48 = vld [vmem:[#allocation2 + $0x279] ss:$2 sm:$0x3f] }
 0x179   : > { %v1925_v15 = vld [vmem:[#allocation3 + $0x79] sm:$0xff]  ;;  %1515 = vst [vmem:[#allocation2 + $0x2a0] sm:$0xff] %v1446_v13  ;;  %v1831_v55 = vmax.f32 %v1817_v46, %v1821_v48  ;;  %v1926_v58 = vld [vmem:[#allocation3 + $0x81] sm:$0xff] }
 0x17a   : > { %v14069_v47 = vld [vmem:[#allocation3 + $0x78] sm:$0xff]  ;;  %11780 = vmatmul.mubr.msk.f32.gmra.mxu1 %vm1929_vm1, %v1925_v15  ;;  %v11716_v49 = vpop.f32.mrf.mxu0  ;;  %v14078_v59 = vld [vmem:[#allocation3 + $0x80] sm:$0xff] }
 0x17b   : > { %11833 = vmatmul.mubr.msk.f32.gmra.mxu0 %vm1929_vm1, %v14069_v47  ;;  %11782 = vmatprep.mubr.msk.f32.mxu1 %vm13410_vm0, %v13409_v43  ;;  %1518 = vst [vmem:[#allocation2 + $0x2b8] sm:$0xff] %v11716_v49  ;;  %v1823_v52 = vld [vmem:[#allocation2 + $0x284] ss:$2 sm:$0xff]  ;;  %v1825_v56 = vld [vmem:[#allocation2 + $0x294] ss:$2 sm:$0x3f] }
 0x17c   : > { %11835 = vmatprep.mubr.msk.f32.mxu0 %vm13410_vm0, %v13409_v43  ;;  %v1456_v54 = vpop.f32.mrf.mxu0  ;;  %v1827_v57 = vld [vmem:[#allocation2 + $0x285] ss:$2 sm:$0xff]  ;;  %v1829_v60 = vld [vmem:[#allocation2 + $0x295] ss:$2 sm:$0x3f] }
 0x17d   : > { %1517 = vst [vmem:[#allocation2 + $0x2b0] sm:$0xff] %v1456_v54  ;;  %v1832_v62 = vmax.f32 %v1823_v52, %v1827_v57  ;;  %v1833_v19 = vmax.f32 %v1825_v56, %v1829_v60  ;;  %v2335_v13 = vld [vmem:[#allocation3 + $0x1a] sm:$0xff]  ;;  %v2336_v52 = vld [vmem:[#allocation3 + $0x22] sm:$0xff]  ;;  %v2574_v56 = vld [vmem:[#allocation3 + $0x2b] sm:$0xff] }
 0x17e   : > { %11783 = vmatmul.mubr.msk.f32.gmra.mxu1 %vm1929_vm1, %v1926_v58  ;;  %v11719_v16 = vpop.f32.mrf.mxu0  ;;  %v2573_v54 = vld [vmem:[#allocation3 + $0x23] sm:$0xff] }
 0x17f   : > { %11836 = vmatmul.mubr.msk.f32.gmra.mxu0 %vm1929_vm1, %v14078_v59  ;;  %11840 = vmatprep.mubr.msk.f32.mxu1 %vm13410_vm0, %v13409_v43  ;;  %1520 = vst [vmem:[#allocation2 + $0x2c8] sm:$0xff] %v11719_v16  ;;  %v1834_v20 = vmax.f32 %v1830_v51, %v1832_v62  ;;  %v1835_v24 = vmax.f32 %v1831_v55, %v1833_v19  ;;  %v2338_v16 = vld [vmem:[#allocation3 + $0x32] sm:$0xff] }
 0x180   : > { %11893 = vmatprep.mubr.msk.f32.mxu0 %vm13410_vm0, %v13409_v43  ;;  %v1466_v23 = vpop.f32.mrf.mxu0  ;;  %v1841_v33 = vld [vmem:[#allocation2 + $0x2a0] ss:$2 sm:$0xff]  ;;  %v1845_v0 = vld [vmem:[#allocation2 + $0x2a1] ss:$2 sm:$0xff] }
 0x181   : > { %1519 = vst [vmem:[#allocation2 + $0x2c0] sm:$0xff] %v1466_v23  ;;  %v1836_v29 = vmax.f32 %v1834_v20, 0.0  ;;  %v1837_v32 = vmax.f32 %v1835_v24, 0.0  ;;  %v1856_v2 = vmax.f32 %v1841_v33, %v1845_v0  ;;  %v2575_v24 = vld [vmem:[#allocation3 + $0x33] sm:$0xff] }
 0x182   : > { %11841 = vmatmul.mubr.msk.f32.vlgmr.msra.gmra.mxu1 %vm1929_vm1, %v2332_v25  ;;  %v11722_v30 = vpop.f32.mrf.mxu0 }
 0x183   : > { %11894 = vmatmul.mubr.msk.f32.vlgmr.msra.gmra.mxu0 %vm1929_vm1, %v2569_v27  ;;  %11945 = vmatpush3.msra.mxu1 %v10137_v21  ;;  %1522 = vst [vmem:[#allocation2 + $0x2d8] sm:$0xff] %v11722_v30  ;;  %1838 = vst [vmem:[#allocation3 + $0x9a] sm:$0xff] %v1836_v29  ;;  %v2339_v30 = vld [vmem:[#allocation3 + $0x3a] sm:$0xff] }
 0x184   : > { %11843 = vmatprep.mubr.msk.f32.mxu1 %vm13410_vm0, %v13409_v43  ;;  %11896 = vmatprep.mubr.msk.f32.mxu0 %vm13410_vm0, %v13409_v43  ;;  %v1476_v34 = vpop.f32.mrf.mxu0  ;;  %1839 = vst [vmem:[#allocation3 + $0xa2] sm:$0x3f] %v1837_v32  ;;  %v1843_v39 = vld [vmem:[#allocation2 + $0x2b0] ss:$2 sm:$0x3f] }
 0x185   : > { %11998 = vmatpush3.msra.mxu0 %v10155_v28  ;;  %12050 = vmatprep.subr.mxu1 %v13409_v43  ;;  %1521 = vst [vmem:[#allocation2 + $0x2d0] sm:$0xff] %v1476_v34  ;;  %v1847_v40 = vld [vmem:[#allocation2 + $0x2b1] ss:$2 sm:$0x3f] }
 0x186   : > { %12103 = vmatprep.subr.mxu0 %v13409_v43  ;;  %11844 = vmatmul.mubr.msk.f32.gmra.mxu1 %vm1929_vm1, %v2333_v35  ;;  %v11725_v36 = vpop.f32.mrf.mxu0  ;;  %v1857_v9 = vmax.f32 %v1843_v39, %v1847_v40  ;;  %v2576_v32 = vld [vmem:[#allocation3 + $0x3b] sm:$0xff]  ;;  %v2577_v35 = vld [vmem:[#allocation3 + $0x43] sm:$0xff]  ;;  %v2579_v39 = vld [vmem:[#allocation3 + $0x53] sm:$0xff] }
 0x187   : > { %11897 = vmatmul.mubr.msk.f32.gmra.mxu0 %vm1929_vm1, %v2570_v1  ;;  %11846 = vmatprep.mubr.msk.f32.mxu1 %vm13410_vm0, %v13409_v43  ;;  %1524 = vst [vmem:[#allocation2 + $0x2e8] sm:$0xff] %v11725_v36  ;;  %v2340_v34 = vld [vmem:[#allocation3 + $0x42] sm:$0xff]  ;;  %v2341_v1 = vld [vmem:[#allocation3 + $0x4a] sm:$0xff]  ;;  %v2343_v40 = vld [vmem:[#allocation3 + $0x5a] sm:$0xff] }
 0x188   : > { %11899 = vmatprep.mubr.msk.f32.mxu0 %vm13410_vm0, %v13409_v43  ;;  %v1849_v42 = vld [vmem:[#allocation2 + $0x2bc] ss:$2 sm:$0xff]  ;;  %v1853_v3 = vld [vmem:[#allocation2 + $0x2bd] ss:$2 sm:$0xff]  ;;  %v1486_v4 = vpop.f32.mrf.mxu0 }
 0x189   : > { %v1858_v7 = vmax.f32 %v1849_v42, %v1853_v3  ;;  %1523 = vst [vmem:[#allocation2 + $0x2e0] sm:$0xff] %v1486_v4  ;;  %v2578_v36 = vld [vmem:[#allocation3 + $0x4b] sm:$0xff]  ;;  %v2580_v42 = vld [vmem:[#allocation3 + $0x5b] sm:$0xff]  ;;  %v2581_v3 = vld [vmem:[#allocation3 + $0x63] sm:$0xff] }
 0x18a   : > { %11847 = vmatmul.mubr.msk.f32.gmra.mxu1 %vm1929_vm1, %v2334_v45  ;;  %v11728_v8 = vpop.f32.mrf.mxu0  ;;  %v2345_v4 = vld [vmem:[#allocation3 + $0x6a] sm:$0xff] }
 0x18b   : > { %11900 = vmatmul.mubr.msk.f32.gmra.mxu0 %vm1929_vm1, %v2571_v6  ;;  %11849 = vmatprep.mubr.msk.f32.mxu1 %vm13410_vm0, %v13409_v43  ;;  %v1860_v11 = vmax.f32 %v1856_v2, %v1858_v7  ;;  %1526 = vst [vmem:[#allocation2 + $0x2f8] sm:$0xff] %v11728_v8  ;;  %v2342_v2 = vld [vmem:[#allocation3 + $0x52] sm:$0xff]  ;;  %v2347_v6 = vld [vmem:[#allocation3 + $0x7a] sm:$0xff]  ;;  %v2348_v8 = vld [vmem:[#allocation3 + $0x82] sm:$0xff] }
 0x18c   : > { %11902 = vmatprep.mubr.msk.f32.mxu0 %vm13410_vm0, %v13409_v43  ;;  %v1851_v12 = vld [vmem:[#allocation2 + $0x2cc] ss:$2 sm:$0x3f]  ;;  %v1855_v44 = vld [vmem:[#allocation2 + $0x2cd] ss:$2 sm:$0x3f]  ;;  %v1496_v10 = vpop.f32.mrf.mxu0 }
 0x18d   : > { %v1862_v46 = vmax.f32 %v1860_v11, 0.0  ;;  %v1859_v15 = vmax.f32 %v1851_v12, %v1855_v44  ;;  %1525 = vst [vmem:[#allocation2 + $0x2f0] sm:$0xff] %v1496_v10  ;;  %v2582_v45 = vld [vmem:[#allocation3 + $0x6b] sm:$0xff]  ;;  %v2584_v7 = vld [vmem:[#allocation3 + $0x7b] sm:$0xff] }
 0x18e   : > { %11850 = vmatmul.mubr.msk.f32.gmra.mxu1 %vm1929_vm1, %v2335_v13  ;;  %v11731_v48 = vpop.f32.mrf.mxu0  ;;  %v10173_v11 = vld [vmem:[%s16475_s2 + $0x30] sm:$0xff]  ;;  %v10191_v44 = vld [vmem:[%s16475_s2 + $0x38] sm:$0xff] }
 0x18f   : > { %11903 = vmatmul.mubr.msk.f32.gmra.mxu0 %vm1929_vm1, %v2572_v14  ;;  %11852 = vmatprep.mubr.msk.f32.mxu1 %vm13410_vm0, %v13409_v43  ;;  %1864 = vst [vmem:[#allocation3 + $0xa8] sm:$0xff] %v1862_v46  ;;  %v1861_v49 = vmax.f32 %v1857_v9, %v1859_v15  ;;  %1528 = vst [vmem:[#allocation2 + $0x308] sm:$0xff] %v11731_v48  ;;  %v2585_v9 = vld [vmem:[#allocation3 + $0x83] sm:$0xff]  ;;  %v13344_v10 = vld [vmem:[#allocation3 + $0xe] sm:$0xff] }
 0x190   : > { %11905 = vmatprep.mubr.msk.f32.mxu0 %vm13410_vm0, %v13409_v43  ;;  %v1506_v51 = vpop.f32.mrf.mxu0  ;;  %v1867_v57 = vld [vmem:[#allocation2 + $0x2d8] ss:$2 sm:$0xff]  ;;  %v1871_v58 = vld [vmem:[#allocation2 + $0x2d9] ss:$2 sm:$0xff]  ;;  %v3045_v15 = vld [vmem:[#allocation3 + $0x1e] sm:$0xff] }
 0x191   : > { %v1863_v55 = vmax.f32 %v1861_v49, 0.0  ;;  %1527 = vst [vmem:[#allocation2 + $0x300] sm:$0xff] %v1506_v51  ;;  %v1882_v19 = vmax.f32 %v1867_v57, %v1871_v58  ;;  %v2806_v12 = vld [vmem:[#allocation3 + $0x4] sm:$0xff]  ;;  %v2807_v13 = vld [vmem:[#allocation3 + $0xc] sm:$0xff]  ;;  %v3044_v14 = vld [vmem:[#allocation3 + $0x16] sm:$0xff] }
 0x192   : > { %11853 = vmatmul.mubr.msk.f32.gmra.mxu1 %vm1929_vm1, %v2336_v52  ;;  %v2808_v46 = vld [vmem:[#allocation3 + $0x14] sm:$0xff]  ;;  %v3046_v48 = vld [vmem:[#allocation3 + $0x26] sm:$0xff]  ;;  %v13345_v49 = vld [vmem:[#allocation3 + $0x1c] sm:$0xff] }
 0x193   : > { %11906 = vmatmul.mubr.msk.f32.gmra.mxu0 %vm1929_vm1, %v2573_v54  ;;  %11855 = vmatprep.mubr.msk.f32.mxu1 %vm13410_vm0, %v13409_v43  ;;  %1865 = vst [vmem:[#allocation3 + $0xb0] sm:$0x3f] %v1863_v55  ;;  %v2810_v54 = vld [vmem:[#allocation3 + $0x24] sm:$0xff]  ;;  %v3047_v55 = vld [vmem:[#allocation3 + $0x2e] sm:$0xff]  ;;  %v3048_v57 = vld [vmem:[#allocation3 + $0x36] sm:$0xff] }
 0x194   : > { %11908 = vmatprep.mubr.msk.f32.mxu0 %vm13410_vm0, %v13409_v43  ;;  %v1869_v60 = vld [vmem:[#allocation2 + $0x2e8] ss:$2 sm:$0x3f]  ;;  %v1873_v62 = vld [vmem:[#allocation2 + $0x2e9] ss:$2 sm:$0x3f] }
 0x195   : > { %v1883_v20 = vmax.f32 %v1869_v60, %v1873_v62  ;;  %v2812_v58 = vld [vmem:[#allocation3 + $0x34] sm:$0xff]  ;;  %v3049_v60 = vld [vmem:[#allocation3 + $0x3e] sm:$0xff] }
 0x196   : > { %11856 = vmatmul.mubr.msk.f32.gmra.mxu1 %vm1929_vm1, %v1628_v41 }
 0x197   : > { %11909 = vmatmul.mubr.msk.f32.gmra.mxu0 %vm1929_vm1, %v2574_v56  ;;  %11858 = vmatprep.mubr.msk.f32.mxu1 %vm13410_vm0, %v13409_v43  ;;  %v2811_v56 = vld [vmem:[#allocation3 + $0x2c] sm:$0xff] }
 0x198   : > { %11911 = vmatprep.mubr.msk.f32.mxu0 %vm13410_vm0, %v13409_v43  ;;  %v1875_v21 = vld [vmem:[#allocation2 + $0x2f4] ss:$2 sm:$0xff]  ;;  %v1877_v23 = vld [vmem:[#allocation2 + $0x304] ss:$2 sm:$0x3f] }
 0x199   : > { %v1879_v25 = vld [vmem:[#allocation2 + $0x2f5] ss:$2 sm:$0xff]  ;;  %v1881_v27 = vld [vmem:[#allocation2 + $0x305] ss:$2 sm:$0x3f] }
 0x19a   : > { %11859 = vmatmul.mubr.msk.f32.gmra.mxu1 %vm1929_vm1, %v2338_v16  ;;  %v1884_v38 = vmax.f32 %v1875_v21, %v1879_v25  ;;  %v1885_v41 = vmax.f32 %v1877_v23, %v1881_v27  ;;  %v2813_v16 = vld [vmem:[#allocation3 + $0x3c] sm:$0xff]  ;;  %v2814_v21 = vld [vmem:[#allocation3 + $0x44] sm:$0xff]  ;;  %v3051_v23 = vld [vmem:[#allocation3 + $0x4e] sm:$0xff] }
 0x19b   : > { %11912 = vmatmul.mubr.msk.f32.gmra.mxu0 %vm1929_vm1, %v2575_v24  ;;  %11861 = vmatprep.mubr.msk.f32.mxu1 %vm13410_vm0, %v13409_v43  ;;  %v3053_v24 = vld [vmem:[#allocation3 + $0x5e] sm:$0xff]  ;;  %v3054_v27 = vld [vmem:[#allocation3 + $0x66] sm:$0xff] }
 0x19c   : > { %11914 = vmatprep.mubr.msk.f32.mxu0 %vm13410_vm0, %v13409_v43  ;;  %v1886_v28 = vmax.f32 %v1882_v19, %v1884_v38  ;;  %v1887_v29 = vmax.f32 %v1883_v20, %v1885_v41  ;;  %v2817_v25 = vld [vmem:[#allocation3 + $0x5c] sm:$0xff]  ;;  %v2818_v38 = vld [vmem:[#allocation3 + $0x64] sm:$0xff]  ;;  %v3055_v41 = vld [vmem:[#allocation3 + $0x6e] sm:$0xff] }
 0x19e   : > { %11862 = vmatmul.mubr.msk.f32.gmra.mxu1 %vm1929_vm1, %v2339_v30  ;;  %v1888_v33 = vmax.f32 %v1886_v28, 0.0  ;;  %v1889_v0 = vmax.f32 %v1887_v29, 0.0 }
 0x19f   : > { %11915 = vmatmul.mubr.msk.f32.gmra.mxu0 %vm1929_vm1, %v2576_v32  ;;  %11864 = vmatprep.mubr.msk.f32.mxu1 %vm13410_vm0, %v13409_v43 }
 0x1a0   : > { %11917 = vmatprep.mubr.msk.f32.mxu0 %vm13410_vm0, %v13409_v43  ;;  %1890 = vst [vmem:[#allocation3 + $0xb6] sm:$0xff] %v1888_v33  ;;  %1891 = vst [vmem:[#allocation3 + $0xbe] sm:$0x3f] %v1889_v0  ;;  %v2819_v0 = vld [vmem:[#allocation3 + $0x6c] sm:$0xff] }
 0x1a2   : > { %11865 = vmatmul.mubr.msk.f32.gmra.mxu1 %vm1929_vm1, %v2340_v34  ;;  %v3056_v34 = vld [vmem:[#allocation3 + $0x76] sm:$0xff] }
 0x1a3   : > { %11918 = vmatmul.mubr.msk.f32.gmra.mxu0 %vm1929_vm1, %v2577_v35  ;;  %11867 = vmatprep.mubr.msk.f32.mxu1 %vm13410_vm0, %v13409_v43 }
 0x1a4   : > { %11920 = vmatprep.mubr.msk.f32.mxu0 %vm13410_vm0, %v13409_v43 }
 0x1a6   : > { %11868 = vmatmul.mubr.msk.f32.gmra.mxu1 %vm1929_vm1, %v2341_v1 }
 0x1a7   : > { %11921 = vmatmul.mubr.msk.f32.gmra.mxu0 %vm1929_vm1, %v2578_v36  ;;  %11870 = vmatprep.mubr.msk.f32.mxu1 %vm13410_vm0, %v13409_v43 }
 0x1a8   : > { %11923 = vmatprep.mubr.msk.f32.mxu0 %vm13410_vm0, %v13409_v43 }
 0x1aa   : > { %11871 = vmatmul.mubr.msk.f32.gmra.mxu1 %vm1929_vm1, %v2342_v2 }
 0x1ab   : > { %11924 = vmatmul.mubr.msk.f32.gmra.mxu0 %vm1929_vm1, %v2579_v39  ;;  %11873 = vmatprep.mubr.msk.f32.mxu1 %vm13410_vm0, %v13409_v43 }
 0x1ac   : > { %11926 = vmatprep.mubr.msk.f32.mxu0 %vm13410_vm0, %v13409_v43 }
 0x1ae   : > { %11874 = vmatmul.mubr.msk.f32.gmra.mxu1 %vm1929_vm1, %v2343_v40  ;;  %v2820_v40 = vld [vmem:[#allocation3 + $0x74] sm:$0xff] }
 0x1af   : > { %11927 = vmatmul.mubr.msk.f32.gmra.mxu0 %vm1929_vm1, %v2580_v42  ;;  %11876 = vmatprep.mubr.msk.f32.mxu1 %vm13410_vm0, %v13409_v43 }
 0x1b0   : > { %11929 = vmatprep.mubr.msk.f32.mxu0 %vm13410_vm0, %v13409_v43 }
 0x1b2   : > { %11877 = vmatmul.mubr.msk.f32.gmra.mxu1 %vm1929_vm1, %v1732_v22  ;;  %v2583_v22 = vld [vmem:[#allocation3 + $0x73] sm:$0xff] }
 0x1b3   : > { %11930 = vmatmul.mubr.msk.f32.gmra.mxu0 %vm1929_vm1, %v2581_v3  ;;  %11879 = vmatprep.mubr.msk.f32.mxu1 %vm13410_vm0, %v13409_v43 }
 0x1b4   : > { %11932 = vmatprep.mubr.msk.f32.mxu0 %vm13410_vm0, %v13409_v43 }
 0x1b6   : > { %11880 = vmatmul.mubr.msk.f32.gmra.mxu1 %vm1929_vm1, %v2345_v4 }
 0x1b7   : > { %11933 = vmatmul.mubr.msk.f32.gmra.mxu0 %vm1929_vm1, %v2582_v45  ;;  %11882 = vmatprep.mubr.msk.f32.mxu1 %vm13410_vm0, %v13409_v43 }
 0x1b8   : > { %11935 = vmatprep.mubr.msk.f32.mxu0 %vm13410_vm0, %v13409_v43 }
 0x1ba   : > { %11883 = vmatmul.mubr.msk.f32.gmra.mxu1 %vm1929_vm1, %v2346_v18 }
 0x1bb   : > { %11936 = vmatmul.mubr.msk.f32.gmra.mxu0 %vm1929_vm1, %v2583_v22  ;;  %11885 = vmatprep.mubr.msk.f32.mxu1 %vm13410_vm0, %v13409_v43  ;;  %v2821_v22 = vld [vmem:[#allocation3 + $0x7c] sm:$0xff] }
 0x1bc   : > { %11938 = vmatprep.mubr.msk.f32.mxu0 %vm13410_vm0, %v13409_v43 }
 0x1be   : > { %11886 = vmatmul.mubr.msk.f32.gmra.mxu1 %vm1929_vm1, %v2347_v6  ;;  %v3058_v6 = vld [vmem:[#allocation3 + $0x86] sm:$0xff] }
 0x1bf   : > { %11939 = vmatmul.mubr.msk.f32.gmra.mxu0 %vm1929_vm1, %v2584_v7  ;;  %11888 = vmatprep.mubr.msk.f32.mxu1 %vm13410_vm0, %v13409_v43 }
 0x1c0   : > { %11941 = vmatprep.mubr.msk.f32.mxu0 %vm13410_vm0, %v13409_v43 }
 0x1c2   : > { %11889 = vmatmul.mubr.msk.f32.gmra.mxu1 %vm1929_vm1, %v2348_v8 }
 0x1c3   : > { %11942 = vmatmul.mubr.msk.f32.gmra.mxu0 %vm1929_vm1, %v2585_v9  ;;  %11946 = vmatprep.mubr.msk.f32.mxu1 %vm13410_vm0, %v13409_v43 }
 0x1c4   : > { %11999 = vmatprep.mubr.msk.f32.mxu0 %vm13410_vm0, %v13409_v43 }
 0x1c6   : > { %11947 = vmatmul.mubr.msk.f32.vlgmr.msra.gmra.mxu1 %vm1929_vm1, %v2806_v12  ;;  %v3059_v12 = vld [vmem:[#allocation3 + $0x8e] sm:$0xff] }
 0x1c7   : > { %12000 = vmatmul.mubr.msk.f32.vlgmr.msra.gmra.mxu0 %vm1929_vm1, %v13344_v10  ;;  %12051 = vmatpush3.msra.mxu1 %v10173_v11  ;;  %v2822_v11 = vld [vmem:[#allocation3 + $0x84] sm:$0xff] }
 0x1c8   : > { %11949 = vmatprep.mubr.msk.f32.mxu1 %vm13410_vm0, %v13409_v43  ;;  %12002 = vmatprep.mubr.msk.f32.mxu0 %vm13410_vm0, %v13409_v43 }
 0x1c9   : > { %12104 = vmatpush3.msra.mxu0 %v10191_v44  ;;  %12156 = vmatprep.subr.mxu1 %v13409_v43 }
 0x1ca   : > { %12209 = vmatprep.subr.mxu0 %v13409_v43  ;;  %11950 = vmatmul.mubr.msk.f32.gmra.mxu1 %vm1929_vm1, %v2807_v13 }
 0x1cb   : > { %12003 = vmatmul.mubr.msk.f32.gmra.mxu0 %vm1929_vm1, %v3044_v14  ;;  %11952 = vmatprep.mubr.msk.f32.mxu1 %vm13410_vm0, %v13409_v43  ;;  %v10209_v14 = vld [vmem:[%s16475_s2 + $0x40] sm:$0xff] }
 0x1cc   : > { %12005 = vmatprep.mubr.msk.f32.mxu0 %vm13410_vm0, %v13409_v43 }
 0x1ce   : > { %11953 = vmatmul.mubr.msk.f32.gmra.mxu1 %vm1929_vm1, %v2808_v46 }
 0x1cf   : > { %12006 = vmatmul.mubr.msk.f32.gmra.mxu0 %vm1929_vm1, %v3045_v15  ;;  %11955 = vmatprep.mubr.msk.f32.mxu1 %vm13410_vm0, %v13409_v43 }
 0x1d0   : > { %12008 = vmatprep.mubr.msk.f32.mxu0 %vm13410_vm0, %v13409_v43 }
 0x1d2   : > { %11956 = vmatmul.mubr.msk.f32.gmra.mxu1 %vm1929_vm1, %v13345_v49  ;;  %v2248_v51 = vpop.f32.mrf.mxu0  ;;  %v3517_v49 = vld [vmem:[#allocation3 + $0x10] sm:$0xff] }
 0x1d3   : > { %12009 = vmatmul.mubr.msk.f32.gmra.mxu0 %vm1929_vm1, %v3046_v48  ;;  %11958 = vmatprep.mubr.msk.f32.mxu1 %vm13410_vm0, %v13409_v43  ;;  %v3280_v48 = vld [vmem:[#allocation3 + $0xf] sm:$0xff] }
 0x1d4   : > { %12011 = vmatprep.mubr.msk.f32.mxu0 %vm13410_vm0, %v13409_v43  ;;  %v11789_v52 = vpop.f32.mrf.mxu0 }
 0x1d5   : > { %v10227_v52 = vld [vmem:[%s16475_s2 + $0x48] sm:$0xff] }
 0x1d6   : > { %11959 = vmatmul.mubr.msk.f32.gmra.mxu1 %vm1929_vm1, %v2810_v54 }
 0x1d7   : > { %12012 = vmatmul.mubr.msk.f32.gmra.mxu0 %vm1929_vm1, %v3047_v55  ;;  %11961 = vmatprep.mubr.msk.f32.mxu1 %vm13410_vm0, %v13409_v43 }
 0x1d8   : > { %12014 = vmatprep.mubr.msk.f32.mxu0 %vm13410_vm0, %v13409_v43 }
 0x1da   : > { %11962 = vmatmul.mubr.msk.f32.gmra.mxu1 %vm1929_vm1, %v2811_v56 }
 0x1db   : > { %12015 = vmatmul.mubr.msk.f32.gmra.mxu0 %vm1929_vm1, %v3048_v57  ;;  %11964 = vmatprep.mubr.msk.f32.mxu1 %vm13410_vm0, %v13409_v43 }
 0x1dc   : > { %12017 = vmatprep.mubr.msk.f32.mxu0 %vm13410_vm0, %v13409_v43 }
 0x1de   : > { %11965 = vmatmul.mubr.msk.f32.gmra.mxu1 %vm1929_vm1, %v2812_v58  ;;  %v3281_v58 = vld [vmem:[#allocation3 + $0x17] sm:$0xff] }
 0x1df   : > { %12018 = vmatmul.mubr.msk.f32.gmra.mxu0 %vm1929_vm1, %v3049_v60  ;;  %11967 = vmatprep.mubr.msk.f32.mxu1 %vm13410_vm0, %v13409_v43  ;;  %v3518_v60 = vld [vmem:[#allocation3 + $0x18] sm:$0xff] }
 0x1e0   : > { %12020 = vmatprep.mubr.msk.f32.mxu0 %vm13410_vm0, %v13409_v43  ;;  %v2047_v62 = vpop.f32.mrf.mxu1 }
 0x1e1   : > { %v14251_v19 = vadd.f32 %v2248_v51, %v2047_v62 }
 0x1e2   : > { %11968 = vmatmul.mubr.msk.f32.gmra.mxu1 %vm1929_vm1, %v2813_v16  ;;  %v11736_v20 = vpop.f32.mrf.mxu1 }
 0x1e3   : > { %12021 = vmatmul.mubr.msk.f32.gmra.mxu0 %vm1929_vm1, %v1680_v17  ;;  %11970 = vmatprep.mubr.msk.f32.mxu1 %vm13410_vm0, %v13409_v43  ;;  %v3052_v17 = vld [vmem:[#allocation3 + $0x56] sm:$0xff] }
 0x1e4   : > { %12023 = vmatprep.mubr.msk.f32.mxu0 %vm13410_vm0, %v13409_v43 }
 0x1e6   : > { %11971 = vmatmul.mubr.msk.f32.gmra.mxu1 %vm1929_vm1, %v2814_v21  ;;  %v3282_v21 = vld [vmem:[#allocation3 + $0x1f] sm:$0xff] }
 0x1e7   : > { %12024 = vmatmul.mubr.msk.f32.gmra.mxu0 %vm1929_vm1, %v3051_v23  ;;  %11973 = vmatprep.mubr.msk.f32.mxu1 %vm13410_vm0, %v13409_v43  ;;  %v3519_v23 = vld [vmem:[#allocation3 + $0x20] sm:$0xff] }
 0x1e8   : > { %12026 = vmatprep.mubr.msk.f32.mxu0 %vm13410_vm0, %v13409_v43 }
 0x1ea   : > { %11974 = vmatmul.mubr.msk.f32.gmra.mxu1 %vm1929_vm1, %v2815_v61  ;;  %v3283_v61 = vld [vmem:[#allocation3 + $0x27] sm:$0xff] }
 0x1eb   : > { %12027 = vmatmul.mubr.msk.f32.gmra.mxu0 %vm1929_vm1, %v3052_v17  ;;  %11976 = vmatprep.mubr.msk.f32.mxu1 %vm13410_vm0, %v13409_v43  ;;  %v3520_v17 = vld [vmem:[#allocation3 + $0x28] sm:$0xff] }
 0x1ec   : > { %12029 = vmatprep.mubr.msk.f32.mxu0 %vm13410_vm0, %v13409_v43 }
 0x1ee   : > { %11977 = vmatmul.mubr.msk.f32.gmra.mxu1 %vm1929_vm1, %v1706_v31 }
 0x1ef   : > { %12030 = vmatmul.mubr.msk.f32.gmra.mxu0 %vm1929_vm1, %v3053_v24  ;;  %11979 = vmatprep.mubr.msk.f32.mxu1 %vm13410_vm0, %v13409_v43 }
 0x1f0   : > { %12032 = vmatprep.mubr.msk.f32.mxu0 %vm13410_vm0, %v13409_v43 }
 0x1f2   : > { %11980 = vmatmul.mubr.msk.f32.gmra.mxu1 %vm1929_vm1, %v2817_v25 }
 0x1f3   : > { %12033 = vmatmul.mubr.msk.f32.gmra.mxu0 %vm1929_vm1, %v3054_v27  ;;  %11982 = vmatprep.mubr.msk.f32.mxu1 %vm13410_vm0, %v13409_v43  ;;  %v2052_v63 = vpop.f32.mrf.mxu1  ;;  %v3284_v27 = vld [vmem:[#allocation3 + $0x2f] sm:$0xff] }
 0x1f4   : > { %12035 = vmatprep.mubr.msk.f32.mxu0 %vm13410_vm0, %v13409_v43  ;;  %v2253_v31 = vpop.f32.mrf.mxu0 }
 0x1f5   : > { %v14287_v28 = vadd.f32 %v2253_v31, %v2052_v63  ;;  %v11739_v29 = vpop.f32.mrf.mxu1  ;;  %v3521_v63 = vld [vmem:[#allocation3 + $0x30] sm:$0xff] }
 0x1f6   : > { %11983 = vmatmul.mubr.msk.f32.gmra.mxu1 %vm1929_vm1, %v2818_v38  ;;  %v11792_v30 = vpop.f32.mrf.mxu0 }
 0x1f7   : > { %12036 = vmatmul.mubr.msk.f32.gmra.mxu0 %vm1929_vm1, %v3055_v41  ;;  %11985 = vmatprep.mubr.msk.f32.mxu1 %vm13410_vm0, %v13409_v43  ;;  %v2057_v32 = vpop.f32.mrf.mxu1 }
 0x1f8   : > { %12038 = vmatprep.mubr.msk.f32.mxu0 %vm13410_vm0, %v13409_v43  ;;  %v2258_v33 = vpop.f32.mrf.mxu0 }
 0x1f9   : > { %v14295_v35 = vadd.f32 %v2258_v33, %v2057_v32  ;;  %v11742_v1 = vpop.f32.mrf.mxu1  ;;  %v3285_v32 = vld [vmem:[#allocation3 + $0x37] sm:$0xff] }
 0x1fa   : > { %11986 = vmatmul.mubr.msk.f32.gmra.mxu1 %vm1929_vm1, %v2819_v0  ;;  %v11795_v36 = vpop.f32.mrf.mxu0  ;;  %v3522_v33 = vld [vmem:[#allocation3 + $0x38] sm:$0xff] }
 0x1fb   : > { %12039 = vmatmul.mubr.msk.f32.gmra.mxu0 %vm1929_vm1, %v3056_v34  ;;  %11988 = vmatprep.mubr.msk.f32.mxu1 %vm13410_vm0, %v13409_v43  ;;  %v2062_v2 = vpop.f32.mrf.mxu1 }
 0x1fc   : > { %12041 = vmatprep.mubr.msk.f32.mxu0 %vm13410_vm0, %v13409_v43  ;;  %v2263_v39 = vpop.f32.mrf.mxu0 }
 0x1fd   : > { %v14303_v42 = vadd.f32 %v2263_v39, %v2062_v2  ;;  %v11745_v3 = vpop.f32.mrf.mxu1  ;;  %v3286_v39 = vld [vmem:[#allocation3 + $0x3f] sm:$0xff] }
 0x1fe   : > { %11989 = vmatmul.mubr.msk.f32.gmra.mxu1 %vm1929_vm1, %v2820_v40  ;;  %v11798_v4 = vpop.f32.mrf.mxu0  ;;  %v3523_v40 = vld [vmem:[#allocation3 + $0x40] sm:$0xff] }
 0x1ff   : > { %12042 = vmatmul.mubr.msk.f32.gmra.mxu0 %vm1929_vm1, %v1784_v5  ;;  %11991 = vmatprep.mubr.msk.f32.mxu1 %vm13410_vm0, %v13409_v43  ;;  %v2067_v45 = vpop.f32.mrf.mxu1 }
 0x200   : > { %12044 = vmatprep.mubr.msk.f32.mxu0 %vm13410_vm0, %v13409_v43  ;;  %v2268_v18 = vpop.f32.mrf.mxu0 }
 0x201   : > { %v14313_v7 = vadd.f32 %v2268_v18, %v2067_v45  ;;  %v11748_v37 = vpop.f32.mrf.mxu1 }
 0x202   : > { %11992 = vmatmul.mubr.msk.f32.gmra.mxu1 %vm1929_vm1, %v2821_v22  ;;  %v11801_v5 = vpop.f32.mrf.mxu0  ;;  %v3524_v37 = vld [vmem:[#allocation3 + $0x48] sm:$0xff] }
 0x203   : > { %12045 = vmatmul.mubr.msk.f32.gmra.mxu0 %vm1929_vm1, %v3058_v6  ;;  %11994 = vmatprep.mubr.msk.f32.mxu1 %vm13410_vm0, %v13409_v43  ;;  %v2072_v8 = vpop.f32.mrf.mxu1  ;;  %v3287_v6 = vld [vmem:[#allocation3 + $0x47] sm:$0xff] }
 0x204   : > { %12047 = vmatprep.mubr.msk.f32.mxu0 %vm13410_vm0, %v13409_v43  ;;  %v2273_v9 = vpop.f32.mrf.mxu0 }
 0x205   : > { %v14321_v44 = vadd.f32 %v2273_v9, %v2072_v8  ;;  %v11751_v10 = vpop.f32.mrf.mxu1 }
 0x206   : > { %11995 = vmatmul.mubr.msk.f32.gmra.mxu1 %vm1929_vm1, %v2822_v11  ;;  %v11804_v13 = vpop.f32.mrf.mxu0  ;;  %v3288_v10 = vld [vmem:[#allocation3 + $0x4f] sm:$0xff] }
 0x207   : > { %12048 = vmatmul.mubr.msk.f32.gmra.mxu0 %vm1929_vm1, %v3059_v12  ;;  %12052 = vmatprep.mubr.msk.f32.mxu1 %vm13410_vm0, %v13409_v43  ;;  %v2077_v46 = vpop.f32.mrf.mxu1  ;;  %v3525_v13 = vld [vmem:[#allocation3 + $0x50] sm:$0xff] }
 0x208   : > { %12105 = vmatprep.mubr.msk.f32.mxu0 %vm13410_vm0, %v13409_v43  ;;  %v2278_v15 = vpop.f32.mrf.mxu0 }
 0x209   : > { %v14332_v51 = vadd.f32 %v2278_v15, %v2077_v46  ;;  %v11754_v54 = vpop.f32.mrf.mxu1 }
 0x20a   : > { %12053 = vmatmul.mubr.msk.f32.vlgmr.msra.gmra.mxu1 %vm1929_vm1, %v3280_v48  ;;  %v11807_v55 = vpop.f32.mrf.mxu0 }
 0x20b   : > { %12106 = vmatmul.mubr.msk.f32.vlgmr.msra.gmra.mxu0 %vm1929_vm1, %v3517_v49  ;;  %12157 = vmatpush3.msra.mxu1 %v10209_v14  ;;  %v2082_v56 = vpop.f32.mrf.mxu1 }
 0x20c   : > { %12055 = vmatprep.mubr.msk.f32.mxu1 %vm13410_vm0, %v13409_v43  ;;  %12108 = vmatprep.mubr.msk.f32.mxu0 %vm13410_vm0, %v13409_v43  ;;  %v2283_v57 = vpop.f32.mrf.mxu0 }
 0x20d   : > { %12210 = vmatpush3.msra.mxu0 %v10227_v52  ;;  %v14343_v62 = vadd.f32 %v2283_v57, %v2082_v56  ;;  %12262 = vmatprep.subr.mxu1 %v13409_v43  ;;  %v11757_v16 = vpop.f32.mrf.mxu1  ;;  %v3289_v52 = vld [vmem:[#allocation3 + $0x57] sm:$0xff] }
 0x20e   : > { %12315 = vmatprep.subr.mxu0 %v13409_v43  ;;  %12056 = vmatmul.mubr.msk.f32.gmra.mxu1 %vm1929_vm1, %v3281_v58  ;;  %v11810_v20 = vpop.f32.mrf.mxu0 }
 0x20f   : > { %12109 = vmatmul.mubr.msk.f32.gmra.mxu0 %vm1929_vm1, %v3518_v60  ;;  %12058 = vmatprep.mubr.msk.f32.mxu1 %vm13410_vm0, %v13409_v43  ;;  %v3290_v60 = vld [vmem:[#allocation3 + $0x5f] sm:$0xff] }
 0x210   : > { %12111 = vmatprep.mubr.msk.f32.mxu0 %vm13410_vm0, %v13409_v43 }
 0x212   : > { %12059 = vmatmul.mubr.msk.f32.gmra.mxu1 %vm1929_vm1, %v3282_v21  ;;  %v3291_v21 = vld [vmem:[#allocation3 + $0x67] sm:$0xff] }
 0x213   : > { %12112 = vmatmul.mubr.msk.f32.gmra.mxu0 %vm1929_vm1, %v3519_v23  ;;  %12061 = vmatprep.mubr.msk.f32.mxu1 %vm13410_vm0, %v13409_v43 }
 0x214   : > { %12114 = vmatprep.mubr.msk.f32.mxu0 %vm13410_vm0, %v13409_v43 }
 0x216   : > { %12062 = vmatmul.mubr.msk.f32.gmra.mxu1 %vm1929_vm1, %v3283_v61 }
 0x217   : > { %12115 = vmatmul.mubr.msk.f32.gmra.mxu0 %vm1929_vm1, %v3520_v17  ;;  %12064 = vmatprep.mubr.msk.f32.mxu1 %vm13410_vm0, %v13409_v43  ;;  %v13346_v17 = vld [vmem:[#allocation3 + $0x70] sm:$0xff] }
 0x218   : > { %12117 = vmatprep.mubr.msk.f32.mxu0 %vm13410_vm0, %v13409_v43 }
 0x219   : > { %v2087_v24 = vpop.f32.mrf.mxu1 }
 0x21a   : > { %v2288_v25 = vpop.f32.mrf.mxu0  ;;  %12065 = vmatmul.mubr.msk.f32.gmra.mxu1 %vm1929_vm1, %v3284_v27  ;;  %v3293_v27 = vld [vmem:[#allocation3 + $0x77] sm:$0xff] }
 0x21b   : > { %v14365_v31 = vadd.f32 %v2288_v25, %v2087_v24  ;;  %12118 = vmatmul.mubr.msk.f32.gmra.mxu0 %vm1929_vm1, %v3521_v63  ;;  %v11760_v38 = vpop.f32.mrf.mxu1  ;;  %12067 = vmatprep.mubr.msk.f32.mxu1 %vm13410_vm0, %v13409_v43 }
 0x21c   : > { %v11813_v41 = vpop.f32.mrf.mxu0  ;;  %12120 = vmatprep.mubr.msk.f32.mxu0 %vm13410_vm0, %v13409_v43 }
 0x21d   : > { %v2092_v29 = vpop.f32.mrf.mxu1 }
 0x21e   : > { %v2293_v30 = vpop.f32.mrf.mxu0  ;;  %12068 = vmatmul.mubr.msk.f32.gmra.mxu1 %vm1929_vm1, %v3285_v32  ;;  %v3294_v32 = vld [vmem:[#allocation3 + $0x7f] sm:$0xff] }
 0x21f   : > { %v14373_v0 = vadd.f32 %v2293_v30, %v2092_v29  ;;  %12121 = vmatmul.mubr.msk.f32.gmra.mxu0 %vm1929_vm1, %v3522_v33  ;;  %v11763_v34 = vpop.f32.mrf.mxu1  ;;  %12070 = vmatprep.mubr.msk.f32.mxu1 %vm13410_vm0, %v13409_v43 }
 0x220   : > { %v11816_v1 = vpop.f32.mrf.mxu0  ;;  %12123 = vmatprep.mubr.msk.f32.mxu0 %vm13410_vm0, %v13409_v43 }
 0x221   : > { %v2097_v36 = vpop.f32.mrf.mxu1 }
 0x222   : > { %v2298_v2 = vpop.f32.mrf.mxu0  ;;  %12071 = vmatmul.mubr.msk.f32.gmra.mxu1 %vm1929_vm1, %v3286_v39  ;;  %v3295_v39 = vld [vmem:[#allocation3 + $0x87] sm:$0xff] }
 0x223   : > { %v14381_v3 = vadd.f32 %v2298_v2, %v2097_v36  ;;  %12124 = vmatmul.mubr.msk.f32.gmra.mxu0 %vm1929_vm1, %v3523_v40  ;;  %v11766_v4 = vpop.f32.mrf.mxu1  ;;  %12073 = vmatprep.mubr.msk.f32.mxu1 %vm13410_vm0, %v13409_v43  ;;  %v3532_v40 = vld [vmem:[#allocation3 + $0x88] sm:$0xff] }
 0x224   : > { %v11819_v45 = vpop.f32.mrf.mxu0  ;;  %12126 = vmatprep.mubr.msk.f32.mxu0 %vm13410_vm0, %v13409_v43 }
 0x225   : > { %v2102_v18 = vpop.f32.mrf.mxu1 }
 0x226   : > { %v2303_v22 = vpop.f32.mrf.mxu0  ;;  %12074 = vmatmul.mubr.msk.f32.gmra.mxu1 %vm1929_vm1, %v3287_v6  ;;  %v3296_v6 = vld [vmem:[#allocation3 + $0x8f] sm:$0xff] }
 0x227   : > { %v14389_v5 = vadd.f32 %v2303_v22, %v2102_v18  ;;  %12127 = vmatmul.mubr.msk.f32.gmra.mxu0 %vm1929_vm1, %v3524_v37  ;;  %v11769_v8 = vpop.f32.mrf.mxu1  ;;  %12076 = vmatprep.mubr.msk.f32.mxu1 %vm13410_vm0, %v13409_v43  ;;  %v3533_v37 = vld [vmem:[#allocation3 + $0x90] sm:$0xff] }
 0x228   : > { %v11822_v9 = vpop.f32.mrf.mxu0  ;;  %12129 = vmatprep.mubr.msk.f32.mxu0 %vm13410_vm0, %v13409_v43 }
 0x229   : > { %v2107_v11 = vpop.f32.mrf.mxu1 }
 0x22a   : > { %v2308_v12 = vpop.f32.mrf.mxu0  ;;  %12077 = vmatmul.mubr.msk.f32.gmra.mxu1 %vm1929_vm1, %v3288_v10  ;;  %v10245_v10 = vld [vmem:[%s16475_s2 + $0x50] sm:$0xff] }
 0x22b   : > { %v14397_v14 = vadd.f32 %v2308_v12, %v2107_v11  ;;  %12130 = vmatmul.mubr.msk.f32.gmra.mxu0 %vm1929_vm1, %v3525_v13  ;;  %v11772_v46 = vpop.f32.mrf.mxu1  ;;  %12079 = vmatprep.mubr.msk.f32.mxu1 %vm13410_vm0, %v13409_v43 }
 0x22c   : > { %v11825_v15 = vpop.f32.mrf.mxu0  ;;  %12132 = vmatprep.mubr.msk.f32.mxu0 %vm13410_vm0, %v13409_v43  ;;  %v3754_v46 = vld [vmem:[#allocation3 + $0x11] sm:$0xff] }
 0x22d   : > { %v2112_v48 = vpop.f32.mrf.mxu1  ;;  %v3991_v15 = vld [vmem:[#allocation3 + $0x12] sm:$0xff] }
 0x22e   : > { %v2313_v49 = vpop.f32.mrf.mxu0  ;;  %12080 = vmatmul.mubr.msk.f32.gmra.mxu1 %vm1929_vm1, %v3289_v52 }
 0x22f   : > { %v14405_v54 = vadd.f32 %v2313_v49, %v2112_v48  ;;  %12133 = vmatmul.mubr.msk.f32.gmra.mxu0 %vm1929_vm1, %v14029_v50  ;;  %v11775_v55 = vpop.f32.mrf.mxu1  ;;  %12082 = vmatprep.mubr.msk.f32.mxu1 %vm13410_vm0, %v13409_v43 }
 0x230   : > { %v11828_v56 = vpop.f32.mrf.mxu0  ;;  %12135 = vmatprep.mubr.msk.f32.mxu0 %vm13410_vm0, %v13409_v43 }
 0x231   : > { %v2117_v57 = vpop.f32.mrf.mxu1 }
 0x232   : > { %v2318_v58 = vpop.f32.mrf.mxu0  ;;  %12083 = vmatmul.mubr.msk.f32.gmra.mxu1 %vm1929_vm1, %v3290_v60  ;;  %v3992_v60 = vld [vmem:[#allocation3 + $0x1a] sm:$0xff] }
 0x233   : > { %v14414_v16 = vadd.f32 %v2318_v58, %v2117_v57  ;;  %12136 = vmatmul.mubr.msk.f32.gmra.mxu0 %vm1929_vm1, %v14038_v53  ;;  %v11778_v20 = vpop.f32.mrf.mxu1  ;;  %12085 = vmatprep.mubr.msk.f32.mxu1 %vm13410_vm0, %v13409_v43  ;;  %v3292_v53 = vld [vmem:[#allocation3 + $0x6f] sm:$0xff]  ;;  %v3755_v58 = vld [vmem:[#allocation3 + $0x19] sm:$0xff] }
 0x234   : > { %v11831_v50 = vpop.f32.mrf.mxu0  ;;  %12138 = vmatprep.mubr.msk.f32.mxu0 %vm13410_vm0, %v13409_v43 }
 0x236   : > { %12086 = vmatmul.mubr.msk.f32.gmra.mxu1 %vm1929_vm1, %v3291_v21 }
 0x237   : > { %12139 = vmatmul.mubr.msk.f32.gmra.mxu0 %vm1929_vm1, %v14047_v26  ;;  %12088 = vmatprep.mubr.msk.f32.mxu1 %vm13410_vm0, %v13409_v43 }
 0x238   : > { %12141 = vmatprep.mubr.msk.f32.mxu0 %vm13410_vm0, %v13409_v43 }
 0x23a   : > { %v2122_v23 = vpop.f32.mrf.mxu1  ;;  %12089 = vmatmul.mubr.msk.f32.gmra.mxu1 %vm1929_vm1, %v3292_v53 }
 0x23b   : > { %v2323_v61 = vpop.f32.mrf.mxu0  ;;  %12142 = vmatmul.mubr.msk.f32.gmra.mxu0 %vm1929_vm1, %v13346_v17  ;;  %12091 = vmatprep.mubr.msk.f32.mxu1 %vm13410_vm0, %v13409_v43  ;;  %v3993_v17 = vld [vmem:[#allocation3 + $0x22] sm:$0xff] }
 0x23c   : > { %v14432_v24 = vadd.f32 %v2323_v61, %v2122_v23  ;;  %12144 = vmatprep.mubr.msk.f32.mxu0 %vm13410_vm0, %v13409_v43  ;;  %v11781_v26 = vpop.f32.mrf.mxu1  ;;  %v3756_v61 = vld [vmem:[#allocation3 + $0x21] sm:$0xff] }
 0x23d   : > { %v11834_v25 = vpop.f32.mrf.mxu0 }
 0x23e   : > { %v2127_v63 = vpop.f32.mrf.mxu1  ;;  %12092 = vmatmul.mubr.msk.f32.gmra.mxu1 %vm1929_vm1, %v3293_v27 }
 0x23f   : > { %v2328_v38 = vpop.f32.mrf.mxu0  ;;  %12145 = vmatmul.mubr.msk.f32.gmra.mxu0 %vm1929_vm1, %v14069_v47  ;;  %12094 = vmatprep.mubr.msk.f32.mxu1 %vm13410_vm0, %v13409_v43 }
 0x240   : > { %v14441_v41 = vadd.f32 %v2328_v38, %v2127_v63  ;;  %12147 = vmatprep.mubr.msk.f32.mxu0 %vm13410_vm0, %v13409_v43  ;;  %v11784_v29 = vpop.f32.mrf.mxu1 }
 0x241   : > { %v11837_v30 = vpop.f32.mrf.mxu0  ;;  %v3757_v29 = vld [vmem:[#allocation3 + $0x29] sm:$0xff] }
 0x242   : > { %v2468_v33 = vpop.f32.mrf.mxu1  ;;  %12095 = vmatmul.mubr.msk.f32.gmra.mxu1 %vm1929_vm1, %v3294_v32  ;;  %v3994_v30 = vld [vmem:[#allocation3 + $0x2a] sm:$0xff] }
 0x243   : > { %v2705_v34 = vpop.f32.mrf.mxu0  ;;  %12148 = vmatmul.mubr.msk.f32.gmra.mxu0 %vm1929_vm1, %v14078_v59  ;;  %v2552_v47 = vadd.f32 %v2468_v33, %v14251_v19  ;;  %12097 = vmatprep.mubr.msk.f32.mxu1 %vm13410_vm0, %v13409_v43 }
 0x244   : > { %12150 = vmatprep.mubr.msk.f32.mxu0 %vm13410_vm0, %v13409_v43  ;;  %v11842_v1 = vpop.f32.mrf.mxu1 }
 0x245   : > { %v11895_v36 = vpop.f32.mrf.mxu0  ;;  %v14455_v2 = vadd.f32 %v2705_v34, %v2552_v47 }
 0x246   : > { %v2473_v4 = vpop.f32.mrf.mxu1  ;;  %12098 = vmatmul.mubr.msk.f32.gmra.mxu1 %vm1929_vm1, %v3295_v39  ;;  %v3758_v36 = vld [vmem:[#allocation3 + $0x31] sm:$0xff] }
 0x247   : > { %v2710_v45 = vpop.f32.mrf.mxu0  ;;  %12151 = vmatmul.mubr.msk.f32.gmra.mxu0 %vm1929_vm1, %v3532_v40  ;;  %v2553_v59 = vadd.f32 %v2473_v4, %v14287_v28  ;;  %12100 = vmatprep.mubr.msk.f32.mxu1 %vm13410_vm0, %v13409_v43  ;;  %v3995_v39 = vld [vmem:[#allocation3 + $0x32] sm:$0xff] }
 0x248   : > { %12153 = vmatprep.mubr.msk.f32.mxu0 %vm13410_vm0, %v13409_v43  ;;  %v11845_v19 = vpop.f32.mrf.mxu1 }
 0x249   : > { %v11898_v18 = vpop.f32.mrf.mxu0  ;;  %v14464_v22 = vadd.f32 %v2710_v45, %v2553_v59 }
 0x24a   : > { %v2478_v8 = vpop.f32.mrf.mxu1  ;;  %12101 = vmatmul.mubr.msk.f32.gmra.mxu1 %vm1929_vm1, %v3296_v6  ;;  %v3759_v18 = vld [vmem:[#allocation3 + $0x39] sm:$0xff] }
 0x24b   : > { %v2715_v9 = vpop.f32.mrf.mxu0  ;;  %12154 = vmatmul.mubr.msk.f32.gmra.mxu0 %vm1929_vm1, %v3533_v37  ;;  %v2554_v28 = vadd.f32 %v2478_v8, %v14295_v35  ;;  %12158 = vmatprep.mubr.msk.f32.mxu1 %vm13410_vm0, %v13409_v43  ;;  %v10263_v35 = vld [vmem:[%s16475_s2 + $0x58] sm:$0xff]  ;;  %v3996_v6 = vld [vmem:[#allocation3 + $0x3a] sm:$0xff] }
 0x24c   : > { %12211 = vmatprep.mubr.msk.f32.mxu0 %vm13410_vm0, %v13409_v43  ;;  %v11848_v11 = vpop.f32.mrf.mxu1 }
 0x24d   : > { %v11901_v12 = vpop.f32.mrf.mxu0  ;;  %v14476_v13 = vadd.f32 %v2715_v9, %v2554_v28 }
 0x24e   : > { %v2483_v48 = vpop.f32.mrf.mxu1  ;;  %12159 = vmatmul.mubr.msk.f32.vlgmr.msra.gmra.mxu1 %vm1929_vm1, %v3754_v46  ;;  %v3760_v12 = vld [vmem:[#allocation3 + $0x41] sm:$0xff] }
 0x24f   : > { %v2720_v49 = vpop.f32.mrf.mxu0  ;;  %12212 = vmatmul.mubr.msk.f32.vlgmr.msra.gmra.mxu0 %vm1929_vm1, %v3991_v15  ;;  %v2555_v52 = vadd.f32 %v2483_v48, %v14303_v42  ;;  %12263 = vmatpush3.msra.mxu1 %v10245_v10  ;;  %v3997_v10 = vld [vmem:[#allocation3 + $0x42] sm:$0xff] }
 0x250   : > { %12161 = vmatprep.mubr.msk.f32.mxu1 %vm13410_vm0, %v13409_v43  ;;  %v11851_v55 = vpop.f32.mrf.mxu1  ;;  %12214 = vmatprep.mubr.msk.f32.mxu0 %vm13410_vm0, %v13409_v43 }
 0x251   : > { %v11904_v56 = vpop.f32.mrf.mxu0  ;;  %12316 = vmatpush3.msra.mxu0 %v10263_v35  ;;  %v14488_v57 = vadd.f32 %v2720_v49, %v2555_v52  ;;  %12368 = vmatprep.subr.mxu1 %v13409_v43  ;;  %v3761_v52 = vld [vmem:[#allocation3 + $0x49] sm:$0xff] }
 0x252   : > { %12421 = vmatprep.subr.mxu0 %v13409_v43  ;;  %v2488_v20 = vpop.f32.mrf.mxu1  ;;  %12162 = vmatmul.mubr.msk.f32.gmra.mxu1 %vm1929_vm1, %v3755_v58  ;;  %v3998_v55 = vld [vmem:[#allocation3 + $0x4a] sm:$0xff] }
 0x253   : > { %v2725_v42 = vpop.f32.mrf.mxu0  ;;  %12215 = vmatmul.mubr.msk.f32.gmra.mxu0 %vm1929_vm1, %v3992_v60  ;;  %v2556_v50 = vadd.f32 %v2488_v20, %v14313_v7  ;;  %12164 = vmatprep.mubr.msk.f32.mxu1 %vm13410_vm0, %v13409_v43 }
 0x254   : > { %12217 = vmatprep.mubr.msk.f32.mxu0 %vm13410_vm0, %v13409_v43  ;;  %v11854_v21 = vpop.f32.mrf.mxu1 }
 0x255   : > { %v11907_v53 = vpop.f32.mrf.mxu0  ;;  %v14499_v23 = vadd.f32 %v2725_v42, %v2556_v50  ;;  %v3762_v50 = vld [vmem:[#allocation3 + $0x51] sm:$0xff] }
 0x256   : > { %v2493_v26 = vpop.f32.mrf.mxu1  ;;  %12165 = vmatmul.mubr.msk.f32.gmra.mxu1 %vm1929_vm1, %v3756_v61  ;;  %v3999_v21 = vld [vmem:[#allocation3 + $0x52] sm:$0xff] }
 0x257   : > { %v2730_v25 = vpop.f32.mrf.mxu0  ;;  %12218 = vmatmul.mubr.msk.f32.gmra.mxu0 %vm1929_vm1, %v3993_v17  ;;  %v2557_v7 = vadd.f32 %v2493_v26, %v14321_v44  ;;  %12167 = vmatprep.mubr.msk.f32.mxu1 %vm13410_vm0, %v13409_v43 }
 0x258   : > { %12220 = vmatprep.mubr.msk.f32.mxu0 %vm13410_vm0, %v13409_v43  ;;  %v11857_v27 = vpop.f32.mrf.mxu1 }
 0x259   : > { %v11910_v63 = vpop.f32.mrf.mxu0  ;;  %v14508_v38 = vadd.f32 %v2730_v25, %v2557_v7  ;;  %v3763_v7 = vld [vmem:[#allocation3 + $0x59] sm:$0xff] }
 0x25a   : > { %v2498_v32 = vpop.f32.mrf.mxu1  ;;  %12168 = vmatmul.mubr.msk.f32.gmra.mxu1 %vm1929_vm1, %v3757_v29  ;;  %v4000_v27 = vld [vmem:[#allocation3 + $0x5a] sm:$0xff] }
 0x25b   : > { %v2735_v33 = vpop.f32.mrf.mxu0  ;;  %12221 = vmatmul.mubr.msk.f32.gmra.mxu0 %vm1929_vm1, %v3994_v30  ;;  %v2558_v44 = vadd.f32 %v2498_v32, %v14332_v51  ;;  %12170 = vmatprep.mubr.msk.f32.mxu1 %vm13410_vm0, %v13409_v43 }
 0x25c   : > { %12223 = vmatprep.mubr.msk.f32.mxu0 %vm13410_vm0, %v13409_v43  ;;  %v11860_v34 = vpop.f32.mrf.mxu1 }
 0x25d   : > { %v11913_v47 = vpop.f32.mrf.mxu0  ;;  %v14517_v1 = vadd.f32 %v2735_v33, %v2558_v44  ;;  %v3764_v44 = vld [vmem:[#allocation3 + $0x61] sm:$0xff] }
 0x25e   : > { %v2503_v40 = vpop.f32.mrf.mxu1  ;;  %12171 = vmatmul.mubr.msk.f32.gmra.mxu1 %vm1929_vm1, %v3758_v36  ;;  %v4001_v34 = vld [vmem:[#allocation3 + $0x62] sm:$0xff] }
 0x25f   : > { %v2740_v4 = vpop.f32.mrf.mxu0  ;;  %12224 = vmatmul.mubr.msk.f32.gmra.mxu0 %vm1929_vm1, %v3995_v39  ;;  %v2559_v51 = vadd.f32 %v2503_v40, %v14343_v62  ;;  %12173 = vmatprep.mubr.msk.f32.mxu1 %vm13410_vm0, %v13409_v43 }
 0x260   : > { %12226 = vmatprep.mubr.msk.f32.mxu0 %vm13410_vm0, %v13409_v43  ;;  %v11863_v45 = vpop.f32.mrf.mxu1 }
 0x261   : > { %v11916_v59 = vpop.f32.mrf.mxu0  ;;  %v14526_v19 = vadd.f32 %v2740_v4, %v2559_v51  ;;  %v3765_v51 = vld [vmem:[#allocation3 + $0x69] sm:$0xff] }
 0x262   : > { %v2508_v37 = vpop.f32.mrf.mxu1  ;;  %12174 = vmatmul.mubr.msk.f32.gmra.mxu1 %vm1929_vm1, %v3759_v18  ;;  %v4002_v45 = vld [vmem:[#allocation3 + $0x6a] sm:$0xff] }
 0x263   : > { %v2745_v8 = vpop.f32.mrf.mxu0  ;;  %12227 = vmatmul.mubr.msk.f32.gmra.mxu0 %vm1929_vm1, %v3996_v6  ;;  %v2560_v62 = vadd.f32 %v2508_v37, %v14365_v31  ;;  %12176 = vmatprep.mubr.msk.f32.mxu1 %vm13410_vm0, %v13409_v43 }
 0x264   : > { %12229 = vmatprep.mubr.msk.f32.mxu0 %vm13410_vm0, %v13409_v43  ;;  %v11866_v9 = vpop.f32.mrf.mxu1 }
 0x265   : > { %v11919_v28 = vpop.f32.mrf.mxu0  ;;  %v14535_v11 = vadd.f32 %v2745_v8, %v2560_v62  ;;  %v3766_v62 = vld [vmem:[#allocation3 + $0x71] sm:$0xff] }
 0x266   : > { %v2513_v46 = vpop.f32.mrf.mxu1  ;;  %12177 = vmatmul.mubr.msk.f32.gmra.mxu1 %vm1929_vm1, %v3760_v12  ;;  %v4003_v9 = vld [vmem:[#allocation3 + $0x72] sm:$0xff] }
 0x267   : > { %v2750_v15 = vpop.f32.mrf.mxu0  ;;  %12230 = vmatmul.mubr.msk.f32.gmra.mxu0 %vm1929_vm1, %v3997_v10  ;;  %v2561_v31 = vadd.f32 %v2513_v46, %v14373_v0  ;;  %12179 = vmatprep.mubr.msk.f32.mxu1 %vm13410_vm0, %v13409_v43 }
 0x268   : > { %12232 = vmatprep.mubr.msk.f32.mxu0 %vm13410_vm0, %v13409_v43  ;;  %v11869_v35 = vpop.f32.mrf.mxu1 }
 0x269   : > { %v11922_v48 = vpop.f32.mrf.mxu0  ;;  %v14544_v49 = vadd.f32 %v2750_v15, %v2561_v31  ;;  %v3767_v31 = vld [vmem:[#allocation3 + $0x79] sm:$0xff] }
 0x26a   : > { %v2518_v56 = vpop.f32.mrf.mxu1  ;;  %12180 = vmatmul.mubr.msk.f32.gmra.mxu1 %vm1929_vm1, %v3761_v52  ;;  %v4004_v35 = vld [vmem:[#allocation3 + $0x7a] sm:$0xff] }
 0x26b   : > { %v2755_v58 = vpop.f32.mrf.mxu0  ;;  %12233 = vmatmul.mubr.msk.f32.gmra.mxu0 %vm1929_vm1, %v3998_v55  ;;  %v2562_v0 = vadd.f32 %v2518_v56, %v14381_v3  ;;  %12182 = vmatprep.mubr.msk.f32.mxu1 %vm13410_vm0, %v13409_v43 }
 0x26c   : > { %12235 = vmatprep.mubr.msk.f32.mxu0 %vm13410_vm0, %v13409_v43  ;;  %v11872_v60 = vpop.f32.mrf.mxu1 }
 0x26d   : > { %v11925_v20 = vpop.f32.mrf.mxu0  ;;  %v14553_v42 = vadd.f32 %v2755_v58, %v2562_v0  ;;  %v3768_v0 = vld [vmem:[#allocation3 + $0x81] sm:$0xff] }
 0x26e   : > { %v2523_v53 = vpop.f32.mrf.mxu1  ;;  %12183 = vmatmul.mubr.msk.f32.gmra.mxu1 %vm1929_vm1, %v3762_v50  ;;  %v4005_v60 = vld [vmem:[#allocation3 + $0x82] sm:$0xff] }
 0x26f   : > { %v2760_v61 = vpop.f32.mrf.mxu0  ;;  %12236 = vmatmul.mubr.msk.f32.gmra.mxu0 %vm1929_vm1, %v3999_v21  ;;  %v2563_v3 = vadd.f32 %v2523_v53, %v14389_v5  ;;  %12185 = vmatprep.mubr.msk.f32.mxu1 %vm13410_vm0, %v13409_v43 }
 0x270   : > { %12238 = vmatprep.mubr.msk.f32.mxu0 %vm13410_vm0, %v13409_v43  ;;  %v11875_v17 = vpop.f32.mrf.mxu1 }
 0x271   : > { %v11928_v26 = vpop.f32.mrf.mxu0  ;;  %v14562_v25 = vadd.f32 %v2760_v61, %v2563_v3  ;;  %v3769_v3 = vld [vmem:[#allocation3 + $0x89] sm:$0xff] }
 0x272   : > { %v2528_v63 = vpop.f32.mrf.mxu1  ;;  %12186 = vmatmul.mubr.msk.f32.gmra.mxu1 %vm1929_vm1, %v3763_v7  ;;  %v4006_v17 = vld [vmem:[#allocation3 + $0x8a] sm:$0xff] }
 0x273   : > { %v2765_v29 = vpop.f32.mrf.mxu0  ;;  %12239 = vmatmul.mubr.msk.f32.gmra.mxu0 %vm1929_vm1, %v4000_v27  ;;  %v2564_v5 = vadd.f32 %v2528_v63, %v14397_v14  ;;  %12188 = vmatprep.mubr.msk.f32.mxu1 %vm13410_vm0, %v13409_v43 }
 0x274   : > { %12241 = vmatprep.mubr.msk.f32.mxu0 %vm13410_vm0, %v13409_v43  ;;  %v11878_v30 = vpop.f32.mrf.mxu1 }
 0x275   : > { %v11931_v32 = vpop.f32.mrf.mxu0  ;;  %v14571_v33 = vadd.f32 %v2765_v29, %v2564_v5  ;;  %v3770_v5 = vld [vmem:[#allocation3 + $0x91] sm:$0xff] }
 0x276   : > { %v2533_v47 = vpop.f32.mrf.mxu1  ;;  %12189 = vmatmul.mubr.msk.f32.gmra.mxu1 %vm1929_vm1, %v3764_v44  ;;  %v4007_v30 = vld [vmem:[#allocation3 + $0x92] sm:$0xff] }
 0x277   : > { %v2770_v36 = vpop.f32.mrf.mxu0  ;;  %12242 = vmatmul.mubr.msk.f32.gmra.mxu0 %vm1929_vm1, %v4001_v34  ;;  %v2565_v14 = vadd.f32 %v2533_v47, %v14405_v54  ;;  %12191 = vmatprep.mubr.msk.f32.mxu1 %vm13410_vm0, %v13409_v43 }
 0x278   : > { %12244 = vmatprep.mubr.msk.f32.mxu0 %vm13410_vm0, %v13409_v43  ;;  %v11881_v39 = vpop.f32.mrf.mxu1 }
 0x279   : > { %v11934_v40 = vpop.f32.mrf.mxu0  ;;  %v14580_v4 = vadd.f32 %v2770_v36, %v2565_v14  ;;  %v10281_v36 = vld [vmem:[%s16475_s2 + $0x60] sm:$0xff]  ;;  %v4228_v39 = vld [vmem:[#allocation3 + $0x1c] sm:$0xff] }
 0x27a   : > { %v2538_v59 = vpop.f32.mrf.mxu1  ;;  %12192 = vmatmul.mubr.msk.f32.gmra.mxu1 %vm1929_vm1, %v3765_v51  ;;  %v4465_v40 = vld [vmem:[#allocation3 + $0x1d] sm:$0xff] }
 0x27b   : > { %v2775_v18 = vpop.f32.mrf.mxu0  ;;  %12245 = vmatmul.mubr.msk.f32.gmra.mxu0 %vm1929_vm1, %v4002_v45  ;;  %v2566_v54 = vadd.f32 %v2538_v59, %v14414_v16  ;;  %12194 = vmatprep.mubr.msk.f32.mxu1 %vm13410_vm0, %v13409_v43 }
 0x27c   : > { %12247 = vmatprep.mubr.msk.f32.mxu0 %vm13410_vm0, %v13409_v43  ;;  %v11884_v6 = vpop.f32.mrf.mxu1 }
 0x27d   : > { %v11937_v37 = vpop.f32.mrf.mxu0  ;;  %v14589_v8 = vadd.f32 %v2775_v18, %v2566_v54 }
 0x27e   : > { %v2543_v28 = vpop.f32.mrf.mxu1  ;;  %12195 = vmatmul.mubr.msk.f32.gmra.mxu1 %vm1929_vm1, %v3766_v62  ;;  %v4229_v37 = vld [vmem:[#allocation3 + $0x24] sm:$0xff] }
 0x27f   : > { %v2780_v12 = vpop.f32.mrf.mxu0  ;;  %12248 = vmatmul.mubr.msk.f32.gmra.mxu0 %vm1929_vm1, %v4003_v9  ;;  %v2567_v16 = vadd.f32 %v2543_v28, %v14432_v24  ;;  %12197 = vmatprep.mubr.msk.f32.mxu1 %vm13410_vm0, %v13409_v43  ;;  %v4466_v62 = vld [vmem:[#allocation3 + $0x25] sm:$0xff] }
 0x280   : > { %12250 = vmatprep.mubr.msk.f32.mxu0 %vm13410_vm0, %v13409_v43  ;;  %v11887_v10 = vpop.f32.mrf.mxu1 }
 0x281   : > { %v11940_v46 = vpop.f32.mrf.mxu0  ;;  %v14598_v15 = vadd.f32 %v2780_v12, %v2567_v16 }
 0x282   : > { %v2548_v48 = vpop.f32.mrf.mxu1  ;;  %12198 = vmatmul.mubr.msk.f32.gmra.mxu1 %vm1929_vm1, %v3767_v31  ;;  %v4230_v46 = vld [vmem:[#allocation3 + $0x2c] sm:$0xff] }
 0x283   : > { %v2785_v52 = vpop.f32.mrf.mxu0  ;;  %12251 = vmatmul.mubr.msk.f32.gmra.mxu0 %vm1929_vm1, %v4004_v35  ;;  %v2568_v24 = vadd.f32 %v2548_v48, %v14441_v41  ;;  %12200 = vmatprep.mubr.msk.f32.mxu1 %vm13410_vm0, %v13409_v43  ;;  %v4467_v31 = vld [vmem:[#allocation3 + $0x2d] sm:$0xff] }
 0x284   : > { %12253 = vmatprep.mubr.msk.f32.mxu0 %vm13410_vm0, %v13409_v43  ;;  %v11890_v55 = vpop.f32.mrf.mxu1 }
 0x285   : > { %v11943_v56 = vpop.f32.mrf.mxu0  ;;  %v14607_v58 = vadd.f32 %v2785_v52, %v2568_v24 }
 0x286   : > { %v2942_v20 = vpop.f32.mrf.mxu1  ;;  %12201 = vmatmul.mubr.msk.f32.gmra.mxu1 %vm1929_vm1, %v3768_v0  ;;  %v4231_v56 = vld [vmem:[#allocation3 + $0x34] sm:$0xff] }
 0x287   : > { %v3179_v50 = vpop.f32.mrf.mxu0  ;;  %12254 = vmatmul.mubr.msk.f32.gmra.mxu0 %vm1929_vm1, %v4005_v60  ;;  %v3026_v41 = vadd.f32 %v2942_v20, %v14455_v2  ;;  %12203 = vmatprep.mubr.msk.f32.mxu1 %vm13410_vm0, %v13409_v43  ;;  %v4468_v0 = vld [vmem:[#allocation3 + $0x35] sm:$0xff] }
 0x288   : > { %12256 = vmatprep.mubr.msk.f32.mxu0 %vm13410_vm0, %v13409_v43  ;;  %v11948_v21 = vpop.f32.mrf.mxu1 }
 0x289   : > { %v12001_v53 = vpop.f32.mrf.mxu0  ;;  %v14616_v61 = vadd.f32 %v3179_v50, %v3026_v41 }
 0x28a   : > { %v2947_v26 = vpop.f32.mrf.mxu1  ;;  %12204 = vmatmul.mubr.msk.f32.gmra.mxu1 %vm1929_vm1, %v3769_v3  ;;  %v4232_v53 = vld [vmem:[#allocation3 + $0x3c] sm:$0xff] }
 0x28b   : > { %v3184_v7 = vpop.f32.mrf.mxu0  ;;  %12257 = vmatmul.mubr.msk.f32.gmra.mxu0 %vm1929_vm1, %v4006_v17  ;;  %v3027_v2 = vadd.f32 %v2947_v26, %v14464_v22  ;;  %12206 = vmatprep.mubr.msk.f32.mxu1 %vm13410_vm0, %v13409_v43  ;;  %v4469_v3 = vld [vmem:[#allocation3 + $0x3d] sm:$0xff] }
 0x28c   : > { %12259 = vmatprep.mubr.msk.f32.mxu0 %vm13410_vm0, %v13409_v43  ;;  %v11951_v27 = vpop.f32.mrf.mxu1 }
 0x28d   : > { %v12004_v63 = vpop.f32.mrf.mxu0  ;;  %v14625_v29 = vadd.f32 %v3184_v7, %v3027_v2 }
 0x28e   : > { %v2952_v32 = vpop.f32.mrf.mxu1  ;;  %12207 = vmatmul.mubr.msk.f32.gmra.mxu1 %vm1929_vm1, %v3770_v5  ;;  %v4233_v63 = vld [vmem:[#allocation3 + $0x44] sm:$0xff] }
 0x28f   : > { %v3189_v44 = vpop.f32.mrf.mxu0  ;;  %12260 = vmatmul.mubr.msk.f32.gmra.mxu0 %vm1929_vm1, %v4007_v30  ;;  %v3028_v22 = vadd.f32 %v2952_v32, %v14476_v13  ;;  %12264 = vmatprep.mubr.msk.f32.mxu1 %vm13410_vm0, %v13409_v43  ;;  %v10299_v13 = vld [vmem:[%s16475_s2 + $0x68] sm:$0xff]  ;;  %v4470_v5 = vld [vmem:[#allocation3 + $0x45] sm:$0xff] }
 0x290   : > { %12317 = vmatprep.mubr.msk.f32.mxu0 %vm13410_vm0, %v13409_v43  ;;  %v11954_v34 = vpop.f32.mrf.mxu1 }
 0x291   : > { %v12007_v47 = vpop.f32.mrf.mxu0  ;;  %v14637_v14 = vadd.f32 %v3189_v44, %v3028_v22 }
 0x292   : > { %v2957_v51 = vpop.f32.mrf.mxu1  ;;  %12265 = vmatmul.mubr.msk.f32.vlgmr.msra.gmra.mxu1 %vm1929_vm1, %v4228_v39  ;;  %v4234_v47 = vld [vmem:[#allocation3 + $0x4c] sm:$0xff] }
 0x293   : > { %v3194_v45 = vpop.f32.mrf.mxu0  ;;  %12318 = vmatmul.mubr.msk.f32.vlgmr.msra.gmra.mxu0 %vm1929_vm1, %v4465_v40  ;;  %v3029_v59 = vadd.f32 %v2957_v51, %v14488_v57  ;;  %12369 = vmatpush3.msra.mxu1 %v10281_v36  ;;  %v4471_v36 = vld [vmem:[#allocation3 + $0x4d] sm:$0xff] }
 0x294   : > { %12267 = vmatprep.mubr.msk.f32.mxu1 %vm13410_vm0, %v13409_v43  ;;  %v11957_v18 = vpop.f32.mrf.mxu1  ;;  %12320 = vmatprep.mubr.msk.f32.mxu0 %vm13410_vm0, %v13409_v43 }
 0x295   : > { %v12010_v54 = vpop.f32.mrf.mxu0  ;;  %12422 = vmatpush3.msra.mxu0 %v10299_v13  ;;  %v14649_v6 = vadd.f32 %v3194_v45, %v3029_v59  ;;  %12474 = vmatprep.subr.mxu1 %v13409_v43  ;;  %v4235_v59 = vld [vmem:[#allocation3 + $0x54] sm:$0xff] }
 0x296   : > { %12527 = vmatprep.subr.mxu0 %v13409_v43  ;;  %v2962_v9 = vpop.f32.mrf.mxu1  ;;  %12268 = vmatmul.mubr.msk.f32.gmra.mxu1 %vm1929_vm1, %v4229_v37  ;;  %v4472_v18 = vld [vmem:[#allocation3 + $0x55] sm:$0xff] }
 0x297   : > { %v3199_v57 = vpop.f32.mrf.mxu0  ;;  %12321 = vmatmul.mubr.msk.f32.gmra.mxu0 %vm1929_vm1, %v4466_v62  ;;  %v3030_v28 = vadd.f32 %v2962_v9, %v14499_v23  ;;  %12270 = vmatprep.mubr.msk.f32.mxu1 %vm13410_vm0, %v13409_v43 }
 0x298   : > { %12323 = vmatprep.mubr.msk.f32.mxu0 %vm13410_vm0, %v13409_v43  ;;  %v11960_v12 = vpop.f32.mrf.mxu1 }
 0x299   : > { %v12013_v16 = vpop.f32.mrf.mxu0  ;;  %v14660_v10 = vadd.f32 %v3199_v57, %v3030_v28  ;;  %v4236_v28 = vld [vmem:[#allocation3 + $0x5c] sm:$0xff] }
 0x29a   : > { %v2967_v35 = vpop.f32.mrf.mxu1  ;;  %12271 = vmatmul.mubr.msk.f32.gmra.mxu1 %vm1929_vm1, %v4230_v46  ;;  %v4473_v12 = vld [vmem:[#allocation3 + $0x5d] sm:$0xff] }
 0x29b   : > { %v3204_v48 = vpop.f32.mrf.mxu0  ;;  %12324 = vmatmul.mubr.msk.f32.gmra.mxu0 %vm1929_vm1, %v4467_v31  ;;  %v3031_v23 = vadd.f32 %v2967_v35, %v14508_v38  ;;  %12273 = vmatprep.mubr.msk.f32.mxu1 %vm13410_vm0, %v13409_v43 }
 0x29c   : > { %12326 = vmatprep.mubr.msk.f32.mxu0 %vm13410_vm0, %v13409_v43  ;;  %v11963_v52 = vpop.f32.mrf.mxu1 }
 0x29d   : > { %v12016_v24 = vpop.f32.mrf.mxu0  ;;  %v14669_v55 = vadd.f32 %v3204_v48, %v3031_v23  ;;  %v4237_v23 = vld [vmem:[#allocation3 + $0x64] sm:$0xff] }
 0x29e   : > { %v2972_v60 = vpop.f32.mrf.mxu1  ;;  %12274 = vmatmul.mubr.msk.f32.gmra.mxu1 %vm1929_vm1, %v4231_v56  ;;  %v4474_v52 = vld [vmem:[#allocation3 + $0x65] sm:$0xff] }
 0x29f   : > { %v3209_v20 = vpop.f32.mrf.mxu0  ;;  %12327 = vmatmul.mubr.msk.f32.gmra.mxu0 %vm1929_vm1, %v4468_v0  ;;  %v3032_v38 = vadd.f32 %v2972_v60, %v14517_v1  ;;  %12276 = vmatprep.mubr.msk.f32.mxu1 %vm13410_vm0, %v13409_v43 }
 0x2a0   : > { %12329 = vmatprep.mubr.msk.f32.mxu0 %vm13410_vm0, %v13409_v43  ;;  %v11966_v50 = vpop.f32.mrf.mxu1 }
 0x2a1   : > { %v12019_v41 = vpop.f32.mrf.mxu0  ;;  %v14678_v21 = vadd.f32 %v3209_v20, %v3032_v38  ;;  %v4238_v38 = vld [vmem:[#allocation3 + $0x6c] sm:$0xff] }
 0x2a2   : > { %v2977_v17 = vpop.f32.mrf.mxu1  ;;  %12277 = vmatmul.mubr.msk.f32.gmra.mxu1 %vm1929_vm1, %v4232_v53  ;;  %v4475_v50 = vld [vmem:[#allocation3 + $0x6d] sm:$0xff] }
 0x2a3   : > { %v3214_v26 = vpop.f32.mrf.mxu0  ;;  %12330 = vmatmul.mubr.msk.f32.gmra.mxu0 %vm1929_vm1, %v4469_v3  ;;  %v3033_v1 = vadd.f32 %v2977_v17, %v14526_v19  ;;  %12279 = vmatprep.mubr.msk.f32.mxu1 %vm13410_vm0, %v13409_v43 }
 0x2a4   : > { %12332 = vmatprep.mubr.msk.f32.mxu0 %vm13410_vm0, %v13409_v43  ;;  %v11969_v7 = vpop.f32.mrf.mxu1 }
 0x2a5   : > { %v12022_v2 = vpop.f32.mrf.mxu0  ;;  %v14687_v27 = vadd.f32 %v3214_v26, %v3033_v1  ;;  %v4239_v1 = vld [vmem:[#allocation3 + $0x74] sm:$0xff] }
 0x2a6   : > { %v2982_v30 = vpop.f32.mrf.mxu1  ;;  %12280 = vmatmul.mubr.msk.f32.gmra.mxu1 %vm1929_vm1, %v4233_v63  ;;  %v4476_v7 = vld [vmem:[#allocation3 + $0x75] sm:$0xff] }
 0x2a7   : > { %v3219_v32 = vpop.f32.mrf.mxu0  ;;  %12333 = vmatmul.mubr.msk.f32.gmra.mxu0 %vm1929_vm1, %v4470_v5  ;;  %v3034_v19 = vadd.f32 %v2982_v30, %v14535_v11  ;;  %12282 = vmatprep.mubr.msk.f32.mxu1 %vm13410_vm0, %v13409_v43 }
 0x2a8   : > { %12335 = vmatprep.mubr.msk.f32.mxu0 %vm13410_vm0, %v13409_v43  ;;  %v11972_v44 = vpop.f32.mrf.mxu1 }
 0x2a9   : > { %v12025_v22 = vpop.f32.mrf.mxu0  ;;  %v14696_v34 = vadd.f32 %v3219_v32, %v3034_v19  ;;  %v4240_v19 = vld [vmem:[#allocation3 + $0x7c] sm:$0xff] }
 0x2aa   : > { %v2987_v39 = vpop.f32.mrf.mxu1  ;;  %12283 = vmatmul.mubr.msk.f32.gmra.mxu1 %vm1929_vm1, %v4234_v47  ;;  %v4477_v44 = vld [vmem:[#allocation3 + $0x7d] sm:$0xff] }
 0x2ab   : > { %v3224_v40 = vpop.f32.mrf.mxu0  ;;  %12336 = vmatmul.mubr.msk.f32.gmra.mxu0 %vm1929_vm1, %v4471_v36  ;;  %v3035_v11 = vadd.f32 %v2987_v39, %v14544_v49  ;;  %12285 = vmatprep.mubr.msk.f32.mxu1 %vm13410_vm0, %v13409_v43 }
 0x2ac   : > { %12338 = vmatprep.mubr.msk.f32.mxu0 %vm13410_vm0, %v13409_v43  ;;  %v11975_v13 = vpop.f32.mrf.mxu1 }
 0x2ad   : > { %v12028_v51 = vpop.f32.mrf.mxu0  ;;  %v14705_v45 = vadd.f32 %v3224_v40, %v3035_v11  ;;  %v4241_v11 = vld [vmem:[#allocation3 + $0x84] sm:$0xff] }
 0x2ae   : > { %v2992_v54 = vpop.f32.mrf.mxu1  ;;  %12286 = vmatmul.mubr.msk.f32.gmra.mxu1 %vm1929_vm1, %v4235_v59  ;;  %v4478_v13 = vld [vmem:[#allocation3 + $0x85] sm:$0xff] }
 0x2af   : > { %v3229_v37 = vpop.f32.mrf.mxu0  ;;  %12339 = vmatmul.mubr.msk.f32.gmra.mxu0 %vm1929_vm1, %v4472_v18  ;;  %v3036_v49 = vadd.f32 %v2992_v54, %v14553_v42  ;;  %12288 = vmatprep.mubr.msk.f32.mxu1 %vm13410_vm0, %v13409_v43 }
 0x2b0   : > { %12341 = vmatprep.mubr.msk.f32.mxu0 %vm13410_vm0, %v13409_v43  ;;  %v11978_v62 = vpop.f32.mrf.mxu1 }
 0x2b1   : > { %v12031_v9 = vpop.f32.mrf.mxu0  ;;  %v14714_v57 = vadd.f32 %v3229_v37, %v3036_v49  ;;  %v4242_v49 = vld [vmem:[#allocation3 + $0x8c] sm:$0xff] }
 0x2b2   : > { %v2997_v16 = vpop.f32.mrf.mxu1  ;;  %12289 = vmatmul.mubr.msk.f32.gmra.mxu1 %vm1929_vm1, %v4236_v28  ;;  %v4479_v62 = vld [vmem:[#allocation3 + $0x8d] sm:$0xff] }
 0x2b3   : > { %v3234_v46 = vpop.f32.mrf.mxu0  ;;  %12342 = vmatmul.mubr.msk.f32.gmra.mxu0 %vm1929_vm1, %v4473_v12  ;;  %v3037_v42 = vadd.f32 %v2997_v16, %v14562_v25  ;;  %12291 = vmatprep.mubr.msk.f32.mxu1 %vm13410_vm0, %v13409_v43 }
 0x2b4   : > { %12344 = vmatprep.mubr.msk.f32.mxu0 %vm13410_vm0, %v13409_v43  ;;  %v11981_v31 = vpop.f32.mrf.mxu1 }
 0x2b5   : > { %v12034_v35 = vpop.f32.mrf.mxu0  ;;  %v14723_v48 = vadd.f32 %v3234_v46, %v3037_v42  ;;  %v4243_v42 = vld [vmem:[#allocation3 + $0x94] sm:$0xff] }
 0x2b6   : > { %v3002_v24 = vpop.f32.mrf.mxu1  ;;  %12292 = vmatmul.mubr.msk.f32.gmra.mxu1 %vm1929_vm1, %v4237_v23  ;;  %v4480_v31 = vld [vmem:[#allocation3 + $0x95] sm:$0xff] }
 0x2b7   : > { %v3239_v56 = vpop.f32.mrf.mxu0  ;;  %12345 = vmatmul.mubr.msk.f32.gmra.mxu0 %vm1929_vm1, %v4474_v52  ;;  %v3038_v25 = vadd.f32 %v3002_v24, %v14571_v33  ;;  %12294 = vmatprep.mubr.msk.f32.mxu1 %vm13410_vm0, %v13409_v43 }
 0x2b8   : > { %12347 = vmatprep.mubr.msk.f32.mxu0 %vm13410_vm0, %v13409_v43  ;;  %v11984_v0 = vpop.f32.mrf.mxu1 }
 0x2b9   : > { %v12037_v60 = vpop.f32.mrf.mxu0  ;;  %v14732_v20 = vadd.f32 %v3239_v56, %v3038_v25  ;;  %v4244_v25 = vld [vmem:[#allocation3 + $0x9c] sm:$0xff] }
 0x2ba   : > { %v3007_v41 = vpop.f32.mrf.mxu1  ;;  %12295 = vmatmul.mubr.msk.f32.gmra.mxu1 %vm1929_vm1, %v4238_v38  ;;  %v4481_v0 = vld [vmem:[#allocation3 + $0x9d] sm:$0xff] }
 0x2bb   : > { %v3244_v53 = vpop.f32.mrf.mxu0  ;;  %12348 = vmatmul.mubr.msk.f32.gmra.mxu0 %vm1929_vm1, %v4475_v50  ;;  %v3039_v33 = vadd.f32 %v3007_v41, %v14580_v4  ;;  %12297 = vmatprep.mubr.msk.f32.mxu1 %vm13410_vm0, %v13409_v43 }
 0x2bc   : > { %12350 = vmatprep.mubr.msk.f32.mxu0 %vm13410_vm0, %v13409_v43  ;;  %v11987_v3 = vpop.f32.mrf.mxu1 }
 0x2bd   : > { %v12040_v17 = vpop.f32.mrf.mxu0  ;;  %v14741_v26 = vadd.f32 %v3244_v53, %v3039_v33  ;;  %v10317_v53 = vld [vmem:[%s16475_s2 + $0x70] sm:$0xff] }
 0x2be   : > { %v3012_v2 = vpop.f32.mrf.mxu1  ;;  %12298 = vmatmul.mubr.msk.f32.gmra.mxu1 %vm1929_vm1, %v4239_v1  ;;  %v4702_v3 = vld [vmem:[#allocation3 + $0x1e] sm:$0xff] }
 0x2bf   : > { %v3249_v63 = vpop.f32.mrf.mxu0  ;;  %12351 = vmatmul.mubr.msk.f32.gmra.mxu0 %vm1929_vm1, %v4476_v7  ;;  %v3040_v4 = vadd.f32 %v3012_v2, %v14589_v8  ;;  %12300 = vmatprep.mubr.msk.f32.mxu1 %vm13410_vm0, %v13409_v43  ;;  %v4939_v17 = vld [vmem:[#allocation3 + $0x1f] sm:$0xff] }
 0x2c0   : > { %12353 = vmatprep.mubr.msk.f32.mxu0 %vm13410_vm0, %v13409_v43  ;;  %v11990_v5 = vpop.f32.mrf.mxu1 }
 0x2c1   : > { %v12043_v30 = vpop.f32.mrf.mxu0  ;;  %v14750_v32 = vadd.f32 %v3249_v63, %v3040_v4 }
 0x2c2   : > { %v3017_v22 = vpop.f32.mrf.mxu1  ;;  %12301 = vmatmul.mubr.msk.f32.gmra.mxu1 %vm1929_vm1, %v4240_v19  ;;  %v4703_v30 = vld [vmem:[#allocation3 + $0x26] sm:$0xff] }
 0x2c3   : > { %v3254_v47 = vpop.f32.mrf.mxu0  ;;  %12354 = vmatmul.mubr.msk.f32.gmra.mxu0 %vm1929_vm1, %v4477_v44  ;;  %v3041_v8 = vadd.f32 %v3017_v22, %v14598_v15  ;;  %12303 = vmatprep.mubr.msk.f32.mxu1 %vm13410_vm0, %v13409_v43  ;;  %v4940_v19 = vld [vmem:[#allocation3 + $0x27] sm:$0xff] }
 0x2c4   : > { %12356 = vmatprep.mubr.msk.f32.mxu0 %vm13410_vm0, %v13409_v43  ;;  %v11993_v36 = vpop.f32.mrf.mxu1 }
 0x2c5   : > { %v12046_v39 = vpop.f32.mrf.mxu0  ;;  %v14759_v40 = vadd.f32 %v3254_v47, %v3041_v8 }
 0x2c6   : > { %v3022_v51 = vpop.f32.mrf.mxu1  ;;  %12304 = vmatmul.mubr.msk.f32.gmra.mxu1 %vm1929_vm1, %v4241_v11  ;;  %v4704_v39 = vld [vmem:[#allocation3 + $0x2e] sm:$0xff] }
 0x2c7   : > { %v3259_v59 = vpop.f32.mrf.mxu0  ;;  %12357 = vmatmul.mubr.msk.f32.gmra.mxu0 %vm1929_vm1, %v4478_v13  ;;  %v3042_v15 = vadd.f32 %v3022_v51, %v14607_v58  ;;  %12306 = vmatprep.mubr.msk.f32.mxu1 %vm13410_vm0, %v13409_v43  ;;  %v4941_v11 = vld [vmem:[#allocation3 + $0x2f] sm:$0xff] }
 0x2c8   : > { %12359 = vmatprep.mubr.msk.f32.mxu0 %vm13410_vm0, %v13409_v43  ;;  %v11996_v18 = vpop.f32.mrf.mxu1 }
 0x2c9   : > { %v12049_v54 = vpop.f32.mrf.mxu0  ;;  %v14768_v37 = vadd.f32 %v3259_v59, %v3042_v15 }
 0x2ca   : > { %v3416_v9 = vpop.f32.mrf.mxu1  ;;  %12307 = vmatmul.mubr.msk.f32.gmra.mxu1 %vm1929_vm1, %v4242_v49  ;;  %v4705_v54 = vld [vmem:[#allocation3 + $0x36] sm:$0xff] }
 0x2cb   : > { %v3653_v28 = vpop.f32.mrf.mxu0  ;;  %12360 = vmatmul.mubr.msk.f32.gmra.mxu0 %vm1929_vm1, %v4479_v62  ;;  %v3500_v58 = vadd.f32 %v3416_v9, %v14616_v61  ;;  %12309 = vmatprep.mubr.msk.f32.mxu1 %vm13410_vm0, %v13409_v43  ;;  %v4942_v49 = vld [vmem:[#allocation3 + $0x37] sm:$0xff] }
 0x2cc   : > { %12362 = vmatprep.mubr.msk.f32.mxu0 %vm13410_vm0, %v13409_v43  ;;  %v12054_v12 = vpop.f32.mrf.mxu1 }
 0x2cd   : > { %v12107_v16 = vpop.f32.mrf.mxu0  ;;  %v14777_v46 = vadd.f32 %v3653_v28, %v3500_v58 }
 0x2ce   : > { %v3421_v35 = vpop.f32.mrf.mxu1  ;;  %12310 = vmatmul.mubr.msk.f32.gmra.mxu1 %vm1929_vm1, %v4243_v42  ;;  %v4706_v16 = vld [vmem:[#allocation3 + $0x3e] sm:$0xff] }
 0x2cf   : > { %v3658_v23 = vpop.f32.mrf.mxu0  ;;  %12363 = vmatmul.mubr.msk.f32.gmra.mxu0 %vm1929_vm1, %v4480_v31  ;;  %v3501_v61 = vadd.f32 %v3421_v35, %v14625_v29  ;;  %12312 = vmatprep.mubr.msk.f32.mxu1 %vm13410_vm0, %v13409_v43  ;;  %v4943_v42 = vld [vmem:[#allocation3 + $0x3f] sm:$0xff] }
 0x2d0   : > { %12365 = vmatprep.mubr.msk.f32.mxu0 %vm13410_vm0, %v13409_v43  ;;  %v12057_v52 = vpop.f32.mrf.mxu1 }
 0x2d1   : > { %v12110_v24 = vpop.f32.mrf.mxu0  ;;  %v14786_v56 = vadd.f32 %v3658_v23, %v3501_v61 }
 0x2d2   : > { %v3426_v60 = vpop.f32.mrf.mxu1  ;;  %12313 = vmatmul.mubr.msk.f32.gmra.mxu1 %vm1929_vm1, %v4244_v25  ;;  %v4707_v24 = vld [vmem:[#allocation3 + $0x46] sm:$0xff] }
 0x2d3   : > { %v3663_v38 = vpop.f32.mrf.mxu0  ;;  %12366 = vmatmul.mubr.msk.f32.gmra.mxu0 %vm1929_vm1, %v4481_v0  ;;  %v3502_v29 = vadd.f32 %v3426_v60, %v14637_v14  ;;  %12370 = vmatprep.mubr.msk.f32.mxu1 %vm13410_vm0, %v13409_v43  ;;  %v10335_v14 = vld [vmem:[%s16475_s2 + $0x78] sm:$0xff] }
 0x2d4   : > { %12423 = vmatprep.mubr.msk.f32.mxu0 %vm13410_vm0, %v13409_v43  ;;  %v12060_v50 = vpop.f32.mrf.mxu1  ;;  %v4944_v25 = vld [vmem:[#allocation3 + $0x47] sm:$0xff] }
 0x2d5   : > { %v12113_v41 = vpop.f32.mrf.mxu0  ;;  %v14798_v33 = vadd.f32 %v3663_v38, %v3502_v29 }
 0x2d6   : > { %v3431_v1 = vpop.f32.mrf.mxu1  ;;  %12371 = vmatmul.mubr.msk.f32.vlgmr.msra.gmra.mxu1 %vm1929_vm1, %v4702_v3  ;;  %v4708_v41 = vld [vmem:[#allocation3 + $0x4e] sm:$0xff] }
 0x2d7   : > { %v3668_v7 = vpop.f32.mrf.mxu0  ;;  %12424 = vmatmul.mubr.msk.f32.vlgmr.msra.gmra.mxu0 %vm1929_vm1, %v4939_v17  ;;  %v3503_v2 = vadd.f32 %v3431_v1, %v14649_v6  ;;  %12475 = vmatpush3.msra.mxu1 %v10317_v53  ;;  %v4945_v53 = vld [vmem:[#allocation3 + $0x4f] sm:$0xff] }
 0x2d8   : > { %12373 = vmatprep.mubr.msk.f32.mxu1 %vm13410_vm0, %v13409_v43  ;;  %v12063_v63 = vpop.f32.mrf.mxu1  ;;  %12426 = vmatprep.mubr.msk.f32.mxu0 %vm13410_vm0, %v13409_v43 }
 0x2d9   : > { %v12116_v4 = vpop.f32.mrf.mxu0  ;;  %12528 = vmatpush3.msra.mxu0 %v10335_v14  ;;  %v14810_v5 = vadd.f32 %v3668_v7, %v3503_v2  ;;  %12580 = vmatprep.subr.mxu1 %v13409_v43  ;;  %v4709_v2 = vld [vmem:[#allocation3 + $0x56] sm:$0xff] }
 0x2da   : > { %12633 = vmatprep.subr.mxu0 %v13409_v43  ;;  %v3436_v44 = vpop.f32.mrf.mxu1  ;;  %12374 = vmatmul.mubr.msk.f32.gmra.mxu1 %vm1929_vm1, %v4703_v30  ;;  %v4946_v63 = vld [vmem:[#allocation3 + $0x57] sm:$0xff] }
 0x2db   : > { %v3673_v6 = vpop.f32.mrf.mxu0  ;;  %12427 = vmatmul.mubr.msk.f32.gmra.mxu0 %vm1929_vm1, %v4940_v19  ;;  %v3504_v22 = vadd.f32 %v3436_v44, %v14660_v10  ;;  %12376 = vmatprep.mubr.msk.f32.mxu1 %vm13410_vm0, %v13409_v43 }
 0x2dc   : > { %12429 = vmatprep.mubr.msk.f32.mxu0 %vm13410_vm0, %v13409_v43  ;;  %v12066_v47 = vpop.f32.mrf.mxu1 }
 0x2dd   : > { %v12119_v8 = vpop.f32.mrf.mxu0  ;;  %v14821_v36 = vadd.f32 %v3673_v6, %v3504_v22  ;;  %v4710_v22 = vld [vmem:[#allocation3 + $0x5e] sm:$0xff] }
 0x2de   : > { %v3441_v13 = vpop.f32.mrf.mxu1  ;;  %12377 = vmatmul.mubr.msk.f32.gmra.mxu1 %vm1929_vm1, %v4704_v39  ;;  %v4947_v47 = vld [vmem:[#allocation3 + $0x5f] sm:$0xff] }
 0x2df   : > { %v3678_v51 = vpop.f32.mrf.mxu0  ;;  %12430 = vmatmul.mubr.msk.f32.gmra.mxu0 %vm1929_vm1, %v4941_v11  ;;  %v3505_v10 = vadd.f32 %v3441_v13, %v14669_v55  ;;  %12379 = vmatprep.mubr.msk.f32.mxu1 %vm13410_vm0, %v13409_v43 }
 0x2e0   : > { %12432 = vmatprep.mubr.msk.f32.mxu0 %vm13410_vm0, %v13409_v43  ;;  %v12069_v59 = vpop.f32.mrf.mxu1 }
 0x2e1   : > { %v12122_v15 = vpop.f32.mrf.mxu0  ;;  %v14830_v18 = vadd.f32 %v3678_v51, %v3505_v10  ;;  %v4711_v10 = vld [vmem:[#allocation3 + $0x66] sm:$0xff] }
 0x2e2   : > { %v3446_v62 = vpop.f32.mrf.mxu1  ;;  %12380 = vmatmul.mubr.msk.f32.gmra.mxu1 %vm1929_vm1, %v4705_v54  ;;  %v4948_v59 = vld [vmem:[#allocation3 + $0x67] sm:$0xff] }
 0x2e3   : > { %v3683_v9 = vpop.f32.mrf.mxu0  ;;  %12433 = vmatmul.mubr.msk.f32.gmra.mxu0 %vm1929_vm1, %v4942_v49  ;;  %v3506_v55 = vadd.f32 %v3446_v62, %v14678_v21  ;;  %12382 = vmatprep.mubr.msk.f32.mxu1 %vm13410_vm0, %v13409_v43 }
 0x2e4   : > { %12435 = vmatprep.mubr.msk.f32.mxu0 %vm13410_vm0, %v13409_v43  ;;  %v12072_v28 = vpop.f32.mrf.mxu1 }
 0x2e5   : > { %v12125_v58 = vpop.f32.mrf.mxu0  ;;  %v14839_v12 = vadd.f32 %v3683_v9, %v3506_v55  ;;  %v4712_v55 = vld [vmem:[#allocation3 + $0x6e] sm:$0xff] }
 0x2e6   : > { %v3451_v31 = vpop.f32.mrf.mxu1  ;;  %12383 = vmatmul.mubr.msk.f32.gmra.mxu1 %vm1929_vm1, %v4706_v16  ;;  %v4949_v28 = vld [vmem:[#allocation3 + $0x6f] sm:$0xff] }
 0x2e7   : > { %v3688_v35 = vpop.f32.mrf.mxu0  ;;  %12436 = vmatmul.mubr.msk.f32.gmra.mxu0 %vm1929_vm1, %v4943_v42  ;;  %v3507_v21 = vadd.f32 %v3451_v31, %v14687_v27  ;;  %12385 = vmatprep.mubr.msk.f32.mxu1 %vm13410_vm0, %v13409_v43 }
 0x2e8   : > { %12438 = vmatprep.mubr.msk.f32.mxu0 %vm13410_vm0, %v13409_v43  ;;  %v12075_v23 = vpop.f32.mrf.mxu1 }
 0x2e9   : > { %v12128_v61 = vpop.f32.mrf.mxu0  ;;  %v14848_v52 = vadd.f32 %v3688_v35, %v3507_v21  ;;  %v4713_v21 = vld [vmem:[#allocation3 + $0x76] sm:$0xff] }
 0x2ea   : > { %v3456_v0 = vpop.f32.mrf.mxu1  ;;  %12386 = vmatmul.mubr.msk.f32.gmra.mxu1 %vm1929_vm1, %v4707_v24  ;;  %v4950_v23 = vld [vmem:[#allocation3 + $0x77] sm:$0xff] }
 0x2eb   : > { %v3693_v60 = vpop.f32.mrf.mxu0  ;;  %12439 = vmatmul.mubr.msk.f32.gmra.mxu0 %vm1929_vm1, %v4944_v25  ;;  %v3508_v27 = vadd.f32 %v3456_v0, %v14696_v34  ;;  %12388 = vmatprep.mubr.msk.f32.mxu1 %vm13410_vm0, %v13409_v43 }
 0x2ec   : > { %12441 = vmatprep.mubr.msk.f32.mxu0 %vm13410_vm0, %v13409_v43  ;;  %v12078_v38 = vpop.f32.mrf.mxu1 }
 0x2ed   : > { %v12131_v29 = vpop.f32.mrf.mxu0  ;;  %v14857_v50 = vadd.f32 %v3693_v60, %v3508_v27  ;;  %v4714_v27 = vld [vmem:[#allocation3 + $0x7e] sm:$0xff] }
 0x2ee   : > { %v3461_v3 = vpop.f32.mrf.mxu1  ;;  %12389 = vmatmul.mubr.msk.f32.gmra.mxu1 %vm1929_vm1, %v4708_v41  ;;  %v4951_v38 = vld [vmem:[#allocation3 + $0x7f] sm:$0xff] }
 0x2ef   : > { %v3698_v17 = vpop.f32.mrf.mxu0  ;;  %12442 = vmatmul.mubr.msk.f32.gmra.mxu0 %vm1929_vm1, %v4945_v53  ;;  %v3509_v34 = vadd.f32 %v3461_v3, %v14705_v45  ;;  %12391 = vmatprep.mubr.msk.f32.mxu1 %vm13410_vm0, %v13409_v43 }
 0x2f0   : > { %12444 = vmatprep.mubr.msk.f32.mxu0 %vm13410_vm0, %v13409_v43  ;;  %v12081_v14 = vpop.f32.mrf.mxu1 }
 0x2f1   : > { %v12134_v1 = vpop.f32.mrf.mxu0  ;;  %v14866_v7 = vadd.f32 %v3698_v17, %v3509_v34  ;;  %v4715_v34 = vld [vmem:[#allocation3 + $0x86] sm:$0xff] }
 0x2f2   : > { %v3466_v4 = vpop.f32.mrf.mxu1  ;;  %12392 = vmatmul.mubr.msk.f32.gmra.mxu1 %vm1929_vm1, %v4709_v2  ;;  %v4952_v14 = vld [vmem:[#allocation3 + $0x87] sm:$0xff] }
 0x2f3   : > { %v3703_v30 = vpop.f32.mrf.mxu0  ;;  %12445 = vmatmul.mubr.msk.f32.gmra.mxu0 %vm1929_vm1, %v4946_v63  ;;  %v3510_v45 = vadd.f32 %v3466_v4, %v14714_v57  ;;  %12394 = vmatprep.mubr.msk.f32.mxu1 %vm13410_vm0, %v13409_v43 }
 0x2f4   : > { %12447 = vmatprep.mubr.msk.f32.mxu0 %vm13410_vm0, %v13409_v43  ;;  %v12084_v19 = vpop.f32.mrf.mxu1 }
 0x2f5   : > { %v12137_v44 = vpop.f32.mrf.mxu0  ;;  %v14875_v6 = vadd.f32 %v3703_v30, %v3510_v45  ;;  %v4716_v45 = vld [vmem:[#allocation3 + $0x8e] sm:$0xff] }
 0x2f6   : > { %v3471_v8 = vpop.f32.mrf.mxu1  ;;  %12395 = vmatmul.mubr.msk.f32.gmra.mxu1 %vm1929_vm1, %v4710_v22  ;;  %v4953_v19 = vld [vmem:[#allocation3 + $0x8f] sm:$0xff] }
 0x2f7   : > { %v3708_v39 = vpop.f32.mrf.mxu0  ;;  %12448 = vmatmul.mubr.msk.f32.gmra.mxu0 %vm1929_vm1, %v4947_v47  ;;  %v3511_v57 = vadd.f32 %v3471_v8, %v14723_v48  ;;  %12397 = vmatprep.mubr.msk.f32.mxu1 %vm13410_vm0, %v13409_v43 }
 0x2f8   : > { %12450 = vmatprep.mubr.msk.f32.mxu0 %vm13410_vm0, %v13409_v43  ;;  %v12087_v11 = vpop.f32.mrf.mxu1 }
 0x2f9   : > { %v12140_v13 = vpop.f32.mrf.mxu0  ;;  %v14884_v51 = vadd.f32 %v3708_v39, %v3511_v57  ;;  %v4717_v57 = vld [vmem:[#allocation3 + $0x96] sm:$0xff] }
 0x2fa   : > { %v3476_v15 = vpop.f32.mrf.mxu1  ;;  %12398 = vmatmul.mubr.msk.f32.gmra.mxu1 %vm1929_vm1, %v4711_v10  ;;  %v4954_v11 = vld [vmem:[#allocation3 + $0x97] sm:$0xff] }
 0x2fb   : > { %v3713_v54 = vpop.f32.mrf.mxu0  ;;  %12451 = vmatmul.mubr.msk.f32.gmra.mxu0 %vm1929_vm1, %v4948_v59  ;;  %v3512_v48 = vadd.f32 %v3476_v15, %v14732_v20  ;;  %12400 = vmatprep.mubr.msk.f32.mxu1 %vm13410_vm0, %v13409_v43 }
 0x2fc   : > { %12453 = vmatprep.mubr.msk.f32.mxu0 %vm13410_vm0, %v13409_v43  ;;  %v12090_v49 = vpop.f32.mrf.mxu1 }
 0x2fd   : > { %v12143_v62 = vpop.f32.mrf.mxu0  ;;  %v14893_v9 = vadd.f32 %v3713_v54, %v3512_v48  ;;  %v4718_v48 = vld [vmem:[#allocation3 + $0x9e] sm:$0xff] }
 0x2fe   : > { %v3481_v58 = vpop.f32.mrf.mxu1  ;;  %12401 = vmatmul.mubr.msk.f32.gmra.mxu1 %vm1929_vm1, %v4712_v55  ;;  %v4955_v49 = vld [vmem:[#allocation3 + $0x9f] sm:$0xff] }
 0x2ff   : > { %v3718_v16 = vpop.f32.mrf.mxu0  ;;  %12454 = vmatmul.mubr.msk.f32.gmra.mxu0 %vm1929_vm1, %v4949_v28  ;;  %v3513_v20 = vadd.f32 %v3481_v58, %v14741_v26  ;;  %12403 = vmatprep.mubr.msk.f32.mxu1 %vm13410_vm0, %v13409_v43 }
 0x300   : > { %12456 = vmatprep.mubr.msk.f32.mxu0 %vm13410_vm0, %v13409_v43  ;;  %v12093_v42 = vpop.f32.mrf.mxu1 }
 0x301   : > { %v12146_v31 = vpop.f32.mrf.mxu0  ;;  %v14902_v35 = vadd.f32 %v3718_v16, %v3513_v20  ;;  %v10353_v16 = vld [vmem:[%s16475_s2 + $0x80] sm:$0xff]  ;;  %v5176_v42 = vld [vmem:[#allocation3 + $0x20] sm:$0xff] }
 0x302   : > { %v3486_v61 = vpop.f32.mrf.mxu1  ;;  %12404 = vmatmul.mubr.msk.f32.gmra.mxu1 %vm1929_vm1, %v4713_v21  ;;  %v5413_v31 = vld [vmem:[#allocation3 + $0x2a] sm:$0xff] }
 0x303   : > { %v3723_v24 = vpop.f32.mrf.mxu0  ;;  %12457 = vmatmul.mubr.msk.f32.gmra.mxu0 %vm1929_vm1, %v4950_v23  ;;  %v3514_v26 = vadd.f32 %v3486_v61, %v14750_v32  ;;  %12406 = vmatprep.mubr.msk.f32.mxu1 %vm13410_vm0, %v13409_v43 }
 0x304   : > { %12459 = vmatprep.mubr.msk.f32.mxu0 %vm13410_vm0, %v13409_v43  ;;  %v12096_v25 = vpop.f32.mrf.mxu1 }
 0x305   : > { %v12149_v0 = vpop.f32.mrf.mxu0  ;;  %v14911_v60 = vadd.f32 %v3723_v24, %v3514_v26 }
 0x306   : > { %v3491_v29 = vpop.f32.mrf.mxu1  ;;  %12407 = vmatmul.mubr.msk.f32.gmra.mxu1 %vm1929_vm1, %v4714_v27  ;;  %v5177_v0 = vld [vmem:[#allocation3 + $0x28] sm:$0xff]  ;;  %v5414_v27 = vld [vmem:[#allocation3 + $0x32] sm:$0xff] }
 0x307   : > { %v3728_v41 = vpop.f32.mrf.mxu0  ;;  %12460 = vmatmul.mubr.msk.f32.gmra.mxu0 %vm1929_vm1, %v4951_v38  ;;  %v3515_v32 = vadd.f32 %v3491_v29, %v14759_v40  ;;  %12409 = vmatprep.mubr.msk.f32.mxu1 %vm13410_vm0, %v13409_v43 }
 0x308   : > { %12462 = vmatprep.mubr.msk.f32.mxu0 %vm13410_vm0, %v13409_v43  ;;  %v12099_v53 = vpop.f32.mrf.mxu1 }
 0x309   : > { %v12152_v3 = vpop.f32.mrf.mxu0  ;;  %v14920_v17 = vadd.f32 %v3728_v41, %v3515_v32 }
 0x30a   : > { %v3496_v1 = vpop.f32.mrf.mxu1  ;;  %12410 = vmatmul.mubr.msk.f32.gmra.mxu1 %vm1929_vm1, %v4715_v34  ;;  %v5178_v3 = vld [vmem:[#allocation3 + $0x30] sm:$0xff]  ;;  %v5415_v34 = vld [vmem:[#allocation3 + $0x3a] sm:$0xff] }
 0x30b   : > { %v3733_v2 = vpop.f32.mrf.mxu0  ;;  %12463 = vmatmul.mubr.msk.f32.gmra.mxu0 %vm1929_vm1, %v4952_v14  ;;  %v3516_v40 = vadd.f32 %v3496_v1, %v14768_v37  ;;  %12412 = vmatprep.mubr.msk.f32.mxu1 %vm13410_vm0, %v13409_v43 }
 0x30c   : > { %12465 = vmatprep.mubr.msk.f32.mxu0 %vm13410_vm0, %v13409_v43  ;;  %v12102_v63 = vpop.f32.mrf.mxu1 }
 0x30d   : > { %v12155_v4 = vpop.f32.mrf.mxu0  ;;  %v14929_v30 = vadd.f32 %v3733_v2, %v3516_v40 }
 0x30e   : > { %v3890_v44 = vpop.f32.mrf.mxu1  ;;  %12413 = vmatmul.mubr.msk.f32.gmra.mxu1 %vm1929_vm1, %v4716_v45  ;;  %v5179_v4 = vld [vmem:[#allocation3 + $0x38] sm:$0xff]  ;;  %v5416_v45 = vld [vmem:[#allocation3 + $0x42] sm:$0xff] }
 0x30f   : > { %v4127_v22 = vpop.f32.mrf.mxu0  ;;  %12466 = vmatmul.mubr.msk.f32.gmra.mxu0 %vm1929_vm1, %v4953_v19  ;;  %v3974_v37 = vadd.f32 %v3890_v44, %v14777_v46  ;;  %12415 = vmatprep.mubr.msk.f32.mxu1 %vm13410_vm0, %v13409_v43 }
 0x310   : > { %12468 = vmatprep.mubr.msk.f32.mxu0 %vm13410_vm0, %v13409_v43  ;;  %v12160_v47 = vpop.f32.mrf.mxu1 }
 0x311   : > { %v12213_v8 = vpop.f32.mrf.mxu0  ;;  %v14938_v39 = vadd.f32 %v4127_v22, %v3974_v37 }
 0x312   : > { %v3895_v13 = vpop.f32.mrf.mxu1  ;;  %12416 = vmatmul.mubr.msk.f32.gmra.mxu1 %vm1929_vm1, %v4717_v57  ;;  %v5180_v8 = vld [vmem:[#allocation3 + $0x40] sm:$0xff]  ;;  %v5417_v57 = vld [vmem:[#allocation3 + $0x4a] sm:$0xff] }
 0x313   : > { %v4132_v10 = vpop.f32.mrf.mxu0  ;;  %12469 = vmatmul.mubr.msk.f32.gmra.mxu0 %vm1929_vm1, %v4954_v11  ;;  %v3975_v46 = vadd.f32 %v3895_v13, %v14786_v56  ;;  %12418 = vmatprep.mubr.msk.f32.mxu1 %vm13410_vm0, %v13409_v43 }
 0x314   : > { %12471 = vmatprep.mubr.msk.f32.mxu0 %vm13410_vm0, %v13409_v43  ;;  %v12163_v59 = vpop.f32.mrf.mxu1 }
 0x315   : > { %v12216_v15 = vpop.f32.mrf.mxu0  ;;  %v14947_v54 = vadd.f32 %v4132_v10, %v3975_v46 }
 0x316   : > { %v3900_v62 = vpop.f32.mrf.mxu1  ;;  %12419 = vmatmul.mubr.msk.f32.gmra.mxu1 %vm1929_vm1, %v4718_v48  ;;  %v5181_v15 = vld [vmem:[#allocation3 + $0x48] sm:$0xff]  ;;  %v5418_v48 = vld [vmem:[#allocation3 + $0x52] sm:$0xff] }
 0x317   : > { %v4137_v55 = vpop.f32.mrf.mxu0  ;;  %12472 = vmatmul.mubr.msk.f32.gmra.mxu0 %vm1929_vm1, %v4955_v49  ;;  %v3976_v56 = vadd.f32 %v3900_v62, %v14798_v33  ;;  %12476 = vmatprep.mubr.msk.f32.mxu1 %vm13410_vm0, %v13409_v43  ;;  %v10371_v33 = vld [vmem:[%s16475_s2 + $0x88] sm:$0xff] }
 0x318   : > { %12529 = vmatprep.mubr.msk.f32.mxu0 %vm13410_vm0, %v13409_v43  ;;  %v12166_v28 = vpop.f32.mrf.mxu1 }
 0x319   : > { %v12219_v58 = vpop.f32.mrf.mxu0  ;;  %v14959_v20 = vadd.f32 %v4137_v55, %v3976_v56 }
 0x31a   : > { %v3905_v21 = vpop.f32.mrf.mxu1  ;;  %12477 = vmatmul.mubr.msk.f32.vlgmr.msra.gmra.mxu1 %vm1929_vm1, %v5176_v42  ;;  %v5182_v58 = vld [vmem:[#allocation3 + $0x50] sm:$0xff] }
 0x31b   : > { %v4142_v23 = vpop.f32.mrf.mxu0  ;;  %12530 = vmatmul.mubr.msk.f32.vlgmr.msra.gmra.mxu0 %vm1929_vm1, %v5413_v31  ;;  %v3977_v61 = vadd.f32 %v3905_v21, %v14810_v5  ;;  %12581 = vmatpush3.msra.mxu1 %v10353_v16  ;;  %v5419_v16 = vld [vmem:[#allocation3 + $0x5a] sm:$0xff] }
 0x31c   : > { %12479 = vmatprep.mubr.msk.f32.mxu1 %vm13410_vm0, %v13409_v43  ;;  %v12169_v24 = vpop.f32.mrf.mxu1  ;;  %12532 = vmatprep.mubr.msk.f32.mxu0 %vm13410_vm0, %v13409_v43 }
 0x31d   : > { %v12222_v26 = vpop.f32.mrf.mxu0  ;;  %12634 = vmatpush3.msra.mxu0 %v10371_v33  ;;  %v14971_v25 = vadd.f32 %v4142_v23, %v3977_v61  ;;  %12686 = vmatprep.subr.mxu1 %v13409_v43  ;;  %v5183_v61 = vld [vmem:[#allocation3 + $0x58] sm:$0xff]  ;;  %v5420_v24 = vld [vmem:[#allocation3 + $0x62] sm:$0xff] }
 0x31e   : > { %12739 = vmatprep.subr.mxu0 %v13409_v43  ;;  %v3910_v38 = vpop.f32.mrf.mxu1  ;;  %12480 = vmatmul.mubr.msk.f32.gmra.mxu1 %vm1929_vm1, %v5177_v0 }
 0x31f   : > { %v4147_v5 = vpop.f32.mrf.mxu0  ;;  %12533 = vmatmul.mubr.msk.f32.gmra.mxu0 %vm1929_vm1, %v5414_v27  ;;  %v3978_v29 = vadd.f32 %v3910_v38, %v14821_v36  ;;  %12482 = vmatprep.mubr.msk.f32.mxu1 %vm13410_vm0, %v13409_v43 }
 0x320   : > { %12535 = vmatprep.mubr.msk.f32.mxu0 %vm13410_vm0, %v13409_v43  ;;  %v12172_v41 = vpop.f32.mrf.mxu1 }
 0x321   : > { %v12225_v32 = vpop.f32.mrf.mxu0  ;;  %v14982_v53 = vadd.f32 %v4147_v5, %v3978_v29  ;;  %v5184_v29 = vld [vmem:[#allocation3 + $0x60] sm:$0xff]  ;;  %v5421_v41 = vld [vmem:[#allocation3 + $0x6a] sm:$0xff] }
 0x322   : > { %v3915_v14 = vpop.f32.mrf.mxu1  ;;  %12483 = vmatmul.mubr.msk.f32.gmra.mxu1 %vm1929_vm1, %v5178_v3 }
 0x323   : > { %v4152_v1 = vpop.f32.mrf.mxu0  ;;  %12536 = vmatmul.mubr.msk.f32.gmra.mxu0 %vm1929_vm1, %v5415_v34  ;;  %v3979_v36 = vadd.f32 %v3915_v14, %v14830_v18  ;;  %12485 = vmatprep.mubr.msk.f32.mxu1 %vm13410_vm0, %v13409_v43 }
 0x324   : > { %12538 = vmatprep.mubr.msk.f32.mxu0 %vm13410_vm0, %v13409_v43  ;;  %v12175_v2 = vpop.f32.mrf.mxu1 }
 0x325   : > { %v12228_v40 = vpop.f32.mrf.mxu0  ;;  %v14991_v63 = vadd.f32 %v4152_v1, %v3979_v36  ;;  %v5185_v36 = vld [vmem:[#allocation3 + $0x68] sm:$0xff]  ;;  %v5422_v2 = vld [vmem:[#allocation3 + $0x72] sm:$0xff] }
 0x326   : > { %v3920_v19 = vpop.f32.mrf.mxu1  ;;  %12486 = vmatmul.mubr.msk.f32.gmra.mxu1 %vm1929_vm1, %v5179_v4 }
 0x327   : > { %v4157_v44 = vpop.f32.mrf.mxu0  ;;  %12539 = vmatmul.mubr.msk.f32.gmra.mxu0 %vm1929_vm1, %v5416_v45  ;;  %v3980_v18 = vadd.f32 %v3920_v19, %v14839_v12  ;;  %12488 = vmatprep.mubr.msk.f32.mxu1 %vm13410_vm0, %v13409_v43 }
 0x328   : > { %12541 = vmatprep.mubr.msk.f32.mxu0 %vm13410_vm0, %v13409_v43  ;;  %v12178_v22 = vpop.f32.mrf.mxu1 }
 0x329   : > { %v12231_v37 = vpop.f32.mrf.mxu0  ;;  %v15000_v47 = vadd.f32 %v4157_v44, %v3980_v18  ;;  %v5186_v18 = vld [vmem:[#allocation3 + $0x70] sm:$0xff]  ;;  %v5423_v22 = vld [vmem:[#allocation3 + $0x7a] sm:$0xff] }
 0x32a   : > { %v3925_v11 = vpop.f32.mrf.mxu1  ;;  %12489 = vmatmul.mubr.msk.f32.gmra.mxu1 %vm1929_vm1, %v5180_v8 }
 0x32b   : > { %v4162_v13 = vpop.f32.mrf.mxu0  ;;  %12542 = vmatmul.mubr.msk.f32.gmra.mxu0 %vm1929_vm1, %v5417_v57  ;;  %v3981_v12 = vadd.f32 %v3925_v11, %v14848_v52  ;;  %12491 = vmatprep.mubr.msk.f32.mxu1 %vm13410_vm0, %v13409_v43 }
 0x32c   : > { %12544 = vmatprep.mubr.msk.f32.mxu0 %vm13410_vm0, %v13409_v43  ;;  %v12181_v10 = vpop.f32.mrf.mxu1 }
 0x32d   : > { %v12234_v46 = vpop.f32.mrf.mxu0  ;;  %v15009_v59 = vadd.f32 %v4162_v13, %v3981_v12  ;;  %v5187_v12 = vld [vmem:[#allocation3 + $0x78] sm:$0xff]  ;;  %v5424_v10 = vld [vmem:[#allocation3 + $0x82] sm:$0xff] }
 0x32e   : > { %v3930_v49 = vpop.f32.mrf.mxu1  ;;  %12492 = vmatmul.mubr.msk.f32.gmra.mxu1 %vm1929_vm1, %v5181_v15 }
 0x32f   : > { %v4167_v62 = vpop.f32.mrf.mxu0  ;;  %12545 = vmatmul.mubr.msk.f32.gmra.mxu0 %vm1929_vm1, %v5418_v48  ;;  %v3982_v52 = vadd.f32 %v3930_v49, %v14857_v50  ;;  %12494 = vmatprep.mubr.msk.f32.mxu1 %vm13410_vm0, %v13409_v43 }
 0x330   : > { %12547 = vmatprep.mubr.msk.f32.mxu0 %vm13410_vm0, %v13409_v43  ;;  %v12184_v55 = vpop.f32.mrf.mxu1 }
 0x331   : > { %v12237_v56 = vpop.f32.mrf.mxu0  ;;  %v15018_v28 = vadd.f32 %v4167_v62, %v3982_v52  ;;  %v5188_v52 = vld [vmem:[#allocation3 + $0x80] sm:$0xff]  ;;  %v5425_v55 = vld [vmem:[#allocation3 + $0x8a] sm:$0xff] }
 0x332   : > { %v3935_v42 = vpop.f32.mrf.mxu1  ;;  %12495 = vmatmul.mubr.msk.f32.gmra.mxu1 %vm1929_vm1, %v5182_v58 }
 0x333   : > { %v4172_v31 = vpop.f32.mrf.mxu0  ;;  %12548 = vmatmul.mubr.msk.f32.gmra.mxu0 %vm1929_vm1, %v5419_v16  ;;  %v3983_v50 = vadd.f32 %v3935_v42, %v14866_v7  ;;  %12497 = vmatprep.mubr.msk.f32.mxu1 %vm13410_vm0, %v13409_v43 }
 0x334   : > { %12550 = vmatprep.mubr.msk.f32.mxu0 %vm13410_vm0, %v13409_v43  ;;  %v12187_v33 = vpop.f32.mrf.mxu1 }
 0x335   : > { %v12240_v21 = vpop.f32.mrf.mxu0  ;;  %v15027_v23 = vadd.f32 %v4172_v31, %v3983_v50  ;;  %v5189_v50 = vld [vmem:[#allocation3 + $0x88] sm:$0xff]  ;;  %v5426_v33 = vld [vmem:[#allocation3 + $0x92] sm:$0xff] }
 0x336   : > { %v3940_v26 = vpop.f32.mrf.mxu1  ;;  %12498 = vmatmul.mubr.msk.f32.gmra.mxu1 %vm1929_vm1, %v5183_v61 }
 0x337   : > { %v4177_v0 = vpop.f32.mrf.mxu0  ;;  %12551 = vmatmul.mubr.msk.f32.gmra.mxu0 %vm1929_vm1, %v5420_v24  ;;  %v3984_v7 = vadd.f32 %v3940_v26, %v14875_v6  ;;  %12500 = vmatprep.mubr.msk.f32.mxu1 %vm13410_vm0, %v13409_v43 }
 0x338   : > { %12553 = vmatprep.mubr.msk.f32.mxu0 %vm13410_vm0, %v13409_v43  ;;  %v12190_v27 = vpop.f32.mrf.mxu1 }
 0x339   : > { %v12243_v38 = vpop.f32.mrf.mxu0  ;;  %v15036_v5 = vadd.f32 %v4177_v0, %v3984_v7  ;;  %v5190_v7 = vld [vmem:[#allocation3 + $0x90] sm:$0xff]  ;;  %v5427_v27 = vld [vmem:[#allocation3 + $0x9a] sm:$0xff] }
 0x33a   : > { %v3945_v32 = vpop.f32.mrf.mxu1  ;;  %12501 = vmatmul.mubr.msk.f32.gmra.mxu1 %vm1929_vm1, %v5184_v29 }
 0x33b   : > { %v4182_v3 = vpop.f32.mrf.mxu0  ;;  %12554 = vmatmul.mubr.msk.f32.gmra.mxu0 %vm1929_vm1, %v5421_v41  ;;  %v3985_v6 = vadd.f32 %v3945_v32, %v14884_v51  ;;  %12503 = vmatprep.mubr.msk.f32.mxu1 %vm13410_vm0, %v13409_v43 }
 0x33c   : > { %12556 = vmatprep.mubr.msk.f32.mxu0 %vm13410_vm0, %v13409_v43  ;;  %v12193_v34 = vpop.f32.mrf.mxu1 }
 0x33d   : > { %v12246_v14 = vpop.f32.mrf.mxu0  ;;  %v15045_v1 = vadd.f32 %v4182_v3, %v3985_v6  ;;  %v5191_v6 = vld [vmem:[#allocation3 + $0x98] sm:$0xff]  ;;  %v5428_v34 = vld [vmem:[#allocation3 + $0xa2] sm:$0xff] }
 0x33e   : > { %v3950_v40 = vpop.f32.mrf.mxu1  ;;  %12504 = vmatmul.mubr.msk.f32.gmra.mxu1 %vm1929_vm1, %v5185_v36 }
 0x33f   : > { %v4187_v4 = vpop.f32.mrf.mxu0  ;;  %12557 = vmatmul.mubr.msk.f32.gmra.mxu0 %vm1929_vm1, %v5422_v2  ;;  %v3986_v51 = vadd.f32 %v3950_v40, %v14893_v9  ;;  %12506 = vmatprep.mubr.msk.f32.mxu1 %vm13410_vm0, %v13409_v43 }
 0x340   : > { %12559 = vmatprep.mubr.msk.f32.mxu0 %vm13410_vm0, %v13409_v43  ;;  %v12196_v45 = vpop.f32.mrf.mxu1 }
 0x341   : > { %v12249_v19 = vpop.f32.mrf.mxu0  ;;  %v15054_v44 = vadd.f32 %v4187_v4, %v3986_v51  ;;  %v5192_v51 = vld [vmem:[#allocation3 + $0xa0] sm:$0xff]  ;;  %v5429_v45 = vld [vmem:[#allocation3 + $0xaa] sm:$0xff] }
 0x342   : > { %v3955_v37 = vpop.f32.mrf.mxu1  ;;  %12507 = vmatmul.mubr.msk.f32.gmra.mxu1 %vm1929_vm1, %v5186_v18 }
 0x343   : > { %v4192_v8 = vpop.f32.mrf.mxu0  ;;  %12560 = vmatmul.mubr.msk.f32.gmra.mxu0 %vm1929_vm1, %v5423_v22  ;;  %v3987_v9 = vadd.f32 %v3955_v37, %v14902_v35  ;;  %12509 = vmatprep.mubr.msk.f32.mxu1 %vm13410_vm0, %v13409_v43 }
 0x344   : > { %12562 = vmatprep.mubr.msk.f32.mxu0 %vm13410_vm0, %v13409_v43  ;;  %v12199_v57 = vpop.f32.mrf.mxu1 }
 0x345   : > { %v12252_v11 = vpop.f32.mrf.mxu0  ;;  %v15063_v13 = vadd.f32 %v4192_v8, %v3987_v9  ;;  %v10389_v8 = vld [vmem:[%s16475_s2 + $0x90] sm:$0xff]  ;;  %v5650_v57 = vld [vmem:[#allocation3 + $0x2b] sm:$0xff] }
 0x346   : > { %v3960_v46 = vpop.f32.mrf.mxu1  ;;  %12510 = vmatmul.mubr.msk.f32.gmra.mxu1 %vm1929_vm1, %v5187_v12  ;;  %v5887_v11 = vld [vmem:[#allocation3 + $0x2c] sm:$0xff] }
 0x347   : > { %v4197_v15 = vpop.f32.mrf.mxu0  ;;  %12563 = vmatmul.mubr.msk.f32.gmra.mxu0 %vm1929_vm1, %v5424_v10  ;;  %v3988_v35 = vadd.f32 %v3960_v46, %v14911_v60  ;;  %12512 = vmatprep.mubr.msk.f32.mxu1 %vm13410_vm0, %v13409_v43 }
 0x348   : > { %12565 = vmatprep.mubr.msk.f32.mxu0 %vm13410_vm0, %v13409_v43  ;;  %v12202_v48 = vpop.f32.mrf.mxu1 }
 0x349   : > { %v12255_v49 = vpop.f32.mrf.mxu0  ;;  %v15072_v62 = vadd.f32 %v4197_v15, %v3988_v35 }
 0x34a   : > { %v3965_v56 = vpop.f32.mrf.mxu1  ;;  %12513 = vmatmul.mubr.msk.f32.gmra.mxu1 %vm1929_vm1, %v5188_v52  ;;  %v5651_v49 = vld [vmem:[#allocation3 + $0x33] sm:$0xff] }
 0x34b   : > { %v4202_v58 = vpop.f32.mrf.mxu0  ;;  %12566 = vmatmul.mubr.msk.f32.gmra.mxu0 %vm1929_vm1, %v5425_v55  ;;  %v3989_v60 = vadd.f32 %v3965_v56, %v14920_v17  ;;  %12515 = vmatprep.mubr.msk.f32.mxu1 %vm13410_vm0, %v13409_v43  ;;  %v5888_v52 = vld [vmem:[#allocation3 + $0x34] sm:$0xff] }
 0x34c   : > { %12568 = vmatprep.mubr.msk.f32.mxu0 %vm13410_vm0, %v13409_v43  ;;  %v12205_v16 = vpop.f32.mrf.mxu1 }
 0x34d   : > { %v12258_v42 = vpop.f32.mrf.mxu0  ;;  %v15081_v31 = vadd.f32 %v4202_v58, %v3989_v60 }
 0x34e   : > { %v3970_v21 = vpop.f32.mrf.mxu1  ;;  %12516 = vmatmul.mubr.msk.f32.gmra.mxu1 %vm1929_vm1, %v5189_v50  ;;  %v5652_v42 = vld [vmem:[#allocation3 + $0x3b] sm:$0xff] }
 0x34f   : > { %v4207_v61 = vpop.f32.mrf.mxu0  ;;  %12569 = vmatmul.mubr.msk.f32.gmra.mxu0 %vm1929_vm1, %v5426_v33  ;;  %v3990_v17 = vadd.f32 %v3970_v21, %v14929_v30  ;;  %12518 = vmatprep.mubr.msk.f32.mxu1 %vm13410_vm0, %v13409_v43  ;;  %v5889_v50 = vld [vmem:[#allocation3 + $0x3c] sm:$0xff] }
 0x350   : > { %12571 = vmatprep.mubr.msk.f32.mxu0 %vm13410_vm0, %v13409_v43  ;;  %v12208_v24 = vpop.f32.mrf.mxu1 }
 0x351   : > { %v12261_v26 = vpop.f32.mrf.mxu0  ;;  %v15090_v0 = vadd.f32 %v4207_v61, %v3990_v17 }
 0x352   : > { %v4364_v38 = vpop.f32.mrf.mxu1  ;;  %12519 = vmatmul.mubr.msk.f32.gmra.mxu1 %vm1929_vm1, %v5190_v7  ;;  %v5653_v26 = vld [vmem:[#allocation3 + $0x43] sm:$0xff] }
 0x353   : > { %v4601_v29 = vpop.f32.mrf.mxu0  ;;  %12572 = vmatmul.mubr.msk.f32.gmra.mxu0 %vm1929_vm1, %v5427_v27  ;;  %v4448_v30 = vadd.f32 %v4364_v38, %v14938_v39  ;;  %12521 = vmatprep.mubr.msk.f32.mxu1 %vm13410_vm0, %v13409_v43  ;;  %v5890_v7 = vld [vmem:[#allocation3 + $0x44] sm:$0xff] }
 0x354   : > { %12574 = vmatprep.mubr.msk.f32.mxu0 %vm13410_vm0, %v13409_v43  ;;  %v12266_v41 = vpop.f32.mrf.mxu1 }
 0x355   : > { %v12319_v32 = vpop.f32.mrf.mxu0  ;;  %v15099_v3 = vadd.f32 %v4601_v29, %v4448_v30 }
 0x356   : > { %v4369_v14 = vpop.f32.mrf.mxu1  ;;  %12522 = vmatmul.mubr.msk.f32.gmra.mxu1 %vm1929_vm1, %v5191_v6  ;;  %v5654_v32 = vld [vmem:[#allocation3 + $0x4b] sm:$0xff] }
 0x357   : > { %v4606_v36 = vpop.f32.mrf.mxu0  ;;  %12575 = vmatmul.mubr.msk.f32.gmra.mxu0 %vm1929_vm1, %v5428_v34  ;;  %v4449_v39 = vadd.f32 %v4369_v14, %v14947_v54  ;;  %12524 = vmatprep.mubr.msk.f32.mxu1 %vm13410_vm0, %v13409_v43  ;;  %v5891_v6 = vld [vmem:[#allocation3 + $0x4c] sm:$0xff] }
 0x358   : > { %12577 = vmatprep.mubr.msk.f32.mxu0 %vm13410_vm0, %v13409_v43  ;;  %v12269_v2 = vpop.f32.mrf.mxu1 }
 0x359   : > { %v12322_v40 = vpop.f32.mrf.mxu0  ;;  %v15108_v4 = vadd.f32 %v4606_v36, %v4449_v39 }
 0x35a   : > { %v4374_v19 = vpop.f32.mrf.mxu1  ;;  %12525 = vmatmul.mubr.msk.f32.gmra.mxu1 %vm1929_vm1, %v5192_v51  ;;  %v5655_v40 = vld [vmem:[#allocation3 + $0x53] sm:$0xff] }
 0x35b   : > { %v4611_v18 = vpop.f32.mrf.mxu0  ;;  %12578 = vmatmul.mubr.msk.f32.gmra.mxu0 %vm1929_vm1, %v5429_v45  ;;  %v4450_v54 = vadd.f32 %v4374_v19, %v14959_v20  ;;  %12582 = vmatprep.mubr.msk.f32.mxu1 %vm13410_vm0, %v13409_v43  ;;  %v10407_v20 = vld [vmem:[%s16475_s2 + $0x98] sm:$0xff]  ;;  %v5892_v51 = vld [vmem:[#allocation3 + $0x54] sm:$0xff] }
 0x35c   : > { %12635 = vmatprep.mubr.msk.f32.mxu0 %vm13410_vm0, %v13409_v43  ;;  %v12272_v22 = vpop.f32.mrf.mxu1 }
 0x35d   : > { %v12325_v37 = vpop.f32.mrf.mxu0  ;;  %v15120_v9 = vadd.f32 %v4611_v18, %v4450_v54 }
 0x35e   : > { %v4379_v12 = vpop.f32.mrf.mxu1  ;;  %12583 = vmatmul.mubr.msk.f32.vlgmr.msra.gmra.mxu1 %vm1929_vm1, %v5650_v57  ;;  %v5656_v37 = vld [vmem:[#allocation3 + $0x5b] sm:$0xff] }
 0x35f   : > { %v4616_v10 = vpop.f32.mrf.mxu0  ;;  %12636 = vmatmul.mubr.msk.f32.vlgmr.msra.gmra.mxu0 %vm1929_vm1, %v5887_v11  ;;  %v4451_v46 = vadd.f32 %v4379_v12, %v14971_v25  ;;  %12687 = vmatpush3.msra.mxu1 %v10389_v8  ;;  %v5893_v8 = vld [vmem:[#allocation3 + $0x5c] sm:$0xff] }
 0x360   : > { %12585 = vmatprep.mubr.msk.f32.mxu1 %vm13410_vm0, %v13409_v43  ;;  %v12275_v15 = vpop.f32.mrf.mxu1  ;;  %12638 = vmatprep.mubr.msk.f32.mxu0 %vm13410_vm0, %v13409_v43 }
 0x361   : > { %v12328_v35 = vpop.f32.mrf.mxu0  ;;  %12740 = vmatpush3.msra.mxu0 %v10407_v20  ;;  %v15132_v48 = vadd.f32 %v4616_v10, %v4451_v46  ;;  %12792 = vmatprep.subr.mxu1 %v13409_v43  ;;  %v5657_v46 = vld [vmem:[#allocation3 + $0x63] sm:$0xff] }
 0x362   : > { %12845 = vmatprep.subr.mxu0 %v13409_v43  ;;  %v4384_v55 = vpop.f32.mrf.mxu1  ;;  %12586 = vmatmul.mubr.msk.f32.gmra.mxu1 %vm1929_vm1, %v5651_v49  ;;  %v5894_v15 = vld [vmem:[#allocation3 + $0x64] sm:$0xff] }
 0x363   : > { %v4621_v25 = vpop.f32.mrf.mxu0  ;;  %12639 = vmatmul.mubr.msk.f32.gmra.mxu0 %vm1929_vm1, %v5888_v52  ;;  %v4452_v56 = vadd.f32 %v4384_v55, %v14982_v53  ;;  %12588 = vmatprep.mubr.msk.f32.mxu1 %vm13410_vm0, %v13409_v43 }
 0x364   : > { %12641 = vmatprep.mubr.msk.f32.mxu0 %vm13410_vm0, %v13409_v43  ;;  %v12278_v58 = vpop.f32.mrf.mxu1 }
 0x365   : > { %v12331_v60 = vpop.f32.mrf.mxu0  ;;  %v15143_v16 = vadd.f32 %v4621_v25, %v4452_v56  ;;  %v5658_v56 = vld [vmem:[#allocation3 + $0x6b] sm:$0xff] }
 0x366   : > { %v4389_v33 = vpop.f32.mrf.mxu1  ;;  %12589 = vmatmul.mubr.msk.f32.gmra.mxu1 %vm1929_vm1, %v5652_v42  ;;  %v5895_v58 = vld [vmem:[#allocation3 + $0x6c] sm:$0xff] }
 0x367   : > { %v4626_v21 = vpop.f32.mrf.mxu0  ;;  %12642 = vmatmul.mubr.msk.f32.gmra.mxu0 %vm1929_vm1, %v5889_v50  ;;  %v4453_v53 = vadd.f32 %v4389_v33, %v14991_v63  ;;  %12591 = vmatprep.mubr.msk.f32.mxu1 %vm13410_vm0, %v13409_v43 }
 0x368   : > { %12644 = vmatprep.mubr.msk.f32.mxu0 %vm13410_vm0, %v13409_v43  ;;  %v12281_v61 = vpop.f32.mrf.mxu1 }
 0x369   : > { %v12334_v17 = vpop.f32.mrf.mxu0  ;;  %v15152_v24 = vadd.f32 %v4626_v21, %v4453_v53  ;;  %v5659_v53 = vld [vmem:[#allocation3 + $0x73] sm:$0xff] }
 0x36a   : > { %v4394_v27 = vpop.f32.mrf.mxu1  ;;  %12592 = vmatmul.mubr.msk.f32.gmra.mxu1 %vm1929_vm1, %v5653_v26  ;;  %v5896_v61 = vld [vmem:[#allocation3 + $0x74] sm:$0xff] }
 0x36b   : > { %v4631_v38 = vpop.f32.mrf.mxu0  ;;  %12645 = vmatmul.mubr.msk.f32.gmra.mxu0 %vm1929_vm1, %v5890_v7  ;;  %v4454_v63 = vadd.f32 %v4394_v27, %v15000_v47  ;;  %12594 = vmatprep.mubr.msk.f32.mxu1 %vm13410_vm0, %v13409_v43 }
 0x36c   : > { %12647 = vmatprep.mubr.msk.f32.mxu0 %vm13410_vm0, %v13409_v43  ;;  %v12284_v29 = vpop.f32.mrf.mxu1 }
 0x36d   : > { %v12337_v30 = vpop.f32.mrf.mxu0  ;;  %v15161_v41 = vadd.f32 %v4631_v38, %v4454_v63  ;;  %v5660_v63 = vld [vmem:[#allocation3 + $0x7b] sm:$0xff] }
 0x36e   : > { %v4399_v34 = vpop.f32.mrf.mxu1  ;;  %12595 = vmatmul.mubr.msk.f32.gmra.mxu1 %vm1929_vm1, %v5654_v32  ;;  %v5897_v29 = vld [vmem:[#allocation3 + $0x7c] sm:$0xff] }
 0x36f   : > { %v4636_v14 = vpop.f32.mrf.mxu0  ;;  %12648 = vmatmul.mubr.msk.f32.gmra.mxu0 %vm1929_vm1, %v5891_v6  ;;  %v4455_v47 = vadd.f32 %v4399_v34, %v15009_v59  ;;  %12597 = vmatprep.mubr.msk.f32.mxu1 %vm13410_vm0, %v13409_v43 }
 0x370   : > { %12650 = vmatprep.mubr.msk.f32.mxu0 %vm13410_vm0, %v13409_v43  ;;  %v12287_v36 = vpop.f32.mrf.mxu1 }
 0x371   : > { %v12340_v39 = vpop.f32.mrf.mxu0  ;;  %v15170_v2 = vadd.f32 %v4636_v14, %v4455_v47  ;;  %v5661_v47 = vld [vmem:[#allocation3 + $0x83] sm:$0xff] }
 0x372   : > { %v4404_v45 = vpop.f32.mrf.mxu1  ;;  %12598 = vmatmul.mubr.msk.f32.gmra.mxu1 %vm1929_vm1, %v5655_v40  ;;  %v5898_v36 = vld [vmem:[#allocation3 + $0x84] sm:$0xff] }
 0x373   : > { %v4641_v19 = vpop.f32.mrf.mxu0  ;;  %12651 = vmatmul.mubr.msk.f32.gmra.mxu0 %vm1929_vm1, %v5892_v51  ;;  %v4456_v59 = vadd.f32 %v4404_v45, %v15018_v28  ;;  %12600 = vmatprep.mubr.msk.f32.mxu1 %vm13410_vm0, %v13409_v43 }
 0x374   : > { %12653 = vmatprep.mubr.msk.f32.mxu0 %vm13410_vm0, %v13409_v43  ;;  %v12290_v18 = vpop.f32.mrf.mxu1 }
 0x375   : > { %v12343_v54 = vpop.f32.mrf.mxu0  ;;  %v15179_v22 = vadd.f32 %v4641_v19, %v4456_v59  ;;  %v5662_v59 = vld [vmem:[#allocation3 + $0x8b] sm:$0xff] }
 0x376   : > { %v4409_v57 = vpop.f32.mrf.mxu1  ;;  %12601 = vmatmul.mubr.msk.f32.gmra.mxu1 %vm1929_vm1, %v5656_v37  ;;  %v5899_v18 = vld [vmem:[#allocation3 + $0x8c] sm:$0xff] }
 0x377   : > { %v4646_v11 = vpop.f32.mrf.mxu0  ;;  %12654 = vmatmul.mubr.msk.f32.gmra.mxu0 %vm1929_vm1, %v5893_v8  ;;  %v4457_v28 = vadd.f32 %v4409_v57, %v15027_v23  ;;  %12603 = vmatprep.mubr.msk.f32.mxu1 %vm13410_vm0, %v13409_v43 }
 0x378   : > { %12656 = vmatprep.mubr.msk.f32.mxu0 %vm13410_vm0, %v13409_v43  ;;  %v12293_v20 = vpop.f32.mrf.mxu1 }
 0x379   : > { %v12346_v12 = vpop.f32.mrf.mxu0  ;;  %v15188_v10 = vadd.f32 %v4646_v11, %v4457_v28  ;;  %v5663_v28 = vld [vmem:[#allocation3 + $0x93] sm:$0xff] }
 0x37a   : > { %v4414_v35 = vpop.f32.mrf.mxu1  ;;  %12604 = vmatmul.mubr.msk.f32.gmra.mxu1 %vm1929_vm1, %v5657_v46  ;;  %v5900_v20 = vld [vmem:[#allocation3 + $0x94] sm:$0xff] }
 0x37b   : > { %v4651_v49 = vpop.f32.mrf.mxu0  ;;  %12657 = vmatmul.mubr.msk.f32.gmra.mxu0 %vm1929_vm1, %v5894_v15  ;;  %v4458_v23 = vadd.f32 %v4414_v35, %v15036_v5  ;;  %12606 = vmatprep.mubr.msk.f32.mxu1 %vm13410_vm0, %v13409_v43 }
 0x37c   : > { %12659 = vmatprep.mubr.msk.f32.mxu0 %vm13410_vm0, %v13409_v43  ;;  %v12296_v52 = vpop.f32.mrf.mxu1 }
 0x37d   : > { %v12349_v55 = vpop.f32.mrf.mxu0  ;;  %v15197_v25 = vadd.f32 %v4651_v49, %v4458_v23  ;;  %v5664_v23 = vld [vmem:[#allocation3 + $0x9b] sm:$0xff] }
 0x37e   : > { %v4419_v60 = vpop.f32.mrf.mxu1  ;;  %12607 = vmatmul.mubr.msk.f32.gmra.mxu1 %vm1929_vm1, %v5658_v56  ;;  %v5901_v52 = vld [vmem:[#allocation3 + $0x9c] sm:$0xff] }
 0x37f   : > { %v4656_v42 = vpop.f32.mrf.mxu0  ;;  %12660 = vmatmul.mubr.msk.f32.gmra.mxu0 %vm1929_vm1, %v5895_v58  ;;  %v4459_v5 = vadd.f32 %v4419_v60, %v15045_v1  ;;  %12609 = vmatprep.mubr.msk.f32.mxu1 %vm13410_vm0, %v13409_v43 }
 0x380   : > { %12662 = vmatprep.mubr.msk.f32.mxu0 %vm13410_vm0, %v13409_v43  ;;  %v12299_v50 = vpop.f32.mrf.mxu1 }
 0x381   : > { %v12352_v33 = vpop.f32.mrf.mxu0  ;;  %v15206_v21 = vadd.f32 %v4656_v42, %v4459_v5  ;;  %v5665_v5 = vld [vmem:[#allocation3 + $0xa3] sm:$0xff] }
 0x382   : > { %v4424_v17 = vpop.f32.mrf.mxu1  ;;  %12610 = vmatmul.mubr.msk.f32.gmra.mxu1 %vm1929_vm1, %v5659_v53  ;;  %v5902_v50 = vld [vmem:[#allocation3 + $0xa4] sm:$0xff] }
 0x383   : > { %v4661_v26 = vpop.f32.mrf.mxu0  ;;  %12663 = vmatmul.mubr.msk.f32.gmra.mxu0 %vm1929_vm1, %v5896_v61  ;;  %v4460_v1 = vadd.f32 %v4424_v17, %v15054_v44  ;;  %12612 = vmatprep.mubr.msk.f32.mxu1 %vm13410_vm0, %v13409_v43 }
 0x384   : > { %12665 = vmatprep.mubr.msk.f32.mxu0 %vm13410_vm0, %v13409_v43  ;;  %v12302_v7 = vpop.f32.mrf.mxu1 }
 0x385   : > { %v12355_v27 = vpop.f32.mrf.mxu0  ;;  %v15215_v38 = vadd.f32 %v4661_v26, %v4460_v1  ;;  %v5666_v1 = vld [vmem:[#allocation3 + $0xab] sm:$0xff] }
 0x386   : > { %v4429_v30 = vpop.f32.mrf.mxu1  ;;  %12613 = vmatmul.mubr.msk.f32.gmra.mxu1 %vm1929_vm1, %v5660_v63  ;;  %v5903_v7 = vld [vmem:[#allocation3 + $0xac] sm:$0xff] }
 0x387   : > { %v4666_v32 = vpop.f32.mrf.mxu0  ;;  %12666 = vmatmul.mubr.msk.f32.gmra.mxu0 %vm1929_vm1, %v5897_v29  ;;  %v4461_v44 = vadd.f32 %v4429_v30, %v15063_v13  ;;  %12615 = vmatprep.mubr.msk.f32.mxu1 %vm13410_vm0, %v13409_v43 }
 0x388   : > { %12668 = vmatprep.mubr.msk.f32.mxu0 %vm13410_vm0, %v13409_v43  ;;  %v12305_v6 = vpop.f32.mrf.mxu1 }
 0x389   : > { %v12358_v34 = vpop.f32.mrf.mxu0  ;;  %v15224_v14 = vadd.f32 %v4666_v32, %v4461_v44  ;;  %v10425_v32 = vld [vmem:[%s16475_s2 + $0xa0] sm:$0xff] }
 0x38a   : > { %v4434_v39 = vpop.f32.mrf.mxu1  ;;  %12616 = vmatmul.mubr.msk.f32.gmra.mxu1 %vm1929_vm1, %v5661_v47  ;;  %v6124_v6 = vld [vmem:[#allocation3 + $0x2d] sm:$0xff] }
 0x38b   : > { %v4671_v40 = vpop.f32.mrf.mxu0  ;;  %12669 = vmatmul.mubr.msk.f32.gmra.mxu0 %vm1929_vm1, %v5898_v36  ;;  %v4462_v13 = vadd.f32 %v4434_v39, %v15072_v62  ;;  %12618 = vmatprep.mubr.msk.f32.mxu1 %vm13410_vm0, %v13409_v43  ;;  %v6361_v34 = vld [vmem:[#allocation3 + $0x2e] sm:$0xff] }
 0x38c   : > { %12671 = vmatprep.mubr.msk.f32.mxu0 %vm13410_vm0, %v13409_v43  ;;  %v12308_v51 = vpop.f32.mrf.mxu1 }
 0x38d   : > { %v12361_v45 = vpop.f32.mrf.mxu0  ;;  %v15233_v19 = vadd.f32 %v4671_v40, %v4462_v13 }
 0x38e   : > { %v4439_v54 = vpop.f32.mrf.mxu1  ;;  %12619 = vmatmul.mubr.msk.f32.gmra.mxu1 %vm1929_vm1, %v5662_v59  ;;  %v6125_v45 = vld [vmem:[#allocation3 + $0x35] sm:$0xff] }
 0x38f   : > { %v4676_v37 = vpop.f32.mrf.mxu0  ;;  %12672 = vmatmul.mubr.msk.f32.gmra.mxu0 %vm1929_vm1, %v5899_v18  ;;  %v4463_v62 = vadd.f32 %v4439_v54, %v15081_v31  ;;  %12621 = vmatprep.mubr.msk.f32.mxu1 %vm13410_vm0, %v13409_v43  ;;  %v6362_v59 = vld [vmem:[#allocation3 + $0x36] sm:$0xff] }
 0x390   : > { %12674 = vmatprep.mubr.msk.f32.mxu0 %vm13410_vm0, %v13409_v43  ;;  %v12311_v8 = vpop.f32.mrf.mxu1 }
 0x391   : > { %v12364_v57 = vpop.f32.mrf.mxu0  ;;  %v15242_v11 = vadd.f32 %v4676_v37, %v4463_v62 }
 0x392   : > { %v4444_v12 = vpop.f32.mrf.mxu1  ;;  %12622 = vmatmul.mubr.msk.f32.gmra.mxu1 %vm1929_vm1, %v5663_v28  ;;  %v6126_v57 = vld [vmem:[#allocation3 + $0x3d] sm:$0xff] }
 0x393   : > { %v4681_v46 = vpop.f32.mrf.mxu0  ;;  %12675 = vmatmul.mubr.msk.f32.gmra.mxu0 %vm1929_vm1, %v5900_v20  ;;  %v4464_v31 = vadd.f32 %v4444_v12, %v15090_v0  ;;  %12624 = vmatprep.mubr.msk.f32.mxu1 %vm13410_vm0, %v13409_v43  ;;  %v6363_v28 = vld [vmem:[#allocation3 + $0x3e] sm:$0xff] }
 0x394   : > { %12677 = vmatprep.mubr.msk.f32.mxu0 %vm13410_vm0, %v13409_v43  ;;  %v12314_v15 = vpop.f32.mrf.mxu1 }
 0x395   : > { %v12367_v35 = vpop.f32.mrf.mxu0  ;;  %v15251_v49 = vadd.f32 %v4681_v46, %v4464_v31 }
 0x396   : > { %v4838_v55 = vpop.f32.mrf.mxu1  ;;  %12625 = vmatmul.mubr.msk.f32.gmra.mxu1 %vm1929_vm1, %v5664_v23  ;;  %v6127_v35 = vld [vmem:[#allocation3 + $0x45] sm:$0xff] }
 0x397   : > { %v5075_v56 = vpop.f32.mrf.mxu0  ;;  %12678 = vmatmul.mubr.msk.f32.gmra.mxu0 %vm1929_vm1, %v5901_v52  ;;  %v4922_v0 = vadd.f32 %v4838_v55, %v15099_v3  ;;  %12627 = vmatprep.mubr.msk.f32.mxu1 %vm13410_vm0, %v13409_v43  ;;  %v6364_v23 = vld [vmem:[#allocation3 + $0x46] sm:$0xff] }
 0x398   : > { %12680 = vmatprep.mubr.msk.f32.mxu0 %vm13410_vm0, %v13409_v43  ;;  %v12372_v58 = vpop.f32.mrf.mxu1 }
 0x399   : > { %v12425_v60 = vpop.f32.mrf.mxu0  ;;  %v15260_v42 = vadd.f32 %v5075_v56, %v4922_v0 }
 0x39a   : > { %v4843_v33 = vpop.f32.mrf.mxu1  ;;  %12628 = vmatmul.mubr.msk.f32.gmra.mxu1 %vm1929_vm1, %v5665_v5  ;;  %v6128_v60 = vld [vmem:[#allocation3 + $0x4d] sm:$0xff] }
 0x39b   : > { %v5080_v53 = vpop.f32.mrf.mxu0  ;;  %12681 = vmatmul.mubr.msk.f32.gmra.mxu0 %vm1929_vm1, %v5902_v50  ;;  %v4923_v3 = vadd.f32 %v4843_v33, %v15108_v4  ;;  %12630 = vmatprep.mubr.msk.f32.mxu1 %vm13410_vm0, %v13409_v43  ;;  %v6365_v5 = vld [vmem:[#allocation3 + $0x4e] sm:$0xff] }
 0x39c   : > { %12683 = vmatprep.mubr.msk.f32.mxu0 %vm13410_vm0, %v13409_v43  ;;  %v12375_v61 = vpop.f32.mrf.mxu1 }
 0x39d   : > { %v12428_v17 = vpop.f32.mrf.mxu0  ;;  %v15269_v26 = vadd.f32 %v5080_v53, %v4923_v3 }
 0x39e   : > { %v4848_v27 = vpop.f32.mrf.mxu1  ;;  %12631 = vmatmul.mubr.msk.f32.gmra.mxu1 %vm1929_vm1, %v5666_v1  ;;  %v6129_v17 = vld [vmem:[#allocation3 + $0x55] sm:$0xff] }
 0x39f   : > { %v5085_v63 = vpop.f32.mrf.mxu0  ;;  %12684 = vmatmul.mubr.msk.f32.gmra.mxu0 %vm1929_vm1, %v5903_v7  ;;  %v4924_v4 = vadd.f32 %v4848_v27, %v15120_v9  ;;  %12688 = vmatprep.mubr.msk.f32.mxu1 %vm13410_vm0, %v13409_v43  ;;  %v10443_v9 = vld [vmem:[%s16475_s2 + $0xa8] sm:$0xff] }
 0x3a0   : > { %12741 = vmatprep.mubr.msk.f32.mxu0 %vm13410_vm0, %v13409_v43  ;;  %v12378_v29 = vpop.f32.mrf.mxu1  ;;  %v6366_v1 = vld [vmem:[#allocation3 + $0x56] sm:$0xff] }
 0x3a1   : > { %v12431_v30 = vpop.f32.mrf.mxu0  ;;  %v15281_v44 = vadd.f32 %v5085_v63, %v4924_v4 }
 0x3a2   : > { %v4853_v47 = vpop.f32.mrf.mxu1  ;;  %12689 = vmatmul.mubr.msk.f32.vlgmr.msra.gmra.mxu1 %vm1929_vm1, %v6124_v6  ;;  %v6130_v30 = vld [vmem:[#allocation3 + $0x5d] sm:$0xff] }
 0x3a3   : > { %v5090_v36 = vpop.f32.mrf.mxu0  ;;  %12742 = vmatmul.mubr.msk.f32.vlgmr.msra.gmra.mxu0 %vm1929_vm1, %v6361_v34  ;;  %v4925_v39 = vadd.f32 %v4853_v47, %v15132_v48  ;;  %12793 = vmatpush3.msra.mxu1 %v10425_v32  ;;  %v6367_v32 = vld [vmem:[#allocation3 + $0x5e] sm:$0xff] }
 0x3a4   : > { %12691 = vmatprep.mubr.msk.f32.mxu1 %vm13410_vm0, %v13409_v43  ;;  %v12381_v40 = vpop.f32.mrf.mxu1  ;;  %12744 = vmatprep.mubr.msk.f32.mxu0 %vm13410_vm0, %v13409_v43 }
 0x3a5   : > { %v12434_v13 = vpop.f32.mrf.mxu0  ;;  %12846 = vmatpush3.msra.mxu0 %v10443_v9  ;;  %v15293_v51 = vadd.f32 %v5090_v36, %v4925_v39  ;;  %12898 = vmatprep.subr.mxu1 %v13409_v43  ;;  %v6131_v39 = vld [vmem:[#allocation3 + $0x65] sm:$0xff] }
 0x3a6   : > { %12951 = vmatprep.subr.mxu0 %v13409_v43  ;;  %v4858_v18 = vpop.f32.mrf.mxu1  ;;  %12692 = vmatmul.mubr.msk.f32.gmra.mxu1 %vm1929_vm1, %v6125_v45  ;;  %v6368_v40 = vld [vmem:[#allocation3 + $0x66] sm:$0xff] }
 0x3a7   : > { %v5095_v48 = vpop.f32.mrf.mxu0  ;;  %12745 = vmatmul.mubr.msk.f32.gmra.mxu0 %vm1929_vm1, %v6362_v59  ;;  %v4926_v54 = vadd.f32 %v4858_v18, %v15143_v16  ;;  %12694 = vmatprep.mubr.msk.f32.mxu1 %vm13410_vm0, %v13409_v43 }
 0x3a8   : > { %12747 = vmatprep.mubr.msk.f32.mxu0 %vm13410_vm0, %v13409_v43  ;;  %v12384_v37 = vpop.f32.mrf.mxu1 }
 0x3a9   : > { %v12437_v62 = vpop.f32.mrf.mxu0  ;;  %v15304_v8 = vadd.f32 %v5095_v48, %v4926_v54  ;;  %v6132_v54 = vld [vmem:[#allocation3 + $0x6d] sm:$0xff] }
 0x3aa   : > { %v4863_v20 = vpop.f32.mrf.mxu1  ;;  %12695 = vmatmul.mubr.msk.f32.gmra.mxu1 %vm1929_vm1, %v6126_v57  ;;  %v6369_v37 = vld [vmem:[#allocation3 + $0x6e] sm:$0xff] }
 0x3ab   : > { %v5100_v12 = vpop.f32.mrf.mxu0  ;;  %12748 = vmatmul.mubr.msk.f32.gmra.mxu0 %vm1929_vm1, %v6363_v28  ;;  %v4927_v16 = vadd.f32 %v4863_v20, %v15152_v24  ;;  %12697 = vmatprep.mubr.msk.f32.mxu1 %vm13410_vm0, %v13409_v43 }
 0x3ac   : > { %12750 = vmatprep.mubr.msk.f32.mxu0 %vm13410_vm0, %v13409_v43  ;;  %v12387_v46 = vpop.f32.mrf.mxu1 }
 0x3ad   : > { %v12440_v31 = vpop.f32.mrf.mxu0  ;;  %v15313_v15 = vadd.f32 %v5100_v12, %v4927_v16  ;;  %v6133_v16 = vld [vmem:[#allocation3 + $0x75] sm:$0xff] }
 0x3ae   : > { %v4868_v52 = vpop.f32.mrf.mxu1  ;;  %12698 = vmatmul.mubr.msk.f32.gmra.mxu1 %vm1929_vm1, %v6127_v35  ;;  %v6370_v46 = vld [vmem:[#allocation3 + $0x76] sm:$0xff] }
 0x3af   : > { %v5105_v55 = vpop.f32.mrf.mxu0  ;;  %12751 = vmatmul.mubr.msk.f32.gmra.mxu0 %vm1929_vm1, %v6364_v23  ;;  %v4928_v24 = vadd.f32 %v4868_v52, %v15161_v41  ;;  %12700 = vmatprep.mubr.msk.f32.mxu1 %vm13410_vm0, %v13409_v43 }
 0x3b0   : > { %12753 = vmatprep.mubr.msk.f32.mxu0 %vm13410_vm0, %v13409_v43  ;;  %v12390_v56 = vpop.f32.mrf.mxu1 }
 0x3b1   : > { %v12443_v0 = vpop.f32.mrf.mxu0  ;;  %v15322_v58 = vadd.f32 %v5105_v55, %v4928_v24  ;;  %v6134_v24 = vld [vmem:[#allocation3 + $0x7d] sm:$0xff] }
 0x3b2   : > { %v4873_v50 = vpop.f32.mrf.mxu1  ;;  %12701 = vmatmul.mubr.msk.f32.gmra.mxu1 %vm1929_vm1, %v6128_v60  ;;  %v6371_v56 = vld [vmem:[#allocation3 + $0x7e] sm:$0xff] }
 0x3b3   : > { %v5110_v33 = vpop.f32.mrf.mxu0  ;;  %12754 = vmatmul.mubr.msk.f32.gmra.mxu0 %vm1929_vm1, %v6365_v5  ;;  %v4929_v41 = vadd.f32 %v4873_v50, %v15170_v2  ;;  %12703 = vmatprep.mubr.msk.f32.mxu1 %vm13410_vm0, %v13409_v43 }
 0x3b4   : > { %12756 = vmatprep.mubr.msk.f32.mxu0 %vm13410_vm0, %v13409_v43  ;;  %v12393_v53 = vpop.f32.mrf.mxu1 }
 0x3b5   : > { %v12446_v3 = vpop.f32.mrf.mxu0  ;;  %v15331_v61 = vadd.f32 %v5110_v33, %v4929_v41  ;;  %v6135_v41 = vld [vmem:[#allocation3 + $0x85] sm:$0xff] }
 0x3b6   : > { %v4878_v7 = vpop.f32.mrf.mxu1  ;;  %12704 = vmatmul.mubr.msk.f32.gmra.mxu1 %vm1929_vm1, %v6129_v17  ;;  %v6372_v53 = vld [vmem:[#allocation3 + $0x86] sm:$0xff] }
 0x3b7   : > { %v5115_v27 = vpop.f32.mrf.mxu0  ;;  %12757 = vmatmul.mubr.msk.f32.gmra.mxu0 %vm1929_vm1, %v6366_v1  ;;  %v4930_v2 = vadd.f32 %v4878_v7, %v15179_v22  ;;  %12706 = vmatprep.mubr.msk.f32.mxu1 %vm13410_vm0, %v13409_v43 }
 0x3b8   : > { %12759 = vmatprep.mubr.msk.f32.mxu0 %vm13410_vm0, %v13409_v43  ;;  %v12396_v63 = vpop.f32.mrf.mxu1 }
 0x3b9   : > { %v12449_v4 = vpop.f32.mrf.mxu0  ;;  %v15340_v29 = vadd.f32 %v5115_v27, %v4930_v2  ;;  %v6136_v2 = vld [vmem:[#allocation3 + $0x8d] sm:$0xff] }
 0x3ba   : > { %v4883_v6 = vpop.f32.mrf.mxu1  ;;  %12707 = vmatmul.mubr.msk.f32.gmra.mxu1 %vm1929_vm1, %v6130_v30  ;;  %v6373_v63 = vld [vmem:[#allocation3 + $0x8e] sm:$0xff] }
 0x3bb   : > { %v5120_v34 = vpop.f32.mrf.mxu0  ;;  %12760 = vmatmul.mubr.msk.f32.gmra.mxu0 %vm1929_vm1, %v6367_v32  ;;  %v4931_v22 = vadd.f32 %v4883_v6, %v15188_v10  ;;  %12709 = vmatprep.mubr.msk.f32.mxu1 %vm13410_vm0, %v13409_v43 }
 0x3bc   : > { %12762 = vmatprep.mubr.msk.f32.mxu0 %vm13410_vm0, %v13409_v43  ;;  %v12399_v9 = vpop.f32.mrf.mxu1 }
 0x3bd   : > { %v12452_v47 = vpop.f32.mrf.mxu0  ;;  %v15349_v36 = vadd.f32 %v5120_v34, %v4931_v22  ;;  %v6137_v22 = vld [vmem:[#allocation3 + $0x95] sm:$0xff] }
 0x3be   : > { %v4888_v13 = vpop.f32.mrf.mxu1  ;;  %12710 = vmatmul.mubr.msk.f32.gmra.mxu1 %vm1929_vm1, %v6131_v39  ;;  %v6374_v9 = vld [vmem:[#allocation3 + $0x96] sm:$0xff] }
 0x3bf   : > { %v5125_v45 = vpop.f32.mrf.mxu0  ;;  %12763 = vmatmul.mubr.msk.f32.gmra.mxu0 %vm1929_vm1, %v6368_v40  ;;  %v4932_v10 = vadd.f32 %v4888_v13, %v15197_v25  ;;  %12712 = vmatprep.mubr.msk.f32.mxu1 %vm13410_vm0, %v13409_v43 }
 0x3c0   : > { %12765 = vmatprep.mubr.msk.f32.mxu0 %vm13410_vm0, %v13409_v43  ;;  %v12402_v59 = vpop.f32.mrf.mxu1 }
 0x3c1   : > { %v12455_v18 = vpop.f32.mrf.mxu0  ;;  %v15358_v48 = vadd.f32 %v5125_v45, %v4932_v10  ;;  %v6138_v10 = vld [vmem:[#allocation3 + $0x9d] sm:$0xff] }
 0x3c2   : > { %v4893_v62 = vpop.f32.mrf.mxu1  ;;  %12713 = vmatmul.mubr.msk.f32.gmra.mxu1 %vm1929_vm1, %v6132_v54  ;;  %v6375_v59 = vld [vmem:[#allocation3 + $0x9e] sm:$0xff] }
 0x3c3   : > { %v5130_v57 = vpop.f32.mrf.mxu0  ;;  %12766 = vmatmul.mubr.msk.f32.gmra.mxu0 %vm1929_vm1, %v6369_v37  ;;  %v4933_v25 = vadd.f32 %v4893_v62, %v15206_v21  ;;  %12715 = vmatprep.mubr.msk.f32.mxu1 %vm13410_vm0, %v13409_v43 }
 0x3c4   : > { %12768 = vmatprep.mubr.msk.f32.mxu0 %vm13410_vm0, %v13409_v43  ;;  %v12405_v28 = vpop.f32.mrf.mxu1 }
 0x3c5   : > { %v12458_v20 = vpop.f32.mrf.mxu0  ;;  %v15367_v12 = vadd.f32 %v5130_v57, %v4933_v25  ;;  %v6139_v25 = vld [vmem:[#allocation3 + $0xa5] sm:$0xff] }
 0x3c6   : > { %v4898_v31 = vpop.f32.mrf.mxu1  ;;  %12716 = vmatmul.mubr.msk.f32.gmra.mxu1 %vm1929_vm1, %v6133_v16  ;;  %v6376_v28 = vld [vmem:[#allocation3 + $0xa6] sm:$0xff] }
 0x3c7   : > { %v5135_v35 = vpop.f32.mrf.mxu0  ;;  %12769 = vmatmul.mubr.msk.f32.gmra.mxu0 %vm1929_vm1, %v6370_v46  ;;  %v4934_v21 = vadd.f32 %v4898_v31, %v15215_v38  ;;  %12718 = vmatprep.mubr.msk.f32.mxu1 %vm13410_vm0, %v13409_v43 }
 0x3c8   : > { %12771 = vmatprep.mubr.msk.f32.mxu0 %vm13410_vm0, %v13409_v43  ;;  %v12408_v23 = vpop.f32.mrf.mxu1 }
 0x3c9   : > { %v12461_v52 = vpop.f32.mrf.mxu0  ;;  %v15376_v55 = vadd.f32 %v5135_v35, %v4934_v21  ;;  %v6140_v21 = vld [vmem:[#allocation3 + $0xad] sm:$0xff] }
 0x3ca   : > { %v4903_v0 = vpop.f32.mrf.mxu1  ;;  %12719 = vmatmul.mubr.msk.f32.gmra.mxu1 %vm1929_vm1, %v6134_v24  ;;  %v6377_v23 = vld [vmem:[#allocation3 + $0xae] sm:$0xff] }
 0x3cb   : > { %v5140_v60 = vpop.f32.mrf.mxu0  ;;  %12772 = vmatmul.mubr.msk.f32.gmra.mxu0 %vm1929_vm1, %v6371_v56  ;;  %v4935_v38 = vadd.f32 %v4903_v0, %v15224_v14  ;;  %12721 = vmatprep.mubr.msk.f32.mxu1 %vm13410_vm0, %v13409_v43 }
 0x3cc   : > { %12774 = vmatprep.mubr.msk.f32.mxu0 %vm13410_vm0, %v13409_v43  ;;  %v12411_v5 = vpop.f32.mrf.mxu1 }
 0x3cd   : > { %v12464_v50 = vpop.f32.mrf.mxu0  ;;  %v15385_v33 = vadd.f32 %v5140_v60, %v4935_v38  ;;  %v10461_v60 = vld [vmem:[%s16475_s2 + $0xb0] sm:$0xff]  ;;  %v6598_v5 = vld [vmem:[#allocation3 + $0x38] sm:$0xff] }
 0x3ce   : > { %v4908_v3 = vpop.f32.mrf.mxu1  ;;  %12722 = vmatmul.mubr.msk.f32.gmra.mxu1 %vm1929_vm1, %v6135_v41  ;;  %v6835_v50 = vld [vmem:[#allocation3 + $0x39] sm:$0xff] }
 0x3cf   : > { %v5145_v17 = vpop.f32.mrf.mxu0  ;;  %12775 = vmatmul.mubr.msk.f32.gmra.mxu0 %vm1929_vm1, %v6372_v53  ;;  %v4936_v14 = vadd.f32 %v4908_v3, %v15233_v19  ;;  %12724 = vmatprep.mubr.msk.f32.mxu1 %vm13410_vm0, %v13409_v43 }
 0x3d0   : > { %12777 = vmatprep.mubr.msk.f32.mxu0 %vm13410_vm0, %v13409_v43  ;;  %v12414_v1 = vpop.f32.mrf.mxu1 }
 0x3d1   : > { %v12467_v7 = vpop.f32.mrf.mxu0  ;;  %v15394_v27 = vadd.f32 %v5145_v17, %v4936_v14 }
 0x3d2   : > { %v4913_v4 = vpop.f32.mrf.mxu1  ;;  %12725 = vmatmul.mubr.msk.f32.gmra.mxu1 %vm1929_vm1, %v6136_v2  ;;  %v6599_v7 = vld [vmem:[#allocation3 + $0x40] sm:$0xff] }
 0x3d3   : > { %v5150_v30 = vpop.f32.mrf.mxu0  ;;  %12778 = vmatmul.mubr.msk.f32.gmra.mxu0 %vm1929_vm1, %v6373_v63  ;;  %v4937_v19 = vadd.f32 %v4913_v4, %v15242_v11  ;;  %12727 = vmatprep.mubr.msk.f32.mxu1 %vm13410_vm0, %v13409_v43  ;;  %v6836_v2 = vld [vmem:[#allocation3 + $0x41] sm:$0xff] }
 0x3d4   : > { %12780 = vmatprep.mubr.msk.f32.mxu0 %vm13410_vm0, %v13409_v43  ;;  %v12417_v32 = vpop.f32.mrf.mxu1 }
 0x3d5   : > { %v12470_v6 = vpop.f32.mrf.mxu0  ;;  %v15403_v34 = vadd.f32 %v5150_v30, %v4937_v19 }
 0x3d6   : > { %v4918_v47 = vpop.f32.mrf.mxu1  ;;  %12728 = vmatmul.mubr.msk.f32.gmra.mxu1 %vm1929_vm1, %v6137_v22  ;;  %v6600_v6 = vld [vmem:[#allocation3 + $0x48] sm:$0xff] }
 0x3d7   : > { %v5155_v39 = vpop.f32.mrf.mxu0  ;;  %12781 = vmatmul.mubr.msk.f32.gmra.mxu0 %vm1929_vm1, %v6374_v9  ;;  %v4938_v11 = vadd.f32 %v4918_v47, %v15251_v49  ;;  %12730 = vmatprep.mubr.msk.f32.mxu1 %vm13410_vm0, %v13409_v43  ;;  %v6837_v22 = vld [vmem:[#allocation3 + $0x49] sm:$0xff] }
 0x3d8   : > { %12783 = vmatprep.mubr.msk.f32.mxu0 %vm13410_vm0, %v13409_v43  ;;  %v12420_v40 = vpop.f32.mrf.mxu1 }
 0x3d9   : > { %v12473_v13 = vpop.f32.mrf.mxu0  ;;  %v15412_v45 = vadd.f32 %v5155_v39, %v4938_v11 }
 0x3da   : > { %v5312_v18 = vpop.f32.mrf.mxu1  ;;  %12731 = vmatmul.mubr.msk.f32.gmra.mxu1 %vm1929_vm1, %v6138_v10  ;;  %v6601_v13 = vld [vmem:[#allocation3 + $0x50] sm:$0xff] }
 0x3db   : > { %v5549_v54 = vpop.f32.mrf.mxu0  ;;  %12784 = vmatmul.mubr.msk.f32.gmra.mxu0 %vm1929_vm1, %v6375_v59  ;;  %v5396_v49 = vadd.f32 %v5312_v18, %v15260_v42  ;;  %12733 = vmatprep.mubr.msk.f32.mxu1 %vm13410_vm0, %v13409_v43  ;;  %v6838_v10 = vld [vmem:[#allocation3 + $0x51] sm:$0xff] }
 0x3dc   : > { %12786 = vmatprep.mubr.msk.f32.mxu0 %vm13410_vm0, %v13409_v43  ;;  %v12478_v37 = vpop.f32.mrf.mxu1 }
 0x3dd   : > { %v12531_v62 = vpop.f32.mrf.mxu0  ;;  %v15421_v57 = vadd.f32 %v5549_v54, %v5396_v49 }
 0x3de   : > { %v5317_v20 = vpop.f32.mrf.mxu1  ;;  %12734 = vmatmul.mubr.msk.f32.gmra.mxu1 %vm1929_vm1, %v6139_v25  ;;  %v6602_v62 = vld [vmem:[#allocation3 + $0x58] sm:$0xff] }
 0x3df   : > { %v5554_v16 = vpop.f32.mrf.mxu0  ;;  %12787 = vmatmul.mubr.msk.f32.gmra.mxu0 %vm1929_vm1, %v6376_v28  ;;  %v5397_v42 = vadd.f32 %v5317_v20, %v15269_v26  ;;  %12736 = vmatprep.mubr.msk.f32.mxu1 %vm13410_vm0, %v13409_v43  ;;  %v6839_v25 = vld [vmem:[#allocation3 + $0x59] sm:$0xff] }
 0x3e0   : > { %12789 = vmatprep.mubr.msk.f32.mxu0 %vm13410_vm0, %v13409_v43  ;;  %v12481_v46 = vpop.f32.mrf.mxu1 }
 0x3e1   : > { %v12534_v31 = vpop.f32.mrf.mxu0  ;;  %v15430_v35 = vadd.f32 %v5554_v16, %v5397_v42 }
 0x3e2   : > { %v5322_v52 = vpop.f32.mrf.mxu1  ;;  %12737 = vmatmul.mubr.msk.f32.gmra.mxu1 %vm1929_vm1, %v6140_v21  ;;  %v6603_v31 = vld [vmem:[#allocation3 + $0x60] sm:$0xff] }
 0x3e3   : > { %v5559_v24 = vpop.f32.mrf.mxu0  ;;  %12790 = vmatmul.mubr.msk.f32.gmra.mxu0 %vm1929_vm1, %v6377_v23  ;;  %v5398_v26 = vadd.f32 %v5322_v52, %v15281_v44  ;;  %12794 = vmatprep.mubr.msk.f32.mxu1 %vm13410_vm0, %v13409_v43  ;;  %v10479_v44 = vld [vmem:[%s16475_s2 + $0xb8] sm:$0xff] }
 0x3e4   : > { %12847 = vmatprep.mubr.msk.f32.mxu0 %vm13410_vm0, %v13409_v43  ;;  %v12484_v56 = vpop.f32.mrf.mxu1  ;;  %v6840_v21 = vld [vmem:[#allocation3 + $0x61] sm:$0xff] }
 0x3e5   : > { %v12537_v0 = vpop.f32.mrf.mxu0  ;;  %v15442_v38 = vadd.f32 %v5559_v24, %v5398_v26 }
 0x3e6   : > { %v5327_v41 = vpop.f32.mrf.mxu1  ;;  %12795 = vmatmul.mubr.msk.f32.vlgmr.msra.gmra.mxu1 %vm1929_vm1, %v6598_v5  ;;  %v6604_v0 = vld [vmem:[#allocation3 + $0x68] sm:$0xff] }
 0x3e7   : > { %v5564_v53 = vpop.f32.mrf.mxu0  ;;  %12848 = vmatmul.mubr.msk.f32.vlgmr.msra.gmra.mxu0 %vm1929_vm1, %v6835_v50  ;;  %v5399_v3 = vadd.f32 %v5327_v41, %v15293_v51  ;;  %12899 = vmatpush3.msra.mxu1 %v10461_v60  ;;  %v6841_v60 = vld [vmem:[#allocation3 + $0x69] sm:$0xff] }
 0x3e8   : > { %12797 = vmatprep.mubr.msk.f32.mxu1 %vm13410_vm0, %v13409_v43  ;;  %v12487_v17 = vpop.f32.mrf.mxu1  ;;  %12850 = vmatprep.mubr.msk.f32.mxu0 %vm13410_vm0, %v13409_v43 }
 0x3e9   : > { %v12540_v14 = vpop.f32.mrf.mxu0  ;;  %12952 = vmatpush3.msra.mxu0 %v10479_v44  ;;  %v15454_v1 = vadd.f32 %v5564_v53, %v5399_v3  ;;  %13004 = vmatprep.subr.mxu1 %v13409_v43  ;;  %v6605_v3 = vld [vmem:[#allocation3 + $0x70] sm:$0xff] }
 0x3ea   : > { %13057 = vmatprep.subr.mxu0 %v13409_v43  ;;  %v5332_v63 = vpop.f32.mrf.mxu1  ;;  %12798 = vmatmul.mubr.msk.f32.gmra.mxu1 %vm1929_vm1, %v6599_v7  ;;  %v6842_v17 = vld [vmem:[#allocation3 + $0x71] sm:$0xff] }
 0x3eb   : > { %v5569_v51 = vpop.f32.mrf.mxu0  ;;  %12851 = vmatmul.mubr.msk.f32.gmra.mxu0 %vm1929_vm1, %v6836_v2  ;;  %v5400_v4 = vadd.f32 %v5332_v63, %v15304_v8  ;;  %12800 = vmatprep.mubr.msk.f32.mxu1 %vm13410_vm0, %v13409_v43 }
 0x3ec   : > { %12853 = vmatprep.mubr.msk.f32.mxu0 %vm13410_vm0, %v13409_v43  ;;  %v12490_v30 = vpop.f32.mrf.mxu1 }
 0x3ed   : > { %v12543_v19 = vpop.f32.mrf.mxu0  ;;  %v15465_v32 = vadd.f32 %v5569_v51, %v5400_v4  ;;  %v6606_v4 = vld [vmem:[#allocation3 + $0x78] sm:$0xff] }
 0x3ee   : > { %v5337_v9 = vpop.f32.mrf.mxu1  ;;  %12801 = vmatmul.mubr.msk.f32.gmra.mxu1 %vm1929_vm1, %v6600_v6  ;;  %v6843_v30 = vld [vmem:[#allocation3 + $0x79] sm:$0xff] }
 0x3ef   : > { %v5574_v47 = vpop.f32.mrf.mxu0  ;;  %12854 = vmatmul.mubr.msk.f32.gmra.mxu0 %vm1929_vm1, %v6837_v22  ;;  %v5401_v8 = vadd.f32 %v5337_v9, %v15313_v15  ;;  %12803 = vmatprep.mubr.msk.f32.mxu1 %vm13410_vm0, %v13409_v43 }
 0x3f0   : > { %12856 = vmatprep.mubr.msk.f32.mxu0 %vm13410_vm0, %v13409_v43  ;;  %v12493_v39 = vpop.f32.mrf.mxu1 }
 0x3f1   : > { %v12546_v11 = vpop.f32.mrf.mxu0  ;;  %v15474_v40 = vadd.f32 %v5574_v47, %v5401_v8  ;;  %v6607_v8 = vld [vmem:[#allocation3 + $0x80] sm:$0xff] }
 0x3f2   : > { %v5342_v59 = vpop.f32.mrf.mxu1  ;;  %12804 = vmatmul.mubr.msk.f32.gmra.mxu1 %vm1929_vm1, %v6601_v13  ;;  %v6844_v39 = vld [vmem:[#allocation3 + $0x81] sm:$0xff] }
 0x3f3   : > { %v5579_v18 = vpop.f32.mrf.mxu0  ;;  %12857 = vmatmul.mubr.msk.f32.gmra.mxu0 %vm1929_vm1, %v6838_v10  ;;  %v5402_v15 = vadd.f32 %v5342_v59, %v15322_v58  ;;  %12806 = vmatprep.mubr.msk.f32.mxu1 %vm13410_vm0, %v13409_v43 }
 0x3f4   : > { %12859 = vmatprep.mubr.msk.f32.mxu0 %vm13410_vm0, %v13409_v43  ;;  %v12496_v54 = vpop.f32.mrf.mxu1 }
 0x3f5   : > { %v12549_v49 = vpop.f32.mrf.mxu0  ;;  %v15483_v37 = vadd.f32 %v5579_v18, %v5402_v15  ;;  %v6608_v15 = vld [vmem:[#allocation3 + $0x88] sm:$0xff] }
 0x3f6   : > { %v5347_v28 = vpop.f32.mrf.mxu1  ;;  %12807 = vmatmul.mubr.msk.f32.gmra.mxu1 %vm1929_vm1, %v6602_v62  ;;  %v6845_v54 = vld [vmem:[#allocation3 + $0x89] sm:$0xff] }
 0x3f7   : > { %v5584_v20 = vpop.f32.mrf.mxu0  ;;  %12860 = vmatmul.mubr.msk.f32.gmra.mxu0 %vm1929_vm1, %v6839_v25  ;;  %v5403_v58 = vadd.f32 %v5347_v28, %v15331_v61  ;;  %12809 = vmatprep.mubr.msk.f32.mxu1 %vm13410_vm0, %v13409_v43 }
 0x3f8   : > { %12862 = vmatprep.mubr.msk.f32.mxu0 %vm13410_vm0, %v13409_v43  ;;  %v12499_v16 = vpop.f32.mrf.mxu1 }
 0x3f9   : > { %v12552_v42 = vpop.f32.mrf.mxu0  ;;  %v15492_v46 = vadd.f32 %v5584_v20, %v5403_v58  ;;  %v6609_v58 = vld [vmem:[#allocation3 + $0x90] sm:$0xff] }
 0x3fa   : > { %v5352_v23 = vpop.f32.mrf.mxu1  ;;  %12810 = vmatmul.mubr.msk.f32.gmra.mxu1 %vm1929_vm1, %v6603_v31  ;;  %v6846_v16 = vld [vmem:[#allocation3 + $0x91] sm:$0xff] }
 0x3fb   : > { %v5589_v52 = vpop.f32.mrf.mxu0  ;;  %12863 = vmatmul.mubr.msk.f32.gmra.mxu0 %vm1929_vm1, %v6840_v21  ;;  %v5404_v61 = vadd.f32 %v5352_v23, %v15340_v29  ;;  %12812 = vmatprep.mubr.msk.f32.mxu1 %vm13410_vm0, %v13409_v43 }
 0x3fc   : > { %12865 = vmatprep.mubr.msk.f32.mxu0 %vm13410_vm0, %v13409_v43  ;;  %v12502_v24 = vpop.f32.mrf.mxu1 }
 0x3fd   : > { %v12555_v26 = vpop.f32.mrf.mxu0  ;;  %v15501_v56 = vadd.f32 %v5589_v52, %v5404_v61  ;;  %v6610_v61 = vld [vmem:[#allocation3 + $0x98] sm:$0xff] }
 0x3fe   : > { %v5357_v5 = vpop.f32.mrf.mxu1  ;;  %12813 = vmatmul.mubr.msk.f32.gmra.mxu1 %vm1929_vm1, %v6604_v0  ;;  %v6847_v24 = vld [vmem:[#allocation3 + $0x99] sm:$0xff] }
 0x3ff   : > { %v5594_v50 = vpop.f32.mrf.mxu0  ;;  %12866 = vmatmul.mubr.msk.f32.gmra.mxu0 %vm1929_vm1, %v6841_v60  ;;  %v5405_v29 = vadd.f32 %v5357_v5, %v15349_v36  ;;  %12815 = vmatprep.mubr.msk.f32.mxu1 %vm13410_vm0, %v13409_v43 }
 0x400   : > { %12868 = vmatprep.mubr.msk.f32.mxu0 %vm13410_vm0, %v13409_v43  ;;  %v12505_v44 = vpop.f32.mrf.mxu1 }
 0x401   : > { %v12558_v41 = vpop.f32.mrf.mxu0  ;;  %v15510_v53 = vadd.f32 %v5594_v50, %v5405_v29  ;;  %v6611_v29 = vld [vmem:[#allocation3 + $0xa0] sm:$0xff] }
 0x402   : > { %v5362_v14 = vpop.f32.mrf.mxu1  ;;  %12816 = vmatmul.mubr.msk.f32.gmra.mxu1 %vm1929_vm1, %v6605_v3  ;;  %v6848_v44 = vld [vmem:[#allocation3 + $0xa1] sm:$0xff] }
 0x403   : > { %v5599_v7 = vpop.f32.mrf.mxu0  ;;  %12869 = vmatmul.mubr.msk.f32.gmra.mxu0 %vm1929_vm1, %v6842_v17  ;;  %v5406_v36 = vadd.f32 %v5362_v14, %v15358_v48  ;;  %12818 = vmatprep.mubr.msk.f32.mxu1 %vm13410_vm0, %v13409_v43 }
 0x404   : > { %12871 = vmatprep.mubr.msk.f32.mxu0 %vm13410_vm0, %v13409_v43  ;;  %v12508_v2 = vpop.f32.mrf.mxu1 }
 0x405   : > { %v12561_v63 = vpop.f32.mrf.mxu0  ;;  %v15519_v51 = vadd.f32 %v5599_v7, %v5406_v36  ;;  %v6612_v36 = vld [vmem:[#allocation3 + $0xa8] sm:$0xff] }
 0x406   : > { %v5367_v19 = vpop.f32.mrf.mxu1  ;;  %12819 = vmatmul.mubr.msk.f32.gmra.mxu1 %vm1929_vm1, %v6606_v4  ;;  %v6849_v2 = vld [vmem:[#allocation3 + $0xa9] sm:$0xff] }
 0x407   : > { %v5604_v6 = vpop.f32.mrf.mxu0  ;;  %12872 = vmatmul.mubr.msk.f32.gmra.mxu0 %vm1929_vm1, %v6843_v30  ;;  %v5407_v48 = vadd.f32 %v5367_v19, %v15367_v12  ;;  %12821 = vmatprep.mubr.msk.f32.mxu1 %vm13410_vm0, %v13409_v43 }
 0x408   : > { %12874 = vmatprep.mubr.msk.f32.mxu0 %vm13410_vm0, %v13409_v43  ;;  %v12511_v22 = vpop.f32.mrf.mxu1 }
 0x409   : > { %v12564_v9 = vpop.f32.mrf.mxu0  ;;  %v15528_v47 = vadd.f32 %v5604_v6, %v5407_v48  ;;  %v6613_v48 = vld [vmem:[#allocation3 + $0xb0] sm:$0xff] }
 0x40a   : > { %v5372_v11 = vpop.f32.mrf.mxu1  ;;  %12822 = vmatmul.mubr.msk.f32.gmra.mxu1 %vm1929_vm1, %v6607_v8  ;;  %v6850_v22 = vld [vmem:[#allocation3 + $0xb1] sm:$0xff] }
 0x40b   : > { %v5609_v13 = vpop.f32.mrf.mxu0  ;;  %12875 = vmatmul.mubr.msk.f32.gmra.mxu0 %vm1929_vm1, %v6844_v39  ;;  %v5408_v12 = vadd.f32 %v5372_v11, %v15376_v55  ;;  %12824 = vmatprep.mubr.msk.f32.mxu1 %vm13410_vm0, %v13409_v43 }
 0x40c   : > { %12877 = vmatprep.mubr.msk.f32.mxu0 %vm13410_vm0, %v13409_v43  ;;  %v12514_v10 = vpop.f32.mrf.mxu1 }
 0x40d   : > { %v12567_v59 = vpop.f32.mrf.mxu0  ;;  %v15537_v18 = vadd.f32 %v5609_v13, %v5408_v12  ;;  %v6614_v12 = vld [vmem:[#allocation3 + $0xb8] sm:$0xff] }
 0x40e   : > { %v5377_v49 = vpop.f32.mrf.mxu1  ;;  %12825 = vmatmul.mubr.msk.f32.gmra.mxu1 %vm1929_vm1, %v6608_v15  ;;  %v6851_v10 = vld [vmem:[#allocation3 + $0xb9] sm:$0xff] }
 0x40f   : > { %v5614_v62 = vpop.f32.mrf.mxu0  ;;  %12878 = vmatmul.mubr.msk.f32.gmra.mxu0 %vm1929_vm1, %v6845_v54  ;;  %v5409_v55 = vadd.f32 %v5377_v49, %v15385_v33  ;;  %12827 = vmatprep.mubr.msk.f32.mxu1 %vm13410_vm0, %v13409_v43 }
 0x410   : > { %12880 = vmatprep.mubr.msk.f32.mxu0 %vm13410_vm0, %v13409_v43  ;;  %v12517_v25 = vpop.f32.mrf.mxu1 }
 0x411   : > { %v12570_v28 = vpop.f32.mrf.mxu0  ;;  %v15546_v20 = vadd.f32 %v5614_v62, %v5409_v55  ;;  %v10497_v62 = vld [vmem:[%s16475_s2 + $0xc0] sm:$0xff]  ;;  %v7072_v25 = vld [vmem:[#allocation3 + $0x3a] sm:$0xff] }
 0x412   : > { %v5382_v42 = vpop.f32.mrf.mxu1  ;;  %12828 = vmatmul.mubr.msk.f32.gmra.mxu1 %vm1929_vm1, %v6609_v58  ;;  %v7309_v28 = vld [vmem:[#allocation3 + $0x3b] sm:$0xff] }
 0x413   : > { %v5619_v31 = vpop.f32.mrf.mxu0  ;;  %12881 = vmatmul.mubr.msk.f32.gmra.mxu0 %vm1929_vm1, %v6846_v16  ;;  %v5410_v33 = vadd.f32 %v5382_v42, %v15394_v27  ;;  %12830 = vmatprep.mubr.msk.f32.mxu1 %vm13410_vm0, %v13409_v43 }
 0x414   : > { %12883 = vmatprep.mubr.msk.f32.mxu0 %vm13410_vm0, %v13409_v43  ;;  %v12520_v21 = vpop.f32.mrf.mxu1 }
 0x415   : > { %v12573_v23 = vpop.f32.mrf.mxu0  ;;  %v15555_v52 = vadd.f32 %v5619_v31, %v5410_v33  ;;  %v7073_v21 = vld [vmem:[#allocation3 + $0x42] sm:$0xff] }
 0x416   : > { %v5387_v26 = vpop.f32.mrf.mxu1  ;;  %12831 = vmatmul.mubr.msk.f32.gmra.mxu1 %vm1929_vm1, %v6610_v61  ;;  %v7310_v23 = vld [vmem:[#allocation3 + $0x43] sm:$0xff] }
 0x417   : > { %v5624_v0 = vpop.f32.mrf.mxu0  ;;  %12884 = vmatmul.mubr.msk.f32.gmra.mxu0 %vm1929_vm1, %v6847_v24  ;;  %v5411_v27 = vadd.f32 %v5387_v26, %v15403_v34  ;;  %12833 = vmatprep.mubr.msk.f32.mxu1 %vm13410_vm0, %v13409_v43 }
 0x418   : > { %12886 = vmatprep.mubr.msk.f32.mxu0 %vm13410_vm0, %v13409_v43  ;;  %v12523_v60 = vpop.f32.mrf.mxu1 }
 0x419   : > { %v12576_v5 = vpop.f32.mrf.mxu0  ;;  %v15564_v50 = vadd.f32 %v5624_v0, %v5411_v27  ;;  %v7074_v60 = vld [vmem:[#allocation3 + $0x4a] sm:$0xff] }
 0x41a   : > { %v5392_v41 = vpop.f32.mrf.mxu1  ;;  %12834 = vmatmul.mubr.msk.f32.gmra.mxu1 %vm1929_vm1, %v6611_v29  ;;  %v7311_v5 = vld [vmem:[#allocation3 + $0x4b] sm:$0xff] }
 0x41b   : > { %v5629_v3 = vpop.f32.mrf.mxu0  ;;  %12887 = vmatmul.mubr.msk.f32.gmra.mxu0 %vm1929_vm1, %v6848_v44  ;;  %v5412_v34 = vadd.f32 %v5392_v41, %v15412_v45  ;;  %12836 = vmatprep.mubr.msk.f32.mxu1 %vm13410_vm0, %v13409_v43 }
 0x41c   : > { %12889 = vmatprep.mubr.msk.f32.mxu0 %vm13410_vm0, %v13409_v43  ;;  %v12526_v17 = vpop.f32.mrf.mxu1 }
 0x41d   : > { %v12579_v14 = vpop.f32.mrf.mxu0  ;;  %v15573_v7 = vadd.f32 %v5629_v3, %v5412_v34  ;;  %v7075_v17 = vld [vmem:[#allocation3 + $0x52] sm:$0xff] }
 0x41e   : > { %v5786_v63 = vpop.f32.mrf.mxu1  ;;  %12837 = vmatmul.mubr.msk.f32.gmra.mxu1 %vm1929_vm1, %v6612_v36  ;;  %v7312_v14 = vld [vmem:[#allocation3 + $0x53] sm:$0xff] }
 0x41f   : > { %v6023_v4 = vpop.f32.mrf.mxu0  ;;  %12890 = vmatmul.mubr.msk.f32.gmra.mxu0 %vm1929_vm1, %v6849_v2  ;;  %v5870_v45 = vadd.f32 %v5786_v63, %v15421_v57  ;;  %12839 = vmatprep.mubr.msk.f32.mxu1 %vm13410_vm0, %v13409_v43 }
 0x420   : > { %12892 = vmatprep.mubr.msk.f32.mxu0 %vm13410_vm0, %v13409_v43  ;;  %v12584_v30 = vpop.f32.mrf.mxu1 }
 0x421   : > { %v12637_v19 = vpop.f32.mrf.mxu0  ;;  %v15582_v6 = vadd.f32 %v6023_v4, %v5870_v45  ;;  %v7076_v30 = vld [vmem:[#allocation3 + $0x5a] sm:$0xff] }
 0x422   : > { %v5791_v9 = vpop.f32.mrf.mxu1  ;;  %12840 = vmatmul.mubr.msk.f32.gmra.mxu1 %vm1929_vm1, %v6613_v48  ;;  %v7313_v19 = vld [vmem:[#allocation3 + $0x5b] sm:$0xff] }
 0x423   : > { %v6028_v8 = vpop.f32.mrf.mxu0  ;;  %12893 = vmatmul.mubr.msk.f32.gmra.mxu0 %vm1929_vm1, %v6850_v22  ;;  %v5871_v57 = vadd.f32 %v5791_v9, %v15430_v35  ;;  %12842 = vmatprep.mubr.msk.f32.mxu1 %vm13410_vm0, %v13409_v43 }
 0x424   : > { %12895 = vmatprep.mubr.msk.f32.mxu0 %vm13410_vm0, %v13409_v43  ;;  %v12587_v39 = vpop.f32.mrf.mxu1 }
 0x425   : > { %v12640_v11 = vpop.f32.mrf.mxu0  ;;  %v15591_v13 = vadd.f32 %v6028_v8, %v5871_v57  ;;  %v7077_v39 = vld [vmem:[#allocation3 + $0x62] sm:$0xff] }
 0x426   : > { %v5796_v59 = vpop.f32.mrf.mxu1  ;;  %12843 = vmatmul.mubr.msk.f32.gmra.mxu1 %vm1929_vm1, %v6614_v12  ;;  %v7314_v11 = vld [vmem:[#allocation3 + $0x63] sm:$0xff] }
 0x427   : > { %v6033_v15 = vpop.f32.mrf.mxu0  ;;  %12896 = vmatmul.mubr.msk.f32.gmra.mxu0 %vm1929_vm1, %v6851_v10  ;;  %v5872_v35 = vadd.f32 %v5796_v59, %v15442_v38  ;;  %12900 = vmatprep.mubr.msk.f32.mxu1 %vm13410_vm0, %v13409_v43 }
 0x428   : > { %12953 = vmatprep.mubr.msk.f32.mxu0 %vm13410_vm0, %v13409_v43  ;;  %v12590_v54 = vpop.f32.mrf.mxu1 }
 0x429   : > { %v12643_v49 = vpop.f32.mrf.mxu0  ;;  %v15603_v55 = vadd.f32 %v6033_v15, %v5872_v35  ;;  %v7078_v54 = vld [vmem:[#allocation3 + $0x6a] sm:$0xff] }
 0x42a   : > { %v5801_v58 = vpop.f32.mrf.mxu1  ;;  %12901 = vmatmul.mubr.msk.f32.vlgmr.msra.gmra.mxu1 %vm1929_vm1, %v7072_v25  ;;  %v7315_v49 = vld [vmem:[#allocation3 + $0x6b] sm:$0xff] }
 0x42b   : > { %v6038_v16 = vpop.f32.mrf.mxu0  ;;  %12954 = vmatmul.mubr.msk.f32.vlgmr.msra.gmra.mxu0 %vm1929_vm1, %v7309_v28  ;;  %v5873_v38 = vadd.f32 %v5801_v58, %v15454_v1  ;;  %13005 = vmatpush3.msra.mxu1 %v10497_v62 }
 0x42c   : > { %12903 = vmatprep.mubr.msk.f32.mxu1 %vm13410_vm0, %v13409_v43  ;;  %v12593_v42 = vpop.f32.mrf.mxu1  ;;  %12956 = vmatprep.mubr.msk.f32.mxu0 %vm13410_vm0, %v13409_v43 }
 0x42d   : > { %v12646_v31 = vpop.f32.mrf.mxu0  ;;  %13127 = vmatprep.subr.mxu1 %v13409_v43  ;;  %v15613_v33 = vadd.f32 %v6038_v16, %v5873_v38  ;;  %v7079_v38 = vld [vmem:[#allocation3 + $0x72] sm:$0xff] }
 0x42e   : > { %v5806_v61 = vpop.f32.mrf.mxu1  ;;  %12904 = vmatmul.mubr.msk.f32.gmra.mxu1 %vm1929_vm1, %v7073_v21  ;;  %v7316_v42 = vld [vmem:[#allocation3 + $0x73] sm:$0xff] }
 0x42f   : > { %v6043_v24 = vpop.f32.mrf.mxu0  ;;  %12957 = vmatmul.mubr.msk.f32.gmra.mxu0 %vm1929_vm1, %v7310_v23  ;;  %v5874_v1 = vadd.f32 %v5806_v61, %v15465_v32  ;;  %12906 = vmatprep.mubr.msk.f32.mxu1 %vm13410_vm0, %v13409_v43 }
 0x430   : > { %12959 = vmatprep.mubr.msk.f32.mxu0 %vm13410_vm0, %v13409_v43  ;;  %v12596_v26 = vpop.f32.mrf.mxu1 }
 0x431   : > { %v12649_v0 = vpop.f32.mrf.mxu0  ;;  %v15622_v27 = vadd.f32 %v6043_v24, %v5874_v1  ;;  %v7080_v1 = vld [vmem:[#allocation3 + $0x7a] sm:$0xff] }
 0x432   : > { %v5811_v29 = vpop.f32.mrf.mxu1  ;;  %12907 = vmatmul.mubr.msk.f32.gmra.mxu1 %vm1929_vm1, %v7074_v60  ;;  %v7317_v26 = vld [vmem:[#allocation3 + $0x7b] sm:$0xff] }
 0x433   : > { %v6048_v44 = vpop.f32.mrf.mxu0  ;;  %12960 = vmatmul.mubr.msk.f32.gmra.mxu0 %vm1929_vm1, %v7311_v5  ;;  %v5875_v32 = vadd.f32 %v5811_v29, %v15474_v40  ;;  %12909 = vmatprep.mubr.msk.f32.mxu1 %vm13410_vm0, %v13409_v43 }
 0x434   : > { %12962 = vmatprep.mubr.msk.f32.mxu0 %vm13410_vm0, %v13409_v43  ;;  %v12599_v41 = vpop.f32.mrf.mxu1 }
 0x435   : > { %v12652_v3 = vpop.f32.mrf.mxu0  ;;  %v15631_v34 = vadd.f32 %v6048_v44, %v5875_v32  ;;  %v7081_v32 = vld [vmem:[#allocation3 + $0x82] sm:$0xff] }
 0x436   : > { %v5816_v36 = vpop.f32.mrf.mxu1  ;;  %12910 = vmatmul.mubr.msk.f32.gmra.mxu1 %vm1929_vm1, %v7075_v17  ;;  %v7318_v41 = vld [vmem:[#allocation3 + $0x83] sm:$0xff] }
 0x437   : > { %v6053_v2 = vpop.f32.mrf.mxu0  ;;  %12963 = vmatmul.mubr.msk.f32.gmra.mxu0 %vm1929_vm1, %v7312_v14  ;;  %v5876_v40 = vadd.f32 %v5816_v36, %v15483_v37  ;;  %12912 = vmatprep.mubr.msk.f32.mxu1 %vm13410_vm0, %v13409_v43 }
 0x438   : > { %12965 = vmatprep.mubr.msk.f32.mxu0 %vm13410_vm0, %v13409_v43  ;;  %v12602_v63 = vpop.f32.mrf.mxu1 }
 0x439   : > { %v12655_v4 = vpop.f32.mrf.mxu0  ;;  %v15640_v45 = vadd.f32 %v6053_v2, %v5876_v40  ;;  %v7082_v40 = vld [vmem:[#allocation3 + $0x8a] sm:$0xff] }
 0x43a   : > { %v5821_v48 = vpop.f32.mrf.mxu1  ;;  %12913 = vmatmul.mubr.msk.f32.gmra.mxu1 %vm1929_vm1, %v7076_v30  ;;  %v7319_v63 = vld [vmem:[#allocation3 + $0x8b] sm:$0xff] }
 0x43b   : > { %v6058_v22 = vpop.f32.mrf.mxu0  ;;  %12966 = vmatmul.mubr.msk.f32.gmra.mxu0 %vm1929_vm1, %v7313_v19  ;;  %v5877_v37 = vadd.f32 %v5821_v48, %v15492_v46  ;;  %12915 = vmatprep.mubr.msk.f32.mxu1 %vm13410_vm0, %v13409_v43 }
 0x43c   : > { %12968 = vmatprep.mubr.msk.f32.mxu0 %vm13410_vm0, %v13409_v43  ;;  %v12605_v9 = vpop.f32.mrf.mxu1 }
 0x43d   : > { %v12658_v8 = vpop.f32.mrf.mxu0  ;;  %v15649_v57 = vadd.f32 %v6058_v22, %v5877_v37  ;;  %v7083_v37 = vld [vmem:[#allocation3 + $0x92] sm:$0xff] }
 0x43e   : > { %v5826_v12 = vpop.f32.mrf.mxu1  ;;  %12916 = vmatmul.mubr.msk.f32.gmra.mxu1 %vm1929_vm1, %v7077_v39  ;;  %v7320_v9 = vld [vmem:[#allocation3 + $0x93] sm:$0xff] }
 0x43f   : > { %v6063_v10 = vpop.f32.mrf.mxu0  ;;  %12969 = vmatmul.mubr.msk.f32.gmra.mxu0 %vm1929_vm1, %v7314_v11  ;;  %v5878_v46 = vadd.f32 %v5826_v12, %v15501_v56  ;;  %12918 = vmatprep.mubr.msk.f32.mxu1 %vm13410_vm0, %v13409_v43 }
 0x440   : > { %12971 = vmatprep.mubr.msk.f32.mxu0 %vm13410_vm0, %v13409_v43  ;;  %v12608_v59 = vpop.f32.mrf.mxu1 }
 0x441   : > { %v12661_v15 = vpop.f32.mrf.mxu0  ;;  %v15658_v35 = vadd.f32 %v6063_v10, %v5878_v46  ;;  %v7084_v46 = vld [vmem:[#allocation3 + $0x9a] sm:$0xff] }
 0x442   : > { %v5831_v62 = vpop.f32.mrf.mxu1  ;;  %12919 = vmatmul.mubr.msk.f32.gmra.mxu1 %vm1929_vm1, %v7078_v54  ;;  %v7321_v59 = vld [vmem:[#allocation3 + $0x9b] sm:$0xff] }
 0x443   : > { %v6068_v25 = vpop.f32.mrf.mxu0  ;;  %12972 = vmatmul.mubr.msk.f32.gmra.mxu0 %vm1929_vm1, %v7315_v49  ;;  %v5879_v56 = vadd.f32 %v5831_v62, %v15510_v53  ;;  %12921 = vmatprep.mubr.msk.f32.mxu1 %vm13410_vm0, %v13409_v43 }
 0x444   : > { %12974 = vmatprep.mubr.msk.f32.mxu0 %vm13410_vm0, %v13409_v43  ;;  %v12611_v28 = vpop.f32.mrf.mxu1 }
 0x445   : > { %v12664_v58 = vpop.f32.mrf.mxu0  ;;  %v15667_v16 = vadd.f32 %v6068_v25, %v5879_v56  ;;  %v7085_v56 = vld [vmem:[#allocation3 + $0xa2] sm:$0xff] }
 0x446   : > { %v5836_v31 = vpop.f32.mrf.mxu1  ;;  %12922 = vmatmul.mubr.msk.f32.gmra.mxu1 %vm1929_vm1, %v7079_v38  ;;  %v7322_v28 = vld [vmem:[#allocation3 + $0xa3] sm:$0xff] }
 0x447   : > { %v6073_v21 = vpop.f32.mrf.mxu0  ;;  %12975 = vmatmul.mubr.msk.f32.gmra.mxu0 %vm1929_vm1, %v7316_v42  ;;  %v5880_v53 = vadd.f32 %v5836_v31, %v15519_v51  ;;  %12924 = vmatprep.mubr.msk.f32.mxu1 %vm13410_vm0, %v13409_v43 }
 0x448   : > { %12977 = vmatprep.mubr.msk.f32.mxu0 %vm13410_vm0, %v13409_v43  ;;  %v12614_v23 = vpop.f32.mrf.mxu1 }
 0x449   : > { %v12667_v61 = vpop.f32.mrf.mxu0  ;;  %v15676_v24 = vadd.f32 %v6073_v21, %v5880_v53  ;;  %v7086_v53 = vld [vmem:[#allocation3 + $0xaa] sm:$0xff] }
 0x44a   : > { %v5841_v0 = vpop.f32.mrf.mxu1  ;;  %12925 = vmatmul.mubr.msk.f32.gmra.mxu1 %vm1929_vm1, %v7080_v1  ;;  %v7323_v23 = vld [vmem:[#allocation3 + $0xab] sm:$0xff] }
 0x44b   : > { %v6078_v60 = vpop.f32.mrf.mxu0  ;;  %12978 = vmatmul.mubr.msk.f32.gmra.mxu0 %vm1929_vm1, %v7317_v26  ;;  %v5881_v51 = vadd.f32 %v5841_v0, %v15528_v47  ;;  %12927 = vmatprep.mubr.msk.f32.mxu1 %vm13410_vm0, %v13409_v43 }
 0x44c   : > { %12980 = vmatprep.mubr.msk.f32.mxu0 %vm13410_vm0, %v13409_v43  ;;  %v12617_v5 = vpop.f32.mrf.mxu1 }
 0x44d   : > { %v12670_v29 = vpop.f32.mrf.mxu0  ;;  %v15685_v44 = vadd.f32 %v6078_v60, %v5881_v51  ;;  %v7087_v51 = vld [vmem:[#allocation3 + $0xb2] sm:$0xff] }
 0x44e   : > { %v5846_v3 = vpop.f32.mrf.mxu1  ;;  %12928 = vmatmul.mubr.msk.f32.gmra.mxu1 %vm1929_vm1, %v7081_v32  ;;  %v7324_v5 = vld [vmem:[#allocation3 + $0xb3] sm:$0xff] }
 0x44f   : > { %v6083_v17 = vpop.f32.mrf.mxu0  ;;  %12981 = vmatmul.mubr.msk.f32.gmra.mxu0 %vm1929_vm1, %v7318_v41  ;;  %v5882_v47 = vadd.f32 %v5846_v3, %v15537_v18  ;;  %12930 = vmatprep.mubr.msk.f32.mxu1 %vm13410_vm0, %v13409_v43 }
 0x450   : > { %12983 = vmatprep.mubr.msk.f32.mxu0 %vm13410_vm0, %v13409_v43  ;;  %v12620_v14 = vpop.f32.mrf.mxu1 }
 0x451   : > { %v12673_v36 = vpop.f32.mrf.mxu0  ;;  %v15694_v2 = vadd.f32 %v6083_v17, %v5882_v47  ;;  %v7088_v47 = vld [vmem:[#allocation3 + $0xba] sm:$0xff] }
 0x452   : > { %v5851_v4 = vpop.f32.mrf.mxu1  ;;  %12931 = vmatmul.mubr.msk.f32.gmra.mxu1 %vm1929_vm1, %v7082_v40  ;;  %v7325_v14 = vld [vmem:[#allocation3 + $0xbb] sm:$0xff] }
 0x453   : > { %v6088_v30 = vpop.f32.mrf.mxu0  ;;  %12984 = vmatmul.mubr.msk.f32.gmra.mxu0 %vm1929_vm1, %v7319_v63  ;;  %v5883_v18 = vadd.f32 %v5851_v4, %v15546_v20  ;;  %12933 = vmatprep.mubr.msk.f32.mxu1 %vm13410_vm0, %v13409_v43 }
 0x454   : > { %12986 = vmatprep.mubr.msk.f32.mxu0 %vm13410_vm0, %v13409_v43  ;;  %v12623_v19 = vpop.f32.mrf.mxu1 }
 0x455   : > { %v12676_v48 = vpop.f32.mrf.mxu0  ;;  %v15703_v22 = vadd.f32 %v6088_v30, %v5883_v18  ;;  %v7546_v18 = vld [vmem:[#allocation3 + $0x3c] sm:$0xff] }
 0x456   : > { %v5856_v8 = vpop.f32.mrf.mxu1  ;;  %12934 = vmatmul.mubr.msk.f32.gmra.mxu1 %vm1929_vm1, %v7083_v37 }
 0x457   : > { %v6093_v39 = vpop.f32.mrf.mxu0  ;;  %12987 = vmatmul.mubr.msk.f32.gmra.mxu0 %vm1929_vm1, %v7320_v9  ;;  %v5884_v20 = vadd.f32 %v5856_v8, %v15555_v52  ;;  %12936 = vmatprep.mubr.msk.f32.mxu1 %vm13410_vm0, %v13409_v43 }
 0x458   : > { %12989 = vmatprep.mubr.msk.f32.mxu0 %vm13410_vm0, %v13409_v43  ;;  %v12626_v11 = vpop.f32.mrf.mxu1 }
 0x459   : > { %v12679_v12 = vpop.f32.mrf.mxu0  ;;  %v15712_v10 = vadd.f32 %v6093_v39, %v5884_v20  ;;  %v7547_v39 = vld [vmem:[#allocation3 + $0x44] sm:$0xff] }
 0x45a   : > { %v5861_v15 = vpop.f32.mrf.mxu1  ;;  %12937 = vmatmul.mubr.msk.f32.gmra.mxu1 %vm1929_vm1, %v7084_v46 }
 0x45b   : > { %v6098_v54 = vpop.f32.mrf.mxu0  ;;  %12990 = vmatmul.mubr.msk.f32.gmra.mxu0 %vm1929_vm1, %v7321_v59  ;;  %v5885_v52 = vadd.f32 %v5861_v15, %v15564_v50  ;;  %12939 = vmatprep.mubr.msk.f32.mxu1 %vm13410_vm0, %v13409_v43  ;;  %v7548_v15 = vld [vmem:[#allocation3 + $0x4c] sm:$0xff] }
 0x45c   : > { %12992 = vmatprep.mubr.msk.f32.mxu0 %vm13410_vm0, %v13409_v43  ;;  %v12629_v49 = vpop.f32.mrf.mxu1 }
 0x45d   : > { %v12682_v62 = vpop.f32.mrf.mxu0  ;;  %v15721_v25 = vadd.f32 %v6098_v54, %v5885_v52 }
 0x45e   : > { %v5866_v58 = vpop.f32.mrf.mxu1  ;;  %12940 = vmatmul.mubr.msk.f32.gmra.mxu1 %vm1929_vm1, %v7085_v56 }
 0x45f   : > { %v6103_v38 = vpop.f32.mrf.mxu0  ;;  %12993 = vmatmul.mubr.msk.f32.gmra.mxu0 %vm1929_vm1, %v7322_v28  ;;  %v5886_v50 = vadd.f32 %v5866_v58, %v15573_v7  ;;  %12942 = vmatprep.mubr.msk.f32.mxu1 %vm13410_vm0, %v13409_v43  ;;  %v7549_v28 = vld [vmem:[#allocation3 + $0x54] sm:$0xff] }
 0x460   : > { %12995 = vmatprep.mubr.msk.f32.mxu0 %vm13410_vm0, %v13409_v43  ;;  %v12632_v42 = vpop.f32.mrf.mxu1 }
 0x461   : > { %v12685_v31 = vpop.f32.mrf.mxu0  ;;  %v15730_v21 = vadd.f32 %v6103_v38, %v5886_v50 }
 0x462   : > { %v6260_v61 = vpop.f32.mrf.mxu1  ;;  %12943 = vmatmul.mubr.msk.f32.gmra.mxu1 %vm1929_vm1, %v7086_v53  ;;  %v7550_v53 = vld [vmem:[#allocation3 + $0x5c] sm:$0xff] }
 0x463   : > { %v6497_v1 = vpop.f32.mrf.mxu0  ;;  %12996 = vmatmul.mubr.msk.f32.gmra.mxu0 %vm1929_vm1, %v7323_v23  ;;  %v6344_v7 = vadd.f32 %v6260_v61, %v15582_v6  ;;  %12945 = vmatprep.mubr.msk.f32.mxu1 %vm13410_vm0, %v13409_v43 }
 0x464   : > { %12998 = vmatprep.mubr.msk.f32.mxu0 %vm13410_vm0, %v13409_v43  ;;  %v12690_v26 = vpop.f32.mrf.mxu1 }
 0x465   : > { %v12743_v0 = vpop.f32.mrf.mxu0  ;;  %v15739_v60 = vadd.f32 %v6497_v1, %v6344_v7 }
 0x466   : > { %v6265_v29 = vpop.f32.mrf.mxu1  ;;  %12946 = vmatmul.mubr.msk.f32.gmra.mxu1 %vm1929_vm1, %v7087_v51  ;;  %v7551_v0 = vld [vmem:[#allocation3 + $0x64] sm:$0xff] }
 0x467   : > { %v6502_v32 = vpop.f32.mrf.mxu0  ;;  %12999 = vmatmul.mubr.msk.f32.gmra.mxu0 %vm1929_vm1, %v7324_v5  ;;  %v6345_v6 = vadd.f32 %v6265_v29, %v15591_v13  ;;  %12948 = vmatprep.mubr.msk.f32.mxu1 %vm13410_vm0, %v13409_v43 }
 0x468   : > { %13001 = vmatprep.mubr.msk.f32.mxu0 %vm13410_vm0, %v13409_v43  ;;  %v12693_v41 = vpop.f32.mrf.mxu1 }
 0x469   : > { %v12746_v3 = vpop.f32.mrf.mxu0  ;;  %v15748_v17 = vadd.f32 %v6502_v32, %v6345_v6  ;;  %v7552_v41 = vld [vmem:[#allocation3 + $0x6c] sm:$0xff] }
 0x46a   : > { %v6270_v36 = vpop.f32.mrf.mxu1  ;;  %12949 = vmatmul.mubr.msk.f32.gmra.mxu1 %vm1929_vm1, %v7088_v47 }
 0x46b   : > { %v6507_v40 = vpop.f32.mrf.mxu0  ;;  %13002 = vmatmul.mubr.msk.f32.gmra.mxu0 %vm1929_vm1, %v7325_v14  ;;  %v6346_v13 = vadd.f32 %v6270_v36, %v15603_v55  ;;  %13006 = vmatprep.mubr.msk.f32.mxu1 %vm13410_vm0, %v13409_v43 }
 0x46c   : > { %13061 = vmatprep.mubr.msk.f32.mxu0 %vm13410_vm0, %v13409_v43  ;;  %v12696_v63 = vpop.f32.mrf.mxu1 }
 0x46d   : > { %v12749_v4 = vpop.f32.mrf.mxu0  ;;  %v15757_v30 = vadd.f32 %v6507_v40, %v6346_v13  ;;  %v7553_v13 = vld [vmem:[#allocation3 + $0x74] sm:$0xff] }
 0x46e   : > { %v6275_v19 = vpop.f32.mrf.mxu1  ;;  %13007 = vmatmul.mubr.msk.f32.vlgmr.msra.gmra.mxu1 %vm1929_vm1, %v7546_v18 }
 0x46f   : > { %v6512_v48 = vpop.f32.mrf.mxu0  ;;  %v6347_v37 = vadd.f32 %v6275_v19, %v15613_v33  ;;  %13009 = vmatprep.mubr.msk.f32.mxu1 %vm13410_vm0, %v13409_v43 }
 0x470   : > { %v12699_v55 = vpop.f32.mrf.mxu1 }
 0x471   : > { %v12752_v9 = vpop.f32.mrf.mxu0  ;;  %v15763_v8 = vadd.f32 %v6512_v48, %v6347_v37  ;;  %v7554_v37 = vld [vmem:[#allocation3 + $0x7c] sm:$0xff] }
 0x472   : > { %v6280_v20 = vpop.f32.mrf.mxu1  ;;  %13010 = vmatmul.mubr.msk.f32.gmra.mxu1 %vm1929_vm1, %v7547_v39 }
 0x473   : > { %v6517_v11 = vpop.f32.mrf.mxu0  ;;  %v6348_v12 = vadd.f32 %v6280_v20, %v15622_v27  ;;  %13012 = vmatprep.mubr.msk.f32.mxu1 %vm13410_vm0, %v13409_v43 }
 0x474   : > { %v12702_v46 = vpop.f32.mrf.mxu1 }
 0x475   : > { %v12755_v59 = vpop.f32.mrf.mxu0  ;;  %v15769_v33 = vadd.f32 %v6517_v11, %v6348_v12  ;;  %v7555_v12 = vld [vmem:[#allocation3 + $0x84] sm:$0xff] }
 0x476   : > { %v6285_v54 = vpop.f32.mrf.mxu1  ;;  %13013 = vmatmul.mubr.msk.f32.gmra.mxu1 %vm1929_vm1, %v7548_v15 }
 0x477   : > { %v6522_v52 = vpop.f32.mrf.mxu0  ;;  %v6349_v49 = vadd.f32 %v6285_v54, %v15631_v34  ;;  %13015 = vmatprep.mubr.msk.f32.mxu1 %vm13410_vm0, %v13409_v43 }
 0x478   : > { %v12705_v62 = vpop.f32.mrf.mxu1 }
 0x479   : > { %v12758_v56 = vpop.f32.mrf.mxu0  ;;  %v15775_v27 = vadd.f32 %v6522_v52, %v6349_v49  ;;  %v7556_v49 = vld [vmem:[#allocation3 + $0x8c] sm:$0xff] }
 0x47a   : > { %v6290_v58 = vpop.f32.mrf.mxu1  ;;  %13016 = vmatmul.mubr.msk.f32.gmra.mxu1 %vm1929_vm1, %v7549_v28 }
 0x47b   : > { %v6527_v38 = vpop.f32.mrf.mxu0  ;;  %v6350_v50 = vadd.f32 %v6290_v58, %v15640_v45  ;;  %13018 = vmatprep.mubr.msk.f32.mxu1 %vm13410_vm0, %v13409_v43 }
 0x47c   : > { %v12708_v42 = vpop.f32.mrf.mxu1 }
 0x47d   : > { %v12761_v31 = vpop.f32.mrf.mxu0  ;;  %v15781_v34 = vadd.f32 %v6527_v38, %v6350_v50  ;;  %v7557_v50 = vld [vmem:[#allocation3 + $0x94] sm:$0xff] }
 0x47e   : > { %v6295_v23 = vpop.f32.mrf.mxu1  ;;  %13019 = vmatmul.mubr.msk.f32.gmra.mxu1 %vm1929_vm1, %v7550_v53 }
 0x47f   : > { %v6532_v61 = vpop.f32.mrf.mxu0  ;;  %v6351_v1 = vadd.f32 %v6295_v23, %v15649_v57  ;;  %13021 = vmatprep.mubr.msk.f32.mxu1 %vm13410_vm0, %v13409_v43 }
 0x480   : > { %v12711_v7 = vpop.f32.mrf.mxu1 }
 0x481   : > { %v12764_v26 = vpop.f32.mrf.mxu0  ;;  %v15787_v45 = vadd.f32 %v6532_v61, %v6351_v1  ;;  %v7558_v1 = vld [vmem:[#allocation3 + $0x9c] sm:$0xff] }
 0x482   : > { %v6300_v51 = vpop.f32.mrf.mxu1  ;;  %13022 = vmatmul.mubr.msk.f32.gmra.mxu1 %vm1929_vm1, %v7551_v0  ;;  %v7892_v7 = vld [vmem:[%s16476_s3 + $0x8] sm:$0xff] }
 0x483   : > { %v6537_v5 = vpop.f32.mrf.mxu0  ;;  %v6352_v29 = vadd.f32 %v6300_v51, %v15658_v35  ;;  %13024 = vmatprep.mubr.msk.f32.mxu1 %vm13410_vm0, %v13409_v43  ;;  %13058 = vmatpush3.msra.mxu0 %v7892_v7 }
 0x484   : > { %v12714_v32 = vpop.f32.mrf.mxu1  ;;  %13059 = vmatprep.subr.mxu0 %v13409_v43 }
 0x485   : > { %v12767_v6 = vpop.f32.mrf.mxu0  ;;  %v15793_v57 = vadd.f32 %v6537_v5, %v6352_v29  ;;  %v7559_v32 = vld [vmem:[#allocation3 + $0xa4] sm:$0xff] }
 0x486   : > { %v6305_v3 = vpop.f32.mrf.mxu1  ;;  %13025 = vmatmul.mubr.msk.f32.gmra.mxu1 %vm1929_vm1, %v7552_v41 }
 0x487   : > { %v6542_v47 = vpop.f32.mrf.mxu0  ;;  %v6353_v14 = vadd.f32 %v6305_v3, %v15667_v16  ;;  %13027 = vmatprep.mubr.msk.f32.mxu1 %vm13410_vm0, %v13409_v43 }
 0x488   : > { %v12717_v36 = vpop.f32.mrf.mxu1 }
 0x489   : > { %v12770_v40 = vpop.f32.mrf.mxu0  ;;  %v15799_v35 = vadd.f32 %v6542_v47, %v6353_v14  ;;  %v7560_v36 = vld [vmem:[#allocation3 + $0xac] sm:$0xff] }
 0x48a   : > { %v6310_v63 = vpop.f32.mrf.mxu1  ;;  %13028 = vmatmul.mubr.msk.f32.gmra.mxu1 %vm1929_vm1, %v7553_v13 }
 0x48b   : > { %v6547_v4 = vpop.f32.mrf.mxu0  ;;  %v6354_v18 = vadd.f32 %v6310_v63, %v15676_v24  ;;  %13030 = vmatprep.mubr.msk.f32.mxu1 %vm13410_vm0, %v13409_v43 }
 0x48c   : > { %v12720_v19 = vpop.f32.mrf.mxu1 }
 0x48d   : > { %v12773_v48 = vpop.f32.mrf.mxu0  ;;  %v15805_v16 = vadd.f32 %v6547_v4, %v6354_v18  ;;  %v7561_v19 = vld [vmem:[#allocation3 + $0xb4] sm:$0xff] }
 0x48e   : > { %v6315_v55 = vpop.f32.mrf.mxu1  ;;  %13031 = vmatmul.mubr.msk.f32.gmra.mxu1 %vm1929_vm1, %v7554_v37 }
 0x48f   : > { %v6552_v9 = vpop.f32.mrf.mxu0  ;;  %v6355_v39 = vadd.f32 %v6315_v55, %v15685_v44  ;;  %13033 = vmatprep.mubr.msk.f32.mxu1 %vm13410_vm0, %v13409_v43 }
 0x490   : > { %v12723_v20 = vpop.f32.mrf.mxu1 }
 0x491   : > { %v12776_v11 = vpop.f32.mrf.mxu0  ;;  %v15811_v24 = vadd.f32 %v6552_v9, %v6355_v39  ;;  %v7562_v20 = vld [vmem:[#allocation3 + $0xbc] sm:$0xff] }
 0x492   : > { %v6320_v46 = vpop.f32.mrf.mxu1  ;;  %13034 = vmatmul.mubr.msk.f32.gmra.mxu1 %vm1929_vm1, %v7555_v12 }
 0x493   : > { %v6557_v59 = vpop.f32.mrf.mxu0  ;;  %v6356_v15 = vadd.f32 %v6320_v46, %v15694_v2  ;;  %13036 = vmatprep.mubr.msk.f32.mxu1 %vm13410_vm0, %v13409_v43 }
 0x494   : > { %v12726_v54 = vpop.f32.mrf.mxu1 }
 0x495   : > { %v12779_v52 = vpop.f32.mrf.mxu0  ;;  %v15817_v44 = vadd.f32 %v6557_v59, %v6356_v15 }
 0x496   : > { %v6325_v62 = vpop.f32.mrf.mxu1  ;;  %13037 = vmatmul.mubr.msk.f32.gmra.mxu1 %vm1929_vm1, %v7556_v49 }
 0x497   : > { %v6562_v56 = vpop.f32.mrf.mxu0  ;;  %v6357_v28 = vadd.f32 %v6325_v62, %v15703_v22  ;;  %13039 = vmatprep.mubr.msk.f32.mxu1 %vm13410_vm0, %v13409_v43 }
 0x498   : > { %v12729_v58 = vpop.f32.mrf.mxu1 }
 0x499   : > { %v12782_v38 = vpop.f32.mrf.mxu0  ;;  %v15823_v2 = vadd.f32 %v6562_v56, %v6357_v28 }
 0x49a   : > { %v6330_v42 = vpop.f32.mrf.mxu1  ;;  %13040 = vmatmul.mubr.msk.f32.gmra.mxu1 %vm1929_vm1, %v7557_v50 }
 0x49b   : > { %v6567_v31 = vpop.f32.mrf.mxu0  ;;  %v6358_v53 = vadd.f32 %v6330_v42, %v15712_v10  ;;  %13042 = vmatprep.mubr.msk.f32.mxu1 %vm13410_vm0, %v13409_v43 }
 0x49c   : > { %v12732_v23 = vpop.f32.mrf.mxu1 }
 0x49d   : > { %v12785_v61 = vpop.f32.mrf.mxu0  ;;  %v15829_v22 = vadd.f32 %v6567_v31, %v6358_v53 }
 0x49e   : > { %v6335_v26 = vpop.f32.mrf.mxu1  ;;  %13043 = vmatmul.mubr.msk.f32.gmra.mxu1 %vm1929_vm1, %v7558_v1 }
 0x49f   : > { %v6572_v0 = vpop.f32.mrf.mxu0  ;;  %v6359_v51 = vadd.f32 %v6335_v26, %v15721_v25  ;;  %13045 = vmatprep.mubr.msk.f32.mxu1 %vm13410_vm0, %v13409_v43 }
 0x4a0   : > { %v12735_v10 = vpop.f32.mrf.mxu1 }
 0x4a1   : > { %v12788_v5 = vpop.f32.mrf.mxu0  ;;  %v15839_v29 = vadd.f32 %v6572_v0, %v6359_v51 }
 0x4a2   : > { %v6340_v6 = vpop.f32.mrf.mxu1  ;;  %13046 = vmatmul.mubr.msk.f32.gmra.mxu1 %vm1929_vm1, %v7559_v32 }
 0x4a3   : > { %v6577_v41 = vpop.f32.mrf.mxu0  ;;  %v6360_v3 = vadd.f32 %v6340_v6, %v15730_v21  ;;  %13048 = vmatprep.mubr.msk.f32.mxu1 %vm13410_vm0, %v13409_v43 }
 0x4a4   : > { %v12738_v25 = vpop.f32.mrf.mxu1 }
 0x4a5   : > { %v12791_v47 = vpop.f32.mrf.mxu0  ;;  %v15845_v14 = vadd.f32 %v6577_v41, %v6360_v3 }
 0x4a6   : > { %v6734_v40 = vpop.f32.mrf.mxu1  ;;  %13049 = vmatmul.mubr.msk.f32.gmra.mxu1 %vm1929_vm1, %v7560_v36 }
 0x4a7   : > { %v6971_v13 = vpop.f32.mrf.mxu0  ;;  %v6818_v63 = vadd.f32 %v6734_v40, %v15739_v60  ;;  %13051 = vmatprep.mubr.msk.f32.mxu1 %vm13410_vm0, %v13409_v43 }
 0x4a8   : > { %v12796_v4 = vpop.f32.mrf.mxu1 }
 0x4a9   : > { %v12849_v18 = vpop.f32.mrf.mxu0  ;;  %v15851_v21 = vadd.f32 %v6971_v13, %v6818_v63 }
 0x4aa   : > { %v6739_v48 = vpop.f32.mrf.mxu1  ;;  %13052 = vmatmul.mubr.msk.f32.gmra.mxu1 %vm1929_vm1, %v7561_v19 }
 0x4ab   : > { %v6976_v37 = vpop.f32.mrf.mxu0  ;;  %v6819_v55 = vadd.f32 %v6739_v48, %v15748_v17  ;;  %13054 = vmatprep.mubr.msk.f32.mxu1 %vm13410_vm0, %v13409_v43  ;;  %v10545_v48 = vld [vmem:[%s16476_s3 + $0xa8] sm:$0xff] }
 0x4ac   : > { %v12799_v9 = vpop.f32.mrf.mxu1  ;;  %13128 = vmatpush3.msra.mxu1 %v10545_v48 }
 0x4ad   : > { %v12852_v39 = vpop.f32.mrf.mxu0  ;;  %v15857_v60 = vadd.f32 %v6976_v37, %v6819_v55  ;;  %13129 = vmatprep.subr.mxu1 %v13409_v43 }
 0x4ae   : > { %v6744_v11 = vpop.f32.mrf.mxu1  ;;  %13055 = vmatmul.mubr.msk.f32.gmra.mxu1 %vm1929_vm1, %v7562_v20 }
 0x4af   : > { %v6981_v12 = vpop.f32.mrf.mxu0  ;;  %v6820_v46 = vadd.f32 %v6744_v11, %v15757_v30  ;;  %13131 = vmatprep.mubr.msk.f32.mxu1 %vm13410_vm0, %v13409_v43 }
 0x4b0   : > { %v12802_v59 = vpop.f32.mrf.mxu1 }
 0x4b1   : > { %v12855_v15 = vpop.f32.mrf.mxu0  ;;  %v15863_v17 = vadd.f32 %v6981_v12, %v6820_v46 }
 0x4b2   : > { %v6749_v54 = vpop.f32.mrf.mxu1 }
 0x4b3   : > { %v6986_v52 = vpop.f32.mrf.mxu0  ;;  %v6821_v49 = vadd.f32 %v6749_v54, %v15763_v8 }
 0x4b4   : > { %v12805_v62 = vpop.f32.mrf.mxu1 }
 0x4b5   : > { %v12858_v56 = vpop.f32.mrf.mxu0  ;;  %v15866_v28 = vadd.f32 %v6986_v52, %v6821_v49 }
 0x4b6   : > { %v6754_v58 = vpop.f32.mrf.mxu1 }
 0x4b7   : > { %v6991_v38 = vpop.f32.mrf.mxu0  ;;  %v6822_v50 = vadd.f32 %v6754_v58, %v15769_v33 }
 0x4b8   : > { %v12808_v30 = vpop.f32.mrf.mxu1 }
 0x4b9   : > { %v12861_v42 = vpop.f32.mrf.mxu0  ;;  %v15869_v31 = vadd.f32 %v6991_v38, %v6822_v50 }
 0x4ba   : > { %v6759_v53 = vpop.f32.mrf.mxu1 }
 0x4bb   : > { %v6996_v23 = vpop.f32.mrf.mxu0  ;;  %v6823_v61 = vadd.f32 %v6759_v53, %v15775_v27 }
 0x4bc   : > { %v12811_v1 = vpop.f32.mrf.mxu1 }
 0x4bd   : > { %v12864_v7 = vpop.f32.mrf.mxu0  ;;  %v15872_v26 = vadd.f32 %v6996_v23, %v6823_v61 }
 0x4be   : > { %v6764_v8 = vpop.f32.mrf.mxu1 }
 0x4bf   : > { %v7001_v0 = vpop.f32.mrf.mxu0  ;;  %v6824_v51 = vadd.f32 %v6764_v8, %v15781_v34 }
 0x4c0   : > { %v12814_v10 = vpop.f32.mrf.mxu1 }
 0x4c1   : > { %v12867_v5 = vpop.f32.mrf.mxu0  ;;  %v15875_v32 = vadd.f32 %v7001_v0, %v6824_v51 }
 0x4c2   : > { %v6769_v33 = vpop.f32.mrf.mxu1 }
 0x4c3   : > { %v7006_v6 = vpop.f32.mrf.mxu0  ;;  %v6825_v41 = vadd.f32 %v6769_v33, %v15787_v45  ;;  %v7891_v45 = vld [vmem:[%s16476_s3] sm:$0xff] }
 0x4c4   : > { %v12817_v3 = vpop.f32.mrf.mxu1  ;;  %13060 = vmatpush3.msra.mxu0 %v7891_v45 }
 0x4c5   : > { %v12870_v25 = vpop.f32.mrf.mxu0  ;;  %v15878_v47 = vadd.f32 %v7006_v6, %v6825_v41  ;;  %13064 = vmatprep.subr.mxu0 %v13409_v43 }
 0x4c6   : > { %v6774_v27 = vpop.f32.mrf.mxu1 }
 0x4c7   : > { %v7011_v36 = vpop.f32.mrf.mxu0  ;;  %v6826_v40 = vadd.f32 %v6774_v27, %v15793_v57 }
 0x4c8   : > { %v12820_v13 = vpop.f32.mrf.mxu1 }
 0x4c9   : > { %v12873_v63 = vpop.f32.mrf.mxu0  ;;  %v15881_v4 = vadd.f32 %v7011_v36, %v6826_v40 }
 0x4ca   : > { %v6779_v34 = vpop.f32.mrf.mxu1 }
 0x4cb   : > { %v7016_v18 = vpop.f32.mrf.mxu0  ;;  %v6827_v19 = vadd.f32 %v6779_v34, %v15799_v35 }
 0x4cc   : > { %v12823_v37 = vpop.f32.mrf.mxu1 }
 0x4cd   : > { %v12876_v55 = vpop.f32.mrf.mxu0  ;;  %v15890_v57 = vadd.f32 %v7016_v18, %v6827_v19 }
 0x4ce   : > { %v6784_v9 = vpop.f32.mrf.mxu1 }
 0x4cf   : > { %v7021_v35 = vpop.f32.mrf.mxu0  ;;  %v6828_v39 = vadd.f32 %v6784_v9, %v15805_v16 }
 0x4d0   : > { %v12826_v20 = vpop.f32.mrf.mxu1 }
 0x4d1   : > { %v12879_v11 = vpop.f32.mrf.mxu0  ;;  %v15895_v12 = vadd.f32 %v7021_v35, %v6828_v39 }
 0x4d2   : > { %v6789_v46 = vpop.f32.mrf.mxu1 }
 0x4d3   : > { %v7026_v59 = vpop.f32.mrf.mxu0  ;;  %v6829_v15 = vadd.f32 %v6789_v46, %v15811_v24 }
 0x4d4   : > { %v12829_v54 = vpop.f32.mrf.mxu1 }
 0x4d5   : > { %v12882_v52 = vpop.f32.mrf.mxu0  ;;  %v15898_v49 = vadd.f32 %v7026_v59, %v6829_v15 }
 0x4d6   : > { %v6794_v62 = vpop.f32.mrf.mxu1 }
 0x4d7   : > { %v7031_v56 = vpop.f32.mrf.mxu0  ;;  %v6830_v58 = vadd.f32 %v6794_v62, %v15817_v44 }
 0x4d8   : > { %v12832_v38 = vpop.f32.mrf.mxu1 }
 0x4d9   : > { %v12885_v50 = vpop.f32.mrf.mxu0  ;;  %v15901_v30 = vadd.f32 %v7031_v56, %v6830_v58 }
 0x4da   : > { %v6799_v16 = vpop.f32.mrf.mxu1 }
 0x4db   : > { %v7036_v42 = vpop.f32.mrf.mxu0  ;;  %v6831_v53 = vadd.f32 %v6799_v16, %v15823_v2 }
 0x4dc   : > { %v12835_v23 = vpop.f32.mrf.mxu1 }
 0x4dd   : > { %v12888_v61 = vpop.f32.mrf.mxu0  ;;  %v15904_v1 = vadd.f32 %v7036_v42, %v6831_v53 }
 0x4de   : > { %v6804_v24 = vpop.f32.mrf.mxu1 }
 0x4df   : > { %v7041_v7 = vpop.f32.mrf.mxu0  ;;  %v6832_v8 = vadd.f32 %v6804_v24, %v15829_v22 }
 0x4e0   : > { %v12838_v0 = vpop.f32.mrf.mxu1 }
 0x4e1   : > { %v12891_v51 = vpop.f32.mrf.mxu0  ;;  %v15907_v10 = vadd.f32 %v7041_v7, %v6832_v8 }
 0x4e2   : > { %v6809_v44 = vpop.f32.mrf.mxu1 }
 0x4e3   : > { %v7046_v5 = vpop.f32.mrf.mxu0  ;;  %v6833_v33 = vadd.f32 %v6809_v44, %v15839_v29 }
 0x4e4   : > { %v12841_v6 = vpop.f32.mrf.mxu1 }
 0x4e5   : > { %v12894_v41 = vpop.f32.mrf.mxu0  ;;  %v15910_v3 = vadd.f32 %v7046_v5, %v6833_v33 }
 0x4e6   : > { %v6814_v2 = vpop.f32.mrf.mxu1 }
 0x4e7   : > { %v7051_v25 = vpop.f32.mrf.mxu0  ;;  %v6834_v27 = vadd.f32 %v6814_v2, %v15845_v14 }
 0x4e8   : > { %v12844_v36 = vpop.f32.mrf.mxu1 }
 0x4e9   : > { %v12897_v40 = vpop.f32.mrf.mxu0  ;;  %v15913_v13 = vadd.f32 %v7051_v25, %v6834_v27 }
 0x4ea   : > { %v7208_v22 = vpop.f32.mrf.mxu1 }
 0x4eb   : > { %v7445_v63 = vpop.f32.mrf.mxu0  ;;  %v7292_v34 = vadd.f32 %v7208_v22, %v15851_v21  ;;  %v10544_v21 = vld [vmem:[%s16476_s3 + $0xa0] sm:$0xff] }
 0x4ec   : > { %v12902_v18 = vpop.f32.mrf.mxu1  ;;  %13130 = vmatpush3.msra.mxu1 %v10544_v21 }
 0x4ed   : > { %v12955_v19 = vpop.f32.mrf.mxu0  ;;  %v15916_v45 = vadd.f32 %v7445_v63, %v7292_v34  ;;  %13141 = vmatprep.subr.mxu1 %v13409_v43 }
 0x4ee   : > { %v7213_v29 = vpop.f32.mrf.mxu1 }
 0x4ef   : > { %v7450_v48 = vpop.f32.mrf.mxu0  ;;  %v7293_v37 = vadd.f32 %v7213_v29, %v15857_v60 }
 0x4f0   : > { %v12905_v55 = vpop.f32.mrf.mxu1 }
 0x4f1   : > { %v12958_v9 = vpop.f32.mrf.mxu0  ;;  %v15919_v35 = vadd.f32 %v7450_v48, %v7293_v37 }
 0x4f2   : > { %v7218_v14 = vpop.f32.mrf.mxu1 }
 0x4f3   : > { %v7455_v39 = vpop.f32.mrf.mxu0  ;;  %v7294_v20 = vadd.f32 %v7218_v14, %v15863_v17 }
 0x4f4   : > { %v12908_v11 = vpop.f32.mrf.mxu1 }
 0x4f5   : > { %v12961_v46 = vpop.f32.mrf.mxu0  ;;  %v15922_v59 = vadd.f32 %v7455_v39, %v7294_v20 }
 0x4f6   : > { %v7223_v15 = vpop.f32.mrf.mxu1 }
 0x4f7   : > { %v7460_v54 = vpop.f32.mrf.mxu0  ;;  %v7295_v60 = vadd.f32 %v7223_v15, %v15866_v28 }
 0x4f8   : > { %v12911_v52 = vpop.f32.mrf.mxu1 }
 0x4f9   : > { %v12964_v62 = vpop.f32.mrf.mxu0  ;;  %v15929_v56 = vadd.f32 %v7460_v54, %v7295_v60 }
 0x4fa   : > { %v7228_v17 = vpop.f32.mrf.mxu1 }
 0x4fb   : > { %v7465_v58 = vpop.f32.mrf.mxu0  ;;  %v7296_v38 = vadd.f32 %v7228_v17, %v15869_v31 }
 0x4fc   : > { %v12914_v50 = vpop.f32.mrf.mxu1 }
 0x4fd   : > { %v12967_v16 = vpop.f32.mrf.mxu0  ;;  %v15932_v42 = vadd.f32 %v7465_v58, %v7296_v38 }
 0x4fe   : > { %v7233_v53 = vpop.f32.mrf.mxu1 }
 0x4ff   : > { %v7470_v23 = vpop.f32.mrf.mxu0  ;;  %v7297_v61 = vadd.f32 %v7233_v53, %v15872_v26 }
 0x500   : > { %v12917_v24 = vpop.f32.mrf.mxu1 }
 0x501   : > { %v12970_v28 = vpop.f32.mrf.mxu0  ;;  %v15935_v7 = vadd.f32 %v7470_v23, %v7297_v61 }
 0x502   : > { %v7238_v8 = vpop.f32.mrf.mxu1 }
 0x503   : > { %v7475_v0 = vpop.f32.mrf.mxu0  ;;  %v7298_v51 = vadd.f32 %v7238_v8, %v15875_v32 }
 0x504   : > { %v12920_v44 = vpop.f32.mrf.mxu1 }
 0x505   : > { %v12973_v5 = vpop.f32.mrf.mxu0  ;;  %v15938_v33 = vadd.f32 %v7475_v0, %v7298_v51 }
 0x506   : > { %v7243_v31 = vpop.f32.mrf.mxu1 }
 0x507   : > { %v7480_v6 = vpop.f32.mrf.mxu0  ;;  %v7299_v41 = vadd.f32 %v7243_v31, %v15878_v47 }
 0x508   : > { %v12923_v2 = vpop.f32.mrf.mxu1 }
 0x509   : > { %v12976_v25 = vpop.f32.mrf.mxu0  ;;  %v15941_v27 = vadd.f32 %v7480_v6, %v7299_v41 }
 0x50a   : > { %v7248_v26 = vpop.f32.mrf.mxu1 }
 0x50b   : > { %v7485_v36 = vpop.f32.mrf.mxu0  ;;  %v7300_v40 = vadd.f32 %v7248_v26, %v15881_v4 }
 0x50c   : > { %v12926_v22 = vpop.f32.mrf.mxu1 }
 0x50d   : > { %v12979_v63 = vpop.f32.mrf.mxu0  ;;  %v15944_v34 = vadd.f32 %v7485_v36, %v7300_v40  ;;  %v15973_v40 = vld [vmem:[%s16479_s6] ss:$0 sm:$0xff] }
 0x50e   : > { %v7253_v32 = vpop.f32.mrf.mxu1 }
 0x50f   : > { %v7490_v18 = vpop.f32.mrf.mxu0  ;;  %v7301_v19 = vadd.f32 %v7253_v32, %v15890_v57 }
 0x510   : > { %v12929_v29 = vpop.f32.mrf.mxu1 }
 0x511   : > { %v12982_v48 = vpop.f32.mrf.mxu0  ;;  %v15947_v37 = vadd.f32 %v7490_v18, %v7301_v19 }
 0x512   : > { %v7258_v47 = vpop.f32.mrf.mxu1 }
 0x513   : > { %v7495_v55 = vpop.f32.mrf.mxu0  ;;  %v7302_v9 = vadd.f32 %v7258_v47, %v15895_v12 }
 0x514   : > { %v12932_v14 = vpop.f32.mrf.mxu1 }
 0x515   : > { %v12985_v39 = vpop.f32.mrf.mxu0  ;;  %v15950_v20 = vadd.f32 %v7495_v55, %v7302_v9 }
 0x516   : > { %v7263_v4 = vpop.f32.mrf.mxu1 }
 0x517   : > { %v7500_v11 = vpop.f32.mrf.mxu0  ;;  %v7303_v46 = vadd.f32 %v7263_v4, %v15898_v49 }
 0x518   : > { %v12935_v21 = vpop.f32.mrf.mxu1 }
 0x519   : > { %v12988_v15 = vpop.f32.mrf.mxu0  ;;  %v15953_v54 = vadd.f32 %v7500_v11, %v7303_v46 }
 0x51a   : > { %v7268_v57 = vpop.f32.mrf.mxu1 }
 0x51b   : > { %v7505_v60 = vpop.f32.mrf.mxu0  ;;  %v7304_v52 = vadd.f32 %v7268_v57, %v15901_v30 }
 0x51c   : > { %v12938_v62 = vpop.f32.mrf.mxu1 }
 0x51d   : > { %v12991_v17 = vpop.f32.mrf.mxu0  ;;  %v15956_v58 = vadd.f32 %v7505_v60, %v7304_v52 }
 0x51e   : > { %v7273_v12 = vpop.f32.mrf.mxu1 }
 0x51f   : > { %v7510_v38 = vpop.f32.mrf.mxu0  ;;  %v7305_v50 = vadd.f32 %v7273_v12, %v15904_v1 }
 0x520   : > { %v12941_v16 = vpop.f32.mrf.mxu1 }
 0x521   : > { %v12994_v53 = vpop.f32.mrf.mxu0  ;;  %v15959_v23 = vadd.f32 %v7510_v38, %v7305_v50 }
 0x522   : > { %v7278_v49 = vpop.f32.mrf.mxu1 }
 0x523   : > { %v7515_v61 = vpop.f32.mrf.mxu0  ;;  %v7306_v24 = vadd.f32 %v7278_v49, %v15907_v10 }
 0x524   : > { %v12944_v28 = vpop.f32.mrf.mxu1 }
 0x525   : > { %v12997_v8 = vpop.f32.mrf.mxu0  ;;  %v15962_v0 = vadd.f32 %v7515_v61, %v7306_v24 }
 0x526   : > { %v7283_v30 = vpop.f32.mrf.mxu1 }
 0x527   : > { %v7520_v51 = vpop.f32.mrf.mxu0  ;;  %v7307_v44 = vadd.f32 %v7283_v30, %v15910_v3 }
 0x528   : > { %v12947_v5 = vpop.f32.mrf.mxu1 }
 0x529   : > { %v13000_v31 = vpop.f32.mrf.mxu0  ;;  %v15965_v6 = vadd.f32 %v7520_v51, %v7307_v44 }
 0x52a   : > { %v7288_v1 = vpop.f32.mrf.mxu1 }
 0x52b   : > { %v7525_v41 = vpop.f32.mrf.mxu0  ;;  %v7308_v2 = vadd.f32 %v7288_v1, %v15913_v13 }
 0x52c   : > { %v12950_v25 = vpop.f32.mrf.mxu1 }
 0x52d   : > { %v13003_v26 = vpop.f32.mrf.mxu0  ;;  %v15968_v36 = vadd.f32 %v7525_v41, %v7308_v2 }
 0x52e   : > { %v7682_v10 = vpop.f32.mrf.mxu1 }
 0x52f   : > { %v7766_v3 = vadd.f32 %v7682_v10, %v15916_v45 }
 0x530   : > { %v13008_v22 = vpop.f32.mrf.mxu1 }
 0x531   : > { %v7788_v63 = vadd.f32 %v15973_v40, %v7766_v3 }
 0x532   : > { %v7687_v32 = vpop.f32.mrf.mxu1 }
 0x533   : > { %7805 = vst [vmem:[#allocation4] sm:$0xff] %v7788_v63  ;;  %v7767_v18 = vadd.f32 %v7687_v32, %v15919_v35 }
 0x534   : > { %v13011_v13 = vpop.f32.mrf.mxu1 }
 0x535   : > { %v7789_v19 = vadd.f32 %v15973_v40, %v7767_v18 }
 0x536   : > { %v7692_v29 = vpop.f32.mrf.mxu1 }
 0x537   : > { %7806 = vst [vmem:[#allocation4 + $0x8] sm:$0xff] %v7789_v19  ;;  %v7768_v48 = vadd.f32 %v7692_v29, %v15922_v59 }
 0x538   : > { %v13014_v47 = vpop.f32.mrf.mxu1 }
 0x539   : > { %v7790_v55 = vadd.f32 %v15973_v40, %v7768_v48 }
 0x53a   : > { %v7697_v9 = vpop.f32.mrf.mxu1 }
 0x53b   : > { %7807 = vst [vmem:[#allocation4 + $0x10] sm:$0xff] %v7790_v55  ;;  %v7769_v45 = vadd.f32 %v7697_v9, %v15929_v56 }
 0x53c   : > { %v13017_v14 = vpop.f32.mrf.mxu1 }
 0x53d   : > { %v7791_v39 = vadd.f32 %v15973_v40, %v7769_v45 }
 0x53e   : > { %v7702_v4 = vpop.f32.mrf.mxu1  ;;  %v7822_v11 = vld [vmem:[#allocation4] ss:$2 sm:$0x1f]  ;;  %v7824_v46 = vld [vmem:[#allocation4 + $0x1] ss:$2 sm:$0x1f] }
 0x53f   : > { %7808 = vst [vmem:[#allocation4 + $0x18] sm:$0xff] %v7791_v39  ;;  %v7770_v35 = vadd.f32 %v7702_v4, %v15932_v42  ;;  %v7829_v52 = vmax.f32 %v7822_v11, %v7824_v46  ;;  %v10518_v4 = vld [vmem:[%s16476_s3 + $0x18] sm:$0xff] }
 0x540   : > { %v13020_v21 = vpop.f32.mrf.mxu1 }
 0x541   : > { %v7792_v15 = vadd.f32 %v15973_v40, %v7770_v35  ;;  %v10517_v21 = vld [vmem:[%s16476_s3 + $0x10] sm:$0xff] }
 0x542   : > { %v7826_v59 = vld [vmem:[#allocation4 + $0xe] ss:$2 sm:$0x1f]  ;;  %v7828_v57 = vld [vmem:[#allocation4 + $0xf] ss:$2 sm:$0x1f]  ;;  %v7707_v60 = vpop.f32.mrf.mxu1 }
 0x543   : > { %v7830_v62 = vmax.f32 %v7826_v59, %v7828_v57  ;;  %7809 = vst [vmem:[#allocation4 + $0x20] sm:$0xff] %v7792_v15  ;;  %v7771_v56 = vadd.f32 %v7707_v60, %v15935_v7  ;;  %v10521_v60 = vld [vmem:[%s16476_s3 + $0x28] sm:$0xff] }
 0x544   : > { %v13023_v17 = vpop.f32.mrf.mxu1 }
 0x545   : > { %v7831_v12 = vmax.f32 %v7829_v52, %v7830_v62  ;;  %v7793_v38 = vadd.f32 %v15973_v40, %v7771_v56 }
 0x546   : > { %v7712_v50 = vpop.f32.mrf.mxu1 }
 0x547   : > { %v7832_v16 = vmax.f32 %v7831_v12, 0.0  ;;  %7810 = vst [vmem:[#allocation4 + $0x28] sm:$0xff] %v7793_v38  ;;  %v7772_v42 = vadd.f32 %v7712_v50, %v15938_v33  ;;  %v10524_v38 = vld [vmem:[%s16476_s3 + $0x38] sm:$0xff] }
 0x548   : > { %v13026_v53 = vpop.f32.mrf.mxu1 }
 0x549   : > { %7833 = vst [vmem:[#allocation5] sm:$0x1f] %v7832_v16  ;;  %v7794_v49 = vadd.f32 %v15973_v40, %v7772_v42 }
 0x54a   : > { %v7717_v61 = vpop.f32.mrf.mxu1  ;;  %v7835_v51 = vld [vmem:[#allocation4 + $0x1c] ss:$2 sm:$0x1f]  ;;  %v7837_v44 = vld [vmem:[#allocation4 + $0x1d] ss:$2 sm:$0x1f] }
 0x54b   : > { %7811 = vst [vmem:[#allocation4 + $0x30] sm:$0xff] %v7794_v49  ;;  %v7773_v24 = vadd.f32 %v7717_v61, %v15941_v27  ;;  %v7842_v2 = vmax.f32 %v7835_v51, %v7837_v44  ;;  %v10527_v61 = vld [vmem:[%s16476_s3 + $0x48] sm:$0xff] }
 0x54c   : > { %v13029_v28 = vpop.f32.mrf.mxu1 }
 0x54d   : > { %v7795_v7 = vadd.f32 %v15973_v40, %v7773_v24 }
 0x54e   : > { %v7722_v8 = vpop.f32.mrf.mxu1 }
 0x54f   : > { %7812 = vst [vmem:[#allocation4 + $0x38] sm:$0xff] %v7795_v7  ;;  %v7774_v30 = vadd.f32 %v7722_v8, %v15944_v34 }
 0x550   : > { %v13032_v5 = vpop.f32.mrf.mxu1 }
 0x551   : > { %v7796_v33 = vadd.f32 %v15973_v40, %v7774_v30 }
 0x552   : > { %v7839_v31 = vld [vmem:[#allocation4 + $0x2a] ss:$2 sm:$0x1f]  ;;  %v7841_v1 = vld [vmem:[#allocation4 + $0x2b] ss:$2 sm:$0x1f]  ;;  %v7727_v41 = vpop.f32.mrf.mxu1 }
 0x553   : > { %v7843_v25 = vmax.f32 %v7839_v31, %v7841_v1  ;;  %7813 = vst [vmem:[#allocation4 + $0x40] sm:$0xff] %v7796_v33  ;;  %v7775_v27 = vadd.f32 %v7727_v41, %v15947_v37  ;;  %v10530_v41 = vld [vmem:[%s16476_s3 + $0x58] sm:$0xff] }
 0x554   : > { %v13035_v26 = vpop.f32.mrf.mxu1 }
 0x555   : > { %v7844_v10 = vmax.f32 %v7842_v2, %v7843_v25  ;;  %v7797_v3 = vadd.f32 %v15973_v40, %v7775_v27 }
 0x556   : > { %v7732_v22 = vpop.f32.mrf.mxu1 }
 0x557   : > { %v7845_v63 = vmax.f32 %v7844_v10, 0.0  ;;  %7814 = vst [vmem:[#allocation4 + $0x48] sm:$0xff] %v7797_v3  ;;  %v7776_v34 = vadd.f32 %v7732_v22, %v15950_v20  ;;  %v10532_v3 = vld [vmem:[%s16476_s3 + $0x60] sm:$0xff] }
 0x558   : > { %v13038_v32 = vpop.f32.mrf.mxu1 }
 0x559   : > { %7846 = vst [vmem:[#allocation5 + $0x5] sm:$0x1f] %v7845_v63  ;;  %v7798_v18 = vadd.f32 %v15973_v40, %v7776_v34  ;;  %v10536_v63 = vld [vmem:[%s16476_s3 + $0x78] sm:$0xff] }
 0x55a   : > { %v7737_v13 = vpop.f32.mrf.mxu1  ;;  %v7848_v29 = vld [vmem:[#allocation4 + $0x38] ss:$2 sm:$0x1f]  ;;  %v7850_v48 = vld [vmem:[#allocation4 + $0x39] ss:$2 sm:$0x1f] }
 0x55b   : > { %7815 = vst [vmem:[#allocation4 + $0x50] sm:$0xff] %v7798_v18  ;;  %v7777_v19 = vadd.f32 %v7737_v13, %v15953_v54  ;;  %v7855_v14 = vmax.f32 %v7848_v29, %v7850_v48  ;;  %v10535_v18 = vld [vmem:[%s16476_s3 + $0x70] sm:$0xff] }
 0x55c   : > { %v13041_v37 = vpop.f32.mrf.mxu1 }
 0x55d   : > { %v7799_v47 = vadd.f32 %v15973_v40, %v7777_v19 }
 0x55e   : > { %v7852_v55 = vld [vmem:[#allocation4 + $0x46] ss:$2 sm:$0x1f]  ;;  %v7854_v9 = vld [vmem:[#allocation4 + $0x47] ss:$2 sm:$0x1f]  ;;  %v7742_v45 = vpop.f32.mrf.mxu1 }
 0x55f   : > { %v7856_v39 = vmax.f32 %v7852_v55, %v7854_v9  ;;  %7816 = vst [vmem:[#allocation4 + $0x58] sm:$0xff] %v7799_v47  ;;  %v7778_v20 = vadd.f32 %v7742_v45, %v15956_v58  ;;  %v10539_v47 = vld [vmem:[%s16476_s3 + $0x88] sm:$0xff]  ;;  %v10538_v45 = vld [vmem:[%s16476_s3 + $0x80] sm:$0xff] }
 0x560   : > { %v13044_v35 = vpop.f32.mrf.mxu1  ;;  %v16003_v54 = vld [vmem:[#allocation5] sm:$0xff] }
 0x561   : > { %v7857_v11 = vmax.f32 %v7855_v14, %v7856_v39  ;;  %v7800_v46 = vadd.f32 %v15973_v40, %v7778_v20  ;;  %13062 = vmatmul.mubr.msk.f32.vlgmr.msra.gmra.mxu0 %vm7893_vm2, %v16003_v54  ;;  %v7971_v57 = vrot.slane %v16003_v54, 1  ;;  %v8048_v12 = vrot.slane %v16003_v54, 2  ;;  %v10551_v39 = vld [vmem:[%s16476_s3 + $0xc8] sm:$0xff]  ;;  %v10550_v35 = vld [vmem:[%s16476_s3 + $0xc0] sm:$0xff] }
 0x562   : > { %13065 = vmatpush3.msra.mxu0 %v10518_v4  ;;  %v7747_v15 = vpop.f32.mrf.mxu1  ;;  %13068 = vmatprep.mubr.msk.f32.mxu0 %vm13410_vm0, %v13409_v43  ;;  %v8125_v49 = vrot.slane %v16003_v54, 3  ;;  %v8202_v1 = vrot.slane %v16003_v54, 4  ;;  %v8279_v10 = vrot.slane %v16003_v54, 5  ;;  %v8356_v22 = vrot.slane %v16003_v54, 6  ;;  %v10542_v4 = vld [vmem:[%s16476_s3 + $0x98] sm:$0xff] }
 0x563   : > { %v7858_v58 = vmax.f32 %v7857_v11, 0.0  ;;  %7817 = vst [vmem:[#allocation4 + $0x60] sm:$0xff] %v7800_v46  ;;  %v7779_v59 = vadd.f32 %v7747_v15, %v15959_v23  ;;  %13066 = vmatprep.subr.mxu0 %v13409_v43  ;;  %v10520_v23 = vld [vmem:[%s16476_s3 + $0x20] sm:$0xff]  ;;  %v8433_v37 = vrot.slane %v16003_v54, 7  ;;  %v10541_v54 = vld [vmem:[%s16476_s3 + $0x90] sm:$0xff]  ;;  %v10557_v46 = vld [vmem:[%s16476_s3 + $0xe8] sm:$0xff] }
 0x564   : > { %13067 = vmatpush3.msra.mxu0 %v10517_v21  ;;  %v13047_v52 = vpop.f32.mrf.mxu1  ;;  %v10548_v15 = vld [vmem:[%s16476_s3 + $0xb8] sm:$0xff] }
 0x565   : > { %7859 = vst [vmem:[#allocation5 + $0xa] sm:$0x1f] %v7858_v58  ;;  %v7801_v62 = vadd.f32 %v15973_v40, %v7779_v59  ;;  %13071 = vmatprep.subr.mxu0 %v13409_v43  ;;  %13069 = vmatmul.mubr.msk.f32.vlgmr.msra.gmra.mxu0 %vm7893_vm2, %v7971_v57  ;;  %v10556_v58 = vld [vmem:[%s16476_s3 + $0xe0] sm:$0xff]  ;;  %v10547_v59 = vld [vmem:[%s16476_s3 + $0xb0] sm:$0xff] }
 0x566   : > { %13072 = vmatpush3.msra.mxu0 %v10521_v60  ;;  %v7752_v56 = vpop.f32.mrf.mxu1  ;;  %13075 = vmatprep.mubr.msk.f32.mxu0 %vm13410_vm0, %v13409_v43  ;;  %v7861_v24 = vld [vmem:[#allocation4 + $0x54] ss:$2 sm:$0x1f]  ;;  %v7863_v28 = vld [vmem:[#allocation4 + $0x55] ss:$2 sm:$0x1f] }
 0x567   : > { %7818 = vst [vmem:[#allocation4 + $0x68] sm:$0xff] %v7801_v62  ;;  %v7780_v17 = vadd.f32 %v7752_v56, %v15962_v0  ;;  %13073 = vmatprep.subr.mxu0 %v13409_v43  ;;  %v10523_v0 = vld [vmem:[%s16476_s3 + $0x30] sm:$0xff]  ;;  %v7868_v5 = vmax.f32 %v7861_v24, %v7863_v28  ;;  %v10563_v60 = vld [vmem:[%s16476_s3 + $0x108] sm:$0xff]  ;;  %v10554_v62 = vld [vmem:[%s16476_s3 + $0xd8] sm:$0xff] }
 0x568   : > { %13074 = vmatpush3.msra.mxu0 %v10520_v23  ;;  %v13050_v50 = vpop.f32.mrf.mxu1  ;;  %v10562_v23 = vld [vmem:[%s16476_s3 + $0x100] sm:$0xff]  ;;  %v10553_v56 = vld [vmem:[%s16476_s3 + $0xd0] sm:$0xff] }
 0x569   : > { %v7802_v16 = vadd.f32 %v15973_v40, %v7780_v17  ;;  %13078 = vmatprep.subr.mxu0 %v13409_v43  ;;  %13076 = vmatmul.mubr.msk.f32.vlgmr.msra.gmra.mxu0 %vm7893_vm2, %v8048_v12  ;;  %v10569_v12 = vld [vmem:[%s16476_s3 + $0x128] sm:$0xff]  ;;  %v10560_v50 = vld [vmem:[%s16476_s3 + $0xf8] sm:$0xff]  ;;  %v10574_v24 = vld [vmem:[%s16476_s3 + $0x140] sm:$0xff] }
 0x56a   : > { %13079 = vmatpush3.msra.mxu0 %v10524_v38  ;;  %v7757_v42 = vpop.f32.mrf.mxu1  ;;  %13082 = vmatprep.mubr.msk.f32.mxu0 %vm13410_vm0, %v13409_v43  ;;  %v10565_v28 = vld [vmem:[%s16476_s3 + $0x110] sm:$0xff] }
 0x56b   : > { %7819 = vst [vmem:[#allocation4 + $0x70] sm:$0xff] %v7802_v16  ;;  %v7781_v53 = vadd.f32 %v7757_v42, %v15965_v6  ;;  %13080 = vmatprep.subr.mxu0 %v13409_v43  ;;  %v10526_v6 = vld [vmem:[%s16476_s3 + $0x40] sm:$0xff] }
 0x56c   : > { %13081 = vmatpush3.msra.mxu0 %v10523_v0  ;;  %v13053_v7 = vpop.f32.mrf.mxu1  ;;  %v10568_v16 = vld [vmem:[%s16476_s3 + $0x120] sm:$0xff]  ;;  %v10559_v0 = vld [vmem:[%s16476_s3 + $0xf0] sm:$0xff] }
 0x56d   : > { %v7803_v8 = vadd.f32 %v15973_v40, %v7781_v53  ;;  %13085 = vmatprep.subr.mxu0 %v13409_v43  ;;  %13083 = vmatmul.mubr.msk.f32.vlgmr.msra.gmra.mxu0 %vm7893_vm2, %v8125_v49  ;;  %v10575_v53 = vld [vmem:[%s16476_s3 + $0x148] sm:$0xff] }
 0x56e   : > { %v7865_v30 = vld [vmem:[#allocation4 + $0x62] ss:$2 sm:$0x1f]  ;;  %v7867_v51 = vld [vmem:[#allocation4 + $0x63] ss:$2 sm:$0x1f]  ;;  %13086 = vmatpush3.msra.mxu0 %v10527_v61  ;;  %v7762_v44 = vpop.f32.mrf.mxu1  ;;  %13089 = vmatprep.mubr.msk.f32.mxu0 %vm13410_vm0, %v13409_v43 }
 0x56f   : > { %v7869_v33 = vmax.f32 %v7865_v30, %v7867_v51  ;;  %7820 = vst [vmem:[#allocation4 + $0x78] sm:$0xff] %v7803_v8  ;;  %v7782_v31 = vadd.f32 %v7762_v44, %v15968_v36  ;;  %13087 = vmatprep.subr.mxu0 %v13409_v43  ;;  %v10529_v36 = vld [vmem:[%s16476_s3 + $0x50] sm:$0xff]  ;;  %v10566_v61 = vld [vmem:[%s16476_s3 + $0x118] sm:$0xff]  ;;  %v10581_v8 = vld [vmem:[%s16476_s3 + $0x168] sm:$0xff] }
 0x570   : > { %13088 = vmatpush3.msra.mxu0 %v10526_v6  ;;  %v13056_v2 = vpop.f32.mrf.mxu1  ;;  %v10572_v30 = vld [vmem:[%s16476_s3 + $0x138] sm:$0xff]  ;;  %v10580_v51 = vld [vmem:[%s16476_s3 + $0x160] sm:$0xff]  ;;  %v10571_v44 = vld [vmem:[%s16476_s3 + $0x130] sm:$0xff] }
 0x571   : > { %v7870_v25 = vmax.f32 %v7868_v5, %v7869_v33  ;;  %v7804_v27 = vadd.f32 %v15973_v40, %v7782_v31  ;;  %13092 = vmatprep.subr.mxu0 %v13409_v43  ;;  %13090 = vmatmul.mubr.msk.f32.vlgmr.msra.gmra.mxu0 %vm7893_vm2, %v8202_v1  ;;  %v10533_v40 = vld [vmem:[%s16476_s3 + $0x68] sm:$0xff]  ;;  %v10578_v1 = vld [vmem:[%s16476_s3 + $0x158] sm:$0xff]  ;;  %v10577_v2 = vld [vmem:[%s16476_s3 + $0x150] sm:$0xff] }
 0x572   : > { %13093 = vmatpush3.msra.mxu0 %v10530_v41  ;;  %13096 = vmatprep.mubr.msk.f32.mxu0 %vm13410_vm0, %v13409_v43  ;;  %v10587_v33 = vld [vmem:[%s16476_s3 + $0x188] sm:$0xff]  ;;  %v10586_v41 = vld [vmem:[%s16476_s3 + $0x180] sm:$0xff] }
 0x573   : > { %v7871_v26 = vmax.f32 %v7870_v25, 0.0  ;;  %7821 = vst [vmem:[#allocation4 + $0x80] sm:$0xff] %v7804_v27  ;;  %13094 = vmatprep.subr.mxu0 %v13409_v43 }
 0x574   : > { %13095 = vmatpush3.msra.mxu0 %v10529_v36  ;;  %v10584_v36 = vld [vmem:[%s16476_s3 + $0x178] sm:$0xff] }
 0x575   : > { %7872 = vst [vmem:[#allocation5 + $0xf] sm:$0x1f] %v7871_v26  ;;  %13099 = vmatprep.subr.mxu0 %v13409_v43  ;;  %13097 = vmatmul.mubr.msk.f32.vlgmr.msra.gmra.mxu0 %vm7893_vm2, %v8279_v10  ;;  %v10583_v26 = vld [vmem:[%s16476_s3 + $0x170] sm:$0xff] }
 0x576   : > { %13100 = vmatpush3.msra.mxu0 %v10533_v40  ;;  %13103 = vmatprep.mubr.msk.f32.mxu0 %vm13410_vm0, %v13409_v43  ;;  %v7874_v34 = vld [vmem:[#allocation4 + $0x70] ss:$2 sm:$0x1f]  ;;  %v7876_v32 = vld [vmem:[#allocation4 + $0x71] ss:$2 sm:$0x1f] }
 0x577   : > { %13101 = vmatprep.subr.mxu0 %v13409_v43  ;;  %v7881_v29 = vmax.f32 %v7874_v34, %v7876_v32  ;;  %v9832_v40 = vld [vmem:[%s16477_s4 + $0x78] sm:$0xff]  ;;  %v9827_v32 = vld [vmem:[%s16477_s4 + $0x50] sm:$0xff] }
 0x578   : > { %13102 = vmatpush3.msra.mxu0 %v10532_v3  ;;  %v9831_v3 = vld [vmem:[%s16477_s4 + $0x70] sm:$0xff]  ;;  %v9828_v34 = vld [vmem:[%s16477_s4 + $0x58] sm:$0xff] }
 0x579   : > { %13106 = vmatprep.subr.mxu0 %v13409_v43  ;;  %13104 = vmatmul.mubr.msk.f32.vlgmr.msra.gmra.mxu0 %vm7893_vm2, %v8356_v22  ;;  %v9830_v22 = vld [vmem:[%s16477_s4 + $0x68] sm:$0xff] }
 0x57a   : > { %v7878_v13 = vld [vmem:[#allocation4 + $0x7e] ss:$2 sm:$0x1f]  ;;  %v7880_v19 = vld [vmem:[#allocation4 + $0x7f] ss:$2 sm:$0x1f]  ;;  %13107 = vmatpush3.msra.mxu0 %v10536_v63  ;;  %13110 = vmatprep.mubr.msk.f32.mxu0 %vm13410_vm0, %v13409_v43 }
 0x57b   : > { %v7882_v48 = vmax.f32 %v7878_v13, %v7880_v19  ;;  %13108 = vmatprep.subr.mxu0 %v13409_v43  ;;  %v9829_v63 = vld [vmem:[%s16477_s4 + $0x60] sm:$0xff]  ;;  %v9824_v19 = vld [vmem:[%s16477_s4 + $0x38] sm:$0xff] }
 0x57c   : > { %13109 = vmatpush3.msra.mxu0 %v10535_v18  ;;  %v16098_v55 = vld [vmem:[#allocation5 + $0x8] sm:$0xff]  ;;  %v9825_v13 = vld [vmem:[%s16477_s4 + $0x40] sm:$0xff] }
 0x57d   : > { %v7883_v9 = vmax.f32 %v7881_v29, %v7882_v48  ;;  %13113 = vmatprep.subr.mxu0 %v13409_v43  ;;  %13111 = vmatmul.mubr.msk.f32.vlgmr.msra.gmra.mxu0 %vm7893_vm2, %v8433_v37  ;;  %v8664_v14 = vrot.slane %v16098_v55, 2  ;;  %v8818_v11 = vrot.slane %v16098_v55, 4  ;;  %v8587_v21 = vrot.slane %v16098_v55, 1  ;;  %v9826_v18 = vld [vmem:[%s16477_s4 + $0x48] sm:$0xff]  ;;  %v9823_v29 = vld [vmem:[%s16477_s4 + $0x30] sm:$0xff]  ;;  %v9821_v37 = vld [vmem:[%s16477_s4 + $0x20] sm:$0xff] }
 0x57e   : > { %13114 = vmatpush3.msra.mxu0 %v10539_v47  ;;  %13117 = vmatprep.mubr.msk.f32.mxu0 %vm13410_vm0, %v13409_v43  ;;  %v8972_v57 = vrot.slane %v16098_v55, 6  ;;  %v8741_v52 = vrot.slane %v16098_v55, 3  ;;  %v8895_v38 = vrot.slane %v16098_v55, 5  ;;  %v9049_v49 = vrot.slane %v16098_v55, 7  ;;  %v9822_v48 = vld [vmem:[%s16477_s4 + $0x28] sm:$0xff]  ;;  %v9820_v47 = vld [vmem:[%s16477_s4 + $0x18] sm:$0xff] }
 0x57f   : > { %v7884_v20 = vmax.f32 %v7883_v9, 0.0  ;;  %13115 = vmatprep.subr.mxu0 %v13409_v43  ;;  %13132 = vmatmul.mubr.msk.f32.vlgmr.msra.gmra.mxu1 %vm7893_vm2, %v8664_v14  ;;  %v9818_v9 = vld [vmem:[%s16477_s4 + $0x8] sm:$0xff]  ;;  %v9919_v14 = vld [vmem:[%s16478_s5 + $0x70] sm:$0xff] }
 0x580   : > { %13116 = vmatpush3.msra.mxu0 %v10538_v45  ;;  %13142 = vmatpush3.msra.mxu1 %v10551_v39  ;;  %v9920_v45 = vld [vmem:[%s16478_s5 + $0x78] sm:$0xff]  ;;  %v9817_v39 = vld [vmem:[%s16477_s4] sm:$0xff] }
 0x581   : > { %7885 = vst [vmem:[#allocation5 + $0x14] sm:$0x1f] %v7884_v20  ;;  %13120 = vmatprep.subr.mxu0 %v13409_v43  ;;  %13118 = vmatmul.mubr.msk.f32.vlgmr.msra.gmra.mxu0 %vm7893_vm2, %v16098_v55  ;;  %v9819_v55 = vld [vmem:[%s16477_s4 + $0x10] sm:$0xff]  ;;  %v9918_v20 = vld [vmem:[%s16478_s5 + $0x68] sm:$0xff] }
 0x582   : > { %13121 = vmatpush3.msra.mxu0 %v10542_v4  ;;  %13143 = vmatprep.subr.mxu1 %v13409_v43  ;;  %v9917_v4 = vld [vmem:[%s16478_s5 + $0x60] sm:$0xff] }
 0x583   : > { %13122 = vmatprep.subr.mxu0 %v13409_v43  ;;  %13144 = vmatpush3.msra.mxu1 %v10550_v35  ;;  %v9916_v35 = vld [vmem:[%s16478_s5 + $0x58] sm:$0xff] }
 0x584   : > { %13145 = vmatprep.mubr.msk.f32.mxu1 %vm13410_vm0, %v13409_v43  ;;  %13123 = vmatpush3.msra.mxu0 %v10541_v54  ;;  %v9915_v54 = vld [vmem:[%s16478_s5 + $0x50] sm:$0xff] }
 0x585   : > { %13146 = vmatmul.mubr.msk.f32.vlgmr.msra.gmra.mxu1 %vm7893_vm2, %v8818_v11  ;;  %13155 = vmatprep.subr.mxu1 %v13409_v43  ;;  %v9914_v11 = vld [vmem:[%s16478_s5 + $0x48] sm:$0xff] }
 0x586   : > { %13124 = vmatprep.mubr.msk.f32.mxu0 %vm13410_vm0, %v13409_v43  ;;  %13134 = vmatprep.subr.mxu0 %v13409_v43 }
 0x587   : > { %13156 = vmatpush3.msra.mxu1 %v10557_v46  ;;  %13125 = vmatmul.mubr.msk.f32.vlgmr.msra.gmra.mxu0 %vm7893_vm2, %v8587_v21  ;;  %v9913_v46 = vld [vmem:[%s16478_s5 + $0x40] sm:$0xff]  ;;  %v9912_v21 = vld [vmem:[%s16478_s5 + $0x38] sm:$0xff] }
 0x588   : > { %13135 = vmatpush3.msra.mxu0 %v10548_v15  ;;  %13157 = vmatprep.subr.mxu1 %v13409_v43  ;;  %v16177_v17 = vld [vmem:[#allocation5 + $0x10] sm:$0xff]  ;;  %v7889_v25 = vld [vmem:[#allocation5 + $0x18] sm:$0x1] }
 0x589   : > { %13136 = vmatprep.subr.mxu0 %v13409_v43  ;;  %13158 = vmatpush3.msra.mxu1 %v10556_v58  ;;  %v9280_v42 = vrot.slane %v16177_v17, 2  ;;  %v9434_v7 = vrot.slane %v16177_v17, 4  ;;  %v9203_v6 = vrot.slane %v16177_v17, 1  ;;  %v9588_v5 = vrot.slane %v16177_v17, 6  ;;  %v9911_v15 = vld [vmem:[%s16478_s5 + $0x30] sm:$0xff]  ;;  %v9910_v58 = vld [vmem:[%s16478_s5 + $0x28] sm:$0xff] }
 0x58a   : > { %13159 = vmatprep.mubr.msk.f32.mxu1 %vm13410_vm0, %v13409_v43  ;;  %13137 = vmatpush3.msra.mxu0 %v10547_v59  ;;  %v9357_v31 = vrot.slane %v16177_v17, 3  ;;  %v9511_v27 = vrot.slane %v16177_v17, 5  ;;  %v9665_v10 = vrot.slane %v16177_v17, 7  ;;  %v9909_v59 = vld [vmem:[%s16478_s5 + $0x20] sm:$0xff] }
 0x58b   : > { %13160 = vmatmul.mubr.msk.f32.vlgmr.msra.gmra.mxu1 %vm7893_vm2, %v8972_v57  ;;  %13169 = vmatprep.subr.mxu1 %v13409_v43  ;;  %v9908_v57 = vld [vmem:[%s16478_s5 + $0x18] sm:$0xff] }
 0x58c   : > { %13138 = vmatprep.mubr.msk.f32.mxu0 %vm13410_vm0, %v13409_v43  ;;  %13148 = vmatprep.subr.mxu0 %v13409_v43 }
 0x58d   : > { %13170 = vmatpush3.msra.mxu1 %v10563_v60  ;;  %13139 = vmatmul.mubr.msk.f32.vlgmr.msra.gmra.mxu0 %vm7893_vm2, %v8741_v52 }
 0x58e   : > { %13149 = vmatpush3.msra.mxu0 %v10554_v62  ;;  %13171 = vmatprep.subr.mxu1 %v13409_v43 }
 0x58f   : > { %13150 = vmatprep.subr.mxu0 %v13409_v43  ;;  %13172 = vmatpush3.msra.mxu1 %v10562_v23 }
 0x590   : > { %13173 = vmatprep.mubr.msk.f32.mxu1 %vm13410_vm0, %v13409_v43  ;;  %13151 = vmatpush3.msra.mxu0 %v10553_v56 }
 0x591   : > { %13174 = vmatmul.mubr.msk.f32.vlgmr.msra.gmra.mxu1 %vm7893_vm2, %v16177_v17  ;;  %13183 = vmatprep.subr.mxu1 %v13409_v43 }
 0x592   : > { %13152 = vmatprep.mubr.msk.f32.mxu0 %vm13410_vm0, %v13409_v43  ;;  %13162 = vmatprep.subr.mxu0 %v13409_v43 }
 0x593   : > { %13184 = vmatpush3.msra.mxu1 %v10569_v12  ;;  %13153 = vmatmul.mubr.msk.f32.vlgmr.msra.gmra.mxu0 %vm7893_vm2, %v8895_v38 }
 0x594   : > { %13163 = vmatpush3.msra.mxu0 %v10560_v50  ;;  %13185 = vmatprep.subr.mxu1 %v13409_v43 }
 0x595   : > { %13164 = vmatprep.subr.mxu0 %v13409_v43  ;;  %13186 = vmatpush3.msra.mxu1 %v10568_v16  ;;  %v7890_v16 = vld [vmem:[%s16479_s6 + $0x1] sm:$0x1] }
 0x596   : > { %13187 = vmatprep.mubr.msk.f32.mxu1 %vm13410_vm0, %v13409_v43  ;;  %13165 = vmatpush3.msra.mxu0 %v10559_v0 }
 0x597   : > { %13188 = vmatmul.mubr.msk.f32.vlgmr.msra.gmra.mxu1 %vm7893_vm2, %v9280_v42  ;;  %13197 = vmatprep.subr.mxu1 %v13409_v43 }
 0x598   : > { %13166 = vmatprep.mubr.msk.f32.mxu0 %vm13410_vm0, %v13409_v43  ;;  %13176 = vmatprep.subr.mxu0 %v13409_v43 }
 0x599   : > { %13198 = vmatpush3.msra.mxu1 %v10575_v53  ;;  %13167 = vmatmul.mubr.msk.f32.vlgmr.msra.gmra.mxu0 %vm7893_vm2, %v9049_v49 }
 0x59a   : > { %13177 = vmatpush3.msra.mxu0 %v10566_v61  ;;  %13199 = vmatprep.subr.mxu1 %v13409_v43 }
 0x59b   : > { %13178 = vmatprep.subr.mxu0 %v13409_v43  ;;  %13200 = vmatpush3.msra.mxu1 %v10574_v24 }
 0x59c   : > { %13201 = vmatprep.mubr.msk.f32.mxu1 %vm13410_vm0, %v13409_v43  ;;  %13179 = vmatpush3.msra.mxu0 %v10565_v28 }
 0x59d   : > { %13202 = vmatmul.mubr.msk.f32.vlgmr.msra.gmra.mxu1 %vm7893_vm2, %v9434_v7  ;;  %13211 = vmatprep.subr.mxu1 %v13409_v43 }
 0x59e   : > { %13180 = vmatprep.mubr.msk.f32.mxu0 %vm13410_vm0, %v13409_v43  ;;  %13190 = vmatprep.subr.mxu0 %v13409_v43 }
 0x59f   : > { %13212 = vmatpush3.msra.mxu1 %v10581_v8  ;;  %13181 = vmatmul.mubr.msk.f32.vlgmr.msra.gmra.mxu0 %vm7893_vm2, %v9203_v6 }
 0x5a0   : > { %13191 = vmatpush3.msra.mxu0 %v10572_v30  ;;  %13213 = vmatprep.subr.mxu1 %v13409_v43 }
 0x5a1   : > { %13192 = vmatprep.subr.mxu0 %v13409_v43  ;;  %13214 = vmatpush3.msra.mxu1 %v10580_v51 }
 0x5a2   : > { %13215 = vmatprep.mubr.msk.f32.mxu1 %vm13410_vm0, %v13409_v43  ;;  %13193 = vmatpush3.msra.mxu0 %v10571_v44 }
 0x5a3   : > { %13216 = vmatmul.mubr.msk.f32.vlgmr.msra.gmra.mxu1 %vm7893_vm2, %v9588_v5  ;;  %13225 = vmatprep.subr.mxu1 %v13409_v43 }
 0x5a4   : > { %13194 = vmatprep.mubr.msk.f32.mxu0 %vm13410_vm0, %v13409_v43  ;;  %13204 = vmatprep.subr.mxu0 %v13409_v43 }
 0x5a5   : > { %13226 = vmatpush3.msra.mxu1 %v10587_v33  ;;  %13195 = vmatmul.mubr.msk.f32.vlgmr.msra.gmra.mxu0 %vm7893_vm2, %v9357_v31 }
 0x5a6   : > { %13205 = vmatpush3.msra.mxu0 %v10578_v1  ;;  %13227 = vmatprep.subr.mxu1 %v13409_v43 }
 0x5a7   : > { %13206 = vmatprep.subr.mxu0 %v13409_v43  ;;  %13228 = vmatpush3.msra.mxu1 %v10586_v41 }
 0x5a8   : > { %13229 = vmatprep.mubr.msk.f32.mxu1 %vm13410_vm0, %v13409_v43  ;;  %13207 = vmatpush3.msra.mxu0 %v10577_v2 }
 0x5a9   : > { %13230 = vmatmul.mubr.msk.f32.vlgmr.msra.gmra.mxu1 %vm7893_vm2, %v7889_v25  ;;  %13208 = vmatprep.mubr.msk.f32.mxu0 %vm13410_vm0, %v13409_v43 }
 0x5aa   : > { %13218 = vmatprep.subr.mxu0 %v13409_v43  ;;  %13209 = vmatmul.mubr.msk.f32.vlgmr.msra.gmra.mxu0 %vm7893_vm2, %v9511_v27 }
 0x5ab   : > { %13219 = vmatpush3.msra.mxu0 %v10584_v36  ;;  %13222 = vmatprep.mubr.msk.f32.mxu0 %vm13410_vm0, %v13409_v43 }
 0x5ac   : > { %13220 = vmatprep.subr.mxu0 %v13409_v43  ;;  %13267 = vmatprep.subr.mxu1 %v13409_v43 }
 0x5ad   : > { %13221 = vmatpush3.msra.mxu0 %v10583_v26  ;;  %13299 = vmatprep.mubr.msk.f32.mxu1 %vm13410_vm0, %v13409_v43 }
 0x5ae   : > { %13223 = vmatmul.mubr.msk.f32.vlgmr.msra.gmra.mxu0 %vm7893_vm2, %v9665_v10  ;;  %13232 = vmatprep.subr.mxu0 %v13409_v43 }
 0x5af   : > { %13264 = vmatprep.mubr.msk.f32.mxu0 %vm13410_vm0, %v13409_v43  ;;  %13233 = vmatpush3.msra.mxu0 %v9832_v40 }
 0x5b0   : > { %13234 = vmatprep.subr.mxu0 %v13409_v43  ;;  %13268 = vmatpush3.msra.mxu1 %v9920_v45 }
 0x5b1   : > { %13235 = vmatpush3.msra.mxu0 %v9831_v3  ;;  %13269 = vmatprep.subr.mxu1 %v13409_v43 }
 0x5b2   : > { %13236 = vmatprep.subr.mxu0 %v13409_v43  ;;  %13270 = vmatpush3.msra.mxu1 %v9919_v14 }
 0x5b3   : > { %13237 = vmatpush3.msra.mxu0 %v9830_v22  ;;  %13271 = vmatprep.subr.mxu1 %v13409_v43 }
 0x5b4   : > { %13238 = vmatprep.subr.mxu0 %v13409_v43  ;;  %13272 = vmatpush3.msra.mxu1 %v9918_v20 }
 0x5b5   : > { %13239 = vmatpush3.msra.mxu0 %v9829_v63  ;;  %13273 = vmatprep.subr.mxu1 %v13409_v43 }
 0x5b6   : > { %13240 = vmatprep.subr.mxu0 %v13409_v43  ;;  %13274 = vmatpush3.msra.mxu1 %v9917_v4 }
 0x5b7   : > { %13241 = vmatpush3.msra.mxu0 %v9828_v34  ;;  %13275 = vmatprep.subr.mxu1 %v13409_v43 }
 0x5b8   : > { %13242 = vmatprep.subr.mxu0 %v13409_v43  ;;  %13276 = vmatpush3.msra.mxu1 %v9916_v35 }
 0x5b9   : > { %13243 = vmatpush3.msra.mxu0 %v9827_v32  ;;  %13277 = vmatprep.subr.mxu1 %v13409_v43 }
 0x5ba   : > { %13244 = vmatprep.subr.mxu0 %v13409_v43  ;;  %13278 = vmatpush3.msra.mxu1 %v9915_v54 }
 0x5bb   : > { %13245 = vmatpush3.msra.mxu0 %v9826_v18  ;;  %13279 = vmatprep.subr.mxu1 %v13409_v43 }
 0x5bc   : > { %13246 = vmatprep.subr.mxu0 %v13409_v43  ;;  %13280 = vmatpush3.msra.mxu1 %v9914_v11 }
 0x5bd   : > { %13247 = vmatpush3.msra.mxu0 %v9825_v13  ;;  %13281 = vmatprep.subr.mxu1 %v13409_v43 }
 0x5be   : > { %13248 = vmatprep.subr.mxu0 %v13409_v43  ;;  %13282 = vmatpush3.msra.mxu1 %v9913_v46 }
 0x5bf   : > { %13249 = vmatpush3.msra.mxu0 %v9824_v19  ;;  %13283 = vmatprep.subr.mxu1 %v13409_v43 }
 0x5c0   : > { %13250 = vmatprep.subr.mxu0 %v13409_v43  ;;  %13284 = vmatpush3.msra.mxu1 %v9912_v21 }
 0x5c1   : > { %13251 = vmatpush3.msra.mxu0 %v9823_v29  ;;  %13285 = vmatprep.subr.mxu1 %v13409_v43 }
 0x5c2   : > { %13252 = vmatprep.subr.mxu0 %v13409_v43  ;;  %13286 = vmatpush3.msra.mxu1 %v9911_v15 }
 0x5c3   : > { %13253 = vmatpush3.msra.mxu0 %v9822_v48  ;;  %13287 = vmatprep.subr.mxu1 %v13409_v43 }
 0x5c4   : > { %13254 = vmatprep.subr.mxu0 %v13409_v43  ;;  %13288 = vmatpush3.msra.mxu1 %v9910_v58 }
 0x5c5   : > { %13255 = vmatpush3.msra.mxu0 %v9821_v37  ;;  %13289 = vmatprep.subr.mxu1 %v13409_v43 }
 0x5c6   : > { %13256 = vmatprep.subr.mxu0 %v13409_v43  ;;  %13290 = vmatpush3.msra.mxu1 %v9909_v59 }
 0x5c7   : > { %13257 = vmatpush3.msra.mxu0 %v9820_v47  ;;  %13291 = vmatprep.subr.mxu1 %v13409_v43 }
 0x5c8   : > { %13258 = vmatprep.subr.mxu0 %v13409_v43  ;;  %13292 = vmatpush3.msra.mxu1 %v9908_v57 }
 0x5c9   : > { %13259 = vmatpush3.msra.mxu0 %v9819_v55  ;;  %13293 = vmatprep.subr.mxu1 %v13409_v43 }
 0x5ca   : > { %13260 = vmatprep.subr.mxu0 %v13409_v43 }
 0x5cb   : > { %13261 = vmatpush3.msra.mxu0 %v9818_v9 }
 0x5cc   : > { %13262 = vmatprep.subr.mxu0 %v13409_v43 }
 0x5cd   : > { %13263 = vmatpush3.msra.mxu0 %v9817_v39 }
 0x621   : > { %v7963_v60 = vpop.f32.mrf.mxu0 }
 0x622   : > { %v7967_v53 = vadd.f32 %v7963_v60, %v7890_v16 }
 0x623   : > { %v13063_v52 = vpop.f32.mrf.mxu0 }
 0x625   : > { %v8040_v62 = vpop.f32.mrf.mxu0 }
 0x626   : > { %v8044_v61 = vadd.f32 %v8040_v62, %v7967_v53 }
 0x627   : > { %v13070_v23 = vpop.f32.mrf.mxu0 }
 0x629   : > { %v8117_v56 = vpop.f32.mrf.mxu0 }
 0x62a   : > { %v8121_v28 = vadd.f32 %v8117_v56, %v8044_v61  ;;  %v9907_v61 = vld [vmem:[%s16478_s5 + $0x10] sm:$0xff] }
 0x62b   : > { %v13077_v17 = vpop.f32.mrf.mxu0  ;;  %13294 = vmatpush3.msra.mxu1 %v9907_v61 }
 0x62c   : > { %13295 = vmatprep.subr.mxu1 %v13409_v43 }
 0x62d   : > { %v8194_v12 = vpop.f32.mrf.mxu0 }
 0x62e   : > { %v8198_v8 = vadd.f32 %v8194_v12, %v8121_v28  ;;  %v9905_v28 = vld [vmem:[%s16478_s5] sm:$0xff] }
 0x62f   : > { %v13084_v38 = vpop.f32.mrf.mxu0 }
 0x631   : > { %v8271_v50 = vpop.f32.mrf.mxu0 }
 0x632   : > { %v8275_v30 = vadd.f32 %v8271_v50, %v8198_v8 }
 0x633   : > { %v13091_v0 = vpop.f32.mrf.mxu0 }
 0x635   : > { %v8348_v42 = vpop.f32.mrf.mxu0 }
 0x636   : > { %v8352_v5 = vadd.f32 %v8348_v42, %v8275_v30 }
 0x637   : > { %v13098_v49 = vpop.f32.mrf.mxu0 }
 0x639   : > { %v8425_v24 = vpop.f32.mrf.mxu0 }
 0x63a   : > { %v8429_v1 = vadd.f32 %v8425_v24, %v8352_v5  ;;  %v9906_v24 = vld [vmem:[%s16478_s5 + $0x8] sm:$0xff] }
 0x63b   : > { %v13105_v7 = vpop.f32.mrf.mxu0  ;;  %13296 = vmatpush3.msra.mxu1 %v9906_v24 }
 0x63c   : > { %13297 = vmatprep.subr.mxu1 %v13409_v43  ;;  %v9833_v7 = vld [vmem:[%s16479_s6 + $0x2] sm:$0x1] }
 0x63d   : > { %v8502_v6 = vpop.f32.mrf.mxu0  ;;  %13298 = vmatpush3.msra.mxu1 %v9905_v28 }
 0x63e   : > { %v8506_v2 = vadd.f32 %v8502_v6, %v8429_v1 }
 0x63f   : > { %v13112_v51 = vpop.f32.mrf.mxu0  ;;  %v8733_v44 = vpop.f32.mrf.mxu1 }
 0x641   : > { %v8579_v33 = vpop.f32.mrf.mxu0  ;;  %v13133_v31 = vpop.f32.mrf.mxu1 }
 0x642   : > { %v8583_v27 = vadd.f32 %v8579_v33, %v8506_v2 }
 0x643   : > { %v13119_v41 = vpop.f32.mrf.mxu0 }
 0x645   : > { %v8887_v25 = vpop.f32.mrf.mxu1 }
 0x647   : > { %v8656_v36 = vpop.f32.mrf.mxu0  ;;  %v13147_v26 = vpop.f32.mrf.mxu1 }
 0x648   : > { %v8660_v10 = vadd.f32 %v8656_v36, %v8583_v27 }
 0x649   : > { %v13126_v40 = vpop.f32.mrf.mxu0 }
 0x64a   : > { %v8737_v3 = vadd.f32 %v8733_v44, %v8660_v10  ;;  %v9921_v44 = vld [vmem:[%s16479_s6 + $0x3] sm:$0x1] }
 0x64b   : > { %v9041_v22 = vpop.f32.mrf.mxu1 }
 0x64d   : > { %v8810_v63 = vpop.f32.mrf.mxu0  ;;  %v13161_v34 = vpop.f32.mrf.mxu1 }
 0x64e   : > { %v8814_v32 = vadd.f32 %v8810_v63, %v8737_v3 }
 0x64f   : > { %v13140_v18 = vpop.f32.mrf.mxu0 }
 0x650   : > { %v8891_v13 = vadd.f32 %v8887_v25, %v8814_v32 }
 0x651   : > { %v9195_v19 = vpop.f32.mrf.mxu1 }
 0x653   : > { %v8964_v29 = vpop.f32.mrf.mxu0  ;;  %v13175_v48 = vpop.f32.mrf.mxu1 }
 0x654   : > { %v8968_v37 = vadd.f32 %v8964_v29, %v8891_v13 }
 0x655   : > { %v13154_v47 = vpop.f32.mrf.mxu0 }
 0x656   : > { %v9045_v55 = vadd.f32 %v9041_v22, %v8968_v37 }
 0x657   : > { %v9349_v9 = vpop.f32.mrf.mxu1 }
 0x659   : > { %v9118_v45 = vpop.f32.mrf.mxu0  ;;  %v13189_v14 = vpop.f32.mrf.mxu1 }
 0x65a   : > { %v9122_v39 = vadd.f32 %v9118_v45, %v9045_v55 }
 0x65b   : > { %v13168_v20 = vpop.f32.mrf.mxu0 }
 0x65c   : > { %v9199_v4 = vadd.f32 %v9195_v19, %v9122_v39 }
 0x65d   : > { %v9503_v35 = vpop.f32.mrf.mxu1 }
 0x65f   : > { %v9272_v54 = vpop.f32.mrf.mxu0  ;;  %v13203_v11 = vpop.f32.mrf.mxu1 }
 0x660   : > { %v9276_v46 = vadd.f32 %v9272_v54, %v9199_v4 }
 0x661   : > { %v13182_v21 = vpop.f32.mrf.mxu0 }
 0x662   : > { %v9353_v15 = vadd.f32 %v9349_v9, %v9276_v46 }
 0x663   : > { %v9657_v58 = vpop.f32.mrf.mxu1 }
 0x665   : > { %v9426_v59 = vpop.f32.mrf.mxu0  ;;  %v13217_v57 = vpop.f32.mrf.mxu1 }
 0x666   : > { %v9430_v60 = vadd.f32 %v9426_v59, %v9353_v15 }
 0x667   : > { %v13196_v52 = vpop.f32.mrf.mxu0 }
 0x668   : > { %v9507_v62 = vadd.f32 %v9503_v35, %v9430_v60 }
 0x669   : > { %v9811_v23 = vpop.f32.mrf.mxu1 }
 0x66a   : > { %v9580_v56 = vpop.f32.mrf.mxu0 }
 0x66b   : > { %v9584_v17 = vadd.f32 %v9580_v56, %v9507_v62  ;;  %v13231_v12 = vpop.f32.mrf.mxu1 }
 0x66c   : > { %v13210_v38 = vpop.f32.mrf.mxu0 }
 0x66d   : > { %v9661_v50 = vadd.f32 %v9657_v58, %v9584_v17 }
 0x66e   : > { %v9734_v16 = vpop.f32.mrf.mxu0 }
 0x66f   : > { %v9738_v0 = vadd.f32 %v9734_v16, %v9661_v50 }
 0x670   : > { %v13224_v42 = vpop.f32.mrf.mxu0 }
 0x671   : > { %v9815_v53 = vadd.f32 %v9811_v23, %v9738_v0 }
 0x673   : > { %v9816_v49 = vmax.f32 %v9815_v53, 0.0 }
 0x675   : > { %13265 = vmatmul.mubr.f32.vlgmr.msra.gmra.mxu0 %v9816_v49 }
 0x735   : > { %v9900_v8 = vpop.f32.mrf.mxu0 }
 0x736   : > { %v9901_v6 = vadd.f32 %v9900_v8, %v9833_v7 }
 0x737   : > { %v13266_v30 = vpop.f32.mrf.mxu0 }
 0x738   : > { %v9904_v51 = vmax.f32 %v9901_v6, 0.0 }
 0x73a   : > { %13300 = vmatmul.mubr.f32.vlgmr.msra.gmra.mxu1 %v9904_v51 }
 0x7fa   : > { %v9988_v43 = vpop.f32.mrf.mxu1 }
 0x7fb   : > { %v9989_v5 = vadd.f32 %v9988_v43, %v9921_v44 }
 0x7fc   : > { %v13301_v33 = vpop.f32.mrf.mxu1 }
 0x7fd   : > { %9992 = vst [vmem:[%s270_s22] sm:$0x1] %v9989_v5 }
 0x7fe   : > { %13360 = shalt.err (!%p13357_p3)
}
 0x7ff   : > { %s13361_s17 = scalar_lea.hbm %s16438_s9, 16  ;;  %s13365_s20 = scalar_lea.hbm %s16480_s7, 32 }
 0x800   : > { %p13362_p4 = scmp.ne.s32.totalorder %s16438_s9, %s13361_s17  ;;  %p13366_p9 = scmp.lt.s32.totalorder %s16438_s9, %s16480_s7 }
 0x801   : > { %p13367_p10 = scmp.lt.s32.totalorder %s13365_s20, %s13361_s17 }
 0x802   : > { %p13363_p7 = pnand %p13362_p4, %p13490_p5 }
 0x803   : > { %p13368_p11 = por %p13367_p10, %p13366_p9 }
 0x804   : > { %p13364_p8 = pneg %p13363_p7 }
 0x806   : > { %p13369_p12 = pnand %p13368_p11, %p13364_p8 }
 0x808   : > { %13372 = shalt.err (!%p13369_p12)
}
 0x809   : > { %13303 = dma.vmem_to_hbm [thread:$0]  (%p13490_p5), %s10007_s23, 16, %s16438_s9, %s9994_s13  }
 0x80a PF: > { %p13309_p13 = scmp.ge.s32.totalorder %s13407_s27, 2  ;;  %s10018_s29 = sand.u32 1, %s13395_s24  }
 0x80b   : > { %s10019_s8 = scalar_lea.sflag [#allocation7], %s10018_s29 }
 0x80c   : > { %p13306_p0 = pnand %p13309_p13, %p13494_p6 }
 0x80e   : > { %p13307_p1 = pneg %p13306_p0 }
 0x810   : > { %13390 = dma.done.wait (%p13307_p1), %s10019_s8, 16  }
 0x811   : > { %13392 = vsyncadd (%p13307_p1), %s10019_s8, 4294967280  ;;  %p17_p2 = scmp.ge.s32.totalorder %s13477_s30, 4   ;;  %s16483_s24 = smov %s13399_s25 }
 0x812   : > { %s16484_s25 = smov %s13403_s26  ;;  %s16485_s26 = smov %s13488_s10 }
 0x813   : > { %s16486_s27 = smov %s13477_s30  ;;  %19 = sbr.rel (!%p17_p2) target bundleno = 3 (0x3), region = 261 }
 0x818   :  { %10023 = vsyncpa [#allocation7], 1 }
 0x819   :  { %10025 = vsyncpa [#allocation7 + $0x1], 1 }

</bundles_post_ra>
